<compile_context>
chip_gen: v7x
topology: tpu7x:2x2x1
jax: 0.10.0
libtpu: 0.0.40
codegen_flags: <defaults>
</compile_context>

<pallas_src>
import jax
import jax.numpy as jnp
from jax.experimental import pallas as pl
from jax.experimental.pallas import tpu as pltpu


# (kernel_size, padding, Cin, Cout) for conv1..conv6, mirroring the PyTorch module.
_LAYER_SPECS = [
    (1, 1, 1, 7),
    (3, 1, 7, 10),
    (1, 1, 10, 10),
    (3, 1, 10, 7),
    (1, 1, 7, 11),
    (1, 1, 11, 888),
]


def init_weights(key):
    weights = []
    for (k, _pad, cin, cout) in _LAYER_SPECS:
        key, sub = jax.random.split(key)
        w = jax.random.normal(sub, (k, k, cin, cout), dtype=jnp.float32) * 0.1
        weights.append(w)
    return weights


# -----------------------------------------------------------------------------
# Weight composition (exact): chaining two zero-padded cross-correlations equals
# a single cross-correlation whose kernel is the offset-summed composition of
# the two kernels and whose padding is the sum of the paddings.  (The per-layer
# zero rings produced by the padded 1x1 convs guarantee no truncation of
# nonzero values at the 3x3 layers, so this holds exactly for this module.)
# -----------------------------------------------------------------------------
def _compose_conv_weights(a, b):
    """a: (kAh,kAw,Cin,Cmid), b: (kBh,kBw,Cmid,Cout)  (HWIO, cross-correlation).

    Returns c of shape (kAh+kBh-1, kAw+kBw-1, Cin, Cout) with
    conv_b(conv_a(x)) == conv_c(x).
    """
    kah, kaw, _cin, cmid = a.shape
    kbh, kbw, cmid2, _cout = b.shape
    assert cmid == cmid2
    c = jnp.zeros((kah + kbh - 1, kaw + kbw - 1, a.shape[2], b.shape[3]),
                  dtype=jnp.float32)
    for bh in range(kbh):
        for bw in range(kbw):
            contrib = jnp.einsum("hwij,jk->hwik", a, b[bh, bw])
            c = c.at[bh:bh + kah, bw:bw + kaw, :, :].add(contrib)
    return c


def _effective_weight(weights):
    w_eff = weights[0]
    for w in weights[1:]:
        w_eff = _compose_conv_weights(w_eff, w)
    return w_eff  # (5, 5, 1, 888) for this module


# -----------------------------------------------------------------------------
# Pallas kernel: one MXU matmul per batch element + fused sigmoid, writing the
# output in NCHW-contiguous order.
# -----------------------------------------------------------------------------
def _fused_conv_sigmoid_kernel(w_ref, a_ref, o_ref):
    # w_ref: (Cout, KKC) bf16, a_ref: (1, KKC, Ho*Wo) bf16, o_ref: (1, Cout, Ho*Wo) f32
    acc = jnp.dot(w_ref[...], a_ref[0], preferred_element_type=jnp.float32)
    o_ref[0] = jax.nn.sigmoid(acc).astype(o_ref.dtype)


def _conv_sigmoid_pallas(x_nhwc, w_eff, pad):
    N, H, W, Cin = x_nhwc.shape
    K = w_eff.shape[0]
    Cout = w_eff.shape[-1]
    Ho = H + 2 * pad - K + 1
    Wo = W + 2 * pad - K + 1
    kkc = K * K * Cin
    hw = Ho * Wo

    # Transposed im2col (tiny glue: Cin==1, the patches matrix is ~N*25*Ho*Wo
    # elements), ordered (kh, kw, cin) to match the weight reshape below.
    xp = jnp.pad(x_nhwc, ((0, 0), (pad, pad), (pad, pad), (0, 0)))
    patches = [xp[:, kh:kh + Ho, kw:kw + Wo, :] for kh in range(K) for kw in range(K)]
    a = jnp.stack(patches, axis=1)             # (N, K*K, Ho, Wo, Cin)
    a = jnp.transpose(a, (0, 1, 4, 2, 3))      # (N, K*K, Cin, Ho, Wo)
    a = a.reshape(N, kkc, hw)

    w_t = jnp.transpose(w_eff, (3, 0, 1, 2)).reshape(Cout, kkc)

    # bf16 operands for the MXU; accumulation + output stay f32.
    a_bf = a.astype(jnp.bfloat16)
    w_bf = w_t.astype(jnp.bfloat16)

    out = pl.pallas_call(
        _fused_conv_sigmoid_kernel,
        out_shape=jax.ShapeDtypeStruct((N, Cout, hw), jnp.float32),
        grid=(N,),
        in_specs=[
            pl.BlockSpec((Cout, kkc), lambda n: (0, 0)),      # weights stay resident
            pl.BlockSpec((1, kkc, hw), lambda n: (n, 0, 0)),  # per-batch patches
        ],
        out_specs=pl.BlockSpec((1, Cout, hw), lambda n: (n, 0, 0)),
        compiler_params=pltpu.CompilerParams(
            dimension_semantics=("parallel",)),
    )(w_bf, a_bf)

    # (N, Cout, Ho*Wo) is already NCHW-contiguous; the reshape is free.
    return out.reshape(N, Cout, Ho, Wo)


def model_forward(x_nchw, weights):
    """x_nchw: (N, 1, H, W) float32 -> (N, 888, H+8, W+8) float32 (PyTorch NCHW)."""
    w_eff = _effective_weight(weights)                             # (5, 5, 1, 888)
    total_pad = sum(pad for (_k, pad, _ci, _co) in _LAYER_SPECS)   # 6
    x_nhwc = jnp.transpose(x_nchw, (0, 2, 3, 1))                   # Cin==1: ~free
    return _conv_sigmoid_pallas(x_nhwc, w_eff, total_pad)


def _reference_forward(x_nchw, weights):
    """Pure-JAX reference: the original 6-conv chain + sigmoid (NHWC/HWIO)."""
    x = jnp.transpose(x_nchw, (0, 2, 3, 1))
    for w, (_k, pad, _cin, _cout) in zip(weights, _LAYER_SPECS):
        x = jax.lax.conv_general_dilated(
            x, w, window_strides=(1, 1), padding=((pad, pad), (pad, pad)),
            dimension_numbers=("NHWC", "HWIO", "NHWC"))
    x = jax.nn.sigmoid(x)
    return jnp.transpose(x, (0, 3, 1, 2))


if __name__ == "__main__":
    key = jax.random.PRNGKey(0)
    kx, kw = jax.random.split(key)

    # Small shapes consistent with the module: batch=2, Cin=1, spatial=16x16.
    x = jax.random.normal(kx, (2, 1, 16, 16), dtype=jnp.float32)
    weights = init_weights(kw)

    out = jax.block_until_ready(jax.jit(model_forward)(x, weights))
    assert out.shape == (2, 888, 24, 24), out.shape

    ref = jax.block_until_ready(jax.jit(_reference_forward)(x, weights))
    max_diff = float(jnp.max(jnp.abs(out - ref)))
    assert max_diff < 2e-3, f"mismatch vs reference: {max_diff}"

    print("KERNEL_OK")
</pallas_src>

<mosaic_0001>
module attributes {stable_mosaic.version = 11 : i64} {
  func.func @_fused_conv_sigmoid_kernel(%arg0: i32, %arg1: memref<888x25xbf16, #tpu.memory_space<vmem>>, %arg2: memref<1x25x576xbf16, #tpu.memory_space<vmem>>, %arg3: memref<1x888x576xf32, #tpu.memory_space<vmem>>) attributes {dimension_semantics = [#tpu.dimension_semantics<parallel>], iteration_bounds = array<i64: 2>, scalar_prefetch = 0 : i64, scratch_operands = 0 : i64, tpu.core_type = #tpu.core_type<tc>, window_params = [{pipeline_mode = #tpu.pipeline_mode<synchronous>, transform_indices = @transform_0, window_bounds = array<i64: 888, 25>}, {transform_indices = @transform_1, window_bounds = array<i64: 1, 25, 576>}, {transform_indices = @transform_2, window_bounds = array<i64: 1, 888, 576>}]} {
    %c0 = arith.constant 0 : index
    %c0_0 = arith.constant 0 : index
    %0 = vector.load %arg1[%c0, %c0_0] : memref<888x25xbf16, #tpu.memory_space<vmem>>, vector<888x25xbf16>
    %c0_1 = arith.constant 0 : index
    %c0_2 = arith.constant 0 : index
    %c0_3 = arith.constant 0 : index
    %1 = vector.load %arg2[%c0_1, %c0_2, %c0_3] : memref<1x25x576xbf16, #tpu.memory_space<vmem>>, vector<1x25x576xbf16>
    %2 = vector.shape_cast %1 : vector<1x25x576xbf16> to vector<25x576xbf16>
    %cst = arith.constant dense<0.000000e+00> : vector<888x576xf32>
    %3 = tpu.matmul %0, %2, %cst {dimension_numbers = #tpu.dot_dimension_numbers<[1], [0], [0], [1], [0, 0, 1, 1], [], []>} : vector<888x25xbf16>, vector<25x576xbf16>, vector<888x576xf32> -> vector<888x576xf32>
    %4 = arith.negf %3 : vector<888x576xf32>
    %5 = math.exp %4 : vector<888x576xf32>
    %cst_4 = arith.constant 1.000000e+00 : f32
    %6 = vector.broadcast %cst_4 : f32 to vector<888x576xf32>
    %7 = arith.addf %6, %5 : vector<888x576xf32>
    %8 = arith.divf %6, %7 : vector<888x576xf32>
    %c0_5 = arith.constant 0 : index
    %c0_6 = arith.constant 0 : index
    %c0_7 = arith.constant 0 : index
    %9 = vector.load %arg3[%c0_5, %c0_6, %c0_7] : memref<1x888x576xf32, #tpu.memory_space<vmem>>, vector<1x888x576xf32>
    %10 = vector.shape_cast %9 : vector<1x888x576xf32> to vector<888x576xf32>
    %11 = vector.shape_cast %8 : vector<888x576xf32> to vector<1x888x576xf32>
    tpu.vector_store %arg3[%c0_5, %c0_6, %c0_7], %11 {strides = array<i32>} : memref<1x888x576xf32, #tpu.memory_space<vmem>>, vector<1x888x576xf32>,
    return
  }
  func.func @transform_0(%arg0: i32) -> (i32, i32) {
    %c0_i32 = arith.constant 0 : i32
    %c0_i32_0 = arith.constant 0 : i32
    %c0_i32_1 = arith.constant 0 : i32
    return %c0_i32, %c0_i32_0 : i32, i32
  }
  func.func @transform_1(%arg0: i32) -> (i32, i32, i32) {
    %c0_i32 = arith.constant 0 : i32
    %c0_i32_0 = arith.constant 0 : i32
    %c0_i32_1 = arith.constant 0 : i32
    return %arg0, %c0_i32, %c0_i32_0 : i32, i32, i32
  }
  func.func @transform_2(%arg0: i32) -> (i32, i32, i32) {
    %c0_i32 = arith.constant 0 : i32
    %c0_i32_0 = arith.constant 0 : i32
    %c0_i32_1 = arith.constant 0 : i32
    return %arg0, %c0_i32, %c0_i32_0 : i32, i32, i32
  }
}

</mosaic_0001>

<bundles_post_ra>
// kernel: model_forward.1
= control target key start
LH: loop header
LB: loop body
LE: loop exit
PB: predicated region body
PF: predicated region fallthrough
CT: control target
= control target key end

     0   :  { %s9744_s9 = smov 0   ;;  %s12898_s0 = inlined_call_operand.vmem [shape: bf16[888,25], index: 0, kind: input, shape index: {}]   ;;  %s12899_s1 = inlined_call_operand.vmem [shape: bf16[2,25,576], index: 1, kind: input, shape index: {}]   ;;  %s12900_s2 = inlined_call_operand.vmem [shape: f32[2,888,576], index: 2, kind: output, shape index: {}]  }
   0x1 LB: > { %s6384_s10 = sadd.s32 4294967295, %s9725_s9   ;;  %p6388_p0 = scmp.ge.s32.totalorder %s9725_s9, 1  ;;  %s9725_s9 = sphi %s9744_s9, %s12_s9  }
   0x2   : > { %p112_p1 = scmp.lt.s32.totalorder %s9725_s9, 3 }
   0x4   : > { %p113_p2 = pnand %p6388_p0, %p112_p1 }
   0x6   : > { %116 = sbr.rel (%p113_p2) target bundleno = 1371 (0x55b), region = 28 }
   0xd   : > { %p134_p3 = scmp.lt.s32.totalorder %s6384_s10, 1  ;;  %vm762_vm0 = vcmask 1043456   ;;  %v12901_v0 = vmov 0   ;;  %vm763_vm1 = vcmask 1044480   ;;  %v9728_v1 = vmov 65535   ;;  %v9774_v11 = vld [vmem:[%s12898_s0] sm:$0xff]  }
   0xe   : > { %813 = vmatprep.mubr.bf16.mxu0 %v12901_v0  ;;  %1233 = vmatprep.mubr.bf16.mxu1 %v12901_v0  ;;  %v764_v2 = vsel %vm762_vm0, 4294967295, %v9728_v1  ;;  %vm593_vm2 = vcmask 203776   ;;  %v7379_v13 = vld [vmem:[%s12898_s0 + $0x150] sm:$0xff]   ;;  %v9789_v15 = vld [vmem:[%s12898_s0 + $0x8] sm:$0xff]   ;;  %v7385_v16 = vld [vmem:[%s12898_s0 + $0x158] sm:$0xff]   ;;  %vm5777_vm3 = vcmask 523264  }
   0xf   : > { %s13180_s10 = smov (!%p134_p3, %s6384_s10), 1  ;;  %v9764_v5 = vsel %vm763_vm1, %v764_v2, 0  ;;  %v9806_v21 = vld [vmem:[%s12898_s0 + $0x10] sm:$0xff]   ;;  %v7387_v22 = vld [vmem:[%s12898_s0 + $0x160] sm:$0xff]   ;;  %v9819_v23 = vld [vmem:[%s12898_s0 + $0x18] sm:$0xff]  }
  0x10   : > { %s7360_s11 = smul.u32 80, %s13180_s10  ;;  %v7389_v24 = vld [vmem:[%s12898_s0 + $0x168] sm:$0xff]   ;;  %v9832_v25 = vld [vmem:[%s12898_s0 + $0x20] sm:$0xff]   ;;  %v7391_v26 = vld [vmem:[%s12898_s0 + $0x170] sm:$0xff]  }
  0x11   : > { %v9845_v27 = vld [vmem:[%s12898_s0 + $0x28] sm:$0xff]   ;;  %v7393_v28 = vld [vmem:[%s12898_s0 + $0x178] sm:$0xff]   ;;  %v9860_v31 = vld [vmem:[%s12898_s0 + $0x30] sm:$0xff]   ;;  %s7361_s25 = smul.u32 4440, %s13180_s10 }
  0x12   : > { %s9760_s14 = scalar_lea.vmem %s12899_s1, %s7360_s11  ;;  %v7395_v32 = vld [vmem:[%s12898_s0 + $0x180] sm:$0xff]   ;;  %v9873_v33 = vld [vmem:[%s12898_s0 + $0x38] sm:$0xff]   ;;  %v7397_v34 = vld [vmem:[%s12898_s0 + $0x188] sm:$0xff]  }
  0x13   : > { %v7372_v3 = vld [vmem:[%s9760_s14 + $0x4] ss:$20 sps:$4 sm:$0xff]   ;;  %v7374_v4 = vld [vmem:[%s9760_s14] ss:$20 sps:$4 sm:$0xff]   ;;  %v7381_v14 = vld [vmem:[%s9760_s14 + $0x8] ss:$20 sps:$4 sm:$0xff]   ;;  %s10149_s27 = scalar_lea.vmem %s12900_s2, %s7361_s25 }
  0x14   : > { %781 = vmatprep.subr.bf16.mxu0 %v7372_v3  ;;  %7356 = vmatprep.subr.bf16.mxu1 %v7372_v3  ;;  %v7375_v6 = vld [vmem:[%s9760_s14 + $0x2c] ss:$20 sps:$4 sm:$0x1f]   ;;  %v7377_v7 = vld [vmem:[%s9760_s14 + $0x28] ss:$20 sps:$4 sm:$0x1f]  }
  0x15   : > { %782 = vmatpush1.bf16.msra.mxu0 %v7374_v4  ;;  %7358 = vmatpush1.bf16.msra.mxu1 %v7374_v4  ;;  %v770_v8 = vand.u32 %v7375_v6, %v9764_v5  ;;  %v767_v9 = vand.u32 %v7377_v7, %v9764_v5  ;;  %v7380_v10 = vld [vmem:[%s9760_s14 + $0x10] ss:$20 sps:$4 sm:$0xff]   ;;  %v7383_v12 = vld [vmem:[%s9760_s14 + $0xc] ss:$20 sps:$4 sm:$0xff]   ;;  %v7404_v38 = vld [vmem:[%s12898_s0 + $0x198] sm:$0xff]  }
  0x16   : > { %v7398_v17 = vld [vmem:[%s9760_s14 + $0x30] ss:$20 sps:$4 sm:$0x1f]   ;;  %v7400_v18 = vld [vmem:[%s9760_s14 + $0x34] ss:$20 sps:$4 sm:$0x1f]  }
  0x17   : > { %783 = vmatprep.subr.bf16.mxu0 %v770_v8  ;;  %7357 = vmatprep.subr.bf16.mxu1 %v770_v8  ;;  %v773_v19 = vand.u32 %v7398_v17, %v9764_v5  ;;  %v776_v20 = vand.u32 %v7400_v18, %v9764_v5  ;;  %v7421_v29 = vld [vmem:[%s9760_s14 + $0x38] ss:$20 sps:$4 sm:$0x1f]   ;;  %v9886_v35 = vld [vmem:[%s12898_s0 + $0x40] sm:$0xff]   ;;  %v7402_v36 = vld [vmem:[%s12898_s0 + $0x190] sm:$0xff]  }
  0x18   : > { %v779_v30 = vand.u32 %v7421_v29, %v9764_v5  ;;  %v9899_v37 = vld [vmem:[%s12898_s0 + $0x48] sm:$0xff]   ;;  %v9912_v39 = vld [vmem:[%s12898_s0 + $0x50] sm:$0xff]   ;;  %v7406_v40 = vld [vmem:[%s12898_s0 + $0x1a0] sm:$0xff]  }
  0x19   : > { %784 = vmatpush1.bf16.msra.mxu0 %v767_v9  ;;  %7359 = vmatpush1.bf16.msra.mxu1 %v767_v9  ;;  %v9925_v41 = vld [vmem:[%s12898_s0 + $0x58] sm:$0xff]   ;;  %v7408_v42 = vld [vmem:[%s12898_s0 + $0x1a8] sm:$0xff]   ;;  %v9938_v43 = vld [vmem:[%s12898_s0 + $0x60] sm:$0xff]  }
  0x1a   : > { %7240 = vmatprep.subr.bf16.mxu0 %v7380_v10  ;;  %1372 = vmatprep.subr.bf16.mxu1 %v7383_v12  ;;  %v7410_v44 = vld [vmem:[%s12898_s0 + $0x1b0] sm:$0xff]   ;;  %v9951_v45 = vld [vmem:[%s12898_s0 + $0x68] sm:$0xff]   ;;  %v7412_v46 = vld [vmem:[%s12898_s0 + $0x1b8] ss:$0 sps:$4 sm:$0xff]  }
  0x1b   : > { %v9964_v47 = vld [vmem:[%s12898_s0 + $0x70] sm:$0xff]   ;;  %v9975_v48 = vld [vmem:[%s12898_s0 + $0x78] sm:$0xff]   ;;  %v9986_v49 = vld [vmem:[%s12898_s0 + $0x80] sm:$0xff]  }
  0x1c   : > { %6457 = vmatmul.mubr.msk.bf16.vlgmr.msra.gmra.mrb[0].mxu0 %vm593_vm2, %v9774_v11  ;;  %6499 = vmatmul.mubr.msk.bf16.vlgmr.msra.gmra.mrb[0].mxu1 %vm593_vm2, %v7379_v13  ;;  %v9997_v50 = vld [vmem:[%s12898_s0 + $0x88] sm:$0xff]   ;;  %v10008_v51 = vld [vmem:[%s12898_s0 + $0x90] sm:$0xff]   ;;  %v10019_v52 = vld [vmem:[%s12898_s0 + $0x98] sm:$0xff]  }
  0x1d   : > { %7241 = vmatpush3.bf16.msra.mxu0 %v7380_v10  ;;  %1373 = vmatpush1.bf16.msra.mxu1 %v7381_v14  ;;  %v10030_v53 = vld [vmem:[%s12898_s0 + $0xa0] sm:$0xff]   ;;  %v10041_v54 = vld [vmem:[%s12898_s0 + $0xa8] sm:$0xff]   ;;  %v10052_v55 = vld [vmem:[%s12898_s0 + $0xb0] sm:$0xff]  }
  0x1e   : > { %823 = vmatprep.mubr.bf16.mxu0 %v12901_v0  ;;  %1243 = vmatprep.mubr.bf16.mxu1 %v12901_v0  ;;  %v10063_v56 = vld [vmem:[%s12898_s0 + $0xb8] sm:$0xff]   ;;  %v10074_v57 = vld [vmem:[%s12898_s0 + $0xc0] sm:$0xff]   ;;  %v10085_v58 = vld [vmem:[%s12898_s0 + $0xc8] sm:$0xff]  }
  0x1f   : > { %1374 = vmatprep.subr.bf16.mxu1 %v776_v20  ;;  %7242 = vmatprep.subr.bf16.mxu0 %v779_v30  ;;  %v7426_v59 = vld [vmem:[%s12898_s0 + $0xd0] sm:$0xff]   ;;  %v7427_v62 = vld [vmem:[%s12898_s0 + $0xd8] sm:$0xff]  }
  0x21   : > { %1375 = vmatpush1.bf16.msra.mxu1 %v773_v19  ;;  %7243 = vmatpush3.bf16.msra.mxu0 %v779_v30 }
  0x24   : > { %6458 = vmatmul.mubr.msk.bf16.gmra.mrb[4].mxu0 %vm593_vm2, %v9789_v15  ;;  %6500 = vmatmul.mubr.msk.bf16.gmra.mrb[4].mxu1 %vm593_vm2, %v7385_v16  ;;  %v7428_v16 = vld [vmem:[%s12898_s0 + $0xe0] sm:$0xff]  }
  0x25   : > { %833 = vmatprep.mubr.bf16.mxu0 %v12901_v0  ;;  %1253 = vmatprep.mubr.bf16.mxu1 %v12901_v0 }
  0x2c   : > { %6459 = vmatmul.mubr.msk.bf16.gmra.mrb[8].mxu0 %vm593_vm2, %v9806_v21  ;;  %6501 = vmatmul.mubr.msk.bf16.gmra.mrb[8].mxu1 %vm593_vm2, %v7387_v22 }
  0x2d   : > { %843 = vmatprep.mubr.bf16.mxu0 %v12901_v0  ;;  %1263 = vmatprep.mubr.bf16.mxu1 %v12901_v0 }
  0x34   : > { %6460 = vmatmul.mubr.msk.bf16.gmra.mrb[12].mxu0 %vm593_vm2, %v9819_v23  ;;  %6502 = vmatmul.mubr.msk.bf16.gmra.mrb[12].mxu1 %vm593_vm2, %v7389_v24 }
  0x35   : > { %853 = vmatprep.mubr.bf16.mxu0 %v12901_v0  ;;  %1273 = vmatprep.mubr.bf16.mxu1 %v12901_v0 }
  0x3c   : > { %6461 = vmatmul.mubr.msk.bf16.gmra.mrb[16].mxu0 %vm593_vm2, %v9832_v25  ;;  %6503 = vmatmul.mubr.msk.bf16.gmra.mrb[16].mxu1 %vm593_vm2, %v7391_v26 }
  0x3d   : > { %863 = vmatprep.mubr.bf16.mxu0 %v12901_v0  ;;  %1283 = vmatprep.mubr.bf16.mxu1 %v12901_v0 }
  0x44   : > { %6462 = vmatmul.mubr.msk.bf16.gmra.mrb[20].mxu0 %vm593_vm2, %v9845_v27  ;;  %6504 = vmatmul.mubr.msk.bf16.gmra.mrb[20].mxu1 %vm593_vm2, %v7393_v28 }
  0x45   : > { %873 = vmatprep.mubr.bf16.mxu0 %v12901_v0  ;;  %1293 = vmatprep.mubr.bf16.mxu1 %v12901_v0 }
  0x4c   : > { %6463 = vmatmul.mubr.msk.bf16.gmra.mrb[24].mxu0 %vm593_vm2, %v9860_v31  ;;  %6505 = vmatmul.mubr.msk.bf16.gmra.mrb[24].mxu1 %vm593_vm2, %v7395_v32 }
  0x4d   : > { %883 = vmatprep.mubr.bf16.mxu0 %v12901_v0  ;;  %1303 = vmatprep.mubr.bf16.mxu1 %v12901_v0 }
  0x54   : > { %6464 = vmatmul.mubr.msk.bf16.gmra.mrb[28].mxu0 %vm593_vm2, %v9873_v33  ;;  %6506 = vmatmul.mubr.msk.bf16.gmra.mrb[28].mxu1 %vm593_vm2, %v7397_v34 }
  0x55   : > { %893 = vmatprep.mubr.bf16.mxu0 %v12901_v0  ;;  %1313 = vmatprep.mubr.bf16.mxu1 %v12901_v0 }
  0x5c   : > { %6465 = vmatmul.mubr.msk.bf16.gmra.mrb[32].mxu0 %vm593_vm2, %v9886_v35  ;;  %6507 = vmatmul.mubr.msk.bf16.gmra.mrb[32].mxu1 %vm593_vm2, %v7402_v36 }
  0x5d   : > { %903 = vmatprep.mubr.bf16.mxu0 %v12901_v0  ;;  %1323 = vmatprep.mubr.bf16.mxu1 %v12901_v0 }
  0x64   : > { %6466 = vmatmul.mubr.msk.bf16.gmra.mrb[36].mxu0 %vm593_vm2, %v9899_v37  ;;  %6508 = vmatmul.mubr.msk.bf16.gmra.mrb[36].mxu1 %vm593_vm2, %v7404_v38 }
  0x65   : > { %913 = vmatprep.mubr.bf16.mxu0 %v12901_v0  ;;  %1333 = vmatprep.mubr.bf16.mxu1 %v12901_v0 }
  0x6c   : > { %6467 = vmatmul.mubr.msk.bf16.gmra.mrb[40].mxu0 %vm593_vm2, %v9912_v39  ;;  %6509 = vmatmul.mubr.msk.bf16.gmra.mrb[40].mxu1 %vm593_vm2, %v7406_v40  ;;  %v7429_v40 = vld [vmem:[%s12898_s0 + $0xe8] sm:$0xff]  }
  0x6d   : > { %923 = vmatprep.mubr.bf16.mxu0 %v12901_v0  ;;  %1343 = vmatprep.mubr.bf16.mxu1 %v12901_v0 }
  0x74   : > { %6468 = vmatmul.mubr.msk.bf16.gmra.mrb[44].mxu0 %vm593_vm2, %v9925_v41  ;;  %6510 = vmatmul.mubr.msk.bf16.gmra.mrb[44].mxu1 %vm593_vm2, %v7408_v42 }
  0x75   : > { %933 = vmatprep.mubr.bf16.mxu0 %v12901_v0  ;;  %1353 = vmatprep.mubr.bf16.mxu1 %v12901_v0 }
  0x7c   : > { %6469 = vmatmul.mubr.msk.bf16.gmra.mrb[48].mxu0 %vm593_vm2, %v9938_v43  ;;  %6511 = vmatmul.mubr.msk.bf16.gmra.mrb[48].mxu1 %vm593_vm2, %v7410_v44 }
  0x7d   : > { %943 = vmatprep.mubr.bf16.mxu0 %v12901_v0  ;;  %1363 = vmatprep.mubr.bf16.mxu1 %v12901_v0 }
  0x84   : > { %6470 = vmatmul.mubr.msk.bf16.gmra.mrb[52].mxu0 %vm593_vm2, %v9951_v45  ;;  %6512 = vmatmul.mubr.msk.bf16.gmra.mrb[52].mxu1 %vm593_vm2, %v7412_v46 }
  0x85   : > { %953 = vmatprep.mubr.bf16.mxu0 %v12901_v0  ;;  %1404 = vmatprep.mubr.bf16.mxu1 %v12901_v0 }
  0x8c   : > { %6471 = vmatmul.mubr.msk.bf16.gmra.mrb[56].mxu0 %vm593_vm2, %v9964_v47  ;;  %6513 = vmatmul.mubr.msk.bf16.vlgmr.msra.gmra.mrb[56].mxu1 %vm593_vm2, %v9774_v11 }
  0x8d   : > { %963 = vmatprep.mubr.bf16.mxu0 %v12901_v0  ;;  %1414 = vmatprep.mubr.bf16.mxu1 %v12901_v0 }
  0x94   : > { %6472 = vmatmul.mubr.msk.bf16.gmra.mrb[60].mxu0 %vm593_vm2, %v9975_v48  ;;  %6514 = vmatmul.mubr.msk.bf16.gmra.mrb[60].mxu1 %vm593_vm2, %v9789_v15 }
  0x95   : > { %973 = vmatprep.mubr.bf16.mxu0 %v12901_v0  ;;  %1424 = vmatprep.mubr.bf16.mxu1 %v12901_v0 }
  0x9c   : > { %6473 = vmatmul.mubr.msk.bf16.gmra.mrb[64].mxu0 %vm593_vm2, %v9986_v49  ;;  %6515 = vmatmul.mubr.msk.bf16.gmra.mrb[64].mxu1 %vm593_vm2, %v9806_v21 }
  0x9d   : > { %983 = vmatprep.mubr.bf16.mxu0 %v12901_v0  ;;  %1434 = vmatprep.mubr.bf16.mxu1 %v12901_v0 }
  0xa4   : > { %6474 = vmatmul.mubr.msk.bf16.gmra.mrb[68].mxu0 %vm593_vm2, %v9997_v50  ;;  %6516 = vmatmul.mubr.msk.bf16.gmra.mrb[68].mxu1 %vm593_vm2, %v9819_v23 }
  0xa5   : > { %993 = vmatprep.mubr.bf16.mxu0 %v12901_v0  ;;  %1444 = vmatprep.mubr.bf16.mxu1 %v12901_v0 }
  0xac   : > { %6475 = vmatmul.mubr.msk.bf16.gmra.mrb[72].mxu0 %vm593_vm2, %v10008_v51  ;;  %6517 = vmatmul.mubr.msk.bf16.gmra.mrb[72].mxu1 %vm593_vm2, %v9832_v25 }
  0xad   : > { %1003 = vmatprep.mubr.bf16.mxu0 %v12901_v0  ;;  %1454 = vmatprep.mubr.bf16.mxu1 %v12901_v0 }
  0xb4   : > { %6476 = vmatmul.mubr.msk.bf16.gmra.mrb[76].mxu0 %vm593_vm2, %v10019_v52  ;;  %6518 = vmatmul.mubr.msk.bf16.gmra.mrb[76].mxu1 %vm593_vm2, %v9845_v27 }
  0xb5   : > { %1013 = vmatprep.mubr.bf16.mxu0 %v12901_v0  ;;  %1464 = vmatprep.mubr.bf16.mxu1 %v12901_v0 }
  0xbc   : > { %6477 = vmatmul.mubr.msk.bf16.gmra.mrb[80].mxu0 %vm593_vm2, %v10030_v53  ;;  %6519 = vmatmul.mubr.msk.bf16.gmra.mrb[80].mxu1 %vm593_vm2, %v9860_v31 }
  0xbd   : > { %1023 = vmatprep.mubr.bf16.mxu0 %v12901_v0  ;;  %1474 = vmatprep.mubr.bf16.mxu1 %v12901_v0 }
  0xc4   : > { %6478 = vmatmul.mubr.msk.bf16.gmra.mrb[84].mxu0 %vm593_vm2, %v10041_v54  ;;  %6520 = vmatmul.mubr.msk.bf16.gmra.mrb[84].mxu1 %vm593_vm2, %v9873_v33 }
  0xc5   : > { %1033 = vmatprep.mubr.bf16.mxu0 %v12901_v0  ;;  %1484 = vmatprep.mubr.bf16.mxu1 %v12901_v0 }
  0xcc   : > { %6479 = vmatmul.mubr.msk.bf16.gmra.mrb[88].mxu0 %vm593_vm2, %v10052_v55  ;;  %6521 = vmatmul.mubr.msk.bf16.gmra.mrb[88].mxu1 %vm593_vm2, %v9886_v35 }
  0xcd   : > { %1043 = vmatprep.mubr.bf16.mxu0 %v12901_v0  ;;  %1494 = vmatprep.mubr.bf16.mxu1 %v12901_v0 }
  0xd4   : > { %6480 = vmatmul.mubr.msk.bf16.gmra.mrb[92].mxu0 %vm593_vm2, %v10063_v56  ;;  %6522 = vmatmul.mubr.msk.bf16.gmra.mrb[92].mxu1 %vm593_vm2, %v9899_v37 }
  0xd5   : > { %1053 = vmatprep.mubr.bf16.mxu0 %v12901_v0  ;;  %1504 = vmatprep.mubr.bf16.mxu1 %v12901_v0 }
  0xdc   : > { %6481 = vmatmul.mubr.msk.bf16.gmra.mrb[96].mxu0 %vm593_vm2, %v10074_v57  ;;  %6523 = vmatmul.mubr.msk.bf16.gmra.mrb[96].mxu1 %vm593_vm2, %v9912_v39 }
  0xdd   : > { %1063 = vmatprep.mubr.bf16.mxu0 %v12901_v0  ;;  %1514 = vmatprep.mubr.bf16.mxu1 %v12901_v0 }
  0xe4   : > { %6482 = vmatmul.mubr.msk.bf16.gmra.mrb[100].mxu0 %vm593_vm2, %v10085_v58  ;;  %6524 = vmatmul.mubr.msk.bf16.gmra.mrb[100].mxu1 %vm593_vm2, %v9925_v41 }
  0xe5   : > { %1073 = vmatprep.mubr.bf16.mxu0 %v12901_v0  ;;  %1524 = vmatprep.mubr.bf16.mxu1 %v12901_v0 }
  0xec   : > { %6483 = vmatmul.mubr.msk.bf16.gmra.mrb[104].mxu0 %vm593_vm2, %v7426_v59  ;;  %6525 = vmatmul.mubr.msk.bf16.gmra.mrb[104].mxu1 %vm593_vm2, %v9938_v43 }
  0xed   : > { %1083 = vmatprep.mubr.bf16.mxu0 %v12901_v0  ;;  %1534 = vmatprep.mubr.bf16.mxu1 %v12901_v0 }
  0xef   : > { %v815_v60 = vpop.f32.mrb[0].mxu0  ;;  %v1235_v61 = vpop.f32.mrb[0].mxu1 }
  0xf0   : > { %v6625_v63 = vmul.f32 -1.442695, %v815_v60  ;;  %v7045_v1 = vmul.f32 -1.442695, %v1235_v61  ;;  %v817_v2 = vpop.f32.mrb[1].mxu0  ;;  %v1237_v3 = vpop.f32.mrb[1].mxu1 }
  0xf1   : > { %v6626_v4 = vmul.f32 -1.442695, %v817_v2  ;;  %v7046_v5 = vmul.f32 -1.442695, %v1237_v3  ;;  %v819_v6 = vpop.f32.mrb[2].mxu0  ;;  %v1239_v7 = vpop.f32.mrb[2].mxu1 }
  0xf2   : > { %7442 = vpow2.f32 %v6625_v63  ;;  %v6630_v8 = vmul.f32 -1.442695, %v819_v6  ;;  %v821_v9 = vpop.f32.mrb[3].mxu0  ;;  %v1241_v10 = vpop.f32.mrb[3].mxu1  ;;  %v7050_v11 = vmul.f32 -1.442695, %v1239_v7 }
  0xf3   : > { %7444 = vpow2.f32 %v7045_v1  ;;  %v6631_v12 = vmul.f32 -1.442695, %v821_v9  ;;  %v7051_v13 = vmul.f32 -1.442695, %v1241_v10 }
  0xf4   : > { %7446 = vpow2.f32 %v6626_v4  ;;  %6484 = vmatmul.mubr.msk.bf16.gmra.mrb[108].mxu0 %vm593_vm2, %v7427_v62  ;;  %6526 = vmatmul.mubr.msk.bf16.gmra.mrb[108].mxu1 %vm593_vm2, %v9951_v45 }
  0xf5   : > { %7448 = vpow2.f32 %v7046_v5  ;;  %1093 = vmatprep.mubr.bf16.mxu0 %v12901_v0  ;;  %1544 = vmatprep.mubr.bf16.mxu1 %v12901_v0 }
  0xf6   : > { %7450 = vpow2.f32 %v6630_v8 }
  0xf7   : > { %7452 = vpow2.f32 %v7050_v11  ;;  %v825_v14 = vpop.f32.mrb[4].mxu0  ;;  %v1245_v15 = vpop.f32.mrb[4].mxu1 }
  0xf8   : > { %7454 = vpow2.f32 %v6631_v12  ;;  %v6635_v17 = vmul.f32 -1.442695, %v825_v14  ;;  %v7055_v18 = vmul.f32 -1.442695, %v1245_v15  ;;  %v827_v19 = vpop.f32.mrb[5].mxu0  ;;  %v1247_v20 = vpop.f32.mrb[5].mxu1 }
  0xf9   : > { %7456 = vpow2.f32 %v7051_v13  ;;  %v6636_v21 = vmul.f32 -1.442695, %v827_v19  ;;  %v7056_v22 = vmul.f32 -1.442695, %v1247_v20  ;;  %v829_v23 = vpop.f32.mrb[6].mxu0  ;;  %v10112_v24 = vpop.f32.mrb[6].mxu1 }
  0xfa   : > { %7458 = vpow2.f32 %v6635_v17  ;;  %v6640_v25 = vmul.f32 -1.442695, %v829_v23  ;;  %v10114_v26 = vpop.f32.mrb[7].mxu0  ;;  %v10116_v27 = vpop.f32.mrb[7].mxu1  ;;  %v7060_v11 = vmul.f32 -1.442695, %v10112_v24 }
  0xfb   : > { %7460 = vpow2.f32 %v7055_v18  ;;  %v7430_v13 = vld [vmem:[%s12898_s0 + $0xf0] sm:$0xff]   ;;  %v7061_v20 = vmul.f32 -1.442695, %v10116_v27 }
  0xfc   : > { %v7443_v28 = vpop.eup %7442  ;;  %7462 = vpow2.f32 %v6636_v21  ;;  %6485 = vmatmul.mubr.msk.bf16.gmra.mrb[112].mxu0 %vm593_vm2, %v7428_v16  ;;  %6527 = vmatmul.mubr.msk.bf16.gmra.mrb[112].mxu1 %vm593_vm2, %v9964_v47  ;;  %v6641_v16 = vmul.f32 -1.442695, %v10114_v26 }
  0xfd   : > { %v7445_v29 = vpop.eup %7444  ;;  %v4108_v30 = vadd.f32 1.0, %v7443_v28  ;;  %7464 = vpow2.f32 %v7056_v22  ;;  %1103 = vmatprep.mubr.bf16.mxu0 %v12901_v0  ;;  %1554 = vmatprep.mubr.bf16.mxu1 %v12901_v0 }
  0xfe   : > { %v7447_v31 = vpop.eup %7446  ;;  %v4528_v32 = vadd.f32 1.0, %v7445_v29  ;;  %7466 = vpow2.f32 %v6640_v25 }
  0xff   : > { %v7449_v33 = vpop.eup %7448  ;;  %7468 = vrcp.f32 %v4108_v30  ;;  %v4109_v34 = vadd.f32 1.0, %v7447_v31  ;;  %v835_v35 = vpop.f32.mrb[8].mxu0 }
 0x100   : > { %v10123_v36 = vpop.f32.mrb[8].mxu1  ;;  %v7451_v37 = vpop.eup %7450  ;;  %7470 = vrcp.f32 %v4528_v32  ;;  %v4529_v38 = vadd.f32 1.0, %v7449_v33  ;;  %v6645_v24 = vmul.f32 -1.442695, %v835_v35 }
 0x101   : > { %v10125_v39 = vpop.f32.mrb[9].mxu0  ;;  %v7453_v41 = vpop.eup %7452  ;;  %7472 = vrcp.f32 %v4109_v34  ;;  %v4113_v42 = vadd.f32 1.0, %v7451_v37  ;;  %v7065_v28 = vmul.f32 -1.442695, %v10123_v36 }
 0x102   : > { %v10130_v43 = vpop.f32.mrb[9].mxu1  ;;  %v10132_v44 = vpop.f32.mrb[10].mxu0  ;;  %7474 = vrcp.f32 %v4529_v38  ;;  %v4533_v46 = vadd.f32 1.0, %v7453_v41  ;;  %v6646_v29 = vmul.f32 -1.442695, %v10125_v39  ;;  %v7431_v39 = vld [vmem:[%s12898_s0 + $0xf8] sm:$0xff]  }
 0x103   : > { %v7455_v45 = vpop.eup %7454  ;;  %v10134_v47 = vpop.f32.mrb[10].mxu1  ;;  %7476 = vrcp.f32 %v4113_v42  ;;  %v7066_v31 = vmul.f32 -1.442695, %v10130_v43 }
 0x104   : > { %v7457_v59 = vpop.eup %7456  ;;  %v4114_v60 = vadd.f32 1.0, %v7455_v45  ;;  %v10137_v61 = vpop.f32.mrb[11].mxu0  ;;  %7478 = vrcp.f32 %v4533_v46  ;;  %6486 = vmatmul.mubr.msk.bf16.gmra.mrb[116].mxu0 %vm593_vm2, %v7429_v40  ;;  %6528 = vmatmul.mubr.msk.bf16.gmra.mrb[116].mxu1 %vm593_vm2, %v9975_v48  ;;  %v7070_v36 = vmul.f32 -1.442695, %v10134_v47 }
 0x105   : > { %v10139_v62 = vpop.f32.mrb[11].mxu1  ;;  %v7459_v63 = vpop.eup %7458  ;;  %v4534_v1 = vadd.f32 1.0, %v7457_v59  ;;  %1113 = vmatprep.mubr.bf16.mxu0 %v12901_v0  ;;  %1564 = vmatprep.mubr.bf16.mxu1 %v12901_v0  ;;  %v6651_v41 = vmul.f32 -1.442695, %v10137_v61 }
 0x106   : > { %v7461_v2 = vpop.eup %7460  ;;  %7480 = vrcp.f32 %v4114_v60  ;;  %v4118_v3 = vadd.f32 1.0, %v7459_v63  ;;  %v7071_v45 = vmul.f32 -1.442695, %v10139_v62 }
 0x107   : > { %v7463_v4 = vpop.eup %7462  ;;  %7482 = vrcp.f32 %v4534_v1  ;;  %v4538_v5 = vadd.f32 1.0, %v7461_v2  ;;  %v10151_v48 = vpop.f32.mrb[12].mxu0 }
 0x108   : > { %v7465_v6 = vpop.eup %7464  ;;  %7484 = vrcp.f32 %v4118_v3  ;;  %v4119_v7 = vadd.f32 1.0, %v7463_v4  ;;  %v10153_v8 = vpop.f32.mrb[12].mxu1  ;;  %v6655_v60 = vmul.f32 -1.442695, %v10151_v48  ;;  %v7432_v48 = vld [vmem:[%s12898_s0 + $0x100] sm:$0xff]  }
 0x109   : > { %v7467_v9 = vpop.eup %7466  ;;  %7486 = vrcp.f32 %v4538_v5  ;;  %v4539_v10 = vadd.f32 1.0, %v7465_v6  ;;  %v10156_v12 = vpop.f32.mrb[13].mxu0  ;;  %v7075_v63 = vmul.f32 -1.442695, %v10153_v8 }
 0x10a   : > { %v7469_v14 = vpop.eup %7468  ;;  %7488 = vrcp.f32 %v4119_v7  ;;  %v4123_v15 = vadd.f32 1.0, %v7467_v9  ;;  %v10162_v17 = vpop.f32.mrb[13].mxu1 }
 0x10b   : > { %v10164_v18 = vpop.f32.mrb[14].mxu0  ;;  %v7471_v19 = vpop.eup %7470  ;;  %5773 = vst [vmem:[%s10149_s27] sm:$0xff] %v7469_v14  ;;  %7490 = vrcp.f32 %v4539_v10 }
 0x10c   : > { %v10168_v21 = vpop.f32.mrb[14].mxu1  ;;  %v10170_v22 = vpop.f32.mrb[15].mxu0  ;;  %6194 = vst [vmem:[%s10149_s27 + $0xd20] sm:$0xff] %v7471_v19  ;;  %7492 = vrcp.f32 %v4123_v15  ;;  %6487 = vmatmul.mubr.msk.bf16.gmra.mrb[120].mxu0 %vm593_vm2, %v7430_v13  ;;  %6529 = vmatmul.mubr.msk.bf16.gmra.mrb[120].mxu1 %vm593_vm2, %v9986_v49  ;;  %v6650_v49 = vmul.f32 -1.442695, %v10132_v44 }
 0x10d   : > { %v7473_v23 = vpop.eup %7472  ;;  %v10173_v25 = vpop.f32.mrb[15].mxu1  ;;  %7494 = vpow2.f32 %v7060_v11  ;;  %1123 = vmatprep.mubr.bf16.mxu0 %v12901_v0  ;;  %1574 = vmatprep.mubr.bf16.mxu1 %v12901_v0 }
 0x10e   : > { %v7475_v26 = vpop.eup %7474  ;;  %5774 = vst [vmem:[%s10149_s27 + $0x8] sm:$0xff] %v7473_v23  ;;  %7496 = vpow2.f32 %v6641_v16 }
 0x10f   : > { %v7477_v27 = vpop.eup %7476  ;;  %6195 = vst [vmem:[%s10149_s27 + $0xd28] sm:$0xff] %v7475_v26  ;;  %7498 = vpow2.f32 %v7061_v20  ;;  %v10188_v33 = vpop.f32.mrb[16].mxu0 }
 0x110   : > { %v7479_v30 = vpop.eup %7478  ;;  %5779 = vst [vmem:[%s10149_s27 + $0x28] sm:$0xff] %v7477_v27  ;;  %7500 = vpow2.f32 %v6645_v24  ;;  %v10190_v34 = vpop.f32.mrb[16].mxu1 }
 0x111   : > { %v7481_v32 = vpop.eup %7480  ;;  %6199 = vst [vmem:[%s10149_s27 + $0xd48] sm:$0xff] %v7479_v30  ;;  %7502 = vpow2.f32 %v7065_v28  ;;  %v10194_v37 = vpop.f32.mrb[17].mxu0 }
 0x112   : > { %v7483_v35 = vpop.eup %7482  ;;  %5780 = vst [vmem:[%s10149_s27 + $0x30] sm:$0xff] %v7481_v32  ;;  %v10196_v38 = vpop.f32.mrb[17].mxu1  ;;  %7504 = vpow2.f32 %v6646_v29 }
 0x113   : > { %v7485_v40 = vpop.eup %7484  ;;  %6200 = vst [vmem:[%s10149_s27 + $0xd50] sm:$0xff] %v7483_v35  ;;  %v10203_v42 = vpop.f32.mrb[18].mxu0  ;;  %7506 = vpow2.f32 %v7066_v31 }
 0x114   : > { %v10205_v43 = vpop.f32.mrb[18].mxu1  ;;  %v7487_v44 = vpop.eup %7486  ;;  %5784 = vst [vmem:[%s10149_s27 + $0x50] sm:$0xff] %v7485_v40  ;;  %7508 = vpow2.f32 %v6650_v49  ;;  %6488 = vmatmul.mubr.msk.bf16.gmra.mrb[124].mxu0 %vm593_vm2, %v7431_v39  ;;  %6530 = vmatmul.mubr.msk.bf16.gmra.mrb[124].mxu1 %vm593_vm2, %v9997_v50  ;;  %v7433_v40 = vld [vmem:[%s12898_s0 + $0x108] sm:$0xff]  }
 0x115   : > { %v10209_v46 = vpop.f32.mrb[19].mxu0  ;;  %v10211_v47 = vpop.f32.mrb[19].mxu1  ;;  %6204 = vst [vmem:[%s10149_s27 + $0xd70] sm:$0xff] %v7487_v44  ;;  %7510 = vpow2.f32 %v7070_v36  ;;  %1133 = vmatprep.mubr.bf16.mxu0 %v12901_v0  ;;  %1584 = vmatprep.mubr.bf16.mxu1 %v12901_v0 }
 0x116   : > { %v7489_v59 = vpop.eup %7488  ;;  %7512 = vpow2.f32 %v6651_v41 }
 0x117   : > { %v7491_v61 = vpop.eup %7490  ;;  %5785 = vst [vmem:[%s10149_s27 + $0x58] sm:$0xff] %v7489_v59  ;;  %7514 = vpow2.f32 %v7071_v45  ;;  %v10224_v4 = vpop.f32.mrb[20].mxu0 }
 0x118   : > { %v7493_v62 = vpop.eup %7492  ;;  %6205 = vst [vmem:[%s10149_s27 + $0xd78] sm:$0xff] %v7491_v61  ;;  %7516 = vpow2.f32 %v6655_v60  ;;  %v10226_v5 = vpop.f32.mrb[20].mxu1 }
 0x119   : > { %v7495_v1 = vpop.eup %7494  ;;  %5789 = vst [vmem:[%s10149_s27 + $0x78] sm:$0xff] %v7493_v62  ;;  %7518 = vpow2.f32 %v7075_v63  ;;  %v10228_v50 = vpop.f32.mrb[21].mxu0  ;;  %v6656_v63 = vmul.f32 -1.442695, %v10156_v12 }
 0x11a   : > { %v7497_v2 = vpop.eup %7496  ;;  %v4543_v3 = vadd.f32 1.0, %v7495_v1  ;;  %v10233_v10 = vpop.f32.mrb[21].mxu1 }
 0x11b   : > { %v7499_v6 = vpop.eup %7498  ;;  %v4124_v7 = vadd.f32 1.0, %v7497_v2  ;;  %v10235_v11 = vpop.f32.mrb[22].mxu0 }
 0x11c   : > { %v7501_v8 = vpop.eup %7500  ;;  %7520 = vrcp.f32 %v4543_v3  ;;  %v4544_v9 = vadd.f32 1.0, %v7499_v6  ;;  %v10237_v15 = vpop.f32.mrb[22].mxu1  ;;  %6489 = vmatmul.mubr.msk.bf16.gmra.mrb[128].mxu0 %vm593_vm2, %v7432_v48  ;;  %6531 = vmatmul.mubr.msk.bf16.gmra.mrb[128].mxu1 %vm593_vm2, %v10008_v51  ;;  %v7076_v3 = vmul.f32 -1.442695, %v10162_v17  ;;  %v7080_v17 = vmul.f32 -1.442695, %v10168_v21 }
 0x11d   : > { %v7503_v13 = vpop.eup %7502  ;;  %7522 = vrcp.f32 %v4124_v7  ;;  %v4128_v14 = vadd.f32 1.0, %v7501_v8  ;;  %v10239_v20 = vpop.f32.mrb[23].mxu0  ;;  %1143 = vmatprep.mubr.bf16.mxu0 %v12901_v0  ;;  %1594 = vmatprep.mubr.bf16.mxu1 %v12901_v0  ;;  %v6660_v8 = vmul.f32 -1.442695, %v10164_v18  ;;  %v6661_v18 = vmul.f32 -1.442695, %v10170_v22 }
 0x11e   : > { %v7505_v16 = vpop.eup %7504  ;;  %7524 = vrcp.f32 %v4544_v9  ;;  %v4548_v19 = vadd.f32 1.0, %v7503_v13  ;;  %v10241_v23 = vpop.f32.mrb[23].mxu1  ;;  %v7434_v22 = vld [vmem:[%s12898_s0 + $0x110] sm:$0xff]  }
 0x11f   : > { %v7507_v24 = vpop.eup %7506  ;;  %7526 = vrcp.f32 %v4128_v14  ;;  %v4129_v26 = vadd.f32 1.0, %v7505_v16  ;;  %v10248_v49 = vpop.f32.mrb[24].mxu0 }
 0x120   : > { %v7509_v28 = vpop.eup %7508  ;;  %7528 = vrcp.f32 %v4548_v19  ;;  %v4549_v27 = vadd.f32 1.0, %v7507_v24  ;;  %v10250_v35 = vpop.f32.mrb[24].mxu1  ;;  %v6665_v19 = vmul.f32 -1.442695, %v10188_v33 }
 0x121   : > { %v7511_v29 = vpop.eup %7510  ;;  %7530 = vrcp.f32 %v4129_v26  ;;  %v4133_v30 = vadd.f32 1.0, %v7509_v28  ;;  %v10252_v39 = vpop.f32.mrb[25].mxu0  ;;  %v7085_v28 = vmul.f32 -1.442695, %v10190_v34  ;;  %v7086_v34 = vmul.f32 -1.442695, %v10196_v38 }
 0x122   : > { %v7513_v31 = vpop.eup %7512  ;;  %7532 = vrcp.f32 %v4549_v27  ;;  %v4553_v32 = vadd.f32 1.0, %v7511_v29  ;;  %v10257_v45 = vpop.f32.mrb[25].mxu1 }
 0x123   : > { %v7515_v36 = vpop.eup %7514  ;;  %7534 = vrcp.f32 %v4133_v30  ;;  %v4134_v51 = vadd.f32 1.0, %v7513_v31  ;;  %v10259_v59 = vpop.f32.mrb[26].mxu0  ;;  %v6666_v30 = vmul.f32 -1.442695, %v10194_v37 }
 0x124   : > { %v7517_v41 = vpop.eup %7516  ;;  %7536 = vrcp.f32 %v4553_v32  ;;  %v4554_v44 = vadd.f32 1.0, %v7515_v36  ;;  %v10262_v62 = vpop.f32.mrb[26].mxu1  ;;  %6490 = vmatmul.mubr.msk.bf16.gmra.mrb[132].mxu0 %vm593_vm2, %v7433_v40  ;;  %6532 = vmatmul.mubr.msk.bf16.gmra.mrb[132].mxu1 %vm593_vm2, %v10019_v52  ;;  %v7081_v52 = vmul.f32 -1.442695, %v10173_v25  ;;  %v6670_v40 = vmul.f32 -1.442695, %v10203_v42 }
 0x125   : > { %v7519_v60 = vpop.eup %7518  ;;  %7538 = vrcp.f32 %v4134_v51  ;;  %v4138_v61 = vadd.f32 1.0, %v7517_v41  ;;  %v10265_v6 = vpop.f32.mrb[27].mxu0  ;;  %1153 = vmatprep.mubr.bf16.mxu0 %v12901_v0  ;;  %1604 = vmatprep.mubr.bf16.mxu1 %v12901_v0  ;;  %v7090_v41 = vmul.f32 -1.442695, %v10205_v43  ;;  %v6671_v42 = vmul.f32 -1.442695, %v10209_v46 }
 0x126   : > { %v7521_v1 = vpop.eup %7520  ;;  %7540 = vrcp.f32 %v4554_v44  ;;  %v4558_v2 = vadd.f32 1.0, %v7519_v60  ;;  %v10267_v7 = vpop.f32.mrb[27].mxu1 }
 0x127   : > { %v7523_v48 = vpop.eup %7522  ;;  %6209 = vst [vmem:[%s10149_s27 + $0xd98] sm:$0xff] %v7521_v1  ;;  %7542 = vrcp.f32 %v4138_v61  ;;  %v10282_v14 = vpop.f32.mrb[28].mxu0  ;;  %v7435_v1 = vld [vmem:[%s12898_s0 + $0x118] sm:$0xff]  }
 0x128   : > { %v7525_v12 = vpop.eup %7524  ;;  %5790 = vst [vmem:[%s10149_s27 + $0x80] sm:$0xff] %v7523_v48  ;;  %7544 = vrcp.f32 %v4558_v2  ;;  %v10284_v16 = vpop.f32.mrb[28].mxu1 }
 0x129   : > { %v7527_v9 = vpop.eup %7526  ;;  %6210 = vst [vmem:[%s10149_s27 + $0xda0] sm:$0xff] %v7525_v12  ;;  %7546 = vpow2.f32 %v6656_v63  ;;  %v10288_v24 = vpop.f32.mrb[29].mxu0 }
 0x12a   : > { %v7529_v13 = vpop.eup %7528  ;;  %5794 = vst [vmem:[%s10149_s27 + $0xa0] sm:$0xff] %v7527_v9  ;;  %7548 = vpow2.f32 %v7076_v3  ;;  %v10290_v26 = vpop.f32.mrb[29].mxu1 }
 0x12b   : > { %v7531_v21 = vpop.eup %7530  ;;  %6214 = vst [vmem:[%s10149_s27 + $0xdc0] sm:$0xff] %v7529_v13  ;;  %7550 = vpow2.f32 %v6660_v8  ;;  %v10297_v27 = vpop.f32.mrb[30].mxu0 }
 0x12c   : > { %v7533_v25 = vpop.eup %7532  ;;  %5795 = vst [vmem:[%s10149_s27 + $0xa8] sm:$0xff] %v7531_v21  ;;  %7552 = vpow2.f32 %v7080_v17  ;;  %v10299_v29 = vpop.f32.mrb[30].mxu1  ;;  %6491 = vmatmul.mubr.msk.bf16.gmra.mrb[136].mxu0 %vm593_vm2, %v7434_v22  ;;  %6533 = vmatmul.mubr.msk.bf16.gmra.mrb[136].mxu1 %vm593_vm2, %v10030_v53 }
 0x12d   : > { %v7535_v33 = vpop.eup %7534  ;;  %6215 = vst [vmem:[%s10149_s27 + $0xdc8] sm:$0xff] %v7533_v25  ;;  %7554 = vpow2.f32 %v6661_v18  ;;  %v10303_v31 = vpop.f32.mrb[31].mxu0  ;;  %1163 = vmatprep.mubr.bf16.mxu0 %v12901_v0  ;;  %1614 = vmatprep.mubr.bf16.mxu1 %v12901_v0 }
 0x12e   : > { %v10305_v32 = vpop.f32.mrb[31].mxu1  ;;  %v7537_v36 = vpop.eup %7536  ;;  %5799 = vst [vmem:[%s10149_s27 + $0xc8] sm:$0xff] %v7535_v33  ;;  %7556 = vpow2.f32 %v7081_v52 }
 0x12f   : > { %v7539_v51 = vpop.eup %7538  ;;  %6219 = vst [vmem:[%s10149_s27 + $0xde8] sm:$0xff] %v7537_v36  ;;  %7558 = vpow2.f32 %v6665_v19  ;;  %v10321_v60 = vpop.f32.mrb[32].mxu0 }
 0x130   : > { %v7541_v37 = vpop.eup %7540  ;;  %5800 = vst [vmem:[%s10149_s27 + $0xd0] sm:$0xff] %v7539_v51  ;;  %7560 = vpow2.f32 %v7085_v28  ;;  %v10323_v53 = vpop.f32.mrb[32].mxu1 }
 0x131   : > { %v7543_v38 = vpop.eup %7542  ;;  %6220 = vst [vmem:[%s10149_s27 + $0xdf0] sm:$0xff] %v7541_v37  ;;  %7562 = vpow2.f32 %v6666_v30  ;;  %v10326_v43 = vpop.f32.mrb[33].mxu0  ;;  %v7436_v37 = vld [vmem:[%s12898_s0 + $0x120] sm:$0xff]  }
 0x132   : > { %v7545_v44 = vpop.eup %7544  ;;  %5804 = vst [vmem:[%s10149_s27 + $0xf0] sm:$0xff] %v7543_v38  ;;  %7564 = vpow2.f32 %v7086_v34  ;;  %v10328_v63 = vpop.f32.mrb[33].mxu1 }
 0x133   : > { %v7547_v61 = vpop.eup %7546  ;;  %6224 = vst [vmem:[%s10149_s27 + $0xe10] sm:$0xff] %v7545_v44  ;;  %7566 = vpow2.f32 %v6670_v40  ;;  %v10333_v3 = vpop.f32.mrb[34].mxu0 }
 0x134   : > { %v7549_v2 = vpop.eup %7548  ;;  %v4139_v46 = vadd.f32 1.0, %v7547_v61  ;;  %7568 = vpow2.f32 %v7090_v41  ;;  %v10335_v12 = vpop.f32.mrb[34].mxu1  ;;  %6492 = vmatmul.mubr.msk.bf16.gmra.mrb[140].mxu0 %vm593_vm2, %v7435_v1  ;;  %6534 = vmatmul.mubr.msk.bf16.gmra.mrb[140].mxu1 %vm593_vm2, %v10041_v54 }
 0x135   : > { %v7551_v48 = vpop.eup %7550  ;;  %v4559_v8 = vadd.f32 1.0, %v7549_v2  ;;  %7570 = vpow2.f32 %v6671_v42  ;;  %v10337_v17 = vpop.f32.mrb[35].mxu0  ;;  %1173 = vmatprep.mubr.bf16.mxu0 %v12901_v0  ;;  %1624 = vmatprep.mubr.bf16.mxu1 %v12901_v0 }
 0x136   : > { %v7553_v9 = vpop.eup %7552  ;;  %7572 = vrcp.f32 %v4139_v46  ;;  %v4143_v18 = vadd.f32 1.0, %v7551_v48  ;;  %v10339_v13 = vpop.f32.mrb[35].mxu1 }
 0x137   : > { %v7555_v52 = vpop.eup %7554  ;;  %7574 = vrcp.f32 %v4559_v8  ;;  %v4563_v21 = vadd.f32 1.0, %v7553_v9  ;;  %v10346_v36 = vpop.f32.mrb[36].mxu0 }
 0x138   : > { %v7557_v19 = vpop.eup %7556  ;;  %7576 = vrcp.f32 %v4143_v18  ;;  %v4144_v22 = vadd.f32 1.0, %v7555_v52  ;;  %v10348_v34 = vpop.f32.mrb[36].mxu1 }
 0x139   : > { %v7559_v25 = vpop.eup %7558  ;;  %7578 = vrcp.f32 %v4563_v21  ;;  %v4564_v28 = vadd.f32 1.0, %v7557_v19  ;;  %v10350_v40 = vpop.f32.mrb[37].mxu0  ;;  %v7091_v21 = vmul.f32 -1.442695, %v10211_v47  ;;  %v7095_v47 = vmul.f32 -1.442695, %v10226_v5 }
 0x13a   : > { %v7561_v33 = vpop.eup %7560  ;;  %7580 = vrcp.f32 %v4144_v22  ;;  %v4148_v30 = vadd.f32 1.0, %v7559_v25  ;;  %v10355_v42 = vpop.f32.mrb[37].mxu1  ;;  %v6675_v25 = vmul.f32 -1.442695, %v10224_v4  ;;  %v7437_v5 = vld [vmem:[%s12898_s0 + $0x128] sm:$0xff]  }
 0x13b   : > { %v7563_v51 = vpop.eup %7562  ;;  %7582 = vrcp.f32 %v4564_v28  ;;  %v4568_v54 = vadd.f32 1.0, %v7561_v33  ;;  %v10357_v44 = vpop.f32.mrb[38].mxu0 }
 0x13c   : > { %v7565_v41 = vpop.eup %7564  ;;  %7584 = vrcp.f32 %v4148_v30  ;;  %v4149_v38 = vadd.f32 1.0, %v7563_v51  ;;  %v10359_v2 = vpop.f32.mrb[38].mxu1  ;;  %6493 = vmatmul.mubr.msk.bf16.gmra.mrb[144].mxu0 %vm593_vm2, %v7436_v37  ;;  %6535 = vmatmul.mubr.msk.bf16.gmra.mrb[144].mxu1 %vm593_vm2, %v10052_v55  ;;  %v6676_v55 = vmul.f32 -1.442695, %v10228_v50 }
 0x13d   : > { %v7567_v61 = vpop.eup %7566  ;;  %7586 = vrcp.f32 %v4568_v54  ;;  %v4569_v1 = vadd.f32 1.0, %v7565_v41  ;;  %v10361_v8 = vpop.f32.mrb[39].mxu0  ;;  %1183 = vmatprep.mubr.bf16.mxu0 %v12901_v0  ;;  %1634 = vmatprep.mubr.bf16.mxu1 %v12901_v0  ;;  %v7096_v54 = vmul.f32 -1.442695, %v10233_v10 }
 0x13e   : > { %v7569_v46 = vpop.eup %7568  ;;  %7588 = vrcp.f32 %v4149_v38  ;;  %v4153_v48 = vadd.f32 1.0, %v7567_v61  ;;  %v10363_v9 = vpop.f32.mrb[39].mxu1  ;;  %v6680_v38 = vmul.f32 -1.442695, %v10235_v11  ;;  %v6681_v11 = vmul.f32 -1.442695, %v10239_v20 }
 0x13f   : > { %v7571_v18 = vpop.eup %7570  ;;  %7590 = vrcp.f32 %v4569_v1  ;;  %v4573_v52 = vadd.f32 1.0, %v7569_v46  ;;  %v10376_v30 = vpop.f32.mrb[40].mxu0  ;;  %v7100_v46 = vmul.f32 -1.442695, %v10237_v15 }
 0x140   : > { %v7573_v19 = vpop.eup %7572  ;;  %7592 = vrcp.f32 %v4153_v48  ;;  %v4154_v22 = vadd.f32 1.0, %v7571_v18  ;;  %v10378_v51 = vpop.f32.mrb[40].mxu1 }
 0x141   : > { %v7575_v28 = vpop.eup %7574  ;;  %5805 = vst [vmem:[%s10149_s27 + $0xf8] sm:$0xff] %v7573_v19  ;;  %7594 = vrcp.f32 %v4573_v52  ;;  %v10382_v37 = vpop.f32.mrb[41].mxu0  ;;  %v7101_v19 = vmul.f32 -1.442695, %v10241_v23  ;;  %v7105_v23 = vmul.f32 -1.442695, %v10250_v35 }
 0x142   : > { %v7577_v33 = vpop.eup %7576  ;;  %6225 = vst [vmem:[%s10149_s27 + $0xe18] sm:$0xff] %v7575_v28  ;;  %7596 = vrcp.f32 %v4154_v22  ;;  %v10384_v41 = vpop.f32.mrb[41].mxu1  ;;  %v6685_v22 = vmul.f32 -1.442695, %v10248_v49  ;;  %v7438_v35 = vld [vmem:[%s12898_s0 + $0x130] sm:$0xff]  }
 0x143   : > { %v7579_v4 = vpop.eup %7578  ;;  %5809 = vst [vmem:[%s10149_s27 + $0x118] sm:$0xff] %v7577_v33  ;;  %7598 = vpow2.f32 %v7091_v21  ;;  %v10391_v61 = vpop.f32.mrb[42].mxu0  ;;  %v7106_v33 = vmul.f32 -1.442695, %v10257_v45 }
 0x144   : > { %v7581_v50 = vpop.eup %7580  ;;  %6229 = vst [vmem:[%s10149_s27 + $0xe38] sm:$0xff] %v7579_v4  ;;  %7600 = vpow2.f32 %v6675_v25  ;;  %v10393_v1 = vpop.f32.mrb[42].mxu1  ;;  %6494 = vmatmul.mubr.msk.bf16.gmra.mrb[148].mxu0 %vm593_vm2, %v7437_v5  ;;  %6536 = vmatmul.mubr.msk.bf16.gmra.mrb[148].mxu1 %vm593_vm2, %v10063_v56  ;;  %v6686_v56 = vmul.f32 -1.442695, %v10252_v39 }
 0x145   : > { %v7583_v10 = vpop.eup %7582  ;;  %5810 = vst [vmem:[%s10149_s27 + $0x120] sm:$0xff] %v7581_v50  ;;  %7602 = vpow2.f32 %v7095_v47  ;;  %v10397_v48 = vpop.f32.mrb[43].mxu0  ;;  %1193 = vmatprep.mubr.bf16.mxu0 %v12901_v0  ;;  %1644 = vmatprep.mubr.bf16.mxu1 %v12901_v0 }
 0x146   : > { %v10399_v18 = vpop.f32.mrb[43].mxu1  ;;  %v7585_v52 = vpop.eup %7584  ;;  %6230 = vst [vmem:[%s10149_s27 + $0xe40] sm:$0xff] %v7583_v10  ;;  %7604 = vpow2.f32 %v6676_v55 }
 0x147   : > { %v7587_v21 = vpop.eup %7586  ;;  %5814 = vst [vmem:[%s10149_s27 + $0x140] sm:$0xff] %v7585_v52  ;;  %7606 = vpow2.f32 %v7096_v54  ;;  %v10416_v28 = vpop.f32.mrb[44].mxu0 }
 0x148   : > { %v7589_v15 = vpop.eup %7588  ;;  %6234 = vst [vmem:[%s10149_s27 + $0xe60] sm:$0xff] %v7587_v21  ;;  %7608 = vpow2.f32 %v6680_v38  ;;  %v10418_v47 = vpop.f32.mrb[44].mxu1 }
 0x149   : > { %v7591_v20 = vpop.eup %7590  ;;  %5815 = vst [vmem:[%s10149_s27 + $0x148] sm:$0xff] %v7589_v15  ;;  %7610 = vpow2.f32 %v7100_v46  ;;  %v10422_v55 = vpop.f32.mrb[45].mxu0 }
 0x14a   : > { %v7593_v25 = vpop.eup %7592  ;;  %6235 = vst [vmem:[%s10149_s27 + $0xe68] sm:$0xff] %v7591_v20  ;;  %7612 = vpow2.f32 %v6681_v11  ;;  %v10424_v4 = vpop.f32.mrb[45].mxu1 }
 0x14b   : > { %v7595_v49 = vpop.eup %7594  ;;  %5819 = vst [vmem:[%s10149_s27 + $0x168] sm:$0xff] %v7593_v25  ;;  %7614 = vpow2.f32 %v7101_v19  ;;  %v10430_v39 = vpop.f32.mrb[46].mxu0 }
 0x14c   : > { %v7597_v54 = vpop.eup %7596  ;;  %6239 = vst [vmem:[%s10149_s27 + $0xe88] sm:$0xff] %v7595_v49  ;;  %7616 = vpow2.f32 %v6685_v22  ;;  %v10432_v5 = vpop.f32.mrb[46].mxu1  ;;  %6495 = vmatmul.mubr.msk.bf16.gmra.mrb[152].mxu0 %vm593_vm2, %v7438_v35  ;;  %6537 = vmatmul.mubr.msk.bf16.gmra.mrb[152].mxu1 %vm593_vm2, %v10074_v57  ;;  %v7439_v35 = vld [vmem:[%s12898_s0 + $0x138] sm:$0xff]  }
 0x14d   : > { %v7599_v50 = vpop.eup %7598  ;;  %5820 = vst [vmem:[%s10149_s27 + $0x170] sm:$0xff] %v7597_v54  ;;  %7618 = vpow2.f32 %v7105_v23  ;;  %v10435_v38 = vpop.f32.mrb[47].mxu0  ;;  %1203 = vmatprep.mubr.bf16.mxu0 %v12901_v0  ;;  %1654 = vmatprep.mubr.bf16.mxu1 %v12901_v0 }
 0x14e   : > { %v10437_v45 = vpop.f32.mrb[47].mxu1  ;;  %v7601_v10 = vpop.eup %7600  ;;  %v4574_v46 = vadd.f32 1.0, %v7599_v50  ;;  %7620 = vpow2.f32 %v6686_v56 }
 0x14f   : > { %v7603_v52 = vpop.eup %7602  ;;  %v4158_v11 = vadd.f32 1.0, %v7601_v10  ;;  %7622 = vpow2.f32 %v7106_v33  ;;  %v10444_v25 = vpop.f32.mrb[48].mxu0 }
 0x150   : > { %v7605_v21 = vpop.eup %7604  ;;  %7624 = vrcp.f32 %v4574_v46  ;;  %v4578_v19 = vadd.f32 1.0, %v7603_v52  ;;  %v10446_v56 = vpop.f32.mrb[48].mxu1 }
 0x151   : > { %v7607_v15 = vpop.eup %7606  ;;  %7626 = vrcp.f32 %v4158_v11  ;;  %v4159_v22 = vadd.f32 1.0, %v7605_v21  ;;  %v10448_v33 = vpop.f32.mrb[49].mxu0 }
 0x152   : > { %v7609_v20 = vpop.eup %7608  ;;  %7628 = vrcp.f32 %v4578_v19  ;;  %v4579_v23 = vadd.f32 1.0, %v7607_v15  ;;  %v10453_v10 = vpop.f32.mrb[49].mxu1 }
 0x153   : > { %v7611_v49 = vpop.eup %7610  ;;  %7630 = vrcp.f32 %v4159_v22  ;;  %v4163_v57 = vadd.f32 1.0, %v7609_v20  ;;  %v10455_v46 = vpop.f32.mrb[50].mxu0 }
 0x154   : > { %v7613_v54 = vpop.eup %7612  ;;  %7632 = vrcp.f32 %v4579_v23  ;;  %v4583_v50 = vadd.f32 1.0, %v7611_v49  ;;  %v10457_v21 = vpop.f32.mrb[50].mxu1  ;;  %6496 = vmatmul.mubr.msk.bf16.gmra.mrb[156].mxu0 %vm593_vm2, %v7439_v35  ;;  %6538 = vmatmul.mubr.msk.bf16.gmra.mrb[156].mxu1 %vm593_vm2, %v10085_v58 }
 0x155   : > { %v7615_v52 = vpop.eup %7614  ;;  %7634 = vrcp.f32 %v4163_v57  ;;  %v4164_v11 = vadd.f32 1.0, %v7613_v54  ;;  %v10459_v22 = vpop.f32.mrb[51].mxu0  ;;  %v12906_v54 = vmov 0  }
 0x156   : > { %v7617_v19 = vpop.eup %7616  ;;  %7636 = vrcp.f32 %v4583_v50  ;;  %v4584_v15 = vadd.f32 1.0, %v7615_v52  ;;  %12904 = vst [vmem:[#allocation2_spill] sm:$0xff] %v10459_v22  ;;  %v10461_v20 = vpop.f32.mrb[51].mxu1  ;;  %1213 = vmatprep.mubr.bf16.mxu0 %v12906_v54  ;;  %1664 = vmatprep.mubr.bf16.mxu1 %v12906_v54  ;;  %v6691_v22 = vmul.f32 -1.442695, %v10265_v6 }
 0x157   : > { %12905 = vst [vmem:[#allocation3_spill] sm:$0xff] %v10461_v20  ;;  %v7619_v0 = vpop.eup %7618  ;;  %7638 = vrcp.f32 %v4164_v11  ;;  %v4168_v23 = vadd.f32 1.0, %v7617_v19  ;;  %v6690_v11 = vmul.f32 -1.442695, %v10259_v59  ;;  %v7110_v20 = vmul.f32 -1.442695, %v10262_v62 }
 0x158   : > { %v7621_v49 = vpop.eup %7620  ;;  %7640 = vrcp.f32 %v4584_v15  ;;  %v4588_v57 = vadd.f32 1.0, %v7619_v0  ;;  %v10470_v58 = vpop.f32.mrb[52].mxu0  ;;  %v7440_v59 = vld [vmem:[%s12898_s0 + $0x140] sm:$0xff]   ;;  %v6695_v6 = vmul.f32 -1.442695, %v10282_v14  ;;  %v9662_v14 = vld [vmem:[%s12898_s0 + $0xd0] sm:$0xff]  }
 0x159   : > { %v7623_v50 = vpop.eup %7622  ;;  %7642 = vrcp.f32 %v4168_v23  ;;  %v4169_v52 = vadd.f32 1.0, %v7621_v49  ;;  %v10472_v15 = vpop.f32.mrb[52].mxu1 }
 0x15a   : > { %v7625_v19 = vpop.eup %7624  ;;  %7644 = vrcp.f32 %v4588_v57  ;;  %v4589_v35 = vadd.f32 1.0, %v7623_v50  ;;  %12907 = vst [vmem:[#allocation4_spill] sm:$0xff] %v10472_v15  ;;  %v10476_v23 = vpop.f32.mrb[53].mxu0  ;;  %v7111_v57 = vmul.f32 -1.442695, %v10267_v7 }
 0x15b   : > { %v7627_v0 = vpop.eup %7626  ;;  %6240 = vst [vmem:[%s10149_s27 + $0xe90] sm:$0xff] %v7625_v19  ;;  %7646 = vrcp.f32 %v4169_v52  ;;  %12908 = vst [vmem:[#allocation5_spill] sm:$0xff] %v10476_v23  ;;  %v10478_v49 = vpop.f32.mrb[53].mxu1  ;;  %v6696_v7 = vmul.f32 -1.442695, %v10288_v24 }
 0x15c   : > { %12909 = vst [vmem:[#allocation6_spill] sm:$0xff] %v10478_v49  ;;  %v7629_v62 = vpop.eup %7628  ;;  %5824 = vst [vmem:[%s10149_s27 + $0x190] sm:$0xff] %v7627_v0  ;;  %7648 = vrcp.f32 %v4589_v35  ;;  %v10485_v50 = vpop.f32.mrb[54].mxu0  ;;  %v7115_v35 = vmul.f32 -1.442695, %v10284_v16  ;;  %6497 = vmatmul.mubr.msk.bf16.gmra.mrb[160].mxu0 %vm593_vm2, %v7440_v59  ;;  %6539 = vmatmul.mubr.msk.bf16.gmra.mrb[160].mxu1 %vm593_vm2, %v9662_v14 }
 0x15d   : > { %v1369_v52 = vpop.f32.mrb[54].mxu1  ;;  %v7631_v19 = vpop.eup %7630  ;;  %6244 = vst [vmem:[%s10149_s27 + $0xeb0] sm:$0xff] %v7629_v62  ;;  %7650 = vpow2.f32 %v6690_v11  ;;  %v7116_v16 = vmul.f32 -1.442695, %v10290_v26  ;;  %1223 = vmatprep.mubr.bf16.mxu0 %v12906_v54  ;;  %1674 = vmatprep.mubr.bf16.mxu1 %v12906_v54  ;;  %v6700_v24 = vmul.f32 -1.442695, %v10297_v27 }
 0x15e   : > { %v10489_v49 = vpop.f32.mrb[55].mxu0  ;;  %v1370_v23 = vpop.f32.mrb[55].mxu1  ;;  %5825 = vst [vmem:[%s10149_s27 + $0x198] sm:$0xff] %v7631_v19  ;;  %7652 = vpow2.f32 %v7110_v20  ;;  %v6701_v62 = vmul.f32 -1.442695, %v10303_v31  ;;  %v7441_v27 = vld [vmem:[%s12898_s0 + $0x148] sm:$0xff]  }
 0x15f   : > { %v7633_v15 = vpop.eup %7632  ;;  %7654 = vpow2.f32 %v6691_v22  ;;  %v10508_v23 = vpop.f32.mrb[56].mxu0  ;;  %v7121_v19 = vmul.f32 -1.442695, %v10305_v32  ;;  %v10539_v32 = vld [vmem:[%s12898_s0 + $0xd8] sm:$0xff]  }
 0x160   : > { %v7635_v0 = vpop.eup %7634  ;;  %6245 = vst [vmem:[%s10149_s27 + $0xeb8] sm:$0xff] %v7633_v15  ;;  %7656 = vpow2.f32 %v7111_v57  ;;  %v7120_v15 = vmul.f32 -1.442695, %v10299_v29  ;;  %v10510_v59 = vpop.f32.mrb[56].mxu1  ;;  %12911 = vst [vmem:[#allocation8_spill] sm:$0xff] %v10539_v32 }
 0x161   : > { %v7637_v11 = vpop.eup %7636  ;;  %5829 = vst [vmem:[%s10149_s27 + $0x1b8] sm:$0xff] %v7635_v0  ;;  %7658 = vpow2.f32 %v6695_v6  ;;  %v10514_v57 = vpop.f32.mrb[57].mxu0  ;;  %v6705_v0 = vmul.f32 -1.442695, %v10321_v60 }
 0x162   : > { %v7639_v22 = vpop.eup %7638  ;;  %6249 = vst [vmem:[%s10149_s27 + $0xed8] sm:$0xff] %v7637_v11  ;;  %7660 = vpow2.f32 %v7115_v35  ;;  %v10516_v52 = vpop.f32.mrb[57].mxu1 }
 0x163   : > { %v7641_v20 = vpop.eup %7640  ;;  %5830 = vst [vmem:[%s10149_s27 + $0x1c0] sm:$0xff] %v7639_v22  ;;  %7662 = vpow2.f32 %v6696_v7  ;;  %v10523_v6 = vpop.f32.mrb[58].mxu0 }
 0x164   : > { %v7643_v26 = vpop.eup %7642  ;;  %6250 = vst [vmem:[%s10149_s27 + $0xee0] sm:$0xff] %v7641_v20  ;;  %7664 = vpow2.f32 %v7116_v16  ;;  %v10525_v35 = vpop.f32.mrb[58].mxu1  ;;  %6498 = vmatmul.mubr.msk.bf16.gmra.mrb[164].mxu0 %vm593_vm2, %v7441_v27  ;;  %6540 = vmatmul.mubr.msk.bf16.gmra.mrb[164].mxu1 %vm593_vm2, %v10539_v32 }
 0x165   : > { %v7645_v29 = vpop.eup %7644  ;;  %5834 = vst [vmem:[%s10149_s27 + $0x1e0] sm:$0xff] %v7643_v26  ;;  %7666 = vpow2.f32 %v6700_v24  ;;  %v10529_v7 = vpop.f32.mrb[59].mxu0  ;;  %1684 = vmatprep.mubr.bf16.mxu1 %v12906_v54  ;;  %v9664_v24 = vld [vmem:[%s12898_s0] sm:$0xff]  }
 0x166   : > { %v7647_v31 = vpop.eup %7646  ;;  %6254 = vst [vmem:[%s10149_s27 + $0xf00] sm:$0xff] %v7645_v29  ;;  %v10531_v14 = vpop.f32.mrb[59].mxu1  ;;  %7668 = vpow2.f32 %v7120_v15  ;;  %7244 = vmatprep.mubr.msk.bf16.mxu0 %vm593_vm2, %v9664_v24 }
 0x167   : > { %12910 = vst [vmem:[#allocation7_spill] sm:$0xff] %v10531_v14  ;;  %v7649_v11 = vpop.eup %7648  ;;  %5835 = vst [vmem:[%s10149_s27 + $0x1e8] sm:$0xff] %v7647_v31  ;;  %7670 = vpow2.f32 %v6701_v62  ;;  %v10548_v27 = vpop.f32.mrb[60].mxu0 }
 0x168   : > { %v7651_v22 = vpop.eup %7650  ;;  %6255 = vst [vmem:[%s10149_s27 + $0xf08] sm:$0xff] %v7649_v11  ;;  %7672 = vpow2.f32 %v7121_v19  ;;  %12912 = vst [vmem:[#allocation9_spill] sm:$0xff] %v10548_v27  ;;  %v10550_v29 = vpop.f32.mrb[60].mxu1 }
 0x169   : > { %v7653_v60 = vpop.eup %7652  ;;  %v4173_v16 = vadd.f32 1.0, %v7651_v22  ;;  %7674 = vpow2.f32 %v6705_v0  ;;  %12913 = vst [vmem:[#allocation10_spill] sm:$0xff] %v10550_v29  ;;  %v10552_v11 = vpop.f32.mrb[61].mxu0 }
 0x16a   : > { %v7655_v20 = vpop.eup %7654  ;;  %v4593_v15 = vadd.f32 1.0, %v7653_v60  ;;  %v10554_v32 = vpop.f32.mrb[61].mxu1 }
 0x16b   : > { %v7657_v26 = vpop.eup %7656  ;;  %7676 = vrcp.f32 %v4173_v16  ;;  %v4174_v62 = vadd.f32 1.0, %v7655_v20  ;;  %12914 = vst [vmem:[#allocation11_spill] sm:$0xff] %v10554_v32  ;;  %v10556_v24 = vpop.f32.mrb[62].mxu0 }
 0x16c   : > { %v7659_v31 = vpop.eup %7658  ;;  %7678 = vrcp.f32 %v4593_v15  ;;  %v4594_v19 = vadd.f32 1.0, %v7657_v26  ;;  %12915 = vst [vmem:[#allocation12_spill] sm:$0xff] %v10556_v24  ;;  %v10558_v16 = vpop.f32.mrb[62].mxu1  ;;  %v7125_v24 = vmul.f32 -1.442695, %v10323_v53 }
 0x16d   : > { %v7661_v22 = vpop.eup %7660  ;;  %7680 = vrcp.f32 %v4174_v62  ;;  %v4178_v14 = vadd.f32 1.0, %v7659_v31  ;;  %12916 = vst [vmem:[#allocation13_spill] sm:$0xff] %v10558_v16  ;;  %v10560_v27 = vpop.f32.mrb[63].mxu0  ;;  %v10567_v31 = vld [vmem:[%s12898_s0 + $0xe0] sm:$0xff]   ;;  %v6710_v53 = vmul.f32 -1.442695, %v10333_v3 }
 0x16e   : > { %v7663_v0 = vpop.eup %7662  ;;  %7682 = vrcp.f32 %v4594_v19  ;;  %v4598_v60 = vadd.f32 1.0, %v7661_v22  ;;  %12917 = vst [vmem:[#allocation14_spill] sm:$0xff] %v10560_v27  ;;  %v10562_v15 = vpop.f32.mrb[63].mxu1  ;;  %6541 = vmatmul.mubr.msk.bf16.gmra.mrb[168].mxu1 %vm593_vm2, %v10567_v31 }
 0x16f   : > { %v7665_v20 = vpop.eup %7664  ;;  %7684 = vrcp.f32 %v4178_v14  ;;  %v4179_v29 = vadd.f32 1.0, %v7663_v0  ;;  %12918 = vst [vmem:[#allocation15_spill] sm:$0xff] %v10562_v15  ;;  %v9666_v14 = vld [vmem:[%s12898_s0 + $0x8] sm:$0xff]   ;;  %1694 = vmatprep.mubr.bf16.mxu1 %v12906_v54  ;;  %v9667_v0 = vld [vmem:[%s12898_s0 + $0x10] sm:$0xff]   ;;  %v10580_v16 = vpop.f32.mrb[64].mxu0 }
 0x170   : > { %v7667_v26 = vpop.eup %7666  ;;  %7686 = vrcp.f32 %v4598_v60  ;;  %v4599_v62 = vadd.f32 1.0, %v7665_v20  ;;  %7245 = vmatmul.mubr.msk.bf16.vlgmr.msra.gmra.mrb[168].mxu0 %vm593_vm2, %v9666_v14  ;;  %12919 = vst [vmem:[#allocation16_spill] sm:$0xff] %v10580_v16  ;;  %v10582_v14 = vpop.f32.mrb[64].mxu1 }
 0x171   : > { %v7669_v19 = vpop.eup %7668  ;;  %7688 = vrcp.f32 %v4179_v29  ;;  %v4183_v22 = vadd.f32 1.0, %v7667_v26  ;;  %7248 = vmatprep.mubr.msk.bf16.mxu0 %vm593_vm2, %v9667_v0  ;;  %v10585_v32 = vpop.f32.mrb[65].mxu0 }
 0x172   : > { %v7671_v60 = vpop.eup %7670  ;;  %7690 = vrcp.f32 %v4599_v62  ;;  %v4603_v20 = vadd.f32 1.0, %v7669_v19  ;;  %12920 = vst [vmem:[#allocation17_spill] sm:$0xff] %v10585_v32  ;;  %v6706_v19 = vmul.f32 -1.442695, %v10326_v43  ;;  %v7130_v43 = vmul.f32 -1.442695, %v10335_v12 }
 0x173   : > { %v7673_v15 = vpop.eup %7672  ;;  %7692 = vrcp.f32 %v4183_v22  ;;  %v4184_v27 = vadd.f32 1.0, %v7671_v60  ;;  %v10588_v22 = vpop.f32.mrb[65].mxu1  ;;  %v6711_v12 = vmul.f32 -1.442695, %v10337_v17 }
 0x174   : > { %v7675_v29 = vpop.eup %7674  ;;  %7694 = vrcp.f32 %v4603_v20  ;;  %v4604_v26 = vadd.f32 1.0, %v7673_v15  ;;  %v10590_v60 = vpop.f32.mrb[66].mxu0  ;;  %v7126_v15 = vmul.f32 -1.442695, %v10328_v63  ;;  %v9669_v63 = vld [vmem:[%s12898_s0 + $0x18] sm:$0xff]  }
 0x175   : > { %v7677_v0 = vpop.eup %7676  ;;  %7696 = vrcp.f32 %v4184_v27  ;;  %v4188_v62 = vadd.f32 1.0, %v7675_v29  ;;  %v10596_v32 = vpop.f32.mrb[66].mxu1  ;;  %v10603_v29 = vld [vmem:[%s12898_s0 + $0xe8] sm:$0xff]  }
 0x176   : > { %v7679_v16 = vpop.eup %7678  ;;  %5839 = vst [vmem:[%s10149_s27 + $0x208] sm:$0xff] %v7677_v0  ;;  %7698 = vrcp.f32 %v4604_v26  ;;  %6542 = vmatmul.mubr.msk.bf16.gmra.mrb[172].mxu1 %vm593_vm2, %v10603_v29  ;;  %v9670_v26 = vld [vmem:[%s12898_s0 + $0x20] sm:$0xff]  }
 0x177   : > { %v7681_v20 = vpop.eup %7680  ;;  %6259 = vst [vmem:[%s10149_s27 + $0xf28] sm:$0xff] %v7679_v16  ;;  %7700 = vrcp.f32 %v4188_v62  ;;  %v10615_v16 = vpop.f32.mrb[67].mxu1  ;;  %1704 = vmatprep.mubr.bf16.mxu1 %v12906_v54  ;;  %v7131_v62 = vmul.f32 -1.442695, %v10339_v13  ;;  %v7136_v13 = vmul.f32 -1.442695, %v10355_v42 }
 0x178   : > { %v7683_v27 = vpop.eup %7682  ;;  %5840 = vst [vmem:[%s10149_s27 + $0x210] sm:$0xff] %v7681_v20  ;;  %7702 = vpow2.f32 %v7125_v24  ;;  %7249 = vmatmul.mubr.msk.bf16.gmra.mrb[172].mxu0 %vm593_vm2, %v9669_v63  ;;  %v10613_v24 = vpop.f32.mrb[67].mxu0  ;;  %v10647_v42 = vld [vmem:[%s12898_s0 + $0xf0] sm:$0xff]  }
 0x179   : > { %v7685_v3 = vpop.eup %7684  ;;  %6260 = vst [vmem:[%s10149_s27 + $0xf30] sm:$0xff] %v7683_v27  ;;  %7704 = vpow2.f32 %v6706_v19  ;;  %7252 = vmatprep.mubr.msk.bf16.mxu0 %vm593_vm2, %v9670_v26  ;;  %v6715_v19 = vmul.f32 -1.442695, %v10346_v36  ;;  %v7135_v27 = vmul.f32 -1.442695, %v10348_v34  ;;  %v10636_v34 = vpop.f32.mrb[68].mxu1 }
 0x17a   : > { %v7687_v0 = vpop.eup %7686  ;;  %5844 = vst [vmem:[%s10149_s27 + $0x230] sm:$0xff] %v7685_v3  ;;  %7706 = vpow2.f32 %v7126_v15  ;;  %v6716_v3 = vmul.f32 -1.442695, %v10350_v40  ;;  %v6720_v36 = vmul.f32 -1.442695, %v10357_v44  ;;  %v9672_v44 = vld [vmem:[%s12898_s0 + $0x28] sm:$0xff]  }
 0x17b   : > { %v7689_v17 = vpop.eup %7688  ;;  %6264 = vst [vmem:[%s10149_s27 + $0xf50] sm:$0xff] %v7687_v0  ;;  %7708 = vpow2.f32 %v6710_v53  ;;  %v10634_v53 = vpop.f32.mrb[68].mxu0  ;;  %v7140_v40 = vmul.f32 -1.442695, %v10359_v2 }
 0x17c   : > { %v7691_v20 = vpop.eup %7690  ;;  %5845 = vst [vmem:[%s10149_s27 + $0x238] sm:$0xff] %v7689_v17  ;;  %7710 = vpow2.f32 %v7130_v43  ;;  %v10642_v0 = vpop.f32.mrb[69].mxu1 }
 0x17d   : > { %v7693_v63 = vpop.eup %7692  ;;  %6265 = vst [vmem:[%s10149_s27 + $0xf58] sm:$0xff] %v7691_v20  ;;  %7712 = vpow2.f32 %v6711_v12  ;;  %v10640_v12 = vpop.f32.mrb[69].mxu0  ;;  %12921 = vst [vmem:[#allocation18_spill] sm:$0xff] %v10642_v0 }
 0x17e   : > { %v7695_v15 = vpop.eup %7694  ;;  %5849 = vst [vmem:[%s10149_s27 + $0x258] sm:$0xff] %v7693_v63  ;;  %7714 = vpow2.f32 %v7131_v62  ;;  %6543 = vmatmul.mubr.msk.bf16.gmra.mrb[176].mxu1 %vm593_vm2, %v10647_v42  ;;  %v10656_v62 = vpop.f32.mrb[70].mxu0 }
 0x17f   : > { %v7697_v26 = vpop.eup %7696  ;;  %6269 = vst [vmem:[%s10149_s27 + $0xf78] sm:$0xff] %v7695_v15  ;;  %7716 = vpow2.f32 %v6715_v19  ;;  %12922 = vst [vmem:[#allocation19_spill] sm:$0xff] %v10656_v62  ;;  %v10658_v17 = vpop.f32.mrb[70].mxu1  ;;  %1714 = vmatprep.mubr.bf16.mxu1 %v12906_v54  ;;  %v9673_v19 = vld [vmem:[%s12898_s0 + $0x30] sm:$0xff]  }
 0x180   : > { %v7699_v43 = vpop.eup %7698  ;;  %5850 = vst [vmem:[%s10149_s27 + $0x260] sm:$0xff] %v7697_v26  ;;  %7718 = vpow2.f32 %v7135_v27  ;;  %7253 = vmatmul.mubr.msk.bf16.gmra.mrb[176].mxu0 %vm593_vm2, %v9672_v44  ;;  %12923 = vst [vmem:[#allocation20_spill] sm:$0xff] %v10658_v17  ;;  %v10666_v15 = vpop.f32.mrb[71].mxu0 }
 0x181   : > { %v7701_v2 = vpop.eup %7700  ;;  %6270 = vst [vmem:[%s10149_s27 + $0xf80] sm:$0xff] %v7699_v43  ;;  %7720 = vpow2.f32 %v6716_v3  ;;  %7256 = vmatprep.mubr.msk.bf16.mxu0 %vm593_vm2, %v9673_v19  ;;  %12924 = vst [vmem:[#allocation21_spill] sm:$0xff] %v10666_v15  ;;  %v10668_v3 = vpop.f32.mrb[71].mxu1 }
 0x182   : > { %v7703_v20 = vpop.eup %7702  ;;  %5854 = vst [vmem:[%s10149_s27 + $0x280] sm:$0xff] %v7701_v2  ;;  %7722 = vpow2.f32 %v7136_v13  ;;  %12925 = vst [vmem:[#allocation22_spill] sm:$0xff] %v10668_v3  ;;  %v10670_v13 = vpop.f32.mrb[72].mxu0  ;;  %v6721_v3 = vmul.f32 -1.442695, %v10361_v8  ;;  %v9678_v8 = vld [vmem:[%s12898_s0 + $0x48] sm:$0xff]  }
 0x183   : > { %v7705_v27 = vpop.eup %7704  ;;  %v4608_v63 = vadd.f32 1.0, %v7703_v20  ;;  %7724 = vpow2.f32 %v6720_v36  ;;  %12926 = vst [vmem:[#allocation23_spill] sm:$0xff] %v10670_v13  ;;  %v10672_v20 = vpop.f32.mrb[72].mxu1 }
 0x184   : > { %v7707_v26 = vpop.eup %7706  ;;  %v4189_v43 = vadd.f32 1.0, %v7705_v27  ;;  %7726 = vpow2.f32 %v7140_v40  ;;  %12927 = vst [vmem:[#allocation24_spill] sm:$0xff] %v10672_v20  ;;  %v10677_v40 = vld [vmem:[%s12898_s0 + $0xf8] sm:$0xff]  }
 0x185   : > { %v7709_v44 = vpop.eup %7708  ;;  %7728 = vrcp.f32 %v4608_v63  ;;  %v4609_v17 = vadd.f32 1.0, %v7707_v26 }
 0x186   : > { %v7711_v62 = vpop.eup %7710  ;;  %7730 = vrcp.f32 %v4189_v43  ;;  %v4193_v0 = vadd.f32 1.0, %v7709_v44  ;;  %6544 = vmatmul.mubr.msk.bf16.gmra.mrb[180].mxu1 %vm593_vm2, %v10677_v40 }
 0x187   : > { %v7713_v19 = vpop.eup %7712  ;;  %7732 = vrcp.f32 %v4609_v17  ;;  %v4613_v2 = vadd.f32 1.0, %v7711_v62  ;;  %v9675_v17 = vld [vmem:[%s12898_s0 + $0x38] sm:$0xff]   ;;  %1724 = vmatprep.mubr.bf16.mxu1 %v12906_v54 }
 0x188   : > { %v7715_v36 = vpop.eup %7714  ;;  %7734 = vrcp.f32 %v4193_v0  ;;  %v4194_v15 = vadd.f32 1.0, %v7713_v19  ;;  %7257 = vmatmul.mubr.msk.bf16.gmra.mrb[180].mxu0 %vm593_vm2, %v9675_v17  ;;  %v9676_v0 = vld [vmem:[%s12898_s0 + $0x40] sm:$0xff]  }
 0x189   : > { %v7717_v62 = vpop.eup %7716  ;;  %7736 = vrcp.f32 %v4613_v2  ;;  %v4614_v27 = vadd.f32 1.0, %v7715_v36  ;;  %7260 = vmatprep.mubr.msk.bf16.mxu0 %vm593_vm2, %v9676_v0 }
 0x18a   : > { %v7719_v63 = vpop.eup %7718  ;;  %7738 = vrcp.f32 %v4194_v15  ;;  %v4198_v26 = vadd.f32 1.0, %v7717_v62  ;;  %v7141_v62 = vmul.f32 -1.442695, %v10363_v9 }
 0x18b   : > { %v7721_v43 = vpop.eup %7720  ;;  %7740 = vrcp.f32 %v4614_v27  ;;  %v4618_v44 = vadd.f32 1.0, %v7719_v63  ;;  %v6725_v63 = vmul.f32 -1.442695, %v10376_v30  ;;  %v7145_v30 = vmul.f32 -1.442695, %v10378_v51 }
 0x18c   : > { %v7723_v19 = vpop.eup %7722  ;;  %7742 = vrcp.f32 %v4198_v26  ;;  %v4199_v17 = vadd.f32 1.0, %v7721_v43  ;;  %v10694_v26 = vpop.f32.mrb[73].mxu0  ;;  %v10699_v43 = vld [vmem:[%s12898_s0 + $0x100] sm:$0xff]   ;;  %v7146_v51 = vmul.f32 -1.442695, %v10384_v41 }
 0x18d   : > { %v7725_v2 = vpop.eup %7724  ;;  %7744 = vrcp.f32 %v4618_v44  ;;  %v4619_v36 = vadd.f32 1.0, %v7723_v19  ;;  %v6726_v44 = vmul.f32 -1.442695, %v10382_v37  ;;  %v10716_v19 = vpop.f32.mrb[73].mxu1  ;;  %v6731_v41 = vmul.f32 -1.442695, %v10397_v48 }
 0x18e   : > { %v7727_v20 = vpop.eup %7726  ;;  %7746 = vrcp.f32 %v4199_v17  ;;  %v4203_v13 = vadd.f32 1.0, %v7725_v2  ;;  %6545 = vmatmul.mubr.msk.bf16.gmra.mrb[184].mxu1 %vm593_vm2, %v10699_v43  ;;  %v10720_v2 = vpop.f32.mrb[74].mxu0  ;;  %v10741_v48 = vld [vmem:[%s12898_s0 + $0x108] sm:$0xff]  }
 0x18f   : > { %v7729_v0 = vpop.eup %7728  ;;  %7748 = vrcp.f32 %v4619_v36  ;;  %v4623_v15 = vadd.f32 1.0, %v7727_v20  ;;  %1734 = vmatprep.mubr.bf16.mxu1 %v12906_v54 }
 0x190   : > { %v7731_v27 = vpop.eup %7730  ;;  %6274 = vst [vmem:[%s10149_s27 + $0xfa0] sm:$0xff] %v7729_v0  ;;  %7750 = vrcp.f32 %v4203_v13  ;;  %7261 = vmatmul.mubr.msk.bf16.gmra.mrb[184].mxu0 %vm593_vm2, %v9678_v8  ;;  %v9679_v13 = vld [vmem:[%s12898_s0 + $0x50] sm:$0xff]   ;;  %v6730_v0 = vmul.f32 -1.442695, %v10391_v61  ;;  %v7151_v61 = vmul.f32 -1.442695, %v10399_v18 }
 0x191   : > { %v7733_v9 = vpop.eup %7732  ;;  %5855 = vst [vmem:[%s10149_s27 + $0x288] sm:$0xff] %v7731_v27  ;;  %7752 = vrcp.f32 %v4623_v15  ;;  %7264 = vmatprep.mubr.msk.bf16.mxu0 %vm593_vm2, %v9679_v13  ;;  %v10724_v15 = vpop.f32.mrb[74].mxu1  ;;  %v9682_v13 = vld [vmem:[%s12898_s0 + $0x60] sm:$0xff]  }
 0x192   : > { %v7735_v20 = vpop.eup %7734  ;;  %6275 = vst [vmem:[%s10149_s27 + $0xfa8] sm:$0xff] %v7733_v9  ;;  %7754 = vpow2.f32 %v6721_v3  ;;  %v7150_v3 = vmul.f32 -1.442695, %v10393_v1  ;;  %v10732_v8 = vpop.f32.mrb[75].mxu1  ;;  %v6735_v1 = vmul.f32 -1.442695, %v10416_v28 }
 0x193   : > { %v7737_v17 = vpop.eup %7736  ;;  %5859 = vst [vmem:[%s10149_s27 + $0x2a8] sm:$0xff] %v7735_v20  ;;  %7756 = vpow2.f32 %v7141_v62  ;;  %v10730_v62 = vpop.f32.mrb[75].mxu0  ;;  %v7155_v28 = vmul.f32 -1.442695, %v10418_v47 }
 0x194   : > { %v7739_v36 = vpop.eup %7738  ;;  %6279 = vst [vmem:[%s10149_s27 + $0xfc8] sm:$0xff] %v7737_v17  ;;  %7758 = vpow2.f32 %v6725_v63  ;;  %v10760_v47 = vpop.f32.mrb[76].mxu0 }
 0x195   : > { %v7741_v37 = vpop.eup %7740  ;;  %5860 = vst [vmem:[%s10149_s27 + $0x2b0] sm:$0xff] %v7739_v36  ;;  %7760 = vpow2.f32 %v7145_v30  ;;  %v9681_v30 = vld [vmem:[%s12898_s0 + $0x58] sm:$0xff]   ;;  %v10762_v36 = vpop.f32.mrb[76].mxu1 }
 0x196   : > { %v7743_v27 = vpop.eup %7742  ;;  %6280 = vst [vmem:[%s10149_s27 + $0xfd0] sm:$0xff] %v7741_v37  ;;  %7762 = vpow2.f32 %v6726_v44  ;;  %6546 = vmatmul.mubr.msk.bf16.gmra.mrb[188].mxu1 %vm593_vm2, %v10741_v48  ;;  %v6736_v44 = vmul.f32 -1.442695, %v10422_v55 }
 0x197   : > { %v7745_v63 = vpop.eup %7744  ;;  %5864 = vst [vmem:[%s10149_s27 + $0x2d0] sm:$0xff] %v7743_v27  ;;  %7764 = vpow2.f32 %v7146_v51  ;;  %1744 = vmatprep.mubr.bf16.mxu1 %v12906_v54  ;;  %v10766_v27 = vpop.f32.mrb[77].mxu1 }
 0x198   : > { %v7747_v9 = vpop.eup %7746  ;;  %6284 = vst [vmem:[%s10149_s27 + $0xff0] sm:$0xff] %v7745_v63  ;;  %7766 = vpow2.f32 %v6730_v0  ;;  %7265 = vmatmul.mubr.msk.bf16.gmra.mrb[188].mxu0 %vm593_vm2, %v9681_v30  ;;  %12929 = vst [vmem:[#allocation26_spill] sm:$0xff] %v10766_v27 }
 0x199   : > { %v7749_v18 = vpop.eup %7748  ;;  %5865 = vst [vmem:[%s10149_s27 + $0x2d8] sm:$0xff] %v7747_v9  ;;  %7768 = vpow2.f32 %v7150_v3  ;;  %7268 = vmatprep.mubr.msk.bf16.mxu0 %vm593_vm2, %v9682_v13  ;;  %v10764_v3 = vpop.f32.mrb[77].mxu0 }
 0x19a   : > { %v7751_v20 = vpop.eup %7750  ;;  %6285 = vst [vmem:[%s10149_s27 + $0xff8] sm:$0xff] %v7749_v18  ;;  %7770 = vpow2.f32 %v6731_v41  ;;  %12928 = vst [vmem:[#allocation25_spill] sm:$0xff] %v10764_v3  ;;  %v10768_v55 = vpop.f32.mrb[78].mxu0 }
 0x19b   : > { %v7753_v17 = vpop.eup %7752  ;;  %5869 = vst [vmem:[%s10149_s27 + $0x2f8] sm:$0xff] %v7751_v20  ;;  %7772 = vpow2.f32 %v7151_v61  ;;  %12930 = vst [vmem:[#allocation27_spill] sm:$0xff] %v10768_v55  ;;  %v10770_v61 = vpop.f32.mrb[78].mxu1  ;;  %v9684_v20 = vld [vmem:[%s12898_s0 + $0x68] sm:$0xff]  }
 0x19c   : > { %v7755_v51 = vpop.eup %7754  ;;  %6289 = vst [vmem:[%s10149_s27 + $0x1018] sm:$0xff] %v7753_v17  ;;  %7774 = vpow2.f32 %v6735_v1  ;;  %12931 = vst [vmem:[#allocation28_spill] sm:$0xff] %v10770_v61  ;;  %v10772_v30 = vpop.f32.mrb[79].mxu0 }
 0x19d   : > { %v7757_v0 = vpop.eup %7756  ;;  %v4204_v37 = vadd.f32 1.0, %v7755_v51  ;;  %7776 = vpow2.f32 %v7155_v28  ;;  %12932 = vst [vmem:[#allocation29_spill] sm:$0xff] %v10772_v30  ;;  %v10777_v28 = vld [vmem:[%s12898_s0 + $0x110] sm:$0xff]  }
 0x19e   : > { %v7759_v41 = vpop.eup %7758  ;;  %v4624_v63 = vadd.f32 1.0, %v7757_v0  ;;  %7778 = vpow2.f32 %v6736_v44  ;;  %6547 = vmatmul.mubr.msk.bf16.gmra.mrb[192].mxu1 %vm593_vm2, %v10777_v28  ;;  %v9685_v51 = vld [vmem:[%s12898_s0 + $0x70] sm:$0xff]  }
 0x19f   : > { %v7761_v9 = vpop.eup %7760  ;;  %7780 = vrcp.f32 %v4204_v37  ;;  %v4208_v1 = vadd.f32 1.0, %v7759_v41  ;;  %1754 = vmatprep.mubr.bf16.mxu1 %v12906_v54 }
 0x1a0   : > { %v7763_v18 = vpop.eup %7762  ;;  %7782 = vrcp.f32 %v4624_v63  ;;  %v4628_v13 = vadd.f32 1.0, %v7761_v9  ;;  %7269 = vmatmul.mubr.msk.bf16.gmra.mrb[192].mxu0 %vm593_vm2, %v9684_v20 }
 0x1a1   : > { %v7765_v44 = vpop.eup %7764  ;;  %7784 = vrcp.f32 %v4208_v1  ;;  %v4209_v17 = vadd.f32 1.0, %v7763_v18  ;;  %7272 = vmatprep.mubr.msk.bf16.mxu0 %vm593_vm2, %v9685_v51 }
 0x1a2   : > { %v7767_v0 = vpop.eup %7766  ;;  %7786 = vrcp.f32 %v4628_v13  ;;  %v4629_v37 = vadd.f32 1.0, %v7765_v44  ;;  %v7156_v44 = vmul.f32 -1.442695, %v10424_v4  ;;  %v6740_v4 = vmul.f32 -1.442695, %v10430_v39 }
 0x1a3   : > { %v7769_v41 = vpop.eup %7768  ;;  %7788 = vrcp.f32 %v4209_v17  ;;  %v4213_v63 = vadd.f32 1.0, %v7767_v0  ;;  %v10794_v17 = vld [vmem:[%s12898_s0 + $0x118] sm:$0xff]   ;;  %v6741_v39 = vmul.f32 -1.442695, %v10435_v38 }
 0x1a4   : > { %v7771_v9 = vpop.eup %7770  ;;  %7790 = vrcp.f32 %v4629_v37  ;;  %v4633_v20 = vadd.f32 1.0, %v7769_v41  ;;  %v7160_v37 = vmul.f32 -1.442695, %v10432_v5 }
 0x1a5   : > { %v7773_v30 = vpop.eup %7772  ;;  %7792 = vrcp.f32 %v4213_v63  ;;  %v4214_v1 = vadd.f32 1.0, %v7771_v9  ;;  %v7161_v63 = vmul.f32 -1.442695, %v10437_v45  ;;  %v7166_v45 = vmul.f32 -1.442695, %v10453_v10 }
 0x1a6   : > { %v7775_v18 = vpop.eup %7774  ;;  %7794 = vrcp.f32 %v4633_v20  ;;  %v4634_v61 = vadd.f32 1.0, %v7773_v30  ;;  %6548 = vmatmul.mubr.msk.bf16.gmra.mrb[196].mxu1 %vm593_vm2, %v10794_v17  ;;  %v9687_v30 = vld [vmem:[%s12898_s0 + $0x78] sm:$0xff]   ;;  %v6745_v20 = vmul.f32 -1.442695, %v10444_v25  ;;  %v10827_v25 = vld [vmem:[%s12898_s0 + $0x120] sm:$0xff]  }
 0x1a7   : > { %v7777_v55 = vpop.eup %7776  ;;  %7796 = vrcp.f32 %v4214_v1  ;;  %v4218_v27 = vadd.f32 1.0, %v7775_v18  ;;  %1764 = vmatprep.mubr.bf16.mxu1 %v12906_v54  ;;  %v7165_v1 = vmul.f32 -1.442695, %v10446_v56  ;;  %v6746_v18 = vmul.f32 -1.442695, %v10448_v33  ;;  %v9690_v56 = vld [vmem:[%s12898_s0 + $0x88] sm:$0xff]  }
 0x1a8   : > { %v7779_v3 = vpop.eup %7778  ;;  %7798 = vrcp.f32 %v4634_v61  ;;  %v4638_v13 = vadd.f32 1.0, %v7777_v55  ;;  %7273 = vmatmul.mubr.msk.bf16.gmra.mrb[196].mxu0 %vm593_vm2, %v9687_v30  ;;  %v9688_v61 = vld [vmem:[%s12898_s0 + $0x80] sm:$0xff]   ;;  %v6750_v10 = vmul.f32 -1.442695, %v10455_v46 }
 0x1a9   : > { %v7781_v51 = vpop.eup %7780  ;;  %7800 = vrcp.f32 %v4218_v27  ;;  %v4219_v55 = vadd.f32 1.0, %v7779_v3  ;;  %7276 = vmatprep.mubr.msk.bf16.mxu0 %vm593_vm2, %v9688_v61  ;;  %v10812_v3 = vpop.f32.mrb[79].mxu1 }
 0x1aa   : > { %v7783_v0 = vpop.eup %7782  ;;  %5870 = vst [vmem:[%s10149_s27 + $0x300] sm:$0xff] %v7781_v51  ;;  %7802 = vrcp.f32 %v4638_v13  ;;  %v10839_v30 = vpop.f32.mrb[80].mxu1  ;;  %v9691_v51 = vld [vmem:[%s12898_s0 + $0x90] sm:$0xff]  }
 0x1ab   : > { %v7785_v27 = vpop.eup %7784  ;;  %6290 = vst [vmem:[%s10149_s27 + $0x1020] sm:$0xff] %v7783_v0  ;;  %7804 = vrcp.f32 %v4219_v55  ;;  %v10850_v61 = vpop.f32.mrb[81].mxu1 }
 0x1ac   : > { %v7787_v41 = vpop.eup %7786  ;;  %5874 = vst [vmem:[%s10149_s27 + $0x320] sm:$0xff] %v7785_v27  ;;  %7806 = vpow2.f32 %v7156_v44  ;;  %v10837_v44 = vpop.f32.mrb[80].mxu0 }
 0x1ad   : > { %v7789_v9 = vpop.eup %7788  ;;  %6294 = vst [vmem:[%s10149_s27 + $0x1040] sm:$0xff] %v7787_v41  ;;  %7808 = vpow2.f32 %v6740_v4  ;;  %v7170_v4 = vmul.f32 -1.442695, %v10457_v21  ;;  %v10848_v46 = vpop.f32.mrb[81].mxu0 }
 0x1ae   : > { %v7791_v5 = vpop.eup %7790  ;;  %5875 = vst [vmem:[%s10149_s27 + $0x328] sm:$0xff] %v7789_v9  ;;  %7810 = vpow2.f32 %v7160_v37  ;;  %6549 = vmatmul.mubr.msk.bf16.gmra.mrb[200].mxu1 %vm593_vm2, %v10827_v25  ;;  %v12933_v37 = vld [vmem:[#allocation2_spill] sm:$0xff]  ;;  %v10856_v41 = vpop.f32.mrb[82].mxu1  ;;  %v12934_v9 = vld [vmem:[#allocation3_spill] sm:$0xff] }
 0x1af   : > { %v7793_v38 = vpop.eup %7792  ;;  %6295 = vst [vmem:[%s10149_s27 + $0x1048] sm:$0xff] %v7791_v5  ;;  %7812 = vpow2.f32 %v6741_v39  ;;  %1774 = vmatprep.mubr.bf16.mxu1 %v12906_v54  ;;  %v6751_v27 = vmul.f32 -1.442695, %v12933_v37  ;;  %v10854_v39 = vpop.f32.mrb[82].mxu0  ;;  %v9694_v37 = vld [vmem:[%s12898_s0 + $0xa0] sm:$0xff]  }
 0x1b0   : > { %v7795_v13 = vpop.eup %7794  ;;  %5879 = vst [vmem:[%s10149_s27 + $0x348] sm:$0xff] %v7793_v38  ;;  %7814 = vpow2.f32 %v7161_v63  ;;  %7277 = vmatmul.mubr.msk.bf16.gmra.mrb[200].mxu0 %vm593_vm2, %v9690_v56  ;;  %v10861_v5 = vpop.f32.mrb[83].mxu0 }
 0x1b1   : > { %v7797_v33 = vpop.eup %7796  ;;  %6299 = vst [vmem:[%s10149_s27 + $0x1068] sm:$0xff] %v7795_v13  ;;  %7816 = vpow2.f32 %v6745_v20  ;;  %7280 = vmatprep.mubr.msk.bf16.mxu0 %vm593_vm2, %v9691_v51  ;;  %v7171_v20 = vmul.f32 -1.442695, %v12934_v9 }
 0x1b2   : > { %v7799_v55 = vpop.eup %7798  ;;  %5880 = vst [vmem:[%s10149_s27 + $0x350] sm:$0xff] %v7797_v33  ;;  %7818 = vpow2.f32 %v7165_v1  ;;  %v10863_v1 = vpop.f32.mrb[83].mxu1 }
 0x1b3   : > { %v7801_v0 = vpop.eup %7800  ;;  %6300 = vst [vmem:[%s10149_s27 + $0x1070] sm:$0xff] %v7799_v55  ;;  %7820 = vpow2.f32 %v6746_v18 }
 0x1b4   : > { %v7803_v63 = vpop.eup %7802  ;;  %5884 = vst [vmem:[%s10149_s27 + $0x370] sm:$0xff] %v7801_v0  ;;  %7822 = vpow2.f32 %v7166_v45  ;;  %v10869_v45 = vld [vmem:[%s12898_s0 + $0x128] sm:$0xff]   ;;  %v10879_v0 = vpop.f32.mrb[84].mxu1 }
 0x1b5   : > { %v7805_v21 = vpop.eup %7804  ;;  %6304 = vst [vmem:[%s10149_s27 + $0x1090] sm:$0xff] %v7803_v63  ;;  %7824 = vpow2.f32 %v6750_v10  ;;  %v9693_v10 = vld [vmem:[%s12898_s0 + $0x98] sm:$0xff]   ;;  %12936 = vst [vmem:[#allocation3_spill] sm:$0xff] %v10879_v0 }
 0x1b6   : > { %v7807_v38 = vpop.eup %7806  ;;  %5885 = vst [vmem:[%s10149_s27 + $0x378] sm:$0xff] %v7805_v21  ;;  %7826 = vpow2.f32 %v7170_v4  ;;  %6550 = vmatmul.mubr.msk.bf16.gmra.mrb[204].mxu1 %vm593_vm2, %v10869_v45  ;;  %v10877_v4 = vpop.f32.mrb[84].mxu0 }
 0x1b7   : > { %v7809_v18 = vpop.eup %7808  ;;  %v4639_v13 = vadd.f32 1.0, %v7807_v38  ;;  %7828 = vpow2.f32 %v6751_v27  ;;  %12935 = vst [vmem:[#allocation2_spill] sm:$0xff] %v10877_v4  ;;  %1784 = vmatprep.mubr.bf16.mxu1 %v12906_v54  ;;  %v10886_v9 = vpop.f32.mrb[85].mxu0 }
 0x1b8   : > { %v7811_v56 = vpop.eup %7810  ;;  %v4223_v33 = vadd.f32 1.0, %v7809_v18  ;;  %7830 = vpow2.f32 %v7171_v20  ;;  %7281 = vmatmul.mubr.msk.bf16.gmra.mrb[204].mxu0 %vm593_vm2, %v9693_v10  ;;  %12937 = vst [vmem:[#allocation30_spill] sm:$0xff] %v10886_v9  ;;  %v10888_v20 = vpop.f32.mrb[85].mxu1 }
 0x1b9   : > { %v7813_v51 = vpop.eup %7812  ;;  %7832 = vrcp.f32 %v4639_v13  ;;  %v4643_v55 = vadd.f32 1.0, %v7811_v56  ;;  %7284 = vmatprep.mubr.msk.bf16.mxu0 %vm593_vm2, %v9694_v37  ;;  %12938 = vst [vmem:[#allocation31_spill] sm:$0xff] %v10888_v20 }
 0x1ba   : > { %v7815_v27 = vpop.eup %7814  ;;  %7834 = vrcp.f32 %v4223_v33  ;;  %v4224_v63 = vadd.f32 1.0, %v7813_v51 }
 0x1bb   : > { %v7817_v21 = vpop.eup %7816  ;;  %7836 = vrcp.f32 %v4643_v55  ;;  %v4644_v38 = vadd.f32 1.0, %v7815_v27  ;;  %v10893_v55 = vld [vmem:[%s12898_s0 + $0x130] sm:$0xff]   ;;  %v9696_v27 = vld [vmem:[%s12898_s0 + $0xa8] sm:$0xff]  }
 0x1bc   : > { %v7819_v18 = vpop.eup %7818  ;;  %7838 = vrcp.f32 %v4224_v63  ;;  %v4228_v13 = vadd.f32 1.0, %v7817_v21 }
 0x1bd   : > { %v7821_v56 = vpop.eup %7820  ;;  %7840 = vrcp.f32 %v4644_v38  ;;  %v4648_v10 = vadd.f32 1.0, %v7819_v18  ;;  %v6755_v18 = vmul.f32 -1.442695, %v10470_v58 }
 0x1be   : > { %v7823_v0 = vpop.eup %7822  ;;  %7842 = vrcp.f32 %v4228_v13  ;;  %v4229_v4 = vadd.f32 1.0, %v7821_v56  ;;  %6551 = vmatmul.mubr.msk.bf16.gmra.mrb[208].mxu1 %vm593_vm2, %v10893_v55 }
 0x1bf   : > { %v7825_v37 = vpop.eup %7824  ;;  %7844 = vrcp.f32 %v4648_v10  ;;  %v4649_v33 = vadd.f32 1.0, %v7823_v0  ;;  %1794 = vmatprep.mubr.bf16.mxu1 %v12906_v54  ;;  %v12939_v10 = vld [vmem:[#allocation4_spill] sm:$0xff] }
 0x1c0   : > { %v7827_v51 = vpop.eup %7826  ;;  %7846 = vrcp.f32 %v4229_v4  ;;  %v4233_v9 = vadd.f32 1.0, %v7825_v37  ;;  %7285 = vmatmul.mubr.msk.bf16.gmra.mrb[208].mxu0 %vm593_vm2, %v9696_v27  ;;  %v9697_v4 = vld [vmem:[%s12898_s0 + $0xb0] sm:$0xff]   ;;  %v7175_v37 = vmul.f32 -1.442695, %v12939_v10 }
 0x1c1   : > { %v7829_v63 = vpop.eup %7828  ;;  %7848 = vrcp.f32 %v4649_v33  ;;  %v4653_v0 = vadd.f32 1.0, %v7827_v51  ;;  %7288 = vmatprep.mubr.msk.bf16.mxu0 %vm593_vm2, %v9697_v4  ;;  %v12940_v51 = vld [vmem:[#allocation5_spill] sm:$0xff]  ;;  %v10912_v4 = vpop.f32.mrb[86].mxu0 }
 0x1c2   : > { %v7831_v21 = vpop.eup %7830  ;;  %7850 = vrcp.f32 %v4233_v9  ;;  %v4234_v38 = vadd.f32 1.0, %v7829_v63  ;;  %v6756_v27 = vmul.f32 -1.442695, %v12940_v51  ;;  %v12941_v9 = vld [vmem:[#allocation6_spill] sm:$0xff] }
 0x1c3   : > { %v7833_v13 = vpop.eup %7832  ;;  %7852 = vrcp.f32 %v4653_v0  ;;  %v4654_v56 = vadd.f32 1.0, %v7831_v21  ;;  %v7176_v63 = vmul.f32 -1.442695, %v12941_v9  ;;  %v6760_v0 = vmul.f32 -1.442695, %v10485_v50  ;;  %v10916_v21 = vpop.f32.mrb[86].mxu1 }
 0x1c4   : > { %v7835_v33 = vpop.eup %7834  ;;  %6305 = vst [vmem:[%s10149_s27 + $0x1098] sm:$0xff] %v7833_v13  ;;  %7854 = vrcp.f32 %v4234_v38  ;;  %v6761_v38 = vmul.f32 -1.442695, %v10489_v49  ;;  %v10929_v50 = vld [vmem:[%s12898_s0 + $0x138] sm:$0xff]  }
 0x1c5   : > { %v7837_v20 = vpop.eup %7836  ;;  %5889 = vst [vmem:[%s10149_s27 + $0x398] sm:$0xff] %v7835_v33  ;;  %7856 = vrcp.f32 %v4654_v56  ;;  %v6765_v56 = vmul.f32 -1.442695, %v10508_v23  ;;  %v10922_v33 = vpop.f32.mrb[87].mxu0  ;;  %v9699_v49 = vld [vmem:[%s12898_s0 + $0xb8] sm:$0xff]  }
 0x1c6   : > { %v7839_v58 = vpop.eup %7838  ;;  %6309 = vst [vmem:[%s10149_s27 + $0x10b8] sm:$0xff] %v7837_v20  ;;  %7858 = vpow2.f32 %v6755_v18  ;;  %v10924_v20 = vpop.f32.mrb[87].mxu1  ;;  %6552 = vmatmul.mubr.msk.bf16.gmra.mrb[212].mxu1 %vm593_vm2, %v10929_v50  ;;  %v6627_v18 = vmul.f32 -1.442695, %v10510_v59  ;;  %v6628_v59 = vmul.f32 -1.442695, %v10516_v52 }
 0x1c7   : > { %v7841_v13 = vpop.eup %7840  ;;  %5890 = vst [vmem:[%s10149_s27 + $0x3a0] sm:$0xff] %v7839_v58  ;;  %7860 = vpow2.f32 %v7175_v37  ;;  %1804 = vmatprep.mubr.bf16.mxu1 %v12906_v54  ;;  %v9700_v37 = vld [vmem:[%s12898_s0 + $0xc0] sm:$0xff]   ;;  %v6770_v58 = vmul.f32 -1.442695, %v10523_v6  ;;  %v10956_v52 = vpop.f32.mrb[88].mxu1 }
 0x1c8   : > { %v7843_v10 = vpop.eup %7842  ;;  %6310 = vst [vmem:[%s10149_s27 + $0x10c0] sm:$0xff] %v7841_v13  ;;  %7862 = vpow2.f32 %v6756_v27  ;;  %7289 = vmatmul.mubr.msk.bf16.gmra.mrb[212].mxu0 %vm593_vm2, %v9699_v49  ;;  %v6766_v27 = vmul.f32 -1.442695, %v10514_v57  ;;  %v6771_v57 = vmul.f32 -1.442695, %v10529_v7  ;;  %v10961_v6 = vpop.f32.mrb[89].mxu1 }
 0x1c9   : > { %v7845_v23 = vpop.eup %7844  ;;  %5894 = vst [vmem:[%s10149_s27 + $0x3c0] sm:$0xff] %v7843_v10  ;;  %7864 = vpow2.f32 %v7176_v63  ;;  %7292 = vmatprep.mubr.msk.bf16.mxu0 %vm593_vm2, %v9700_v37  ;;  %v6632_v10 = vmul.f32 -1.442695, %v10525_v35  ;;  %12943 = vst [vmem:[#allocation5_spill] sm:$0xff] %v10961_v6  ;;  %v10971_v7 = vld [vmem:[%s12898_s0 + $0x140] sm:$0xff]   ;;  %v9702_v37 = vld [vmem:[%s12898_s0 + $0xc8] sm:$0xff]  }
 0x1ca   : > { %v7847_v51 = vpop.eup %7846  ;;  %6314 = vst [vmem:[%s10149_s27 + $0x10e0] sm:$0xff] %v7845_v23  ;;  %7866 = vpow2.f32 %v6760_v0 }
 0x1cb   : > { %v7849_v9 = vpop.eup %7848  ;;  %5895 = vst [vmem:[%s10149_s27 + $0x3c8] sm:$0xff] %v7847_v51  ;;  %7868 = vpow2.f32 %v6761_v38  ;;  %v10954_v38 = vpop.f32.mrb[88].mxu0 }
 0x1cc   : > { %v7851_v63 = vpop.eup %7850  ;;  %6315 = vst [vmem:[%s10149_s27 + $0x10e8] sm:$0xff] %v7849_v9  ;;  %7870 = vpow2.f32 %v6765_v56  ;;  %v10959_v56 = vpop.f32.mrb[89].mxu0 }
 0x1cd   : > { %v7853_v13 = vpop.eup %7852  ;;  %5899 = vst [vmem:[%s10149_s27 + $0x3e8] sm:$0xff] %v7851_v63  ;;  %7872 = vpow2.f32 %v6627_v18  ;;  %12942 = vst [vmem:[#allocation4_spill] sm:$0xff] %v10959_v56  ;;  %v10964_v35 = vpop.f32.mrb[90].mxu0 }
 0x1ce   : > { %v7855_v0 = vpop.eup %7854  ;;  %6319 = vst [vmem:[%s10149_s27 + $0x1108] sm:$0xff] %v7853_v13  ;;  %7874 = vpow2.f32 %v6766_v27  ;;  %12944 = vst [vmem:[#allocation6_spill] sm:$0xff] %v10964_v35  ;;  %v10966_v18 = vpop.f32.mrb[90].mxu1  ;;  %6553 = vmatmul.mubr.msk.bf16.gmra.mrb[216].mxu1 %vm593_vm2, %v10971_v7 }
 0x1cf   : > { %v7857_v49 = vpop.eup %7856  ;;  %5900 = vst [vmem:[%s10149_s27 + $0x3f0] sm:$0xff] %v7855_v0  ;;  %7876 = vpow2.f32 %v6628_v59  ;;  %12945 = vst [vmem:[#allocation32_spill] sm:$0xff] %v10966_v18  ;;  %v10979_v9 = vpop.f32.mrb[91].mxu0  ;;  %1814 = vmatprep.mubr.bf16.mxu1 %v12906_v54  ;;  %v9703_v59 = vld [vmem:[%s12898_s0 + $0xd0] sm:$0xff]  }
 0x1d0   : > { %v7859_v23 = vpop.eup %7858  ;;  %6320 = vst [vmem:[%s10149_s27 + $0x1110] sm:$0xff] %v7857_v49  ;;  %7878 = vpow2.f32 %v6770_v58  ;;  %7293 = vmatmul.mubr.msk.bf16.gmra.mrb[216].mxu0 %vm593_vm2, %v9702_v37  ;;  %12946 = vst [vmem:[#allocation33_spill] sm:$0xff] %v10979_v9  ;;  %v10986_v13 = vpop.f32.mrb[91].mxu1 }
 0x1d1   : > { %v7861_v51 = vpop.eup %7860  ;;  %v4238_v27 = vadd.f32 1.0, %v7859_v23  ;;  %7880 = vpow2.f32 %v6632_v10  ;;  %7296 = vmatprep.mubr.msk.bf16.mxu0 %vm593_vm2, %v9703_v59  ;;  %12947 = vst [vmem:[#allocation34_spill] sm:$0xff] %v10986_v13  ;;  %v10988_v6 = vpop.f32.mrb[92].mxu0 }
 0x1d2   : > { %v7863_v63 = vpop.eup %7862  ;;  %v4658_v58 = vadd.f32 1.0, %v7861_v51  ;;  %7882 = vpow2.f32 %v6771_v57  ;;  %12948 = vst [vmem:[#allocation35_spill] sm:$0xff] %v10988_v6 }
 0x1d3   : > { %v7865_v0 = vpop.eup %7864  ;;  %7884 = vrcp.f32 %v4238_v27  ;;  %v4239_v49 = vadd.f32 1.0, %v7863_v63  ;;  %v10993_v27 = vld [vmem:[%s12898_s0 + $0x148] sm:$0xff]   ;;  %v12949_v63 = vld [vmem:[#allocation8_spill] sm:$0xff] }
 0x1d4   : > { %v7867_v23 = vpop.eup %7866  ;;  %7886 = vrcp.f32 %v4658_v58  ;;  %v4659_v10 = vadd.f32 1.0, %v7865_v0 }
 0x1d5   : > { %v7869_v37 = vpop.eup %7868  ;;  %7888 = vrcp.f32 %v4239_v49  ;;  %v4243_v9 = vadd.f32 1.0, %v7867_v23 }
 0x1d6   : > { %v7871_v18 = vpop.eup %7870  ;;  %7890 = vrcp.f32 %v4659_v10  ;;  %v4244_v35 = vadd.f32 1.0, %v7869_v37  ;;  %6554 = vmatmul.mubr.msk.bf16.gmra.mrb[220].mxu1 %vm593_vm2, %v10993_v27  ;;  %v12950_v37 = vld [vmem:[#allocation7_spill] sm:$0xff] }
 0x1d7   : > { %v7873_v59 = vpop.eup %7872  ;;  %7892 = vrcp.f32 %v4243_v9  ;;  %v4248_v51 = vadd.f32 1.0, %v7871_v18  ;;  %1824 = vmatprep.mubr.bf16.mxu1 %v12906_v54 }
 0x1d8   : > { %v7875_v57 = vpop.eup %7874  ;;  %7894 = vrcp.f32 %v4244_v35  ;;  %v4110_v13 = vadd.f32 1.0, %v7873_v59  ;;  %7297 = vmatmul.mubr.msk.bf16.gmra.mrb[220].mxu0 %vm593_vm2, %v12949_v63  ;;  %v6633_v59 = vmul.f32 -1.442695, %v12950_v37  ;;  %v12951_v63 = vld [vmem:[#allocation9_spill] sm:$0xff] }
 0x1d9   : > { %v7877_v58 = vpop.eup %7876  ;;  %7896 = vrcp.f32 %v4248_v51  ;;  %v4249_v0 = vadd.f32 1.0, %v7875_v57  ;;  %7300 = vmatprep.mubr.msk.bf16.mxu0 %vm593_vm2, %v10567_v31  ;;  %v6775_v6 = vmul.f32 -1.442695, %v12951_v63 }
 0x1da   : > { %v7879_v35 = vpop.eup %7878  ;;  %7898 = vrcp.f32 %v4110_v13  ;;  %v4111_v18 = vadd.f32 1.0, %v7877_v58  ;;  %v12952_v13 = vld [vmem:[#allocation10_spill] sm:$0xff] }
 0x1db   : > { %v7881_v9 = vpop.eup %7880  ;;  %7900 = vrcp.f32 %v4249_v0  ;;  %v4253_v49 = vadd.f32 1.0, %v7879_v35  ;;  %v6637_v58 = vmul.f32 -1.442695, %v12952_v13  ;;  %v6776_v0 = vmul.f32 -1.442695, %v10552_v11  ;;  %v11008_v35 = vpop.f32.mrb[92].mxu1 }
 0x1dc   : > { %v7883_v23 = vpop.eup %7882  ;;  %7902 = vrcp.f32 %v4111_v18  ;;  %v4115_v10 = vadd.f32 1.0, %v7881_v9  ;;  %v12953_v9 = vld [vmem:[#allocation11_spill] sm:$0xff] }
 0x1dd   : > { %v7885_v51 = vpop.eup %7884  ;;  %7904 = vrcp.f32 %v4253_v49  ;;  %v4254_v57 = vadd.f32 1.0, %v7883_v23  ;;  %v6638_v49 = vmul.f32 -1.442695, %v12953_v9  ;;  %v11012_v23 = vpop.f32.mrb[93].mxu0 }
 0x1de   : > { %v7887_v31 = vpop.eup %7886  ;;  %5904 = vst [vmem:[%s10149_s27 + $0x410] sm:$0xff] %v7885_v51  ;;  %7906 = vrcp.f32 %v4115_v10  ;;  %v11017_v10 = vld [vmem:[%s12898_s0 + $0x150] sm:$0xff]  }
 0x1df   : > { %v7889_v56 = vpop.eup %7888  ;;  %6324 = vst [vmem:[%s10149_s27 + $0x1130] sm:$0xff] %v7887_v31  ;;  %7908 = vrcp.f32 %v4254_v57  ;;  %6555 = vmatmul.mubr.msk.bf16.gmra.mrb[224].mxu1 %vm593_vm2, %v11017_v10  ;;  %v12955_v57 = vld [vmem:[#allocation13_spill] sm:$0xff] }
 0x1e0   : > { %v7891_v18 = vpop.eup %7890  ;;  %5905 = vst [vmem:[%s10149_s27 + $0x418] sm:$0xff] %v7889_v56  ;;  %7910 = vpow2.f32 %v6633_v59  ;;  %7301 = vmatmul.mubr.msk.bf16.gmra.mrb[224].mxu0 %vm593_vm2, %v10603_v29  ;;  %v12954_v56 = vld [vmem:[#allocation12_spill] sm:$0xff]  ;;  %v11025_v59 = vpop.f32.mrb[93].mxu1  ;;  %1834 = vmatprep.mubr.bf16.mxu1 %v12906_v54  ;;  %v6642_v63 = vmul.f32 -1.442695, %v12955_v57 }
 0x1e1   : > { %v7893_v11 = vpop.eup %7892  ;;  %6325 = vst [vmem:[%s10149_s27 + $0x1138] sm:$0xff] %v7891_v18  ;;  %7912 = vpow2.f32 %v6775_v6  ;;  %v6780_v37 = vmul.f32 -1.442695, %v12954_v56  ;;  %7304 = vmatprep.mubr.msk.bf16.mxu0 %vm593_vm2, %v10647_v42  ;;  %v11032_v29 = vpop.f32.mrb[94].mxu0  ;;  %v12957_v6 = vld [vmem:[#allocation14_spill] sm:$0xff]  ;;  %v12958_v42 = vld [vmem:[#allocation15_spill] sm:$0xff] }
 0x1e2   : > { %v7895_v51 = vpop.eup %7894  ;;  %5909 = vst [vmem:[%s10149_s27 + $0x438] sm:$0xff] %v7893_v11  ;;  %7914 = vpow2.f32 %v6637_v58  ;;  %12956 = vst [vmem:[#allocation8_spill] sm:$0xff] %v11032_v29  ;;  %v6781_v13 = vmul.f32 -1.442695, %v12957_v6  ;;  %v11036_v18 = vpop.f32.mrb[94].mxu1  ;;  %v12959_v11 = vld [vmem:[#allocation16_spill] sm:$0xff] }
 0x1e3   : > { %v7897_v31 = vpop.eup %7896  ;;  %5910 = vst [vmem:[%s10149_s27 + $0x440] sm:$0xff] %v7895_v51  ;;  %7916 = vpow2.f32 %v6776_v0  ;;  %v6643_v56 = vmul.f32 -1.442695, %v12958_v42  ;;  %v6785_v57 = vmul.f32 -1.442695, %v12959_v11  ;;  %v11042_v29 = vpop.f32.mrb[95].mxu0 }
 0x1e4   : > { %v7899_v9 = vpop.eup %7898  ;;  %5914 = vst [vmem:[%s10149_s27 + $0x460] sm:$0xff] %v7897_v31  ;;  %7918 = vpow2.f32 %v6638_v49  ;;  %v11044_v51 = vpop.f32.mrb[95].mxu1  ;;  %v6647_v6 = vmul.f32 -1.442695, %v10582_v14  ;;  %v12960_v49 = vld [vmem:[#allocation17_spill] sm:$0xff] }
 0x1e5   : > { %v7901_v58 = vpop.eup %7900  ;;  %5775 = vst [vmem:[%s10149_s27 + $0x10] sm:$0xff] %v7899_v9  ;;  %7920 = vpow2.f32 %v6780_v37  ;;  %v6786_v42 = vmul.f32 -1.442695, %v12960_v49  ;;  %v6648_v37 = vmul.f32 -1.442695, %v10588_v22  ;;  %v11055_v11 = vld [vmem:[%s12898_s0 + $0x158] sm:$0xff]  }
 0x1e6   : > { %v7903_v0 = vpop.eup %7902  ;;  %5915 = vst [vmem:[%s10149_s27 + $0x468] sm:$0xff] %v7901_v58  ;;  %7922 = vpow2.f32 %v6642_v63  ;;  %v11068_v58 = vpop.f32.mrb[96].mxu1 }
 0x1e7   : > { %v7905_v31 = vpop.eup %7904  ;;  %5776 = vst [vmem:[%s10149_s27 + $0x18] sm:$0xff] %v7903_v0  ;;  %7924 = vpow2.f32 %v6781_v13  ;;  %6556 = vmatmul.mubr.msk.bf16.gmra.mrb[228].mxu1 %vm593_vm2, %v11055_v11  ;;  %12962 = vst [vmem:[#allocation9_spill] sm:$0xff] %v11068_v58 }
 0x1e8   : > { %v7907_v9 = vpop.eup %7906  ;;  %5919 = vst [vmem:[%s10149_s27 + $0x488] sm:$0xff] %v7905_v31  ;;  %7926 = vpow2.f32 %v6643_v56  ;;  %7305 = vmatmul.mubr.msk.bf16.gmra.mrb[228].mxu0 %vm593_vm2, %v10677_v40  ;;  %1844 = vmatprep.mubr.bf16.mxu1 %v12906_v54  ;;  %v11066_v56 = vpop.f32.mrb[96].mxu0 }
 0x1e9   : > { %v7909_v14 = vpop.eup %7908  ;;  %5781 = vst [vmem:[%s10149_s27 + $0x38] sm:$0xff] %v7907_v9  ;;  %7928 = vpow2.f32 %v6785_v57  ;;  %7308 = vmatprep.mubr.msk.bf16.mxu0 %vm593_vm2, %v10699_v43  ;;  %12961 = vst [vmem:[#allocation7_spill] sm:$0xff] %v11066_v56  ;;  %v11070_v31 = vpop.f32.mrb[97].mxu0 }
 0x1ea   : > { %v7911_v22 = vpop.eup %7910  ;;  %5920 = vst [vmem:[%s10149_s27 + $0x490] sm:$0xff] %v7909_v14  ;;  %7930 = vpow2.f32 %v6647_v6  ;;  %v11072_v57 = vpop.f32.mrb[97].mxu1 }
 0x1eb   : > { %v7913_v63 = vpop.eup %7912  ;;  %v4116_v13 = vadd.f32 1.0, %v7911_v22  ;;  %7932 = vpow2.f32 %v6786_v42  ;;  %v11074_v9 = vpop.f32.mrb[98].mxu0 }
 0x1ec   : > { %v7915_v0 = vpop.eup %7914  ;;  %v4258_v40 = vadd.f32 1.0, %v7913_v63  ;;  %7934 = vpow2.f32 %v6648_v37  ;;  %12963 = vst [vmem:[#allocation10_spill] sm:$0xff] %v11074_v9  ;;  %v11076_v6 = vpop.f32.mrb[98].mxu1  ;;  %v11081_v63 = vld [vmem:[%s12898_s0 + $0x160] sm:$0xff]   ;;  %v6790_v9 = vmul.f32 -1.442695, %v10590_v60 }
 0x1ed   : > { %v7917_v49 = vpop.eup %7916  ;;  %7936 = vrcp.f32 %v4116_v13  ;;  %v4120_v43 = vadd.f32 1.0, %v7915_v0  ;;  %12964 = vst [vmem:[#allocation11_spill] sm:$0xff] %v11076_v6 }
 0x1ee   : > { %v7919_v14 = vpop.eup %7918  ;;  %7938 = vrcp.f32 %v4258_v40  ;;  %v4259_v42 = vadd.f32 1.0, %v7917_v49 }
 0x1ef   : > { %v7921_v22 = vpop.eup %7920  ;;  %7940 = vrcp.f32 %v4120_v43  ;;  %v4121_v58 = vadd.f32 1.0, %v7919_v14  ;;  %6557 = vmatmul.mubr.msk.bf16.gmra.mrb[232].mxu1 %vm593_vm2, %v11081_v63 }
 0x1f0   : > { %v7923_v56 = vpop.eup %7922  ;;  %7942 = vrcp.f32 %v4259_v42  ;;  %v4263_v37 = vadd.f32 1.0, %v7921_v22  ;;  %7309 = vmatmul.mubr.msk.bf16.gmra.mrb[232].mxu0 %vm593_vm2, %v10741_v48  ;;  %1854 = vmatprep.mubr.bf16.mxu1 %v12906_v54 }
 0x1f1   : > { %v7925_v13 = vpop.eup %7924  ;;  %7944 = vrcp.f32 %v4121_v58  ;;  %v4125_v0 = vadd.f32 1.0, %v7923_v56  ;;  %7312 = vmatprep.mubr.msk.bf16.mxu0 %vm593_vm2, %v10777_v28 }
 0x1f2   : > { %v7927_v40 = vpop.eup %7926  ;;  %7946 = vrcp.f32 %v4263_v37  ;;  %v4264_v49 = vadd.f32 1.0, %v7925_v13  ;;  %v6652_v13 = vmul.f32 -1.442695, %v10596_v32  ;;  %v6653_v32 = vmul.f32 -1.442695, %v10615_v16 }
 0x1f3   : > { %v7929_v43 = vpop.eup %7928  ;;  %7948 = vrcp.f32 %v4125_v0  ;;  %v4126_v14 = vadd.f32 1.0, %v7927_v40  ;;  %v6791_v40 = vmul.f32 -1.442695, %v10613_v24  ;;  %v6657_v16 = vmul.f32 -1.442695, %v10636_v34  ;;  %v12967_v34 = vld [vmem:[#allocation20_spill] sm:$0xff] }
 0x1f4   : > { %v7931_v42 = vpop.eup %7930  ;;  %7950 = vrcp.f32 %v4264_v49  ;;  %v4268_v22 = vadd.f32 1.0, %v7929_v43  ;;  %v11097_v49 = vld [vmem:[%s12898_s0 + $0x168] sm:$0xff]   ;;  %v11110_v43 = vpop.f32.mrb[99].mxu0 }
 0x1f5   : > { %v7933_v6 = vpop.eup %7932  ;;  %7952 = vrcp.f32 %v4126_v14  ;;  %v4130_v48 = vadd.f32 1.0, %v7931_v42 }
 0x1f6   : > { %v7935_v58 = vpop.eup %7934  ;;  %7954 = vrcp.f32 %v4268_v22  ;;  %v4269_v56 = vadd.f32 1.0, %v7933_v6  ;;  %v6795_v6 = vmul.f32 -1.442695, %v10634_v53  ;;  %v12965_v53 = vld [vmem:[#allocation18_spill] sm:$0xff] }
 0x1f7   : > { %v7937_v28 = vpop.eup %7936  ;;  %7956 = vrcp.f32 %v4130_v48  ;;  %v4131_v37 = vadd.f32 1.0, %v7935_v58  ;;  %6558 = vmatmul.mubr.msk.bf16.gmra.mrb[236].mxu1 %vm593_vm2, %v11097_v49  ;;  %v6658_v22 = vmul.f32 -1.442695, %v12965_v53  ;;  %v12966_v58 = vld [vmem:[#allocation19_spill] sm:$0xff] }
 0x1f8   : > { %v7939_v0 = vpop.eup %7938  ;;  %5782 = vst [vmem:[%s10149_s27 + $0x40] sm:$0xff] %v7937_v28  ;;  %7958 = vrcp.f32 %v4269_v56  ;;  %7313 = vmatmul.mubr.msk.bf16.gmra.mrb[236].mxu0 %vm593_vm2, %v10794_v17  ;;  %1864 = vmatprep.mubr.bf16.mxu1 %v12906_v54  ;;  %v11112_v17 = vpop.f32.mrb[99].mxu1  ;;  %v6800_v56 = vmul.f32 -1.442695, %v12966_v58 }
 0x1f9   : > { %v7941_v60 = vpop.eup %7940  ;;  %5924 = vst [vmem:[%s10149_s27 + $0x4b0] sm:$0xff] %v7939_v0  ;;  %7960 = vrcp.f32 %v4131_v37  ;;  %7316 = vmatprep.mubr.msk.bf16.mxu0 %vm593_vm2, %v10827_v25  ;;  %v6796_v25 = vmul.f32 -1.442695, %v10640_v12  ;;  %v6662_v37 = vmul.f32 -1.442695, %v12967_v34  ;;  %v12968_v12 = vld [vmem:[#allocation21_spill] sm:$0xff] }
 0x1fa   : > { %v7943_v24 = vpop.eup %7942  ;;  %5786 = vst [vmem:[%s10149_s27 + $0x60] sm:$0xff] %v7941_v60  ;;  %7962 = vpow2.f32 %v6790_v9  ;;  %v6801_v0 = vmul.f32 -1.442695, %v12968_v12  ;;  %v11128_v60 = vpop.f32.mrb[100].mxu1 }
 0x1fb   : > { %v7945_v14 = vpop.eup %7944  ;;  %5925 = vst [vmem:[%s10149_s27 + $0x4b8] sm:$0xff] %v7943_v24  ;;  %7964 = vpow2.f32 %v6652_v13 }
 0x1fc   : > { %v7947_v42 = vpop.eup %7946  ;;  %5787 = vst [vmem:[%s10149_s27 + $0x68] sm:$0xff] %v7945_v14  ;;  %7966 = vpow2.f32 %v6791_v40  ;;  %v11126_v40 = vpop.f32.mrb[100].mxu0 }
 0x1fd   : > { %v7949_v9 = vpop.eup %7948  ;;  %5929 = vst [vmem:[%s10149_s27 + $0x4d8] sm:$0xff] %v7947_v42  ;;  %7968 = vpow2.f32 %v6653_v32  ;;  %v11133_v32 = vld [vmem:[%s12898_s0 + $0x170] sm:$0xff]   ;;  %v11143_v42 = vpop.f32.mrb[101].mxu1 }
 0x1fe   : > { %v7951_v48 = vpop.eup %7950  ;;  %5791 = vst [vmem:[%s10149_s27 + $0x88] sm:$0xff] %v7949_v9  ;;  %7970 = vpow2.f32 %v6795_v6  ;;  %v12969_v6 = vld [vmem:[#allocation22_spill] sm:$0xff] }
 0x1ff   : > { %v7953_v28 = vpop.eup %7952  ;;  %5930 = vst [vmem:[%s10149_s27 + $0x4e0] sm:$0xff] %v7951_v48  ;;  %7972 = vpow2.f32 %v6657_v16  ;;  %6559 = vmatmul.mubr.msk.bf16.gmra.mrb[240].mxu1 %vm593_vm2, %v11133_v32  ;;  %v6663_v14 = vmul.f32 -1.442695, %v12969_v6  ;;  %v11141_v16 = vpop.f32.mrb[101].mxu0 }
 0x200   : > { %v7955_v13 = vpop.eup %7954  ;;  %5792 = vst [vmem:[%s10149_s27 + $0x90] sm:$0xff] %v7953_v28  ;;  %7974 = vpow2.f32 %v6796_v25  ;;  %7317 = vmatmul.mubr.msk.bf16.gmra.mrb[240].mxu0 %vm593_vm2, %v10869_v45  ;;  %1874 = vmatprep.mubr.bf16.mxu1 %v12906_v54  ;;  %v12970_v45 = vld [vmem:[#allocation23_spill] sm:$0xff]  ;;  %v11150_v53 = vpop.f32.mrb[102].mxu0 }
 0x201   : > { %v7957_v24 = vpop.eup %7956  ;;  %5934 = vst [vmem:[%s10149_s27 + $0x500] sm:$0xff] %v7955_v13  ;;  %7976 = vpow2.f32 %v6658_v22  ;;  %7320 = vmatprep.mubr.msk.bf16.mxu0 %vm593_vm2, %v10893_v55  ;;  %v6805_v9 = vmul.f32 -1.442695, %v12970_v45  ;;  %v11152_v22 = vpop.f32.mrb[102].mxu1 }
 0x202   : > { %v7959_v25 = vpop.eup %7958  ;;  %5796 = vst [vmem:[%s10149_s27 + $0xb0] sm:$0xff] %v7957_v24  ;;  %7978 = vpow2.f32 %v6800_v56  ;;  %v11156_v28 = vpop.f32.mrb[103].mxu0 }
 0x203   : > { %v7961_v48 = vpop.eup %7960  ;;  %5935 = vst [vmem:[%s10149_s27 + $0x508] sm:$0xff] %v7959_v25  ;;  %7980 = vpow2.f32 %v6662_v37  ;;  %v11158_v34 = vpop.f32.mrb[103].mxu1 }
 0x204   : > { %v7963_v58 = vpop.eup %7962  ;;  %5797 = vst [vmem:[%s10149_s27 + $0xb8] sm:$0xff] %v7961_v48  ;;  %7982 = vpow2.f32 %v6801_v0  ;;  %12971 = vst [vmem:[#allocation12_spill] sm:$0xff] %v11158_v34  ;;  %v11160_v37 = vpop.f32.mrb[104].mxu0  ;;  %v11167_v0 = vld [vmem:[%s12898_s0 + $0x178] sm:$0xff]  }
 0x205   : > { %v7965_v55 = vpop.eup %7964  ;;  %v4273_v13 = vadd.f32 1.0, %v7963_v58  ;;  %7984 = vpow2.f32 %v6663_v14  ;;  %12972 = vst [vmem:[#allocation13_spill] sm:$0xff] %v11160_v37  ;;  %v11162_v48 = vpop.f32.mrb[104].mxu1 }
 0x206   : > { %v7967_v56 = vpop.eup %7966  ;;  %v4135_v12 = vadd.f32 1.0, %v7965_v55  ;;  %7986 = vpow2.f32 %v6805_v9  ;;  %12973 = vst [vmem:[#allocation14_spill] sm:$0xff] %v11162_v48  ;;  %v11173_v58 = vpop.f32.mrb[105].mxu0 }
 0x207   : > { %v7969_v24 = vpop.eup %7968  ;;  %7988 = vrcp.f32 %v4273_v13  ;;  %v4274_v6 = vadd.f32 1.0, %v7967_v56  ;;  %6560 = vmatmul.mubr.msk.bf16.gmra.mrb[244].mxu1 %vm593_vm2, %v11167_v0  ;;  %12974 = vst [vmem:[#allocation15_spill] sm:$0xff] %v11173_v58 }
 0x208   : > { %v7971_v45 = vpop.eup %7970  ;;  %7990 = vrcp.f32 %v4135_v12  ;;  %v4136_v25 = vadd.f32 1.0, %v7969_v24  ;;  %7321 = vmatmul.mubr.msk.bf16.gmra.mrb[244].mxu0 %vm593_vm2, %v10929_v50  ;;  %1884 = vmatprep.mubr.bf16.mxu1 %v12906_v54 }
 0x209   : > { %v7973_v14 = vpop.eup %7972  ;;  %7992 = vrcp.f32 %v4274_v6  ;;  %v4278_v9 = vadd.f32 1.0, %v7971_v45  ;;  %7324 = vmatprep.mubr.msk.bf16.mxu0 %vm593_vm2, %v10971_v7 }
 0x20a   : > { %v7975_v55 = vpop.eup %7974  ;;  %7994 = vrcp.f32 %v4136_v25  ;;  %v4140_v13 = vadd.f32 1.0, %v7973_v14  ;;  %v12975_v14 = vld [vmem:[#allocation24_spill] sm:$0xff] }
 0x20b   : > { %v7977_v56 = vpop.eup %7976  ;;  %7996 = vrcp.f32 %v4278_v9  ;;  %v4279_v12 = vadd.f32 1.0, %v7975_v55  ;;  %v6667_v9 = vmul.f32 -1.442695, %v12975_v14  ;;  %v11182_v55 = vld [vmem:[%s12898_s0 + $0x180] sm:$0xff]  }
 0x20c   : > { %v7979_v24 = vpop.eup %7978  ;;  %7998 = vrcp.f32 %v4140_v13  ;;  %v4141_v48 = vadd.f32 1.0, %v7977_v56  ;;  %v6668_v56 = vmul.f32 -1.442695, %v10716_v19  ;;  %v6811_v19 = vmul.f32 -1.442695, %v10730_v62 }
 0x20d   : > { %v7981_v50 = vpop.eup %7980  ;;  %8000 = vrcp.f32 %v4279_v12  ;;  %v4283_v6 = vadd.f32 1.0, %v7979_v24  ;;  %v11200_v24 = vpop.f32.mrb[106].mxu0  ;;  %v6677_v62 = vmul.f32 -1.442695, %v10762_v36 }
 0x20e   : > { %v7983_v45 = vpop.eup %7982  ;;  %8002 = vrcp.f32 %v4141_v48  ;;  %v4145_v58 = vadd.f32 1.0, %v7981_v50 }
 0x20f   : > { %v7985_v37 = vpop.eup %7984  ;;  %8004 = vrcp.f32 %v4283_v6  ;;  %v4284_v34 = vadd.f32 1.0, %v7983_v45  ;;  %6561 = vmatmul.mubr.msk.bf16.gmra.mrb[248].mxu1 %vm593_vm2, %v11182_v55 }
 0x210   : > { %v7987_v7 = vpop.eup %7986  ;;  %8006 = vrcp.f32 %v4145_v58  ;;  %v4146_v25 = vadd.f32 1.0, %v7985_v37  ;;  %7325 = vmatmul.mubr.msk.bf16.gmra.mrb[248].mxu0 %vm593_vm2, %v10993_v27  ;;  %v6806_v37 = vmul.f32 -1.442695, %v10694_v26  ;;  %1894 = vmatprep.mubr.bf16.mxu1 %v12906_v54  ;;  %v6810_v27 = vmul.f32 -1.442695, %v10720_v2 }
 0x211   : > { %v7989_v48 = vpop.eup %7988  ;;  %8008 = vrcp.f32 %v4284_v34  ;;  %v4288_v13 = vadd.f32 1.0, %v7987_v7  ;;  %7328 = vmatprep.mubr.msk.bf16.mxu0 %vm593_vm2, %v11017_v10  ;;  %v11196_v34 = vpop.f32.mrb[105].mxu1  ;;  %v6672_v10 = vmul.f32 -1.442695, %v10724_v15  ;;  %v6673_v2 = vmul.f32 -1.442695, %v10732_v8 }
 0x212   : > { %v7991_v58 = vpop.eup %7990  ;;  %5939 = vst [vmem:[%s10149_s27 + $0x528] sm:$0xff] %v7989_v48  ;;  %8010 = vrcp.f32 %v4146_v25  ;;  %v11204_v6 = vpop.f32.mrb[106].mxu1  ;;  %v6815_v15 = vmul.f32 -1.442695, %v10760_v47  ;;  %v11219_v8 = vld [vmem:[%s12898_s0 + $0x188] sm:$0xff]   ;;  %v12976_v48 = vld [vmem:[#allocation25_spill] sm:$0xff] }
 0x213   : > { %v7993_v12 = vpop.eup %7992  ;;  %5801 = vst [vmem:[%s10149_s27 + $0xd8] sm:$0xff] %v7991_v58  ;;  %8012 = vrcp.f32 %v4288_v13  ;;  %v11210_v25 = vpop.f32.mrb[107].mxu0  ;;  %v6816_v13 = vmul.f32 -1.442695, %v12976_v48 }
 0x214   : > { %v7995_v26 = vpop.eup %7994  ;;  %5940 = vst [vmem:[%s10149_s27 + $0x530] sm:$0xff] %v7993_v12  ;;  %8014 = vpow2.f32 %v6667_v9  ;;  %v11212_v14 = vpop.f32.mrb[107].mxu1 }
 0x215   : > { %v7997_v50 = vpop.eup %7996  ;;  %5802 = vst [vmem:[%s10149_s27 + $0xe0] sm:$0xff] %v7995_v26  ;;  %8016 = vpow2.f32 %v6806_v37  ;;  %v12977_v37 = vld [vmem:[#allocation26_spill] sm:$0xff]  ;;  %v12979_v26 = vld [vmem:[#allocation28_spill] sm:$0xff] }
 0x216   : > { %v7999_v45 = vpop.eup %7998  ;;  %5944 = vst [vmem:[%s10149_s27 + $0x550] sm:$0xff] %v7997_v50  ;;  %8018 = vpow2.f32 %v6668_v56  ;;  %v6678_v58 = vmul.f32 -1.442695, %v12977_v37  ;;  %v11255_v37 = vld [vmem:[%s12898_s0 + $0x190] sm:$0xff]  }
 0x217   : > { %v8001_v7 = vpop.eup %8000  ;;  %5806 = vst [vmem:[%s10149_s27 + $0x100] sm:$0xff] %v7999_v45  ;;  %8020 = vpow2.f32 %v6810_v27  ;;  %6562 = vmatmul.mubr.msk.bf16.gmra.mrb[252].mxu1 %vm593_vm2, %v11219_v8 }
 0x218   : > { %v8003_v9 = vpop.eup %8002  ;;  %5945 = vst [vmem:[%s10149_s27 + $0x558] sm:$0xff] %v8001_v7  ;;  %8022 = vpow2.f32 %v6672_v10  ;;  %7329 = vmatmul.mubr.msk.bf16.gmra.mrb[252].mxu0 %vm593_vm2, %v11055_v11  ;;  %1904 = vmatprep.mubr.bf16.mxu1 %v12906_v54  ;;  %v12978_v11 = vld [vmem:[#allocation27_spill] sm:$0xff]  ;;  %v6682_v10 = vmul.f32 -1.442695, %v12979_v26 }
 0x219   : > { %v8005_v47 = vpop.eup %8004  ;;  %5807 = vst [vmem:[%s10149_s27 + $0x108] sm:$0xff] %v8003_v9  ;;  %8024 = vpow2.f32 %v6811_v19  ;;  %7332 = vmatprep.mubr.msk.bf16.mxu0 %vm593_vm2, %v11081_v63  ;;  %v6820_v12 = vmul.f32 -1.442695, %v12978_v11  ;;  %v11237_v63 = vpop.f32.mrb[108].mxu0 }
 0x21a   : > { %v8007_v36 = vpop.eup %8006  ;;  %5949 = vst [vmem:[%s10149_s27 + $0x578] sm:$0xff] %v8005_v47  ;;  %8026 = vpow2.f32 %v6673_v2  ;;  %v11239_v19 = vpop.f32.mrb[108].mxu1 }
 0x21b   : > { %v8009_v56 = vpop.eup %8008  ;;  %5811 = vst [vmem:[%s10149_s27 + $0x128] sm:$0xff] %v8007_v36  ;;  %8028 = vpow2.f32 %v6815_v15  ;;  %v11242_v2 = vpop.f32.mrb[109].mxu0 }
 0x21c   : > { %v8011_v27 = vpop.eup %8010  ;;  %5950 = vst [vmem:[%s10149_s27 + $0x580] sm:$0xff] %v8009_v56  ;;  %8030 = vpow2.f32 %v6677_v62  ;;  %v11244_v7 = vpop.f32.mrb[109].mxu1 }
 0x21d   : > { %v8013_v50 = vpop.eup %8012  ;;  %5812 = vst [vmem:[%s10149_s27 + $0x130] sm:$0xff] %v8011_v27  ;;  %8032 = vpow2.f32 %v6816_v13  ;;  %v11246_v62 = vpop.f32.mrb[110].mxu0 }
 0x21e   : > { %v8015_v45 = vpop.eup %8014  ;;  %5954 = vst [vmem:[%s10149_s27 + $0x5a0] sm:$0xff] %v8013_v50  ;;  %8034 = vpow2.f32 %v6678_v58  ;;  %v11248_v47 = vpop.f32.mrb[110].mxu1 }
 0x21f   : > { %v8017_v15 = vpop.eup %8016  ;;  %v4150_v9 = vadd.f32 1.0, %v8015_v45  ;;  %8036 = vpow2.f32 %v6820_v12  ;;  %12980 = vst [vmem:[#allocation16_spill] sm:$0xff] %v11248_v47  ;;  %v11250_v36 = vpop.f32.mrb[111].mxu0  ;;  %6563 = vmatmul.mubr.msk.bf16.gmra.mrb[0].mxu1 %vm593_vm2, %v11255_v37 }
 0x220   : > { %v8019_v48 = vpop.eup %8018  ;;  %v4289_v13 = vadd.f32 1.0, %v8017_v15  ;;  %8038 = vpow2.f32 %v6682_v10  ;;  %12981 = vst [vmem:[#allocation17_spill] sm:$0xff] %v11250_v36  ;;  %7333 = vmatmul.mubr.msk.bf16.gmra.mrb[0].mxu0 %vm593_vm2, %v11097_v49  ;;  %v11261_v11 = vpop.f32.mrb[111].mxu1  ;;  %1914 = vmatprep.mubr.bf16.mxu1 %v12906_v54 }
 0x221   : > { %v8021_v58 = vpop.eup %8020  ;;  %8040 = vrcp.f32 %v4150_v9  ;;  %v4151_v56 = vadd.f32 1.0, %v8019_v48  ;;  %12982 = vst [vmem:[#allocation18_spill] sm:$0xff] %v11261_v11  ;;  %7336 = vmatprep.mubr.msk.bf16.mxu0 %vm593_vm2, %v11133_v32 }
 0x222   : > { %v8023_v12 = vpop.eup %8022  ;;  %8042 = vrcp.f32 %v4289_v13  ;;  %v4293_v27 = vadd.f32 1.0, %v8021_v58  ;;  %v11269_v13 = vld [vmem:[%s12898_s0 + $0x198] sm:$0xff]  }
 0x223   : > { %v8025_v26 = vpop.eup %8024  ;;  %8044 = vrcp.f32 %v4151_v56  ;;  %v4155_v10 = vadd.f32 1.0, %v8023_v12 }
 0x224   : > { %v8027_v50 = vpop.eup %8026  ;;  %8046 = vrcp.f32 %v4293_v27  ;;  %v4294_v45 = vadd.f32 1.0, %v8025_v26  ;;  %v12983_v27 = vld [vmem:[#allocation29_spill] sm:$0xff] }
 0x225   : > { %v8029_v49 = vpop.eup %8028  ;;  %8048 = vrcp.f32 %v4155_v10  ;;  %v4156_v15 = vadd.f32 1.0, %v8027_v50  ;;  %v6821_v26 = vmul.f32 -1.442695, %v12983_v27 }
 0x226   : > { %v8031_v9 = vpop.eup %8030  ;;  %8050 = vrcp.f32 %v4294_v45  ;;  %v4298_v48 = vadd.f32 1.0, %v8029_v49 }
 0x227   : > { %v8033_v11 = vpop.eup %8032  ;;  %8052 = vrcp.f32 %v4156_v15  ;;  %v4160_v36 = vadd.f32 1.0, %v8031_v9  ;;  %6564 = vmatmul.mubr.msk.bf16.gmra.mrb[4].mxu1 %vm593_vm2, %v11269_v13  ;;  %v6826_v15 = vmul.f32 -1.442695, %v10848_v46 }
 0x228   : > { %v8035_v47 = vpop.eup %8034  ;;  %8054 = vrcp.f32 %v4298_v48  ;;  %v4299_v32 = vadd.f32 1.0, %v8033_v11  ;;  %7337 = vmatmul.mubr.msk.bf16.gmra.mrb[4].mxu0 %vm593_vm2, %v11167_v0  ;;  %1924 = vmatprep.mubr.bf16.mxu1 %v12906_v54  ;;  %v6683_v0 = vmul.f32 -1.442695, %v10812_v3  ;;  %v6688_v3 = vmul.f32 -1.442695, %v10850_v61 }
 0x229   : > { %v8037_v58 = vpop.eup %8036  ;;  %8056 = vrcp.f32 %v4160_v36  ;;  %v4161_v56 = vadd.f32 1.0, %v8035_v47  ;;  %7340 = vmatprep.mubr.msk.bf16.mxu0 %vm593_vm2, %v11182_v55  ;;  %v6825_v47 = vmul.f32 -1.442695, %v10837_v44  ;;  %v6687_v55 = vmul.f32 -1.442695, %v10839_v30  ;;  %v9715_v30 = vld [vmem:[%s12898_s0 + $0x1a0] sm:$0xff]  }
 0x22a   : > { %v8039_v11 = vpop.eup %8038  ;;  %8058 = vrcp.f32 %v4299_v32  ;;  %v4303_v12 = vadd.f32 1.0, %v8037_v58  ;;  %v6830_v44 = vmul.f32 -1.442695, %v10854_v39  ;;  %v6692_v61 = vmul.f32 -1.442695, %v10856_v41  ;;  %v11303_v58 = vpop.f32.mrb[112].mxu0 }
 0x22b   : > { %v8041_v10 = vpop.eup %8040  ;;  %8060 = vrcp.f32 %v4161_v56  ;;  %v4165_v50 = vadd.f32 1.0, %v8039_v11  ;;  %v6831_v32 = vmul.f32 -1.442695, %v10861_v5  ;;  %v6693_v41 = vmul.f32 -1.442695, %v10863_v1  ;;  %v11309_v11 = vpop.f32.mrb[113].mxu0 }
 0x22c   : > { %v8043_v36 = vpop.eup %8042  ;;  %5816 = vst [vmem:[%s10149_s27 + $0x150] sm:$0xff] %v8041_v10  ;;  %8062 = vrcp.f32 %v4303_v12  ;;  %v12984_v5 = vld [vmem:[#allocation2_spill] sm:$0xff] }
 0x22d   : > { %v8045_v45 = vpop.eup %8044  ;;  %5955 = vst [vmem:[%s10149_s27 + $0x5a8] sm:$0xff] %v8043_v36  ;;  %8064 = vrcp.f32 %v4165_v50  ;;  %v6835_v27 = vmul.f32 -1.442695, %v12984_v5 }
 0x22e   : > { %v8047_v49 = vpop.eup %8046  ;;  %5817 = vst [vmem:[%s10149_s27 + $0x158] sm:$0xff] %v8045_v45  ;;  %8066 = vpow2.f32 %v6821_v26  ;;  %v11315_v26 = vpop.f32.mrb[114].mxu0 }
 0x22f   : > { %v8049_v9 = vpop.eup %8048  ;;  %5959 = vst [vmem:[%s10149_s27 + $0x5c8] sm:$0xff] %v8047_v49  ;;  %8068 = vpow2.f32 %v6683_v0  ;;  %6565 = vmatmul.mubr.msk.bf16.gmra.mrb[8].mxu1 %vm593_vm2, %v9715_v30  ;;  %v12985_v0 = vld [vmem:[#allocation3_spill] sm:$0xff] }
 0x230   : > { %v8051_v48 = vpop.eup %8050  ;;  %5821 = vst [vmem:[%s10149_s27 + $0x178] sm:$0xff] %v8049_v9  ;;  %8070 = vpow2.f32 %v6825_v47  ;;  %7341 = vmatmul.mubr.msk.bf16.gmra.mrb[8].mxu0 %vm593_vm2, %v11219_v8  ;;  %1934 = vmatprep.mubr.bf16.mxu1 %v12906_v54  ;;  %v11305_v8 = vpop.f32.mrb[112].mxu1  ;;  %v6697_v1 = vmul.f32 -1.442695, %v12985_v0  ;;  %v12986_v47 = vld [vmem:[#allocation30_spill] sm:$0xff] }
 0x231   : > { %v8053_v46 = vpop.eup %8052  ;;  %5960 = vst [vmem:[%s10149_s27 + $0x5d0] sm:$0xff] %v8051_v48  ;;  %8072 = vpow2.f32 %v6687_v55  ;;  %7344 = vmatprep.mubr.msk.bf16.mxu0 %vm593_vm2, %v11255_v37  ;;  %v11311_v12 = vpop.f32.mrb[113].mxu1  ;;  %v6836_v45 = vmul.f32 -1.442695, %v12986_v47 }
 0x232   : > { %v8055_v39 = vpop.eup %8054  ;;  %5822 = vst [vmem:[%s10149_s27 + $0x180] sm:$0xff] %v8053_v46  ;;  %8074 = vpow2.f32 %v6826_v15  ;;  %v11317_v10 = vpop.f32.mrb[114].mxu1 }
 0x233   : > { %v8057_v56 = vpop.eup %8056  ;;  %5964 = vst [vmem:[%s10149_s27 + $0x5f0] sm:$0xff] %v8055_v39  ;;  %8076 = vpow2.f32 %v6688_v3  ;;  %v11323_v55 = vpop.f32.mrb[115].mxu0  ;;  %v9716_v3 = vld [vmem:[%s12898_s0 + $0x1a8] sm:$0xff]  }
 0x234   : > { %v8059_v37 = vpop.eup %8058  ;;  %5826 = vst [vmem:[%s10149_s27 + $0x1a0] sm:$0xff] %v8057_v56  ;;  %8078 = vpow2.f32 %v6830_v44  ;;  %v11325_v49 = vpop.f32.mrb[115].mxu1 }
 0x235   : > { %v8061_v50 = vpop.eup %8060  ;;  %5965 = vst [vmem:[%s10149_s27 + $0x5f8] sm:$0xff] %v8059_v37  ;;  %8080 = vpow2.f32 %v6692_v61  ;;  %v11337_v39 = vpop.f32.mrb[116].mxu0 }
 0x236   : > { %v8063_v36 = vpop.eup %8062  ;;  %5827 = vst [vmem:[%s10149_s27 + $0x1a8] sm:$0xff] %v8061_v50  ;;  %8082 = vpow2.f32 %v6831_v32  ;;  %v11339_v32 = vpop.f32.mrb[116].mxu1 }
 0x237   : > { %v8065_v15 = vpop.eup %8064  ;;  %5969 = vst [vmem:[%s10149_s27 + $0x618] sm:$0xff] %v8063_v36  ;;  %8084 = vpow2.f32 %v6693_v41  ;;  %6566 = vmatmul.mubr.msk.bf16.gmra.mrb[12].mxu1 %vm593_vm2, %v9716_v3  ;;  %v11341_v37 = vpop.f32.mrb[117].mxu0 }
 0x238   : > { %v8067_v9 = vpop.eup %8066  ;;  %5831 = vst [vmem:[%s10149_s27 + $0x1c8] sm:$0xff] %v8065_v15  ;;  %8086 = vpow2.f32 %v6835_v27  ;;  %7345 = vmatmul.mubr.msk.bf16.gmra.mrb[12].mxu0 %vm593_vm2, %v11269_v13  ;;  %1944 = vmatprep.mubr.bf16.mxu1 %v12906_v54  ;;  %v11343_v13 = vpop.f32.mrb[117].mxu1 }
 0x239   : > { %v8069_v48 = vpop.eup %8068  ;;  %v4304_v44 = vadd.f32 1.0, %v8067_v9  ;;  %8088 = vpow2.f32 %v6697_v1  ;;  %7348 = vmatprep.mubr.msk.bf16.mxu0 %vm593_vm2, %v9715_v30  ;;  %v11345_v50 = vpop.f32.mrb[118].mxu0 }
 0x23a   : > { %v8071_v46 = vpop.eup %8070  ;;  %v4166_v61 = vadd.f32 1.0, %v8069_v48  ;;  %8090 = vpow2.f32 %v6836_v45  ;;  %v9717_v48 = vld [vmem:[%s12898_s0 + $0x1b0] sm:$0xff]  }
 0x23b   : > { %v8073_v56 = vpop.eup %8072  ;;  %8092 = vrcp.f32 %v4304_v44  ;;  %v4308_v41 = vadd.f32 1.0, %v8071_v46 }
 0x23c   : > { %v8075_v5 = vpop.eup %8074  ;;  %8094 = vrcp.f32 %v4166_v61  ;;  %v4170_v27 = vadd.f32 1.0, %v8073_v56 }
 0x23d   : > { %v8077_v30 = vpop.eup %8076  ;;  %8096 = vrcp.f32 %v4308_v41  ;;  %v4309_v0 = vadd.f32 1.0, %v8075_v5 }
 0x23e   : > { %v8079_v1 = vpop.eup %8078  ;;  %8098 = vrcp.f32 %v4170_v27  ;;  %v4171_v36 = vadd.f32 1.0, %v8077_v30 }
 0x23f   : > { %v8081_v47 = vpop.eup %8080  ;;  %8100 = vrcp.f32 %v4309_v0  ;;  %v4313_v45 = vadd.f32 1.0, %v8079_v1  ;;  %6567 = vmatmul.mubr.msk.bf16.gmra.mrb[16].mxu1 %vm593_vm2, %v9717_v48  ;;  %v12987_v0 = vld [vmem:[#allocation31_spill] sm:$0xff] }
 0x240   : > { %v8083_v15 = vpop.eup %8082  ;;  %8102 = vrcp.f32 %v4171_v36  ;;  %v4175_v9 = vadd.f32 1.0, %v8081_v47  ;;  %7349 = vmatmul.mubr.msk.bf16.gmra.mrb[16].mxu0 %vm593_vm2, %v9716_v3  ;;  %1954 = vmatprep.mubr.bf16.mxu1 %v12906_v54  ;;  %v6698_v3 = vmul.f32 -1.442695, %v12987_v0  ;;  %v6840_v54 = vmul.f32 -1.442695, %v10912_v4 }
 0x241   : > { %v8085_v44 = vpop.eup %8084  ;;  %8104 = vrcp.f32 %v4313_v45  ;;  %v4314_v46 = vadd.f32 1.0, %v8083_v15  ;;  %7352 = vmatprep.mubr.msk.bf16.mxu0 %vm593_vm2, %v9717_v48  ;;  %v6702_v45 = vmul.f32 -1.442695, %v10916_v21  ;;  %v11360_v48 = vpop.f32.mrb[118].mxu1  ;;  %v6703_v4 = vmul.f32 -1.442695, %v10924_v20 }
 0x242   : > { %v8087_v61 = vpop.eup %8086  ;;  %8106 = vrcp.f32 %v4175_v9  ;;  %v4176_v56 = vadd.f32 1.0, %v8085_v44  ;;  %v6841_v9 = vmul.f32 -1.442695, %v10922_v33  ;;  %v6845_v33 = vmul.f32 -1.442695, %v10954_v38  ;;  %v12989_v38 = vld [vmem:[#allocation5_spill] sm:$0xff] }
 0x243   : > { %v8089_v41 = vpop.eup %8088  ;;  %8108 = vrcp.f32 %v4314_v46  ;;  %v4318_v5 = vadd.f32 1.0, %v8087_v61  ;;  %v9718_v46 = vld [vmem:[%s12898_s0 + $0x1b8] ss:$0 sps:$4 sm:$0xff]   ;;  %v11371_v61 = vpop.f32.mrb[119].mxu0 }
 0x244   : > { %v8091_v27 = vpop.eup %8090  ;;  %8110 = vrcp.f32 %v4176_v56  ;;  %v4180_v30 = vadd.f32 1.0, %v8089_v41  ;;  %v11373_v56 = vpop.f32.mrb[119].mxu1  ;;  %v6707_v41 = vmul.f32 -1.442695, %v10956_v52  ;;  %v12991_v52 = vld [vmem:[#allocation32_spill] sm:$0xff] }
 0x245   : > { %v8093_v1 = vpop.eup %8092  ;;  %8112 = vrcp.f32 %v4318_v5  ;;  %v4319_v36 = vadd.f32 1.0, %v8091_v27  ;;  %v12988_v27 = vld [vmem:[#allocation4_spill] sm:$0xff] }
 0x246   : > { %v8095_v47 = vpop.eup %8094  ;;  %5970 = vst [vmem:[%s10149_s27 + $0x620] sm:$0xff] %v8093_v1  ;;  %8114 = vrcp.f32 %v4180_v30  ;;  %v6846_v30 = vmul.f32 -1.442695, %v12988_v27 }
 0x247   : > { %v8097_v15 = vpop.eup %8096  ;;  %5832 = vst [vmem:[%s10149_s27 + $0x1d0] sm:$0xff] %v8095_v47  ;;  %8116 = vrcp.f32 %v4319_v36  ;;  %6568 = vmatmul.mubr.msk.bf16.gmra.mrb[20].mxu1 %vm593_vm2, %v9718_v46  ;;  %v12990_v36 = vld [vmem:[#allocation6_spill] sm:$0xff] }
 0x248   : > { %v8099_v44 = vpop.eup %8098  ;;  %5974 = vst [vmem:[%s10149_s27 + $0x640] sm:$0xff] %v8097_v15  ;;  %8118 = vpow2.f32 %v6698_v3  ;;  %7353 = vmatmul.mubr.msk.bf16.gmra.mrb[20].mxu0 %vm593_vm2, %v9718_v46  ;;  %v6708_v3 = vmul.f32 -1.442695, %v12989_v38  ;;  %v11389_v46 = vpop.f32.mrb[120].mxu1 }
 0x249   : > { %v8101_v21 = vpop.eup %8100  ;;  %5836 = vst [vmem:[%s10149_s27 + $0x1f0] sm:$0xff] %v8099_v44  ;;  %8120 = vpow2.f32 %v6840_v54  ;;  %v6850_v54 = vmul.f32 -1.442695, %v12990_v36 }
 0x24a   : > { %v8103_v20 = vpop.eup %8102  ;;  %5975 = vst [vmem:[%s10149_s27 + $0x648] sm:$0xff] %v8101_v21  ;;  %8122 = vpow2.f32 %v6702_v45  ;;  %v6712_v45 = vmul.f32 -1.442695, %v12991_v52 }
 0x24b   : > { %v8105_v5 = vpop.eup %8104  ;;  %5837 = vst [vmem:[%s10149_s27 + $0x1f8] sm:$0xff] %v8103_v20  ;;  %8124 = vpow2.f32 %v6841_v9  ;;  %v12992_v9 = vld [vmem:[#allocation33_spill] sm:$0xff] }
 0x24c   : > { %v8107_v0 = vpop.eup %8106  ;;  %5979 = vst [vmem:[%s10149_s27 + $0x668] sm:$0xff] %v8105_v5  ;;  %8126 = vpow2.f32 %v6703_v4  ;;  %v6851_v44 = vmul.f32 -1.442695, %v12992_v9  ;;  %v11387_v4 = vpop.f32.mrb[120].mxu0 }
 0x24d   : > { %v8109_v1 = vpop.eup %8108  ;;  %5841 = vst [vmem:[%s10149_s27 + $0x218] sm:$0xff] %v8107_v0  ;;  %8128 = vpow2.f32 %v6845_v33  ;;  %v12993_v33 = vld [vmem:[#allocation34_spill] sm:$0xff]  ;;  %v11393_v5 = vpop.f32.mrb[121].mxu0 }
 0x24e   : > { %v8111_v47 = vpop.eup %8110  ;;  %5980 = vst [vmem:[%s10149_s27 + $0x670] sm:$0xff] %v8109_v1  ;;  %8130 = vpow2.f32 %v6707_v41  ;;  %v6713_v20 = vmul.f32 -1.442695, %v12993_v33  ;;  %v11395_v41 = vpop.f32.mrb[121].mxu1 }
 0x24f   : > { %v8113_v15 = vpop.eup %8112  ;;  %5842 = vst [vmem:[%s10149_s27 + $0x220] sm:$0xff] %v8111_v47  ;;  %8132 = vpow2.f32 %v6846_v30  ;;  %v11398_v30 = vpop.f32.mrb[122].mxu0 }
 0x250   : > { %v8115_v21 = vpop.eup %8114  ;;  %5984 = vst [vmem:[%s10149_s27 + $0x690] sm:$0xff] %v8113_v15  ;;  %8134 = vpow2.f32 %v6708_v3  ;;  %v11400_v0 = vpop.f32.mrb[122].mxu1 }
 0x251   : > { %v8117_v27 = vpop.eup %8116  ;;  %5846 = vst [vmem:[%s10149_s27 + $0x240] sm:$0xff] %v8115_v21  ;;  %8136 = vpow2.f32 %v6850_v54  ;;  %12994 = vst [vmem:[#allocation19_spill] sm:$0xff] %v11400_v0  ;;  %v11403_v3 = vpop.f32.mrb[123].mxu0 }
 0x252   : > { %v8119_v38 = vpop.eup %8118  ;;  %5985 = vst [vmem:[%s10149_s27 + $0x698] sm:$0xff] %v8117_v27  ;;  %8138 = vpow2.f32 %v6712_v45  ;;  %12995 = vst [vmem:[#allocation20_spill] sm:$0xff] %v11403_v3  ;;  %v11405_v47 = vpop.f32.mrb[123].mxu1 }
 0x253   : > { %v8121_v1 = vpop.eup %8120  ;;  %v4181_v36 = vadd.f32 1.0, %v8119_v38  ;;  %8140 = vpow2.f32 %v6851_v44  ;;  %12996 = vst [vmem:[#allocation21_spill] sm:$0xff] %v11405_v47  ;;  %v11407_v45 = vpop.f32.mrb[124].mxu0 }
 0x254   : > { %v8123_v52 = vpop.eup %8122  ;;  %v4323_v15 = vadd.f32 1.0, %v8121_v1  ;;  %8142 = vpow2.f32 %v6713_v20  ;;  %12997 = vst [vmem:[#allocation22_spill] sm:$0xff] %v11407_v45  ;;  %v11409_v38 = vpop.f32.mrb[124].mxu1 }
 0x255   : > { %v8125_v9 = vpop.eup %8124  ;;  %8144 = vrcp.f32 %v4181_v36  ;;  %v4185_v54 = vadd.f32 1.0, %v8123_v52  ;;  %12998 = vst [vmem:[#allocation23_spill] sm:$0xff] %v11409_v38 }
 0x256   : > { %v8127_v21 = vpop.eup %8126  ;;  %8146 = vrcp.f32 %v4323_v15  ;;  %v4324_v33 = vadd.f32 1.0, %v8125_v9 }
 0x257   : > { %v8129_v0 = vpop.eup %8128  ;;  %8148 = vrcp.f32 %v4185_v54  ;;  %v4186_v27 = vadd.f32 1.0, %v8127_v21 }
 0x258   : > { %v8131_v44 = vpop.eup %8130  ;;  %8150 = vrcp.f32 %v4324_v33  ;;  %v4328_v3 = vadd.f32 1.0, %v8129_v0  ;;  %v12999_v33 = vld [vmem:[#allocation35_spill] sm:$0xff] }
 0x259   : > { %v8133_v47 = vpop.eup %8132  ;;  %8152 = vrcp.f32 %v4186_v27  ;;  %v4190_v1 = vadd.f32 1.0, %v8131_v44  ;;  %v6855_v27 = vmul.f32 -1.442695, %v12999_v33 }
 0x25a   : > { %v8135_v20 = vpop.eup %8134  ;;  %8154 = vrcp.f32 %v4328_v3  ;;  %v4329_v36 = vadd.f32 1.0, %v8133_v47  ;;  %v6717_v47 = vmul.f32 -1.442695, %v11008_v35 }
 0x25b   : > { %v8137_v52 = vpop.eup %8136  ;;  %8156 = vrcp.f32 %v4190_v1  ;;  %v4191_v15 = vadd.f32 1.0, %v8135_v20  ;;  %v6856_v20 = vmul.f32 -1.442695, %v11012_v23  ;;  %v6722_v23 = vmul.f32 -1.442695, %v11036_v18  ;;  %v13001_v18 = vld [vmem:[#allocation7_spill] sm:$0xff] }
 0x25c   : > { %v8139_v9 = vpop.eup %8138  ;;  %8158 = vrcp.f32 %v4329_v36  ;;  %v4333_v54 = vadd.f32 1.0, %v8137_v52  ;;  %v11415_v36 = vpop.f32.mrb[125].mxu0 }
 0x25d   : > { %v8141_v21 = vpop.eup %8140  ;;  %8160 = vrcp.f32 %v4191_v15  ;;  %v4195_v38 = vadd.f32 1.0, %v8139_v9  ;;  %v6718_v15 = vmul.f32 -1.442695, %v11025_v59  ;;  %v6861_v59 = vmul.f32 -1.442695, %v11042_v29 }
 0x25e   : > { %v8143_v45 = vpop.eup %8142  ;;  %8162 = vrcp.f32 %v4333_v54  ;;  %v4334_v0 = vadd.f32 1.0, %v8141_v21  ;;  %v11425_v21 = vpop.f32.mrb[126].mxu0 }
 0x25f   : > { %v8145_v44 = vpop.eup %8144  ;;  %8164 = vrcp.f32 %v4195_v38  ;;  %v4196_v3 = vadd.f32 1.0, %v8143_v45  ;;  %v13000_v45 = vld [vmem:[#allocation8_spill] sm:$0xff]  ;;  %v11421_v38 = vpop.f32.mrb[125].mxu1 }
 0x260   : > { %v8147_v1 = vpop.eup %8146  ;;  %5847 = vst [vmem:[%s10149_s27 + $0x248] sm:$0xff] %v8145_v44  ;;  %8166 = vrcp.f32 %v4334_v0  ;;  %v6860_v35 = vmul.f32 -1.442695, %v13000_v45  ;;  %v11429_v33 = vpop.f32.mrb[126].mxu1  ;;  %v6723_v44 = vmul.f32 -1.442695, %v11044_v51 }
 0x261   : > { %v8149_v52 = vpop.eup %8148  ;;  %5989 = vst [vmem:[%s10149_s27 + $0x6b8] sm:$0xff] %v8147_v1  ;;  %8168 = vrcp.f32 %v4196_v3  ;;  %v11435_v1 = vpop.f32.mrb[127].mxu0  ;;  %v6866_v51 = vmul.f32 -1.442695, %v11070_v31 }
 0x262   : > { %v8151_v9 = vpop.eup %8150  ;;  %5851 = vst [vmem:[%s10149_s27 + $0x268] sm:$0xff] %v8149_v52  ;;  %8170 = vpow2.f32 %v6855_v27  ;;  %v13002_v52 = vld [vmem:[#allocation9_spill] sm:$0xff] }
 0x263   : > { %v8153_v54 = vpop.eup %8152  ;;  %5990 = vst [vmem:[%s10149_s27 + $0x6c0] sm:$0xff] %v8151_v9  ;;  %8172 = vpow2.f32 %v6717_v47  ;;  %v6865_v47 = vmul.f32 -1.442695, %v13001_v18  ;;  %v6727_v9 = vmul.f32 -1.442695, %v13002_v52  ;;  %v11449_v18 = vpop.f32.mrb[128].mxu0 }
 0x264   : > { %v8155_v0 = vpop.eup %8154  ;;  %5852 = vst [vmem:[%s10149_s27 + $0x270] sm:$0xff] %v8153_v54  ;;  %8174 = vpow2.f32 %v6856_v20  ;;  %v11437_v20 = vpop.f32.mrb[127].mxu1 }
 0x265   : > { %v8157_v27 = vpop.eup %8156  ;;  %5994 = vst [vmem:[%s10149_s27 + $0x6e0] sm:$0xff] %v8155_v0  ;;  %8176 = vpow2.f32 %v6718_v15  ;;  %v13003_v0 = vld [vmem:[#allocation10_spill] sm:$0xff] }
 0x266   : > { %v8159_v3 = vpop.eup %8158  ;;  %5856 = vst [vmem:[%s10149_s27 + $0x290] sm:$0xff] %v8157_v27  ;;  %8178 = vpow2.f32 %v6860_v35  ;;  %v6728_v35 = vmul.f32 -1.442695, %v11072_v57  ;;  %v6870_v27 = vmul.f32 -1.442695, %v13003_v0 }
 0x267   : > { %v8161_v29 = vpop.eup %8160  ;;  %5995 = vst [vmem:[%s10149_s27 + $0x6e8] sm:$0xff] %v8159_v3  ;;  %8180 = vpow2.f32 %v6722_v23 }
 0x268   : > { %v8163_v15 = vpop.eup %8162  ;;  %5857 = vst [vmem:[%s10149_s27 + $0x298] sm:$0xff] %v8161_v29  ;;  %8182 = vpow2.f32 %v6861_v59  ;;  %v11451_v59 = vpop.f32.mrb[128].mxu1 }
 0x269   : > { %v8165_v45 = vpop.eup %8164  ;;  %5999 = vst [vmem:[%s10149_s27 + $0x708] sm:$0xff] %v8163_v15  ;;  %8184 = vpow2.f32 %v6723_v44  ;;  %13004 = vst [vmem:[#allocation24_spill] sm:$0xff] %v11451_v59  ;;  %v11453_v44 = vpop.f32.mrb[129].mxu0 }
 0x26a   : > { %v8167_v54 = vpop.eup %8166  ;;  %5861 = vst [vmem:[%s10149_s27 + $0x2b8] sm:$0xff] %v8165_v45  ;;  %8186 = vpow2.f32 %v6865_v47  ;;  %13005 = vst [vmem:[#allocation25_spill] sm:$0xff] %v11453_v44  ;;  %v11455_v57 = vpop.f32.mrb[129].mxu1 }
 0x26b   : > { %v8169_v3 = vpop.eup %8168  ;;  %6000 = vst [vmem:[%s10149_s27 + $0x710] sm:$0xff] %v8167_v54  ;;  %8188 = vpow2.f32 %v6727_v9  ;;  %13006 = vst [vmem:[#allocation26_spill] sm:$0xff] %v11455_v57  ;;  %v11457_v15 = vpop.f32.mrb[130].mxu0 }
 0x26c   : > { %v8171_v23 = vpop.eup %8170  ;;  %5862 = vst [vmem:[%s10149_s27 + $0x2c0] sm:$0xff] %v8169_v3  ;;  %8190 = vpow2.f32 %v6866_v51  ;;  %13007 = vst [vmem:[#allocation27_spill] sm:$0xff] %v11457_v15  ;;  %v11459_v9 = vpop.f32.mrb[130].mxu1 }
 0x26d   : > { %v8173_v31 = vpop.eup %8172  ;;  %v4338_v29 = vadd.f32 1.0, %v8171_v23  ;;  %8192 = vpow2.f32 %v6728_v35  ;;  %13008 = vst [vmem:[#allocation28_spill] sm:$0xff] %v11459_v9  ;;  %v11461_v54 = vpop.f32.mrb[131].mxu0 }
 0x26e   : > { %v8175_v47 = vpop.eup %8174  ;;  %v4200_v52 = vadd.f32 1.0, %v8173_v31  ;;  %8194 = vpow2.f32 %v6870_v27 }
 0x26f   : > { %v8177_v45 = vpop.eup %8176  ;;  %8196 = vrcp.f32 %v4338_v29  ;;  %v4339_v51 = vadd.f32 1.0, %v8175_v47 }
 0x270   : > { %v8179_v0 = vpop.eup %8178  ;;  %8198 = vrcp.f32 %v4200_v52  ;;  %v4201_v3 = vadd.f32 1.0, %v8177_v45 }
 0x271   : > { %v8181_v35 = vpop.eup %8180  ;;  %8200 = vrcp.f32 %v4339_v51  ;;  %v4343_v23 = vadd.f32 1.0, %v8179_v0 }
 0x272   : > { %v8183_v44 = vpop.eup %8182  ;;  %8202 = vrcp.f32 %v4201_v3  ;;  %v4205_v57 = vadd.f32 1.0, %v8181_v35  ;;  %v13009_v35 = vld [vmem:[#allocation11_spill] sm:$0xff] }
 0x273   : > { %v8185_v31 = vpop.eup %8184  ;;  %8204 = vrcp.f32 %v4343_v23  ;;  %v4344_v27 = vadd.f32 1.0, %v8183_v44  ;;  %v6732_v44 = vmul.f32 -1.442695, %v13009_v35 }
 0x274   : > { %v8187_v15 = vpop.eup %8186  ;;  %8206 = vrcp.f32 %v4205_v57  ;;  %v4206_v9 = vadd.f32 1.0, %v8185_v31 }
 0x275   : > { %v8189_v59 = vpop.eup %8188  ;;  %8208 = vrcp.f32 %v4344_v27  ;;  %v4348_v29 = vadd.f32 1.0, %v8187_v15  ;;  %v6871_v15 = vmul.f32 -1.442695, %v11110_v43  ;;  %v6875_v27 = vmul.f32 -1.442695, %v11126_v40 }
 0x276   : > { %v8191_v47 = vpop.eup %8190  ;;  %8210 = vrcp.f32 %v4206_v9  ;;  %v4210_v52 = vadd.f32 1.0, %v8189_v59  ;;  %v6733_v59 = vmul.f32 -1.442695, %v11112_v17  ;;  %v6737_v43 = vmul.f32 -1.442695, %v11128_v60 }
 0x277   : > { %v8193_v45 = vpop.eup %8192  ;;  %8212 = vrcp.f32 %v4348_v29  ;;  %v4349_v51 = vadd.f32 1.0, %v8191_v47  ;;  %v11469_v29 = vpop.f32.mrb[131].mxu1  ;;  %v6876_v17 = vmul.f32 -1.442695, %v11141_v16  ;;  %v6742_v60 = vmul.f32 -1.442695, %v11152_v22 }
 0x278   : > { %v8195_v0 = vpop.eup %8194  ;;  %8214 = vrcp.f32 %v4210_v52  ;;  %v4211_v3 = vadd.f32 1.0, %v8193_v45  ;;  %v6881_v16 = vmul.f32 -1.442695, %v11156_v28  ;;  %v13011_v28 = vld [vmem:[#allocation13_spill] sm:$0xff] }
 0x279   : > { %v8197_v23 = vpop.eup %8196  ;;  %8216 = vrcp.f32 %v4349_v51  ;;  %v4353_v57 = vadd.f32 1.0, %v8195_v0  ;;  %v6738_v51 = vmul.f32 -1.442695, %v11143_v42  ;;  %v6880_v0 = vmul.f32 -1.442695, %v11150_v53  ;;  %v11485_v42 = vpop.f32.mrb[132].mxu1 }
 0x27a   : > { %v8199_v31 = vpop.eup %8198  ;;  %6004 = vst [vmem:[%s10149_s27 + $0x730] sm:$0xff] %v8197_v23  ;;  %8218 = vrcp.f32 %v4211_v3  ;;  %v13010_v53 = vld [vmem:[#allocation12_spill] sm:$0xff] }
 0x27b   : > { %v8201_v9 = vpop.eup %8200  ;;  %5866 = vst [vmem:[%s10149_s27 + $0x2e0] sm:$0xff] %v8199_v31  ;;  %8220 = vrcp.f32 %v4353_v57  ;;  %v6743_v57 = vmul.f32 -1.442695, %v13010_v53  ;;  %v11491_v31 = vpop.f32.mrb[133].mxu1 }
 0x27c   : > { %v8203_v47 = vpop.eup %8202  ;;  %6005 = vst [vmem:[%s10149_s27 + $0x738] sm:$0xff] %v8201_v9  ;;  %8222 = vpow2.f32 %v6732_v44  ;;  %v11483_v44 = vpop.f32.mrb[132].mxu0 }
 0x27d   : > { %v8205_v52 = vpop.eup %8204  ;;  %5867 = vst [vmem:[%s10149_s27 + $0x2e8] sm:$0xff] %v8203_v47  ;;  %8224 = vpow2.f32 %v6871_v15  ;;  %v11489_v15 = vpop.f32.mrb[133].mxu0 }
 0x27e   : > { %v8207_v45 = vpop.eup %8206  ;;  %6009 = vst [vmem:[%s10149_s27 + $0x758] sm:$0xff] %v8205_v52  ;;  %8226 = vpow2.f32 %v6733_v59  ;;  %v6885_v59 = vmul.f32 -1.442695, %v13011_v28  ;;  %v11495_v9 = vpop.f32.mrb[134].mxu0 }
 0x27f   : > { %v8209_v40 = vpop.eup %8208  ;;  %5871 = vst [vmem:[%s10149_s27 + $0x308] sm:$0xff] %v8207_v45  ;;  %8228 = vpow2.f32 %v6875_v27  ;;  %v11497_v27 = vpop.f32.mrb[134].mxu1 }
 0x280   : > { %v8211_v3 = vpop.eup %8210  ;;  %6010 = vst [vmem:[%s10149_s27 + $0x760] sm:$0xff] %v8209_v40  ;;  %8230 = vpow2.f32 %v6737_v43  ;;  %v13012_v43 = vld [vmem:[#allocation14_spill] sm:$0xff]  ;;  %v11502_v45 = vpop.f32.mrb[135].mxu0 }
 0x281   : > { %v8213_v35 = vpop.eup %8212  ;;  %5872 = vst [vmem:[%s10149_s27 + $0x310] sm:$0xff] %v8211_v3  ;;  %8232 = vpow2.f32 %v6876_v17  ;;  %v6747_v52 = vmul.f32 -1.442695, %v13012_v43 }
 0x282   : > { %v8215_v23 = vpop.eup %8214  ;;  %6014 = vst [vmem:[%s10149_s27 + $0x780] sm:$0xff] %v8213_v35  ;;  %8234 = vpow2.f32 %v6738_v51  ;;  %v11504_v51 = vpop.f32.mrb[135].mxu1 }
 0x283   : > { %v8217_v22 = vpop.eup %8216  ;;  %5876 = vst [vmem:[%s10149_s27 + $0x330] sm:$0xff] %v8215_v23  ;;  %8236 = vpow2.f32 %v6880_v0  ;;  %v11509_v28 = vpop.f32.mrb[136].mxu1 }
 0x284   : > { %v8219_v47 = vpop.eup %8218  ;;  %6015 = vst [vmem:[%s10149_s27 + $0x788] sm:$0xff] %v8217_v22  ;;  %8238 = vpow2.f32 %v6742_v60  ;;  %v11507_v22 = vpop.f32.mrb[136].mxu0  ;;  %13014 = vst [vmem:[#allocation2_spill] sm:$0xff] %v11509_v28 }
 0x285   : > { %v8221_v17 = vpop.eup %8220  ;;  %5877 = vst [vmem:[%s10149_s27 + $0x338] sm:$0xff] %v8219_v47  ;;  %8240 = vpow2.f32 %v6881_v16  ;;  %13013 = vst [vmem:[#allocation29_spill] sm:$0xff] %v11507_v22  ;;  %v11511_v43 = vpop.f32.mrb[137].mxu0 }
 0x286   : > { %v8223_v40 = vpop.eup %8222  ;;  %6019 = vst [vmem:[%s10149_s27 + $0x7a8] sm:$0xff] %v8221_v17  ;;  %8242 = vpow2.f32 %v6743_v57  ;;  %13015 = vst [vmem:[#allocation3_spill] sm:$0xff] %v11511_v43  ;;  %v11513_v17 = vpop.f32.mrb[137].mxu1 }
 0x287   : > { %v8225_v0 = vpop.eup %8224  ;;  %v4215_v3 = vadd.f32 1.0, %v8223_v40  ;;  %8244 = vpow2.f32 %v6885_v59  ;;  %13016 = vst [vmem:[#allocation30_spill] sm:$0xff] %v11513_v17 }
 0x288   : > { %v8227_v35 = vpop.eup %8226  ;;  %v4354_v23 = vadd.f32 1.0, %v8225_v0  ;;  %8246 = vpow2.f32 %v6747_v52 }
 0x289   : > { %v8229_v53 = vpop.eup %8228  ;;  %8248 = vrcp.f32 %v4215_v3  ;;  %v4216_v60 = vadd.f32 1.0, %v8227_v35 }
 0x28a   : > { %v8231_v16 = vpop.eup %8230  ;;  %8250 = vrcp.f32 %v4354_v23  ;;  %v4358_v47 = vadd.f32 1.0, %v8229_v53 }
 0x28b   : > { %v8233_v57 = vpop.eup %8232  ;;  %8252 = vrcp.f32 %v4216_v60  ;;  %v4220_v59 = vadd.f32 1.0, %v8231_v16 }
 0x28c   : > { %v8235_v40 = vpop.eup %8234  ;;  %8254 = vrcp.f32 %v4358_v47  ;;  %v4359_v52 = vadd.f32 1.0, %v8233_v57  ;;  %v13017_v57 = vld [vmem:[#allocation15_spill] sm:$0xff] }
 0x28d   : > { %v8237_v0 = vpop.eup %8236  ;;  %8256 = vrcp.f32 %v4220_v59  ;;  %v4221_v3 = vadd.f32 1.0, %v8235_v40  ;;  %v6886_v59 = vmul.f32 -1.442695, %v13017_v57  ;;  %v6757_v57 = vmul.f32 -1.442695, %v11239_v19  ;;  %v13018_v19 = vld [vmem:[#allocation16_spill] sm:$0xff] }
 0x28e   : > { %v8239_v35 = vpop.eup %8238  ;;  %8258 = vrcp.f32 %v4359_v52  ;;  %v4363_v22 = vadd.f32 1.0, %v8237_v0  ;;  %v6748_v0 = vmul.f32 -1.442695, %v11196_v34  ;;  %v6891_v34 = vmul.f32 -1.442695, %v11210_v25 }
 0x28f   : > { %v8241_v28 = vpop.eup %8240  ;;  %8260 = vrcp.f32 %v4221_v3  ;;  %v4225_v23 = vadd.f32 1.0, %v8239_v35 }
 0x290   : > { %v8243_v53 = vpop.eup %8242  ;;  %8262 = vrcp.f32 %v4363_v22  ;;  %v4364_v43 = vadd.f32 1.0, %v8241_v28  ;;  %v6890_v22 = vmul.f32 -1.442695, %v11200_v24  ;;  %v6753_v24 = vmul.f32 -1.442695, %v11212_v14 }
 0x291   : > { %v8245_v17 = vpop.eup %8244  ;;  %8264 = vrcp.f32 %v4225_v23  ;;  %v4226_v60 = vadd.f32 1.0, %v8243_v53  ;;  %v11525_v23 = vpop.f32.mrb[138].mxu1  ;;  %v6896_v14 = vmul.f32 -1.442695, %v11242_v2  ;;  %v13019_v2 = vld [vmem:[#allocation17_spill] sm:$0xff] }
 0x292   : > { %v8247_v16 = vpop.eup %8246  ;;  %8266 = vrcp.f32 %v4364_v43  ;;  %v4368_v47 = vadd.f32 1.0, %v8245_v17  ;;  %v6752_v43 = vmul.f32 -1.442695, %v11204_v6  ;;  %v11521_v17 = vpop.f32.mrb[138].mxu0  ;;  %v6895_v6 = vmul.f32 -1.442695, %v11237_v63 }
 0x293   : > { %v8249_v40 = vpop.eup %8248  ;;  %8268 = vrcp.f32 %v4226_v60  ;;  %v4230_v52 = vadd.f32 1.0, %v8247_v16  ;;  %v11531_v16 = vpop.f32.mrb[139].mxu0  ;;  %v6758_v63 = vmul.f32 -1.442695, %v11244_v7 }
 0x294   : > { %v8251_v3 = vpop.eup %8250  ;;  %5881 = vst [vmem:[%s10149_s27 + $0x358] sm:$0xff] %v8249_v40  ;;  %8270 = vrcp.f32 %v4368_v47  ;;  %v11533_v47 = vpop.f32.mrb[139].mxu1 }
 0x295   : > { %v8253_v28 = vpop.eup %8252  ;;  %6020 = vst [vmem:[%s10149_s27 + $0x7b0] sm:$0xff] %v8251_v3  ;;  %8272 = vrcp.f32 %v4230_v52  ;;  %v11549_v7 = vpop.f32.mrb[140].mxu1 }
 0x296   : > { %v8255_v35 = vpop.eup %8254  ;;  %5882 = vst [vmem:[%s10149_s27 + $0x360] sm:$0xff] %v8253_v28  ;;  %8274 = vpow2.f32 %v6886_v59 }
 0x297   : > { %v8257_v53 = vpop.eup %8256  ;;  %6024 = vst [vmem:[%s10149_s27 + $0x7d0] sm:$0xff] %v8255_v35  ;;  %8276 = vpow2.f32 %v6748_v0  ;;  %v6900_v0 = vmul.f32 -1.442695, %v11246_v62  ;;  %v11547_v35 = vpop.f32.mrb[140].mxu0 }
 0x298   : > { %v8259_v60 = vpop.eup %8258  ;;  %5886 = vst [vmem:[%s10149_s27 + $0x380] sm:$0xff] %v8257_v53  ;;  %8278 = vpow2.f32 %v6890_v22  ;;  %v6762_v22 = vmul.f32 -1.442695, %v13018_v19  ;;  %v11552_v53 = vpop.f32.mrb[141].mxu0 }
 0x299   : > { %v8261_v25 = vpop.eup %8260  ;;  %6025 = vst [vmem:[%s10149_s27 + $0x7d8] sm:$0xff] %v8259_v60  ;;  %8280 = vpow2.f32 %v6752_v43  ;;  %v6901_v43 = vmul.f32 -1.442695, %v13019_v2  ;;  %v11554_v62 = vpop.f32.mrb[141].mxu1 }
 0x29a   : > { %v8263_v59 = vpop.eup %8262  ;;  %5887 = vst [vmem:[%s10149_s27 + $0x388] sm:$0xff] %v8261_v25  ;;  %8282 = vpow2.f32 %v6891_v34  ;;  %v11557_v60 = vpop.f32.mrb[142].mxu0 }
 0x29b   : > { %v8265_v40 = vpop.eup %8264  ;;  %6029 = vst [vmem:[%s10149_s27 + $0x7f8] sm:$0xff] %v8263_v59  ;;  %8284 = vpow2.f32 %v6753_v24  ;;  %v11561_v59 = vpop.f32.mrb[143].mxu0 }
 0x29c   : > { %v8267_v52 = vpop.eup %8266  ;;  %5891 = vst [vmem:[%s10149_s27 + $0x3a8] sm:$0xff] %v8265_v40  ;;  %8286 = vpow2.f32 %v6895_v6  ;;  %v11559_v6 = vpop.f32.mrb[142].mxu1  ;;  %13021 = vst [vmem:[#allocation4_spill] sm:$0xff] %v11561_v59 }
 0x29d   : > { %v8269_v3 = vpop.eup %8268  ;;  %6030 = vst [vmem:[%s10149_s27 + $0x800] sm:$0xff] %v8267_v52  ;;  %8288 = vpow2.f32 %v6757_v57  ;;  %13020 = vst [vmem:[#allocation31_spill] sm:$0xff] %v11559_v6 }
 0x29e   : > { %v8271_v28 = vpop.eup %8270  ;;  %5892 = vst [vmem:[%s10149_s27 + $0x3b0] sm:$0xff] %v8269_v3  ;;  %8290 = vpow2.f32 %v6896_v14 }
 0x29f   : > { %v8273_v34 = vpop.eup %8272  ;;  %6034 = vst [vmem:[%s10149_s27 + $0x820] sm:$0xff] %v8271_v28  ;;  %8292 = vpow2.f32 %v6758_v63  ;;  %v11563_v63 = vpop.f32.mrb[143].mxu1 }
 0x2a0   : > { %v8275_v24 = vpop.eup %8274  ;;  %5896 = vst [vmem:[%s10149_s27 + $0x3d0] sm:$0xff] %v8273_v34  ;;  %8294 = vpow2.f32 %v6900_v0  ;;  %13022 = vst [vmem:[#allocation5_spill] sm:$0xff] %v11563_v63 }
 0x2a1   : > { %v8277_v25 = vpop.eup %8276  ;;  %v4369_v57 = vadd.f32 1.0, %v8275_v24  ;;  %8296 = vpow2.f32 %v6762_v22  ;;  %v11565_v22 = vpop.f32.mrb[144].mxu0 }
 0x2a2   : > { %v8279_v14 = vpop.eup %8278  ;;  %v4231_v40 = vadd.f32 1.0, %v8277_v25  ;;  %8298 = vpow2.f32 %v6901_v43 }
 0x2a3   : > { %v8281_v52 = vpop.eup %8280  ;;  %8300 = vrcp.f32 %v4369_v57  ;;  %v4373_v3 = vadd.f32 1.0, %v8279_v14 }
 0x2a4   : > { %v8283_v19 = vpop.eup %8282  ;;  %8302 = vrcp.f32 %v4231_v40  ;;  %v4235_v0 = vadd.f32 1.0, %v8281_v52 }
 0x2a5   : > { %v8285_v28 = vpop.eup %8284  ;;  %8304 = vrcp.f32 %v4373_v3  ;;  %v4374_v2 = vadd.f32 1.0, %v8283_v19 }
 0x2a6   : > { %v8287_v34 = vpop.eup %8286  ;;  %8306 = vrcp.f32 %v4235_v0  ;;  %v4236_v24 = vadd.f32 1.0, %v8285_v28  ;;  %v13023_v28 = vld [vmem:[#allocation18_spill] sm:$0xff] }
 0x2a7   : > { %v8289_v59 = vpop.eup %8288  ;;  %8308 = vrcp.f32 %v4374_v2  ;;  %v4378_v25 = vadd.f32 1.0, %v8287_v34  ;;  %v6763_v2 = vmul.f32 -1.442695, %v13023_v28 }
 0x2a8   : > { %v8291_v43 = vpop.eup %8290  ;;  %8310 = vrcp.f32 %v4236_v24  ;;  %v4240_v63 = vadd.f32 1.0, %v8289_v59  ;;  %v6905_v24 = vmul.f32 -1.442695, %v11303_v58  ;;  %v6768_v58 = vmul.f32 -1.442695, %v11311_v12 }
 0x2a9   : > { %v8293_v6 = vpop.eup %8292  ;;  %8312 = vrcp.f32 %v4378_v25  ;;  %v4379_v57 = vadd.f32 1.0, %v8291_v43  ;;  %v6906_v43 = vmul.f32 -1.442695, %v11309_v11  ;;  %v6911_v12 = vmul.f32 -1.442695, %v11323_v55 }
 0x2aa   : > { %v8295_v14 = vpop.eup %8294  ;;  %8314 = vrcp.f32 %v4240_v63  ;;  %v4241_v40 = vadd.f32 1.0, %v8293_v6  ;;  %v6767_v6 = vmul.f32 -1.442695, %v11305_v8  ;;  %v6910_v8 = vmul.f32 -1.442695, %v11315_v26 }
 0x2ab   : > { %v8297_v52 = vpop.eup %8296  ;;  %8316 = vrcp.f32 %v4379_v57  ;;  %v4383_v3 = vadd.f32 1.0, %v8295_v14  ;;  %v11573_v57 = vpop.f32.mrb[144].mxu1 }
 0x2ac   : > { %v8299_v19 = vpop.eup %8298  ;;  %8318 = vrcp.f32 %v4241_v40  ;;  %v4245_v0 = vadd.f32 1.0, %v8297_v52  ;;  %v11577_v40 = vpop.f32.mrb[145].mxu0 }
 0x2ad   : > { %v8301_v34 = vpop.eup %8300  ;;  %8320 = vrcp.f32 %v4383_v3  ;;  %v4384_v59 = vadd.f32 1.0, %v8299_v19  ;;  %v11581_v3 = vpop.f32.mrb[145].mxu1  ;;  %v6772_v19 = vmul.f32 -1.442695, %v11317_v10  ;;  %v6915_v10 = vmul.f32 -1.442695, %v11337_v39 }
 0x2ae   : > { %v8303_v25 = vpop.eup %8302  ;;  %6035 = vst [vmem:[%s10149_s27 + $0x828] sm:$0xff] %v8301_v34  ;;  %8322 = vrcp.f32 %v4245_v0  ;;  %v11585_v0 = vpop.f32.mrb[146].mxu0  ;;  %v6773_v34 = vmul.f32 -1.442695, %v11325_v49  ;;  %v6916_v49 = vmul.f32 -1.442695, %v11341_v37 }
 0x2af   : > { %v8305_v63 = vpop.eup %8304  ;;  %5897 = vst [vmem:[%s10149_s27 + $0x3d8] sm:$0xff] %v8303_v25  ;;  %8324 = vrcp.f32 %v4384_v59  ;;  %v6778_v39 = vmul.f32 -1.442695, %v11343_v13 }
 0x2b0   : > { %v8307_v14 = vpop.eup %8306  ;;  %6039 = vst [vmem:[%s10149_s27 + $0x848] sm:$0xff] %v8305_v63  ;;  %8326 = vpow2.f32 %v6763_v2  ;;  %v11589_v2 = vpop.f32.mrb[146].mxu1 }
 0x2b1   : > { %v8309_v52 = vpop.eup %8308  ;;  %5901 = vst [vmem:[%s10149_s27 + $0x3f8] sm:$0xff] %v8307_v14  ;;  %8328 = vpow2.f32 %v6905_v24  ;;  %v11595_v24 = vpop.f32.mrb[147].mxu0 }
 0x2b2   : > { %v8311_v11 = vpop.eup %8310  ;;  %6040 = vst [vmem:[%s10149_s27 + $0x850] sm:$0xff] %v8309_v52  ;;  %8330 = vpow2.f32 %v6767_v6  ;;  %v11597_v25 = vpop.f32.mrb[147].mxu1  ;;  %v6777_v6 = vmul.f32 -1.442695, %v11339_v32 }
 0x2b3   : > { %v8313_v28 = vpop.eup %8312  ;;  %5902 = vst [vmem:[%s10149_s27 + $0x400] sm:$0xff] %v8311_v11  ;;  %8332 = vpow2.f32 %v6906_v43  ;;  %v11607_v32 = vpop.f32.mrb[148].mxu0 }
 0x2b4   : > { %v8315_v26 = vpop.eup %8314  ;;  %6044 = vst [vmem:[%s10149_s27 + $0x870] sm:$0xff] %v8313_v28  ;;  %8334 = vpow2.f32 %v6768_v58  ;;  %v11609_v11 = vpop.f32.mrb[148].mxu1 }
 0x2b5   : > { %v8317_v59 = vpop.eup %8316  ;;  %5906 = vst [vmem:[%s10149_s27 + $0x420] sm:$0xff] %v8315_v26  ;;  %8336 = vpow2.f32 %v6910_v8  ;;  %v11611_v28 = vpop.f32.mrb[149].mxu0 }
 0x2b6   : > { %v8319_v55 = vpop.eup %8318  ;;  %6045 = vst [vmem:[%s10149_s27 + $0x878] sm:$0xff] %v8317_v59  ;;  %8338 = vpow2.f32 %v6772_v19 }
 0x2b7   : > { %v8321_v63 = vpop.eup %8320  ;;  %5907 = vst [vmem:[%s10149_s27 + $0x428] sm:$0xff] %v8319_v55  ;;  %8340 = vpow2.f32 %v6911_v12  ;;  %v11613_v12 = vpop.f32.mrb[149].mxu1 }
 0x2b8   : > { %v8323_v43 = vpop.eup %8322  ;;  %6049 = vst [vmem:[%s10149_s27 + $0x898] sm:$0xff] %v8321_v63  ;;  %8342 = vpow2.f32 %v6773_v34  ;;  %v11615_v34 = vpop.f32.mrb[150].mxu0 }
 0x2b9   : > { %v8325_v14 = vpop.eup %8324  ;;  %5911 = vst [vmem:[%s10149_s27 + $0x448] sm:$0xff] %v8323_v43  ;;  %8344 = vpow2.f32 %v6915_v10  ;;  %v11617_v59 = vpop.f32.mrb[150].mxu1 }
 0x2ba   : > { %v8327_v58 = vpop.eup %8326  ;;  %6050 = vst [vmem:[%s10149_s27 + $0x8a0] sm:$0xff] %v8325_v14  ;;  %8346 = vpow2.f32 %v6777_v6  ;;  %13024 = vst [vmem:[#allocation6_spill] sm:$0xff] %v11617_v59 }
 0x2bb   : > { %v8329_v52 = vpop.eup %8328  ;;  %v4246_v8 = vadd.f32 1.0, %v8327_v58  ;;  %8348 = vpow2.f32 %v6916_v49 }
 0x2bc   : > { %v8331_v19 = vpop.eup %8330  ;;  %v4388_v37 = vadd.f32 1.0, %v8329_v52  ;;  %8350 = vpow2.f32 %v6778_v39 }
 0x2bd   : > { %v8333_v13 = vpop.eup %8332  ;;  %8352 = vrcp.f32 %v4246_v8  ;;  %v4250_v26 = vadd.f32 1.0, %v8331_v19 }
 0x2be   : > { %v8335_v10 = vpop.eup %8334  ;;  %8354 = vrcp.f32 %v4388_v37  ;;  %v4389_v55 = vadd.f32 1.0, %v8333_v13 }
 0x2bf   : > { %v8337_v6 = vpop.eup %8336  ;;  %8356 = vrcp.f32 %v4250_v26  ;;  %v4251_v63 = vadd.f32 1.0, %v8335_v10 }
 0x2c0   : > { %v8339_v49 = vpop.eup %8338  ;;  %8358 = vrcp.f32 %v4389_v55  ;;  %v4393_v43 = vadd.f32 1.0, %v8337_v6  ;;  %v6920_v6 = vmul.f32 -1.442695, %v11345_v50  ;;  %v6925_v50 = vmul.f32 -1.442695, %v11387_v4 }
 0x2c1   : > { %v8341_v39 = vpop.eup %8340  ;;  %8360 = vrcp.f32 %v4251_v63  ;;  %v4255_v14 = vadd.f32 1.0, %v8339_v49  ;;  %v6788_v4 = vmul.f32 -1.442695, %v11395_v41 }
 0x2c2   : > { %v8343_v58 = vpop.eup %8342  ;;  %8362 = vrcp.f32 %v4393_v43  ;;  %v4394_v52 = vadd.f32 1.0, %v8341_v39  ;;  %v6782_v43 = vmul.f32 -1.442695, %v11360_v48  ;;  %v11627_v48 = vpop.f32.mrb[151].mxu0 }
 0x2c3   : > { %v8345_v8 = vpop.eup %8344  ;;  %8364 = vrcp.f32 %v4255_v14  ;;  %v4256_v19 = vadd.f32 1.0, %v8343_v58  ;;  %v6921_v14 = vmul.f32 -1.442695, %v11371_v61  ;;  %v6787_v61 = vmul.f32 -1.442695, %v11389_v46  ;;  %v13025_v46 = vld [vmem:[#allocation19_spill] sm:$0xff] }
 0x2c4   : > { %v8347_v59 = vpop.eup %8346  ;;  %8366 = vrcp.f32 %v4394_v52  ;;  %v4398_v37 = vadd.f32 1.0, %v8345_v8  ;;  %v11629_v8 = vpop.f32.mrb[151].mxu1 }
 0x2c5   : > { %v8349_v13 = vpop.eup %8348  ;;  %8368 = vrcp.f32 %v4256_v19  ;;  %v4260_v26 = vadd.f32 1.0, %v8347_v59  ;;  %v6783_v59 = vmul.f32 -1.442695, %v11373_v56  ;;  %v6926_v56 = vmul.f32 -1.442695, %v11393_v5  ;;  %v13026_v5 = vld [vmem:[#allocation20_spill] sm:$0xff] }
 0x2c6   : > { %v8351_v10 = vpop.eup %8350  ;;  %8370 = vrcp.f32 %v4398_v37  ;;  %v4399_v55 = vadd.f32 1.0, %v8349_v13  ;;  %v11645_v41 = vpop.f32.mrb[152].mxu1 }
 0x2c7   : > { %v8353_v63 = vpop.eup %8352  ;;  %8372 = vrcp.f32 %v4260_v26  ;;  %v4261_v49 = vadd.f32 1.0, %v8351_v10  ;;  %v6930_v10 = vmul.f32 -1.442695, %v11398_v30  ;;  %v13027_v30 = vld [vmem:[#allocation21_spill] sm:$0xff] }
 0x2c8   : > { %v8355_v39 = vpop.eup %8354  ;;  %5912 = vst [vmem:[%s10149_s27 + $0x450] sm:$0xff] %v8353_v63  ;;  %8374 = vrcp.f32 %v4399_v55 }
 0x2c9   : > { %v8357_v58 = vpop.eup %8356  ;;  %6054 = vst [vmem:[%s10149_s27 + $0x8c0] sm:$0xff] %v8355_v39  ;;  %8376 = vrcp.f32 %v4261_v49  ;;  %v6931_v49 = vmul.f32 -1.442695, %v13026_v5 }
 0x2ca   : > { %v8359_v52 = vpop.eup %8358  ;;  %5916 = vst [vmem:[%s10149_s27 + $0x470] sm:$0xff] %v8357_v58  ;;  %8378 = vpow2.f32 %v6920_v6  ;;  %v6792_v6 = vmul.f32 -1.442695, %v13025_v46 }
 0x2cb   : > { %v8361_v19 = vpop.eup %8360  ;;  %6055 = vst [vmem:[%s10149_s27 + $0x8c8] sm:$0xff] %v8359_v52  ;;  %8380 = vpow2.f32 %v6782_v43  ;;  %v11643_v43 = vpop.f32.mrb[152].mxu0 }
 0x2cc   : > { %v8363_v37 = vpop.eup %8362  ;;  %5917 = vst [vmem:[%s10149_s27 + $0x478] sm:$0xff] %v8361_v19  ;;  %8382 = vpow2.f32 %v6921_v14  ;;  %v6793_v14 = vmul.f32 -1.442695, %v13027_v30  ;;  %v11649_v58 = vpop.f32.mrb[153].mxu0 }
 0x2cd   : > { %v8365_v13 = vpop.eup %8364  ;;  %6059 = vst [vmem:[%s10149_s27 + $0x8e8] sm:$0xff] %v8363_v37  ;;  %8384 = vpow2.f32 %v6783_v59  ;;  %v11651_v59 = vpop.f32.mrb[153].mxu1 }
 0x2ce   : > { %v8367_v26 = vpop.eup %8366  ;;  %5921 = vst [vmem:[%s10149_s27 + $0x498] sm:$0xff] %v8365_v13  ;;  %8386 = vpow2.f32 %v6925_v50  ;;  %v13028_v50 = vld [vmem:[#allocation22_spill] sm:$0xff]  ;;  %v11657_v37 = vpop.f32.mrb[154].mxu1 }
 0x2cf   : > { %v8369_v55 = vpop.eup %8368  ;;  %6060 = vst [vmem:[%s10149_s27 + $0x8f0] sm:$0xff] %v8367_v26  ;;  %8388 = vpow2.f32 %v6787_v61  ;;  %v6935_v19 = vmul.f32 -1.442695, %v13028_v50  ;;  %v11655_v61 = vpop.f32.mrb[154].mxu0 }
 0x2d0   : > { %v8371_v63 = vpop.eup %8370  ;;  %5922 = vst [vmem:[%s10149_s27 + $0x4a0] sm:$0xff] %v8369_v55  ;;  %8390 = vpow2.f32 %v6926_v56  ;;  %v11663_v26 = vpop.f32.mrb[155].mxu1 }
 0x2d1   : > { %v8373_v39 = vpop.eup %8372  ;;  %6064 = vst [vmem:[%s10149_s27 + $0x910] sm:$0xff] %v8371_v63  ;;  %8392 = vpow2.f32 %v6788_v4  ;;  %v11661_v4 = vpop.f32.mrb[155].mxu0  ;;  %13029 = vst [vmem:[#allocation32_spill] sm:$0xff] %v11663_v26 }
 0x2d2   : > { %v8375_v52 = vpop.eup %8374  ;;  %5926 = vst [vmem:[%s10149_s27 + $0x4c0] sm:$0xff] %v8373_v39  ;;  %8394 = vpow2.f32 %v6930_v10  ;;  %v11667_v50 = vpop.f32.mrb[156].mxu1 }
 0x2d3   : > { %v8377_v56 = vpop.eup %8376  ;;  %6065 = vst [vmem:[%s10149_s27 + $0x918] sm:$0xff] %v8375_v52  ;;  %8396 = vpow2.f32 %v6792_v6  ;;  %v11665_v6 = vpop.f32.mrb[156].mxu0  ;;  %13031 = vst [vmem:[#allocation34_spill] sm:$0xff] %v11667_v50 }
 0x2d4   : > { %v8379_v13 = vpop.eup %8378  ;;  %5927 = vst [vmem:[%s10149_s27 + $0x4c8] sm:$0xff] %v8377_v56  ;;  %8398 = vpow2.f32 %v6931_v49  ;;  %13030 = vst [vmem:[#allocation33_spill] sm:$0xff] %v11665_v6  ;;  %v11669_v26 = vpop.f32.mrb[157].mxu0 }
 0x2d5   : > { %v8381_v55 = vpop.eup %8380  ;;  %v4403_v46 = vadd.f32 1.0, %v8379_v13  ;;  %8400 = vpow2.f32 %v6793_v14  ;;  %13032 = vst [vmem:[#allocation35_spill] sm:$0xff] %v11669_v26 }
 0x2d6   : > { %v8383_v10 = vpop.eup %8382  ;;  %v4265_v63 = vadd.f32 1.0, %v8381_v55  ;;  %8402 = vpow2.f32 %v6935_v19 }
 0x2d7   : > { %v8385_v5 = vpop.eup %8384  ;;  %8404 = vrcp.f32 %v4403_v46  ;;  %v4404_v39 = vadd.f32 1.0, %v8383_v10 }
 0x2d8   : > { %v8387_v30 = vpop.eup %8386  ;;  %8406 = vrcp.f32 %v4265_v63  ;;  %v4266_v52 = vadd.f32 1.0, %v8385_v5 }
 0x2d9   : > { %v8389_v49 = vpop.eup %8388  ;;  %8408 = vrcp.f32 %v4404_v39  ;;  %v4408_v56 = vadd.f32 1.0, %v8387_v30 }
 0x2da   : > { %v8391_v13 = vpop.eup %8390  ;;  %8410 = vrcp.f32 %v4266_v52  ;;  %v4270_v14 = vadd.f32 1.0, %v8389_v49  ;;  %v13033_v49 = vld [vmem:[#allocation23_spill] sm:$0xff] }
 0x2db   : > { %v8393_v55 = vpop.eup %8392  ;;  %8412 = vrcp.f32 %v4408_v56  ;;  %v4409_v19 = vadd.f32 1.0, %v8391_v13  ;;  %v6797_v56 = vmul.f32 -1.442695, %v13033_v49 }
 0x2dc   : > { %v8395_v46 = vpop.eup %8394  ;;  %8414 = vrcp.f32 %v4270_v14  ;;  %v4271_v10 = vadd.f32 1.0, %v8393_v55  ;;  %v6936_v55 = vmul.f32 -1.442695, %v11415_v36  ;;  %v6802_v36 = vmul.f32 -1.442695, %v11429_v33 }
 0x2dd   : > { %v8397_v63 = vpop.eup %8396  ;;  %8416 = vrcp.f32 %v4409_v19  ;;  %v4413_v5 = vadd.f32 1.0, %v8395_v46  ;;  %v6798_v46 = vmul.f32 -1.442695, %v11421_v38  ;;  %v6941_v38 = vmul.f32 -1.442695, %v11435_v1 }
 0x2de   : > { %v8399_v6 = vpop.eup %8398  ;;  %8418 = vrcp.f32 %v4271_v10  ;;  %v4275_v50 = vadd.f32 1.0, %v8397_v63  ;;  %v6945_v33 = vmul.f32 -1.442695, %v11449_v18  ;;  %v13036_v18 = vld [vmem:[#allocation26_spill] sm:$0xff] }
 0x2df   : > { %v8401_v39 = vpop.eup %8400  ;;  %8420 = vrcp.f32 %v4413_v5  ;;  %v4414_v30 = vadd.f32 1.0, %v8399_v6  ;;  %v6940_v6 = vmul.f32 -1.442695, %v11425_v21 }
 0x2e0   : > { %v8403_v26 = vpop.eup %8402  ;;  %8422 = vrcp.f32 %v4275_v50  ;;  %v4276_v52 = vadd.f32 1.0, %v8401_v39  ;;  %v11677_v50 = vpop.f32.mrb[157].mxu1 }
 0x2e1   : > { %v8405_v13 = vpop.eup %8404  ;;  %8424 = vrcp.f32 %v4414_v30  ;;  %v4418_v14 = vadd.f32 1.0, %v8403_v26  ;;  %v11681_v26 = vpop.f32.mrb[158].mxu0  ;;  %v6803_v30 = vmul.f32 -1.442695, %v11437_v20  ;;  %v13035_v20 = vld [vmem:[#allocation25_spill] sm:$0xff] }
 0x2e2   : > { %v8407_v19 = vpop.eup %8406  ;;  %6069 = vst [vmem:[%s10149_s27 + $0x938] sm:$0xff] %v8405_v13  ;;  %8426 = vrcp.f32 %v4276_v52  ;;  %v11685_v39 = vpop.f32.mrb[158].mxu1  ;;  %v13034_v13 = vld [vmem:[#allocation24_spill] sm:$0xff] }
 0x2e3   : > { %v8409_v10 = vpop.eup %8408  ;;  %5931 = vst [vmem:[%s10149_s27 + $0x4e8] sm:$0xff] %v8407_v19  ;;  %8428 = vrcp.f32 %v4418_v14  ;;  %v11691_v49 = vpop.f32.mrb[159].mxu0  ;;  %v6807_v14 = vmul.f32 -1.442695, %v13034_v13  ;;  %v6946_v19 = vmul.f32 -1.442695, %v13035_v20 }
 0x2e4   : > { %v8411_v63 = vpop.eup %8410  ;;  %6070 = vst [vmem:[%s10149_s27 + $0x940] sm:$0xff] %v8409_v10  ;;  %8430 = vpow2.f32 %v6797_v56  ;;  %v11693_v56 = vpop.f32.mrb[159].mxu1  ;;  %v6808_v10 = vmul.f32 -1.442695, %v13036_v18 }
 0x2e5   : > { %v8413_v5 = vpop.eup %8412  ;;  %5932 = vst [vmem:[%s10149_s27 + $0x4f0] sm:$0xff] %v8411_v63  ;;  %8432 = vpow2.f32 %v6936_v55  ;;  %v13037_v63 = vld [vmem:[#allocation27_spill] sm:$0xff]  ;;  %v11708_v13 = vpop.f32.mrb[160].mxu1 }
 0x2e6   : > { %v8415_v21 = vpop.eup %8414  ;;  %6074 = vst [vmem:[%s10149_s27 + $0x960] sm:$0xff] %v8413_v5  ;;  %8434 = vpow2.f32 %v6798_v46  ;;  %v6950_v5 = vmul.f32 -1.442695, %v13037_v63  ;;  %13039 = vst [vmem:[#allocation8_spill] sm:$0xff] %v11708_v13 }
 0x2e7   : > { %v8417_v52 = vpop.eup %8416  ;;  %5936 = vst [vmem:[%s10149_s27 + $0x510] sm:$0xff] %v8415_v21  ;;  %8436 = vpow2.f32 %v6940_v6  ;;  %v13038_v21 = vld [vmem:[#allocation28_spill] sm:$0xff] }
 0x2e8   : > { %v8419_v1 = vpop.eup %8418  ;;  %6075 = vst [vmem:[%s10149_s27 + $0x968] sm:$0xff] %v8417_v52  ;;  %8438 = vpow2.f32 %v6802_v36  ;;  %v6812_v52 = vmul.f32 -1.442695, %v13038_v21 }
 0x2e9   : > { %v8421_v55 = vpop.eup %8420  ;;  %5937 = vst [vmem:[%s10149_s27 + $0x518] sm:$0xff] %v8419_v1  ;;  %8440 = vpow2.f32 %v6941_v38  ;;  %v11706_v38 = vpop.f32.mrb[160].mxu0 }
 0x2ea   : > { %v8423_v46 = vpop.eup %8422  ;;  %6079 = vst [vmem:[%s10149_s27 + $0x988] sm:$0xff] %v8421_v55  ;;  %8442 = vpow2.f32 %v6803_v30  ;;  %v11711_v55 = vpop.f32.mrb[161].mxu0 }
 0x2eb   : > { %v8425_v6 = vpop.eup %8424  ;;  %5941 = vst [vmem:[%s10149_s27 + $0x538] sm:$0xff] %v8423_v46  ;;  %8444 = vpow2.f32 %v6945_v33  ;;  %13040 = vst [vmem:[#allocation7_spill] sm:$0xff] %v11711_v55  ;;  %v11713_v33 = vpop.f32.mrb[161].mxu1 }
 0x2ec   : > { %v8427_v36 = vpop.eup %8426  ;;  %6080 = vst [vmem:[%s10149_s27 + $0x990] sm:$0xff] %v8425_v6  ;;  %8446 = vpow2.f32 %v6807_v14  ;;  %13041 = vst [vmem:[#allocation9_spill] sm:$0xff] %v11713_v33  ;;  %v11715_v14 = vpop.f32.mrb[162].mxu0 }
 0x2ed   : > { %v8429_v1 = vpop.eup %8428  ;;  %5942 = vst [vmem:[%s10149_s27 + $0x540] sm:$0xff] %v8427_v36  ;;  %8448 = vpow2.f32 %v6946_v19  ;;  %13042 = vst [vmem:[#allocation10_spill] sm:$0xff] %v11715_v14  ;;  %v11717_v18 = vpop.f32.mrb[162].mxu1 }
 0x2ee   : > { %v8431_v30 = vpop.eup %8430  ;;  %6084 = vst [vmem:[%s10149_s27 + $0x9b0] sm:$0xff] %v8429_v1  ;;  %8450 = vpow2.f32 %v6808_v10  ;;  %13043 = vst [vmem:[#allocation11_spill] sm:$0xff] %v11717_v18  ;;  %v11719_v63 = vpop.f32.mrb[163].mxu0 }
 0x2ef   : > { %v8433_v20 = vpop.eup %8432  ;;  %v4280_v46 = vadd.f32 1.0, %v8431_v30  ;;  %8452 = vpow2.f32 %v6950_v5  ;;  %13044 = vst [vmem:[#allocation12_spill] sm:$0xff] %v11719_v63  ;;  %v11721_v10 = vpop.f32.mrb[163].mxu1 }
 0x2f0   : > { %v8435_v6 = vpop.eup %8434  ;;  %v4419_v19 = vadd.f32 1.0, %v8433_v20  ;;  %8454 = vpow2.f32 %v6812_v52 }
 0x2f1   : > { %v8437_v36 = vpop.eup %8436  ;;  %8456 = vrcp.f32 %v4280_v46  ;;  %v4281_v21 = vadd.f32 1.0, %v8435_v6 }
 0x2f2   : > { %v8439_v1 = vpop.eup %8438  ;;  %8458 = vrcp.f32 %v4419_v19  ;;  %v4423_v33 = vadd.f32 1.0, %v8437_v36 }
 0x2f3   : > { %v8441_v55 = vpop.eup %8440  ;;  %8460 = vrcp.f32 %v4281_v21  ;;  %v4285_v5 = vadd.f32 1.0, %v8439_v1 }
 0x2f4   : > { %v8443_v30 = vpop.eup %8442  ;;  %8462 = vrcp.f32 %v4423_v33  ;;  %v4424_v14 = vadd.f32 1.0, %v8441_v55  ;;  %v6951_v33 = vmul.f32 -1.442695, %v11461_v54  ;;  %v6956_v54 = vmul.f32 -1.442695, %v11489_v15 }
 0x2f5   : > { %v8445_v18 = vpop.eup %8444  ;;  %8464 = vrcp.f32 %v4285_v5  ;;  %v4286_v20 = vadd.f32 1.0, %v8443_v30  ;;  %v6961_v15 = vmul.f32 -1.442695, %v11502_v45  ;;  %v13045_v45 = vld [vmem:[#allocation29_spill] sm:$0xff] }
 0x2f6   : > { %v8447_v52 = vpop.eup %8446  ;;  %8466 = vrcp.f32 %v4424_v14  ;;  %v4428_v63 = vadd.f32 1.0, %v8445_v18  ;;  %v6813_v18 = vmul.f32 -1.442695, %v11469_v29  ;;  %v6818_v29 = vmul.f32 -1.442695, %v11491_v31  ;;  %v11741_v31 = vpop.f32.mrb[164].mxu1 }
 0x2f7   : > { %v8449_v13 = vpop.eup %8448  ;;  %8468 = vrcp.f32 %v4286_v20  ;;  %v4290_v46 = vadd.f32 1.0, %v8447_v52  ;;  %v6817_v20 = vmul.f32 -1.442695, %v11485_v42  ;;  %v6822_v42 = vmul.f32 -1.442695, %v11497_v27 }
 0x2f8   : > { %v8451_v6 = vpop.eup %8450  ;;  %8470 = vrcp.f32 %v4428_v63  ;;  %v4429_v19 = vadd.f32 1.0, %v8449_v13  ;;  %v6955_v13 = vmul.f32 -1.442695, %v11483_v44  ;;  %v6960_v44 = vmul.f32 -1.442695, %v11495_v9 }
 0x2f9   : > { %v8453_v36 = vpop.eup %8452  ;;  %8472 = vrcp.f32 %v4290_v46  ;;  %v4291_v21 = vadd.f32 1.0, %v8451_v6  ;;  %v6823_v9 = vmul.f32 -1.442695, %v11504_v51 }
 0x2fa   : > { %v8455_v1 = vpop.eup %8454  ;;  %8474 = vrcp.f32 %v4429_v19  ;;  %v4433_v55 = vadd.f32 1.0, %v8453_v36 }
 0x2fb   : > { %v8457_v5 = vpop.eup %8456  ;;  %8476 = vrcp.f32 %v4291_v21  ;;  %v4295_v14 = vadd.f32 1.0, %v8455_v1  ;;  %v11739_v21 = vpop.f32.mrb[164].mxu0 }
 0x2fc   : > { %v8459_v30 = vpop.eup %8458  ;;  %5946 = vst [vmem:[%s10149_s27 + $0x560] sm:$0xff] %v8457_v5  ;;  %8478 = vrcp.f32 %v4433_v55  ;;  %v11745_v55 = vpop.f32.mrb[165].mxu0  ;;  %v6965_v5 = vmul.f32 -1.442695, %v13045_v45 }
 0x2fd   : > { %v8461_v63 = vpop.eup %8460  ;;  %6085 = vst [vmem:[%s10149_s27 + $0x9b8] sm:$0xff] %v8459_v30  ;;  %8480 = vrcp.f32 %v4295_v14  ;;  %v11751_v14 = vpop.f32.mrb[166].mxu0 }
 0x2fe   : > { %v8463_v52 = vpop.eup %8462  ;;  %5947 = vst [vmem:[%s10149_s27 + $0x568] sm:$0xff] %v8461_v63  ;;  %8482 = vpow2.f32 %v6951_v33  ;;  %v11747_v33 = vpop.f32.mrb[165].mxu1 }
 0x2ff   : > { %v8465_v46 = vpop.eup %8464  ;;  %6089 = vst [vmem:[%s10149_s27 + $0x9d8] sm:$0xff] %v8463_v52  ;;  %8484 = vpow2.f32 %v6813_v18  ;;  %v11753_v18 = vpop.f32.mrb[166].mxu1 }
 0x300   : > { %v8467_v6 = vpop.eup %8466  ;;  %5951 = vst [vmem:[%s10149_s27 + $0x588] sm:$0xff] %v8465_v46  ;;  %8486 = vpow2.f32 %v6955_v13  ;;  %v13046_v13 = vld [vmem:[#allocation2_spill] sm:$0xff]  ;;  %v11761_v46 = vpop.f32.mrb[167].mxu1 }
 0x301   : > { %v8469_v19 = vpop.eup %8468  ;;  %6090 = vst [vmem:[%s10149_s27 + $0x9e0] sm:$0xff] %v8467_v6  ;;  %8488 = vpow2.f32 %v6817_v20  ;;  %v6827_v51 = vmul.f32 -1.442695, %v13046_v13  ;;  %v13047_v20 = vld [vmem:[#allocation3_spill] sm:$0xff] }
 0x302   : > { %v8471_v36 = vpop.eup %8470  ;;  %5952 = vst [vmem:[%s10149_s27 + $0x590] sm:$0xff] %v8469_v19  ;;  %8490 = vpow2.f32 %v6956_v54  ;;  %v6966_v52 = vmul.f32 -1.442695, %v13047_v20  ;;  %v11759_v54 = vpop.f32.mrb[167].mxu0 }
 0x303   : > { %v8473_v1 = vpop.eup %8472  ;;  %6094 = vst [vmem:[%s10149_s27 + $0xa00] sm:$0xff] %v8471_v36  ;;  %8492 = vpow2.f32 %v6818_v29 }
 0x304   : > { %v8475_v27 = vpop.eup %8474  ;;  %5956 = vst [vmem:[%s10149_s27 + $0x5b0] sm:$0xff] %v8473_v1  ;;  %8494 = vpow2.f32 %v6960_v44  ;;  %v11765_v1 = vpop.f32.mrb[168].mxu1 }
 0x305   : > { %v8477_v30 = vpop.eup %8476  ;;  %6095 = vst [vmem:[%s10149_s27 + $0xa08] sm:$0xff] %v8475_v27  ;;  %8496 = vpow2.f32 %v6822_v42 }
 0x306   : > { %v8479_v63 = vpop.eup %8478  ;;  %5957 = vst [vmem:[%s10149_s27 + $0x5b8] sm:$0xff] %v8477_v30  ;;  %8498 = vpow2.f32 %v6961_v15  ;;  %v11767_v15 = vpop.f32.mrb[168].mxu0 }
 0x307   : > { %v8481_v29 = vpop.eup %8480  ;;  %6099 = vst [vmem:[%s10149_s27 + $0xa28] sm:$0xff] %v8479_v63  ;;  %8500 = vpow2.f32 %v6823_v9  ;;  %v11769_v30 = vpop.f32.mrb[169].mxu1 }
 0x308   : > { %v8483_v6 = vpop.eup %8482  ;;  %5961 = vst [vmem:[%s10149_s27 + $0x5d8] sm:$0xff] %v8481_v29  ;;  %8502 = vpow2.f32 %v6965_v5  ;;  %13048 = vst [vmem:[#allocation13_spill] sm:$0xff] %v11769_v30  ;;  %v11771_v13 = vpop.f32.mrb[169].mxu0 }
 0x309   : > { %v8485_v44 = vpop.eup %8484  ;;  %v4434_v19 = vadd.f32 1.0, %v8483_v6  ;;  %8504 = vpow2.f32 %v6827_v51  ;;  %13049 = vst [vmem:[#allocation14_spill] sm:$0xff] %v11771_v13  ;;  %v11773_v63 = vpop.f32.mrb[170].mxu1 }
 0x30a   : > { %v8487_v42 = vpop.eup %8486  ;;  %v4296_v36 = vadd.f32 1.0, %v8485_v44  ;;  %8506 = vpow2.f32 %v6966_v52  ;;  %13050 = vst [vmem:[#allocation15_spill] sm:$0xff] %v11773_v63 }
 0x30b   : > { %v8489_v27 = vpop.eup %8488  ;;  %8508 = vrcp.f32 %v4434_v19  ;;  %v4438_v45 = vadd.f32 1.0, %v8487_v42 }
 0x30c   : > { %v8491_v9 = vpop.eup %8490  ;;  %8510 = vrcp.f32 %v4296_v36  ;;  %v4300_v5 = vadd.f32 1.0, %v8489_v27 }
 0x30d   : > { %v8493_v51 = vpop.eup %8492  ;;  %8512 = vrcp.f32 %v4438_v45  ;;  %v4439_v20 = vadd.f32 1.0, %v8491_v9 }
 0x30e   : > { %v8495_v52 = vpop.eup %8494  ;;  %8514 = vrcp.f32 %v4300_v5  ;;  %v4301_v29 = vadd.f32 1.0, %v8493_v51  ;;  %v13051_v51 = vld [vmem:[#allocation30_spill] sm:$0xff] }
 0x30f   : > { %v8497_v6 = vpop.eup %8496  ;;  %8516 = vrcp.f32 %v4439_v20  ;;  %v4443_v44 = vadd.f32 1.0, %v8495_v52  ;;  %v6828_v20 = vmul.f32 -1.442695, %v13051_v51 }
 0x310   : > { %v8499_v19 = vpop.eup %8498  ;;  %8518 = vrcp.f32 %v4301_v29  ;;  %v4305_v42 = vadd.f32 1.0, %v8497_v6  ;;  %v6970_v6 = vmul.f32 -1.442695, %v11521_v17 }
 0x311   : > { %v8501_v30 = vpop.eup %8500  ;;  %8520 = vrcp.f32 %v4443_v44  ;;  %v4444_v13 = vadd.f32 1.0, %v8499_v19 }
 0x312   : > { %v8503_v36 = vpop.eup %8502  ;;  %8522 = vrcp.f32 %v4305_v42  ;;  %v4306_v27 = vadd.f32 1.0, %v8501_v30  ;;  %v6832_v30 = vmul.f32 -1.442695, %v11525_v23  ;;  %v6975_v23 = vmul.f32 -1.442695, %v11547_v35 }
 0x313   : > { %v8505_v63 = vpop.eup %8504  ;;  %8524 = vrcp.f32 %v4444_v13  ;;  %v4448_v45 = vadd.f32 1.0, %v8503_v36  ;;  %v6971_v13 = vmul.f32 -1.442695, %v11531_v16  ;;  %v6833_v36 = vmul.f32 -1.442695, %v11533_v47 }
 0x314   : > { %v8507_v9 = vpop.eup %8506  ;;  %8526 = vrcp.f32 %v4306_v27  ;;  %v4310_v5 = vadd.f32 1.0, %v8505_v63  ;;  %v11781_v63 = vpop.f32.mrb[170].mxu0  ;;  %v6976_v47 = vmul.f32 -1.442695, %v11552_v53  ;;  %v6838_v35 = vmul.f32 -1.442695, %v11554_v62 }
 0x315   : > { %v8509_v52 = vpop.eup %8508  ;;  %8528 = vrcp.f32 %v4448_v45  ;;  %v4449_v29 = vadd.f32 1.0, %v8507_v9  ;;  %v11787_v27 = vpop.f32.mrb[171].mxu1  ;;  %v6837_v9 = vmul.f32 -1.442695, %v11549_v7  ;;  %v13052_v7 = vld [vmem:[#allocation31_spill] sm:$0xff]  ;;  %v13053_v53 = vld [vmem:[#allocation4_spill] sm:$0xff] }
 0x316   : > { %v8511_v44 = vpop.eup %8510  ;;  %6100 = vst [vmem:[%s10149_s27 + $0xa30] sm:$0xff] %v8509_v52  ;;  %8530 = vrcp.f32 %v4310_v5  ;;  %v11789_v45 = vpop.f32.mrb[171].mxu0  ;;  %v6980_v52 = vmul.f32 -1.442695, %v11557_v60  ;;  %v13054_v60 = vld [vmem:[#allocation5_spill] sm:$0xff] }
 0x317   : > { %v8513_v19 = vpop.eup %8512  ;;  %5962 = vst [vmem:[%s10149_s27 + $0x5e0] sm:$0xff] %v8511_v44  ;;  %8532 = vrcp.f32 %v4449_v29  ;;  %v11805_v62 = vpop.f32.mrb[172].mxu0 }
 0x318   : > { %v8515_v42 = vpop.eup %8514  ;;  %6104 = vst [vmem:[%s10149_s27 + $0xa50] sm:$0xff] %v8513_v19  ;;  %8534 = vpow2.f32 %v6828_v20  ;;  %v11803_v19 = vpop.f32.mrb[172].mxu1 }
 0x319   : > { %v8517_v17 = vpop.eup %8516  ;;  %5966 = vst [vmem:[%s10149_s27 + $0x600] sm:$0xff] %v8515_v42  ;;  %8536 = vpow2.f32 %v6970_v6  ;;  %v6842_v6 = vmul.f32 -1.442695, %v13052_v7  ;;  %v6843_v42 = vmul.f32 -1.442695, %v13054_v60 }
 0x31a   : > { %v8519_v16 = vpop.eup %8518  ;;  %6105 = vst [vmem:[%s10149_s27 + $0xa58] sm:$0xff] %v8517_v17  ;;  %8538 = vpow2.f32 %v6832_v30  ;;  %v6981_v30 = vmul.f32 -1.442695, %v13053_v53  ;;  %v11811_v17 = vpop.f32.mrb[173].mxu0 }
 0x31b   : > { %v8521_v5 = vpop.eup %8520  ;;  %5967 = vst [vmem:[%s10149_s27 + $0x608] sm:$0xff] %v8519_v16  ;;  %8540 = vpow2.f32 %v6971_v13 }
 0x31c   : > { %v8523_v51 = vpop.eup %8522  ;;  %6109 = vst [vmem:[%s10149_s27 + $0xa78] sm:$0xff] %v8521_v5  ;;  %8542 = vpow2.f32 %v6833_v36  ;;  %v11809_v36 = vpop.f32.mrb[173].mxu1 }
 0x31d   : > { %v8525_v20 = vpop.eup %8524  ;;  %5971 = vst [vmem:[%s10149_s27 + $0x628] sm:$0xff] %v8523_v51  ;;  %8544 = vpow2.f32 %v6975_v23  ;;  %v11814_v16 = vpop.f32.mrb[174].mxu1 }
 0x31e   : > { %v8527_v29 = vpop.eup %8526  ;;  %6110 = vst [vmem:[%s10149_s27 + $0xa80] sm:$0xff] %v8525_v20  ;;  %8546 = vpow2.f32 %v6837_v9  ;;  %v11816_v9 = vpop.f32.mrb[174].mxu0 }
 0x31f   : > { %v8529_v44 = vpop.eup %8528  ;;  %5972 = vst [vmem:[%s10149_s27 + $0x630] sm:$0xff] %v8527_v29  ;;  %8548 = vpow2.f32 %v6976_v47  ;;  %v11821_v20 = vpop.f32.mrb[175].mxu0 }
 0x320   : > { %v8531_v13 = vpop.eup %8530  ;;  %6114 = vst [vmem:[%s10149_s27 + $0xaa0] sm:$0xff] %v8529_v44  ;;  %8550 = vpow2.f32 %v6838_v35  ;;  %v11819_v35 = vpop.f32.mrb[175].mxu1  ;;  %13056 = vst [vmem:[#allocation17_spill] sm:$0xff] %v11821_v20 }
 0x321   : > { %v8533_v23 = vpop.eup %8532  ;;  %5976 = vst [vmem:[%s10149_s27 + $0x650] sm:$0xff] %v8531_v13  ;;  %8552 = vpow2.f32 %v6980_v52  ;;  %13055 = vst [vmem:[#allocation16_spill] sm:$0xff] %v11819_v35 }
 0x322   : > { %v8535_v5 = vpop.eup %8534  ;;  %6115 = vst [vmem:[%s10149_s27 + $0xaa8] sm:$0xff] %v8533_v23  ;;  %8554 = vpow2.f32 %v6842_v6  ;;  %v11823_v6 = vpop.f32.mrb[176].mxu1 }
 0x323   : > { %v8537_v47 = vpop.eup %8536  ;;  %v4311_v51 = vadd.f32 1.0, %v8535_v5  ;;  %8556 = vpow2.f32 %v6981_v30  ;;  %13057 = vst [vmem:[#allocation18_spill] sm:$0xff] %v11823_v6  ;;  %v11825_v5 = vpop.f32.mrb[176].mxu0 }
 0x324   : > { %v8539_v29 = vpop.eup %8538  ;;  %v4453_v7 = vadd.f32 1.0, %v8537_v47  ;;  %8558 = vpow2.f32 %v6843_v42  ;;  %13058 = vst [vmem:[#allocation19_spill] sm:$0xff] %v11825_v5 }
 0x325   : > { %v8541_v44 = vpop.eup %8540  ;;  %8560 = vrcp.f32 %v4311_v51  ;;  %v4315_v52 = vadd.f32 1.0, %v8539_v29 }
 0x326   : > { %v8543_v53 = vpop.eup %8542  ;;  %8562 = vrcp.f32 %v4453_v7  ;;  %v4454_v13 = vadd.f32 1.0, %v8541_v44 }
 0x327   : > { %v8545_v60 = vpop.eup %8544  ;;  %8564 = vrcp.f32 %v4315_v52  ;;  %v4316_v23 = vadd.f32 1.0, %v8543_v53 }
 0x328   : > { %v8547_v30 = vpop.eup %8546  ;;  %8566 = vrcp.f32 %v4454_v13  ;;  %v4458_v35 = vadd.f32 1.0, %v8545_v60  ;;  %v6985_v60 = vmul.f32 -1.442695, %v11565_v22  ;;  %v6990_v22 = vmul.f32 -1.442695, %v11585_v0 }
 0x329   : > { %v8549_v20 = vpop.eup %8548  ;;  %8568 = vrcp.f32 %v4316_v23  ;;  %v4320_v47 = vadd.f32 1.0, %v8547_v30 }
 0x32a   : > { %v8551_v42 = vpop.eup %8550  ;;  %8570 = vrcp.f32 %v4458_v35  ;;  %v4459_v51 = vadd.f32 1.0, %v8549_v20  ;;  %v6847_v20 = vmul.f32 -1.442695, %v11573_v57  ;;  %v11837_v57 = vpop.f32.mrb[177].mxu0 }
 0x32b   : > { %v8553_v29 = vpop.eup %8552  ;;  %8572 = vrcp.f32 %v4320_v47  ;;  %v4321_v7 = vadd.f32 1.0, %v8551_v42  ;;  %v6986_v47 = vmul.f32 -1.442695, %v11577_v40  ;;  %v6852_v40 = vmul.f32 -1.442695, %v11589_v2 }
 0x32c   : > { %v8555_v44 = vpop.eup %8554  ;;  %8574 = vrcp.f32 %v4459_v51  ;;  %v4463_v52 = vadd.f32 1.0, %v8553_v29  ;;  %v6848_v51 = vmul.f32 -1.442695, %v11581_v3  ;;  %v6991_v3 = vmul.f32 -1.442695, %v11595_v24 }
 0x32d   : > { %v8557_v53 = vpop.eup %8556  ;;  %8576 = vrcp.f32 %v4321_v7  ;;  %v4325_v5 = vadd.f32 1.0, %v8555_v44  ;;  %v6995_v2 = vmul.f32 -1.442695, %v11607_v32  ;;  %v6858_v32 = vmul.f32 -1.442695, %v11613_v12 }
 0x32e   : > { %v8559_v6 = vpop.eup %8558  ;;  %8578 = vrcp.f32 %v4463_v52  ;;  %v4464_v13 = vadd.f32 1.0, %v8557_v53  ;;  %v11845_v52 = vpop.f32.mrb[178].mxu0  ;;  %v6853_v53 = vmul.f32 -1.442695, %v11597_v25  ;;  %v6996_v25 = vmul.f32 -1.442695, %v11611_v28 }
 0x32f   : > { %v8561_v23 = vpop.eup %8560  ;;  %8580 = vrcp.f32 %v4325_v5  ;;  %v4326_v35 = vadd.f32 1.0, %v8559_v6  ;;  %v11835_v6 = vpop.f32.mrb[177].mxu1 }
 0x330   : > { %v8563_v30 = vpop.eup %8562  ;;  %5977 = vst [vmem:[%s10149_s27 + $0x658] sm:$0xff] %v8561_v23  ;;  %8582 = vrcp.f32 %v4464_v13  ;;  %v11843_v44 = vpop.f32.mrb[178].mxu1 }
 0x331   : > { %v8565_v42 = vpop.eup %8564  ;;  %6119 = vst [vmem:[%s10149_s27 + $0xac8] sm:$0xff] %v8563_v30  ;;  %8584 = vrcp.f32 %v4326_v35  ;;  %v11853_v24 = vpop.f32.mrb[179].mxu0  ;;  %v6857_v35 = vmul.f32 -1.442695, %v11609_v11 }
 0x332   : > { %v8567_v29 = vpop.eup %8566  ;;  %5981 = vst [vmem:[%s10149_s27 + $0x678] sm:$0xff] %v8565_v42  ;;  %8586 = vpow2.f32 %v6985_v60  ;;  %v11851_v60 = vpop.f32.mrb[179].mxu1  ;;  %v7000_v42 = vmul.f32 -1.442695, %v11615_v34 }
 0x333   : > { %v8569_v5 = vpop.eup %8568  ;;  %6120 = vst [vmem:[%s10149_s27 + $0xad0] sm:$0xff] %v8567_v29  ;;  %8588 = vpow2.f32 %v6847_v20  ;;  %v11865_v29 = vpop.f32.mrb[180].mxu1 }
 0x334   : > { %v8571_v7 = vpop.eup %8570  ;;  %5982 = vst [vmem:[%s10149_s27 + $0x680] sm:$0xff] %v8569_v5  ;;  %8590 = vpow2.f32 %v6986_v47 }
 0x335   : > { %v8573_v0 = vpop.eup %8572  ;;  %6124 = vst [vmem:[%s10149_s27 + $0xaf0] sm:$0xff] %v8571_v7  ;;  %8592 = vpow2.f32 %v6848_v51 }
 0x336   : > { %v8575_v13 = vpop.eup %8574  ;;  %5986 = vst [vmem:[%s10149_s27 + $0x6a0] sm:$0xff] %v8573_v0  ;;  %8594 = vpow2.f32 %v6990_v22  ;;  %v11867_v22 = vpop.f32.mrb[180].mxu0 }
 0x337   : > { %v8577_v23 = vpop.eup %8576  ;;  %6125 = vst [vmem:[%s10149_s27 + $0xaf8] sm:$0xff] %v8575_v13  ;;  %8596 = vpow2.f32 %v6852_v40  ;;  %v11869_v40 = vpop.f32.mrb[181].mxu1 }
 0x338   : > { %v8579_v20 = vpop.eup %8578  ;;  %5987 = vst [vmem:[%s10149_s27 + $0x6a8] sm:$0xff] %v8577_v23  ;;  %8598 = vpow2.f32 %v6991_v3  ;;  %v11871_v12 = vpop.f32.mrb[181].mxu0 }
 0x339   : > { %v8581_v30 = vpop.eup %8580  ;;  %6129 = vst [vmem:[%s10149_s27 + $0xb18] sm:$0xff] %v8579_v20  ;;  %8600 = vpow2.f32 %v6853_v53  ;;  %v11873_v34 = vpop.f32.mrb[182].mxu1 }
 0x33a   : > { %v8583_v47 = vpop.eup %8582  ;;  %5991 = vst [vmem:[%s10149_s27 + $0x6c8] sm:$0xff] %v8581_v30  ;;  %8602 = vpow2.f32 %v6995_v2  ;;  %v11875_v0 = vpop.f32.mrb[182].mxu0 }
 0x33b   : > { %v8585_v51 = vpop.eup %8584  ;;  %6130 = vst [vmem:[%s10149_s27 + $0xb20] sm:$0xff] %v8583_v47  ;;  %8604 = vpow2.f32 %v6857_v35  ;;  %v11877_v2 = vpop.f32.mrb[183].mxu1 }
 0x33c   : > { %v8587_v11 = vpop.eup %8586  ;;  %5992 = vst [vmem:[%s10149_s27 + $0x6d0] sm:$0xff] %v8585_v51  ;;  %8606 = vpow2.f32 %v6996_v25 }
 0x33d   : > { %v8589_v28 = vpop.eup %8588  ;;  %v4468_v5 = vadd.f32 1.0, %v8587_v11  ;;  %8608 = vpow2.f32 %v6858_v32 }
 0x33e   : > { %v8591_v7 = vpop.eup %8590  ;;  %v4330_v3 = vadd.f32 1.0, %v8589_v28  ;;  %8610 = vpow2.f32 %v7000_v42 }
 0x33f   : > { %v8593_v53 = vpop.eup %8592  ;;  %8612 = vrcp.f32 %v4468_v5  ;;  %v4469_v13 = vadd.f32 1.0, %v8591_v7 }
 0x340   : > { %v8595_v23 = vpop.eup %8594  ;;  %8614 = vrcp.f32 %v4330_v3  ;;  %v4331_v35 = vadd.f32 1.0, %v8593_v53 }
 0x341   : > { %v8597_v20 = vpop.eup %8596  ;;  %8616 = vrcp.f32 %v4469_v13  ;;  %v4473_v25 = vadd.f32 1.0, %v8595_v23 }
 0x342   : > { %v8599_v30 = vpop.eup %8598  ;;  %8618 = vrcp.f32 %v4331_v35  ;;  %v4335_v32 = vadd.f32 1.0, %v8597_v20  ;;  %v13059_v20 = vld [vmem:[#allocation6_spill] sm:$0xff] }
 0x343   : > { %v8601_v47 = vpop.eup %8600  ;;  %8620 = vrcp.f32 %v4473_v25  ;;  %v4474_v42 = vadd.f32 1.0, %v8599_v30  ;;  %v6862_v25 = vmul.f32 -1.442695, %v13059_v20 }
 0x344   : > { %v8603_v51 = vpop.eup %8602  ;;  %8622 = vrcp.f32 %v4335_v32  ;;  %v4336_v11 = vadd.f32 1.0, %v8601_v47  ;;  %v7001_v47 = vmul.f32 -1.442695, %v11627_v48  ;;  %v6867_v48 = vmul.f32 -1.442695, %v11645_v41 }
 0x345   : > { %v8605_v28 = vpop.eup %8604  ;;  %8624 = vrcp.f32 %v4474_v42  ;;  %v4478_v5 = vadd.f32 1.0, %v8603_v51  ;;  %v6863_v51 = vmul.f32 -1.442695, %v11629_v8  ;;  %v7006_v8 = vmul.f32 -1.442695, %v11649_v58 }
 0x346   : > { %v8607_v7 = vpop.eup %8606  ;;  %8626 = vrcp.f32 %v4336_v11  ;;  %v4340_v3 = vadd.f32 1.0, %v8605_v28  ;;  %v7005_v28 = vmul.f32 -1.442695, %v11643_v43  ;;  %v6872_v41 = vmul.f32 -1.442695, %v11657_v37 }
 0x347   : > { %v8609_v53 = vpop.eup %8608  ;;  %8628 = vrcp.f32 %v4478_v5  ;;  %v4479_v13 = vadd.f32 1.0, %v8607_v7  ;;  %v11885_v5 = vpop.f32.mrb[183].mxu0  ;;  %v7011_v58 = vmul.f32 -1.442695, %v11661_v4  ;;  %v13061_v4 = vld [vmem:[#allocation33_spill] sm:$0xff] }
 0x348   : > { %v8611_v23 = vpop.eup %8610  ;;  %8630 = vrcp.f32 %v4340_v3  ;;  %v4341_v35 = vadd.f32 1.0, %v8609_v53 }
 0x349   : > { %v8613_v30 = vpop.eup %8612  ;;  %8632 = vrcp.f32 %v4479_v13  ;;  %v4483_v32 = vadd.f32 1.0, %v8611_v23  ;;  %v6868_v13 = vmul.f32 -1.442695, %v11651_v59  ;;  %v7010_v23 = vmul.f32 -1.442695, %v11655_v61  ;;  %v11901_v59 = vpop.f32.mrb[184].mxu0 }
 0x34a   : > { %v8615_v42 = vpop.eup %8614  ;;  %6134 = vst [vmem:[%s10149_s27 + $0xb40] sm:$0xff] %v8613_v30  ;;  %8634 = vrcp.f32 %v4341_v35  ;;  %v13060_v61 = vld [vmem:[#allocation32_spill] sm:$0xff] }
 0x34b   : > { %v8617_v11 = vpop.eup %8616  ;;  %5996 = vst [vmem:[%s10149_s27 + $0x6f0] sm:$0xff] %v8615_v42  ;;  %8636 = vrcp.f32 %v4483_v32  ;;  %v6873_v32 = vmul.f32 -1.442695, %v13060_v61  ;;  %v11907_v42 = vpop.f32.mrb[185].mxu0 }
 0x34c   : > { %v8619_v7 = vpop.eup %8618  ;;  %6135 = vst [vmem:[%s10149_s27 + $0xb48] sm:$0xff] %v8617_v11  ;;  %8638 = vpow2.f32 %v6862_v25  ;;  %v11899_v25 = vpop.f32.mrb[184].mxu1 }
 0x34d   : > { %v8621_v3 = vpop.eup %8620  ;;  %5997 = vst [vmem:[%s10149_s27 + $0x6f8] sm:$0xff] %v8619_v7  ;;  %8640 = vpow2.f32 %v7001_v47  ;;  %v11905_v47 = vpop.f32.mrb[185].mxu1 }
 0x34e   : > { %v8623_v53 = vpop.eup %8622  ;;  %6139 = vst [vmem:[%s10149_s27 + $0xb68] sm:$0xff] %v8621_v3  ;;  %8642 = vpow2.f32 %v6863_v51  ;;  %v7015_v51 = vmul.f32 -1.442695, %v13061_v4  ;;  %v11911_v11 = vpop.f32.mrb[186].mxu1 }
 0x34f   : > { %v8625_v43 = vpop.eup %8624  ;;  %6001 = vst [vmem:[%s10149_s27 + $0x718] sm:$0xff] %v8623_v53  ;;  %8644 = vpow2.f32 %v7005_v28  ;;  %v11913_v28 = vpop.f32.mrb[186].mxu0 }
 0x350   : > { %v8627_v35 = vpop.eup %8626  ;;  %6140 = vst [vmem:[%s10149_s27 + $0xb70] sm:$0xff] %v8625_v43  ;;  %8646 = vpow2.f32 %v6867_v48  ;;  %v13062_v48 = vld [vmem:[#allocation34_spill] sm:$0xff]  ;;  %v11918_v53 = vpop.f32.mrb[187].mxu1 }
 0x351   : > { %v8629_v20 = vpop.eup %8628  ;;  %6002 = vst [vmem:[%s10149_s27 + $0x720] sm:$0xff] %v8627_v35  ;;  %8648 = vpow2.f32 %v7006_v8  ;;  %v6877_v3 = vmul.f32 -1.442695, %v13062_v48 }
 0x352   : > { %v8631_v30 = vpop.eup %8630  ;;  %6144 = vst [vmem:[%s10149_s27 + $0xb90] sm:$0xff] %v8629_v20  ;;  %8650 = vpow2.f32 %v6868_v13  ;;  %v11920_v13 = vpop.f32.mrb[187].mxu0 }
 0x353   : > { %v8633_v37 = vpop.eup %8632  ;;  %6006 = vst [vmem:[%s10149_s27 + $0x740] sm:$0xff] %v8631_v30  ;;  %8652 = vpow2.f32 %v7010_v23  ;;  %v11925_v4 = vpop.f32.mrb[188].mxu0 }
 0x354   : > { %v8635_v7 = vpop.eup %8634  ;;  %6145 = vst [vmem:[%s10149_s27 + $0xb98] sm:$0xff] %v8633_v37  ;;  %8654 = vpow2.f32 %v6872_v41  ;;  %v11923_v37 = vpop.f32.mrb[188].mxu1  ;;  %13064 = vst [vmem:[#allocation21_spill] sm:$0xff] %v11925_v4 }
 0x355   : > { %v8637_v8 = vpop.eup %8636  ;;  %6007 = vst [vmem:[%s10149_s27 + $0x748] sm:$0xff] %v8635_v7  ;;  %8656 = vpow2.f32 %v7011_v58  ;;  %13063 = vst [vmem:[#allocation20_spill] sm:$0xff] %v11923_v37  ;;  %v11927_v48 = vpop.f32.mrb[189].mxu1 }
 0x356   : > { %v8639_v43 = vpop.eup %8638  ;;  %6149 = vst [vmem:[%s10149_s27 + $0xbb8] sm:$0xff] %v8637_v8  ;;  %8658 = vpow2.f32 %v6873_v32  ;;  %13065 = vst [vmem:[#allocation22_spill] sm:$0xff] %v11927_v48  ;;  %v11929_v8 = vpop.f32.mrb[189].mxu0 }
 0x357   : > { %v8641_v23 = vpop.eup %8640  ;;  %v4345_v35 = vadd.f32 1.0, %v8639_v43  ;;  %8660 = vpow2.f32 %v7015_v51  ;;  %13066 = vst [vmem:[#allocation23_spill] sm:$0xff] %v11929_v8 }
 0x358   : > { %v8643_v20 = vpop.eup %8642  ;;  %v4484_v30 = vadd.f32 1.0, %v8641_v23  ;;  %8662 = vpow2.f32 %v6877_v3 }
 0x359   : > { %v8645_v61 = vpop.eup %8644  ;;  %8664 = vrcp.f32 %v4345_v35  ;;  %v4346_v41 = vadd.f32 1.0, %v8643_v20 }
 0x35a   : > { %v8647_v58 = vpop.eup %8646  ;;  %8666 = vrcp.f32 %v4484_v30  ;;  %v4488_v7 = vadd.f32 1.0, %v8645_v61 }
 0x35b   : > { %v8649_v32 = vpop.eup %8648  ;;  %8668 = vrcp.f32 %v4346_v41  ;;  %v4350_v51 = vadd.f32 1.0, %v8647_v58 }
 0x35c   : > { %v8651_v43 = vpop.eup %8650  ;;  %8670 = vrcp.f32 %v4488_v7  ;;  %v4489_v3 = vadd.f32 1.0, %v8649_v32  ;;  %v13067_v32 = vld [vmem:[#allocation35_spill] sm:$0xff] }
 0x35d   : > { %v8653_v23 = vpop.eup %8652  ;;  %8672 = vrcp.f32 %v4350_v51  ;;  %v4351_v35 = vadd.f32 1.0, %v8651_v43  ;;  %v7016_v51 = vmul.f32 -1.442695, %v13067_v32  ;;  %v13068_v32 = vld [vmem:[#allocation8_spill] sm:$0xff] }
 0x35e   : > { %v8655_v20 = vpop.eup %8654  ;;  %8674 = vrcp.f32 %v4489_v3  ;;  %v4493_v37 = vadd.f32 1.0, %v8653_v23  ;;  %v6878_v23 = vmul.f32 -1.442695, %v11677_v50  ;;  %v11941_v50 = vpop.f32.mrb[190].mxu0 }
 0x35f   : > { %v8657_v4 = vpop.eup %8656  ;;  %8676 = vrcp.f32 %v4351_v35  ;;  %v4355_v30 = vadd.f32 1.0, %v8655_v20  ;;  %v7021_v20 = vmul.f32 -1.442695, %v11691_v49  ;;  %v11949_v49 = vpop.f32.mrb[191].mxu0 }
 0x360   : > { %v8659_v61 = vpop.eup %8658  ;;  %8678 = vrcp.f32 %v4493_v37  ;;  %v4494_v48 = vadd.f32 1.0, %v8657_v4  ;;  %v7020_v37 = vmul.f32 -1.442695, %v11681_v26  ;;  %v6883_v26 = vmul.f32 -1.442695, %v11693_v56  ;;  %v13069_v56 = vld [vmem:[#allocation7_spill] sm:$0xff] }
 0x361   : > { %v8661_v8 = vpop.eup %8660  ;;  %8680 = vrcp.f32 %v4355_v30  ;;  %v4356_v41 = vadd.f32 1.0, %v8659_v61  ;;  %v11939_v30 = vpop.f32.mrb[190].mxu1 }
 0x362   : > { %v8663_v58 = vpop.eup %8662  ;;  %8682 = vrcp.f32 %v4494_v48  ;;  %v4498_v7 = vadd.f32 1.0, %v8661_v8  ;;  %v6882_v48 = vmul.f32 -1.442695, %v11685_v39  ;;  %v7025_v39 = vmul.f32 -1.442695, %v11706_v38  ;;  %v13070_v38 = vld [vmem:[#allocation9_spill] sm:$0xff] }
 0x363   : > { %v8665_v43 = vpop.eup %8664  ;;  %8684 = vrcp.f32 %v4356_v41  ;;  %v4360_v3 = vadd.f32 1.0, %v8663_v58  ;;  %v11947_v58 = vpop.f32.mrb[191].mxu1 }
 0x364   : > { %v8667_v35 = vpop.eup %8666  ;;  %6011 = vst [vmem:[%s10149_s27 + $0x768] sm:$0xff] %v8665_v43  ;;  %8686 = vrcp.f32 %v4498_v7 }
 0x365   : > { %v8669_v4 = vpop.eup %8668  ;;  %6150 = vst [vmem:[%s10149_s27 + $0xbc0] sm:$0xff] %v8667_v35  ;;  %8688 = vrcp.f32 %v4360_v3  ;;  %v7026_v3 = vmul.f32 -1.442695, %v13069_v56  ;;  %v6888_v35 = vmul.f32 -1.442695, %v13070_v38 }
 0x366   : > { %v8671_v8 = vpop.eup %8670  ;;  %6012 = vst [vmem:[%s10149_s27 + $0x770] sm:$0xff] %v8669_v4  ;;  %8690 = vpow2.f32 %v7016_v51  ;;  %v6887_v51 = vmul.f32 -1.442695, %v13068_v32  ;;  %v13071_v4 = vld [vmem:[#allocation10_spill] sm:$0xff] }
 0x367   : > { %v8673_v61 = vpop.eup %8672  ;;  %6154 = vst [vmem:[%s10149_s27 + $0xbe0] sm:$0xff] %v8671_v8  ;;  %8692 = vpow2.f32 %v6878_v23  ;;  %v7030_v8 = vmul.f32 -1.442695, %v13071_v4 }
 0x368   : > { %v8675_v41 = vpop.eup %8674  ;;  %6016 = vst [vmem:[%s10149_s27 + $0x790] sm:$0xff] %v8673_v61  ;;  %8694 = vpow2.f32 %v7020_v37  ;;  %v13072_v61 = vld [vmem:[#allocation11_spill] sm:$0xff] }
 0x369   : > { %v8677_v7 = vpop.eup %8676  ;;  %6155 = vst [vmem:[%s10149_s27 + $0xbe8] sm:$0xff] %v8675_v41  ;;  %8696 = vpow2.f32 %v6882_v48  ;;  %v6892_v41 = vmul.f32 -1.442695, %v13072_v61 }
 0x36a   : > { %v8679_v43 = vpop.eup %8678  ;;  %6017 = vst [vmem:[%s10149_s27 + $0x798] sm:$0xff] %v8677_v7  ;;  %8698 = vpow2.f32 %v7021_v20  ;;  %v13073_v7 = vld [vmem:[#allocation12_spill] sm:$0xff] }
 0x36b   : > { %v8681_v23 = vpop.eup %8680  ;;  %6159 = vst [vmem:[%s10149_s27 + $0xc08] sm:$0xff] %v8679_v43  ;;  %8700 = vpow2.f32 %v6883_v26  ;;  %v7031_v32 = vmul.f32 -1.442695, %v13073_v7  ;;  %v11963_v26 = vpop.f32.mrb[192].mxu1 }
 0x36c   : > { %v8683_v37 = vpop.eup %8682  ;;  %6021 = vst [vmem:[%s10149_s27 + $0x7b8] sm:$0xff] %v8681_v23  ;;  %8702 = vpow2.f32 %v7025_v39  ;;  %v11965_v43 = vpop.f32.mrb[192].mxu0 }
 0x36d   : > { %v8685_v48 = vpop.eup %8684  ;;  %6160 = vst [vmem:[%s10149_s27 + $0xc10] sm:$0xff] %v8683_v37  ;;  %8704 = vpow2.f32 %v6887_v51  ;;  %13074 = vst [vmem:[#allocation24_spill] sm:$0xff] %v11965_v43  ;;  %v11968_v39 = vpop.f32.mrb[193].mxu1 }
 0x36e   : > { %v8687_v20 = vpop.eup %8686  ;;  %6022 = vst [vmem:[%s10149_s27 + $0x7c0] sm:$0xff] %v8685_v48  ;;  %8706 = vpow2.f32 %v7026_v3  ;;  %13075 = vst [vmem:[#allocation25_spill] sm:$0xff] %v11968_v39  ;;  %v11970_v23 = vpop.f32.mrb[193].mxu0 }
 0x36f   : > { %v8689_v56 = vpop.eup %8688  ;;  %6164 = vst [vmem:[%s10149_s27 + $0xc30] sm:$0xff] %v8687_v20  ;;  %8708 = vpow2.f32 %v6888_v35  ;;  %13076 = vst [vmem:[#allocation26_spill] sm:$0xff] %v11970_v23  ;;  %v11973_v51 = vpop.f32.mrb[194].mxu1 }
 0x370   : > { %v8691_v38 = vpop.eup %8690  ;;  %6026 = vst [vmem:[%s10149_s27 + $0x7e0] sm:$0xff] %v8689_v56  ;;  %8710 = vpow2.f32 %v7030_v8  ;;  %13077 = vst [vmem:[#allocation27_spill] sm:$0xff] %v11973_v51  ;;  %v11975_v37 = vpop.f32.mrb[194].mxu0 }
 0x371   : > { %13078 = vst [vmem:[#allocation28_spill] sm:$0xff] %v11975_v37  ;;  %v8693_v3 = vpop.eup %8692  ;;  %v4499_v4 = vadd.f32 1.0, %v8691_v38  ;;  %8712 = vpow2.f32 %v6892_v41  ;;  %v11977_v48 = vpop.f32.mrb[195].mxu1 }
 0x372   : > { %13079 = vst [vmem:[#allocation29_spill] sm:$0xff] %v11977_v48  ;;  %v8695_v61 = vpop.eup %8694  ;;  %v4361_v7 = vadd.f32 1.0, %v8693_v3  ;;  %8714 = vpow2.f32 %v7031_v32  ;;  %v11979_v35 = vpop.f32.mrb[195].mxu0 }
 0x373   : > { %13080 = vst [vmem:[#allocation2_spill] sm:$0xff] %v11979_v35  ;;  %v8697_v20 = vpop.eup %8696  ;;  %8716 = vrcp.f32 %v4499_v4  ;;  %v4503_v23 = vadd.f32 1.0, %v8695_v61  ;;  %v11981_v41 = vpop.f32.mrb[196].mxu1 }
 0x374   : > { %v8699_v39 = vpop.eup %8698  ;;  %8718 = vrcp.f32 %v4361_v7  ;;  %v4365_v8 = vadd.f32 1.0, %v8697_v20 }
 0x375   : > { %v8701_v56 = vpop.eup %8700  ;;  %8720 = vrcp.f32 %v4503_v23  ;;  %v4504_v51 = vadd.f32 1.0, %v8699_v39 }
 0x376   : > { %v8703_v37 = vpop.eup %8702  ;;  %8722 = vrcp.f32 %v4365_v8  ;;  %v4366_v38 = vadd.f32 1.0, %v8701_v56  ;;  %v7035_v56 = vmul.f32 -1.442695, %v11739_v21 }
 0x377   : > { %v8705_v48 = vpop.eup %8704  ;;  %8724 = vrcp.f32 %v4504_v51  ;;  %v4508_v3 = vadd.f32 1.0, %v8703_v37  ;;  %v6893_v51 = vmul.f32 -1.442695, %v11721_v10 }
 0x378   : > { %v8707_v32 = vpop.eup %8706  ;;  %8726 = vrcp.f32 %v4366_v38  ;;  %v4370_v35 = vadd.f32 1.0, %v8705_v48  ;;  %v11985_v38 = vpop.f32.mrb[196].mxu0 }
 0x379   : > { %v8709_v43 = vpop.eup %8708  ;;  %8728 = vrcp.f32 %v4508_v3  ;;  %v4509_v4 = vadd.f32 1.0, %v8707_v32  ;;  %v7036_v32 = vmul.f32 -1.442695, %v11745_v55  ;;  %v6902_v55 = vmul.f32 -1.442695, %v11753_v18 }
 0x37a   : > { %v8711_v61 = vpop.eup %8710  ;;  %8730 = vrcp.f32 %v4370_v35  ;;  %v4371_v7 = vadd.f32 1.0, %v8709_v43  ;;  %v6897_v43 = vmul.f32 -1.442695, %v11741_v31  ;;  %v11997_v31 = vpop.f32.mrb[197].mxu0  ;;  %v6907_v18 = vmul.f32 -1.442695, %v11765_v1 }
 0x37b   : > { %v8713_v23 = vpop.eup %8712  ;;  %8732 = vrcp.f32 %v4509_v4  ;;  %v4513_v39 = vadd.f32 1.0, %v8711_v61  ;;  %v6898_v4 = vmul.f32 -1.442695, %v11747_v33  ;;  %v7040_v61 = vmul.f32 -1.442695, %v11751_v14  ;;  %v13082_v1 = vld [vmem:[#allocation14_spill] sm:$0xff] }
 0x37c   : > { %v8715_v20 = vpop.eup %8714  ;;  %8734 = vrcp.f32 %v4371_v7  ;;  %v4375_v8 = vadd.f32 1.0, %v8713_v23  ;;  %v11995_v7 = vpop.f32.mrb[197].mxu1  ;;  %v7041_v33 = vmul.f32 -1.442695, %v11759_v54 }
 0x37d   : > { %v8717_v37 = vpop.eup %8716  ;;  %8736 = vrcp.f32 %v4513_v39  ;;  %v4514_v48 = vadd.f32 1.0, %v8715_v20  ;;  %v12003_v20 = vpop.f32.mrb[198].mxu1 }
 0x37e   : > { %v8719_v35 = vpop.eup %8718  ;;  %6165 = vst [vmem:[%s10149_s27 + $0xc38] sm:$0xff] %v8717_v37  ;;  %8738 = vrcp.f32 %v4375_v8  ;;  %v12005_v8 = vpop.f32.mrb[198].mxu0 }
 0x37f   : > { %v8721_v3 = vpop.eup %8720  ;;  %6027 = vst [vmem:[%s10149_s27 + $0x7e8] sm:$0xff] %v8719_v35  ;;  %8740 = vrcp.f32 %v4514_v48  ;;  %v12011_v48 = vpop.f32.mrb[199].mxu1  ;;  %v6639_v35 = vmul.f32 -1.442695, %v11767_v15 }
 0x380   : > { %v8723_v10 = vpop.eup %8722  ;;  %6169 = vst [vmem:[%s10149_s27 + $0xc58] sm:$0xff] %v8721_v3  ;;  %8742 = vpow2.f32 %v6893_v51  ;;  %v6903_v51 = vmul.f32 -1.442695, %v11761_v46  ;;  %v12013_v54 = vpop.f32.mrb[199].mxu0  ;;  %v13081_v46 = vld [vmem:[#allocation13_spill] sm:$0xff] }
 0x381   : > { %v8725_v21 = vpop.eup %8724  ;;  %6031 = vst [vmem:[%s10149_s27 + $0x808] sm:$0xff] %v8723_v10  ;;  %8744 = vpow2.f32 %v7035_v56  ;;  %v6908_v3 = vmul.f32 -1.442695, %v13081_v46  ;;  %v6629_v10 = vmul.f32 -1.442695, %v13082_v1  ;;  %v12023_v15 = vpop.f32.mrb[200].mxu1 }
 0x382   : > { %v8727_v23 = vpop.eup %8726  ;;  %6170 = vst [vmem:[%s10149_s27 + $0xc60] sm:$0xff] %v8725_v21  ;;  %8746 = vpow2.f32 %v6897_v43 }
 0x383   : > { %v8729_v39 = vpop.eup %8728  ;;  %6032 = vst [vmem:[%s10149_s27 + $0x810] sm:$0xff] %v8727_v23  ;;  %8748 = vpow2.f32 %v7036_v32 }
 0x384   : > { %v8731_v14 = vpop.eup %8730  ;;  %6174 = vst [vmem:[%s10149_s27 + $0xc80] sm:$0xff] %v8729_v39  ;;  %8750 = vpow2.f32 %v6898_v4 }
 0x385   : > { %v8733_v37 = vpop.eup %8732  ;;  %6036 = vst [vmem:[%s10149_s27 + $0x830] sm:$0xff] %v8731_v14  ;;  %8752 = vpow2.f32 %v7040_v61  ;;  %v12027_v14 = vpop.f32.mrb[201].mxu1 }
 0x386   : > { %v8735_v56 = vpop.eup %8734  ;;  %6175 = vst [vmem:[%s10149_s27 + $0xc88] sm:$0xff] %v8733_v37  ;;  %8754 = vpow2.f32 %v6902_v55  ;;  %v12025_v55 = vpop.f32.mrb[200].mxu0 }
 0x387   : > { %v8737_v43 = vpop.eup %8736  ;;  %6037 = vst [vmem:[%s10149_s27 + $0x838] sm:$0xff] %v8735_v56  ;;  %8756 = vpow2.f32 %v7041_v33  ;;  %v12031_v56 = vpop.f32.mrb[202].mxu1 }
 0x388   : > { %v8739_v32 = vpop.eup %8738  ;;  %6179 = vst [vmem:[%s10149_s27 + $0xca8] sm:$0xff] %v8737_v43  ;;  %8758 = vpow2.f32 %v6903_v51  ;;  %v12029_v51 = vpop.f32.mrb[201].mxu0  ;;  %13083 = vst [vmem:[#allocation3_spill] sm:$0xff] %v12031_v56 }
 0x389   : > { %v8741_v4 = vpop.eup %8740  ;;  %6041 = vst [vmem:[%s10149_s27 + $0x858] sm:$0xff] %v8739_v32  ;;  %8760 = vpow2.f32 %v6907_v18 }
 0x38a   : > { %v8743_v21 = vpop.eup %8742  ;;  %6180 = vst [vmem:[%s10149_s27 + $0xcb0] sm:$0xff] %v8741_v4  ;;  %8762 = vpow2.f32 %v6639_v35  ;;  %v12033_v35 = vpop.f32.mrb[202].mxu0 }
 0x38b   : > { %v8745_v61 = vpop.eup %8744  ;;  %v4376_v23 = vadd.f32 1.0, %v8743_v21  ;;  %8764 = vpow2.f32 %v6908_v3  ;;  %13084 = vst [vmem:[#allocation30_spill] sm:$0xff] %v12033_v35 }
 0x38c   : > { %v8747_v39 = vpop.eup %8746  ;;  %v4518_v33 = vadd.f32 1.0, %v8745_v61  ;;  %8766 = vpow2.f32 %v6629_v10 }
 0x38d   : > { %v8749_v37 = vpop.eup %8748  ;;  %8768 = vrcp.f32 %v4376_v23  ;;  %v4380_v18 = vadd.f32 1.0, %v8747_v39 }
 0x38e   : > { %v8751_v43 = vpop.eup %8750  ;;  %8770 = vrcp.f32 %v4518_v33  ;;  %v4519_v46 = vadd.f32 1.0, %v8749_v37 }
 0x38f   : > { %v8753_v3 = vpop.eup %8752  ;;  %8772 = vrcp.f32 %v4380_v18  ;;  %v4381_v32 = vadd.f32 1.0, %v8751_v43 }
 0x390   : > { %v8755_v1 = vpop.eup %8754  ;;  %8774 = vrcp.f32 %v4519_v46  ;;  %v4523_v10 = vadd.f32 1.0, %v8753_v3  ;;  %v13085_v3 = vld [vmem:[#allocation15_spill] sm:$0xff] }
 0x391   : > { %v8757_v4 = vpop.eup %8756  ;;  %8776 = vrcp.f32 %v4381_v32  ;;  %v4385_v21 = vadd.f32 1.0, %v8755_v1  ;;  %v6912_v32 = vmul.f32 -1.442695, %v13085_v3  ;;  %v6922_v3 = vmul.f32 -1.442695, %v11814_v16  ;;  %v13087_v16 = vld [vmem:[#allocation17_spill] sm:$0xff] }
 0x392   : > { %v8759_v61 = vpop.eup %8758  ;;  %8778 = vrcp.f32 %v4523_v10  ;;  %v4524_v23 = vadd.f32 1.0, %v8757_v4  ;;  %v6644_v4 = vmul.f32 -1.442695, %v11781_v63  ;;  %v12043_v63 = vpop.f32.mrb[203].mxu1 }
 0x393   : > { %v8761_v39 = vpop.eup %8760  ;;  %8780 = vrcp.f32 %v4385_v21  ;;  %v4386_v56 = vadd.f32 1.0, %v8759_v61  ;;  %v6913_v61 = vmul.f32 -1.442695, %v11787_v27  ;;  %v6659_v27 = vmul.f32 -1.442695, %v11805_v62 }
 0x394   : > { %v8763_v35 = vpop.eup %8762  ;;  %8782 = vrcp.f32 %v4524_v23  ;;  %v4390_v33 = vadd.f32 1.0, %v8761_v39  ;;  %v6917_v39 = vmul.f32 -1.442695, %v11803_v19  ;;  %v6649_v19 = vmul.f32 -1.442695, %v11811_v17  ;;  %v12059_v17 = vpop.f32.mrb[204].mxu1 }
 0x395   : > { %v8765_v37 = vpop.eup %8764  ;;  %8784 = vrcp.f32 %v4386_v56  ;;  %v4122_v18 = vadd.f32 1.0, %v8763_v35  ;;  %v6634_v35 = vmul.f32 -1.442695, %v11789_v45  ;;  %v6918_v45 = vmul.f32 -1.442695, %v11809_v36  ;;  %v13086_v36 = vld [vmem:[#allocation16_spill] sm:$0xff] }
 0x396   : > { %v8767_v43 = vpop.eup %8766  ;;  %8786 = vrcp.f32 %v4390_v33  ;;  %v4391_v46 = vadd.f32 1.0, %v8765_v37  ;;  %v12045_v33 = vpop.f32.mrb[203].mxu0  ;;  %v6664_v62 = vmul.f32 -1.442695, %v11816_v9 }
 0x397   : > { %v8769_v1 = vpop.eup %8768  ;;  %8788 = vrcp.f32 %v4122_v18  ;;  %v4112_v10 = vadd.f32 1.0, %v8767_v43 }
 0x398   : > { %v8771_v21 = vpop.eup %8770  ;;  %6042 = vst [vmem:[%s10149_s27 + $0x860] sm:$0xff] %v8769_v1  ;;  %8790 = vrcp.f32 %v4391_v46 }
 0x399   : > { %v8773_v56 = vpop.eup %8772  ;;  %6184 = vst [vmem:[%s10149_s27 + $0xcd0] sm:$0xff] %v8771_v21  ;;  %8792 = vrcp.f32 %v4112_v10  ;;  %v6923_v10 = vmul.f32 -1.442695, %v13086_v36 }
 0x39a   : > { %v8775_v23 = vpop.eup %8774  ;;  %6046 = vst [vmem:[%s10149_s27 + $0x880] sm:$0xff] %v8773_v56  ;;  %8794 = vpow2.f32 %v6912_v32  ;;  %v12065_v56 = vpop.f32.mrb[205].mxu1 }
 0x39b   : > { %v8777_v37 = vpop.eup %8776  ;;  %6185 = vst [vmem:[%s10149_s27 + $0xcd8] sm:$0xff] %v8775_v23  ;;  %8796 = vpow2.f32 %v6644_v4  ;;  %v12061_v4 = vpop.f32.mrb[204].mxu0  ;;  %v13088_v23 = vld [vmem:[#allocation18_spill] sm:$0xff] }
 0x39c   : > { %v8779_v18 = vpop.eup %8778  ;;  %6047 = vst [vmem:[%s10149_s27 + $0x888] sm:$0xff] %v8777_v37  ;;  %8798 = vpow2.f32 %v6913_v61  ;;  %v6654_v61 = vmul.f32 -1.442695, %v13087_v16  ;;  %v12072_v37 = vpop.f32.mrb[206].mxu1 }
 0x39d   : > { %v8781_v43 = vpop.eup %8780  ;;  %6189 = vst [vmem:[%s10149_s27 + $0xcf8] sm:$0xff] %v8779_v18  ;;  %8800 = vpow2.f32 %v6634_v35  ;;  %v12067_v35 = vpop.f32.mrb[205].mxu0 }
 0x39e   : > { %v8783_v46 = vpop.eup %8782  ;;  %6051 = vst [vmem:[%s10149_s27 + $0x8a8] sm:$0xff] %v8781_v43  ;;  %8802 = vpow2.f32 %v6917_v39  ;;  %v6927_v39 = vmul.f32 -1.442695, %v13088_v23  ;;  %v12079_v43 = vpop.f32.mrb[207].mxu1 }
 0x39f   : > { %v8785_v32 = vpop.eup %8784  ;;  %6190 = vst [vmem:[%s10149_s27 + $0xd00] sm:$0xff] %v8783_v46  ;;  %8804 = vpow2.f32 %v6659_v27  ;;  %v12074_v27 = vpop.f32.mrb[206].mxu0 }
 0x3a0   : > { %v8787_v1 = vpop.eup %8786  ;;  %6052 = vst [vmem:[%s10149_s27 + $0x8b0] sm:$0xff] %v8785_v32  ;;  %8806 = vpow2.f32 %v6918_v45 }
 0x3a1   : > { %v8789_v21 = vpop.eup %8788  ;;  %6056 = vst [vmem:[%s10149_s27 + $0x8d0] sm:$0xff] %v8787_v1  ;;  %8808 = vpow2.f32 %v6649_v19  ;;  %v12081_v19 = vpop.f32.mrb[207].mxu0 }
 0x3a2   : > { %v8791_v9 = vpop.eup %8790  ;;  %5788 = vst.msk [vmem:[%s10149_s27 + $0x70] sm:$0xff] %vm5777_vm3, %v8789_v21  ;;  %8810 = vpow2.f32 %v6922_v3  ;;  %13089 = vst [vmem:[#allocation31_spill] sm:$0xff] %v12081_v19  ;;  %v12085_v23 = vpop.f32.mrb[208].mxu0 }
 0x3a3   : > { %v8793_v18 = vpop.eup %8792  ;;  %6057 = vst [vmem:[%s10149_s27 + $0x8d8] sm:$0xff] %v8791_v9  ;;  %8812 = vpow2.f32 %v6664_v62  ;;  %v12083_v9 = vpop.f32.mrb[208].mxu1  ;;  %13091 = vst [vmem:[#allocation5_spill] sm:$0xff] %v12085_v23 }
 0x3a4   : > { %v8795_v45 = vpop.eup %8794  ;;  %5778 = vst.msk [vmem:[%s10149_s27 + $0x20] sm:$0xff] %vm5777_vm3, %v8793_v18  ;;  %8814 = vpow2.f32 %v6923_v10  ;;  %13090 = vst [vmem:[#allocation4_spill] sm:$0xff] %v12083_v9  ;;  %v12087_v19 = vpop.f32.mrb[209].mxu1 }
 0x3a5   : > { %v8797_v46 = vpop.eup %8796  ;;  %v4395_v32 = vadd.f32 1.0, %v8795_v45  ;;  %8816 = vpow2.f32 %v6654_v61  ;;  %13092 = vst [vmem:[#allocation6_spill] sm:$0xff] %v12087_v19 }
 0x3a6   : > { %v8799_v3 = vpop.eup %8798  ;;  %v4127_v1 = vadd.f32 1.0, %v8797_v46  ;;  %8818 = vpow2.f32 %v6927_v39 }
 0x3a7   : > { %v8801_v36 = vpop.eup %8800  ;;  %8820 = vrcp.f32 %v4395_v32  ;;  %v4396_v21 = vadd.f32 1.0, %v8799_v3 }
 0x3a8   : > { %v8803_v16 = vpop.eup %8802  ;;  %8822 = vrcp.f32 %v4127_v1  ;;  %v4117_v62 = vadd.f32 1.0, %v8801_v36 }
 0x3a9   : > { %v8805_v10 = vpop.eup %8804  ;;  %8824 = vrcp.f32 %v4396_v21  ;;  %v4400_v18 = vadd.f32 1.0, %v8803_v16 }
 0x3aa   : > { %v8807_v45 = vpop.eup %8806  ;;  %8826 = vrcp.f32 %v4117_v62  ;;  %v4142_v61 = vadd.f32 1.0, %v8805_v10  ;;  %v13093_v10 = vld [vmem:[#allocation19_spill] sm:$0xff] }
 0x3ab   : > { %v8809_v46 = vpop.eup %8808  ;;  %8828 = vrcp.f32 %v4400_v18  ;;  %v4401_v39 = vadd.f32 1.0, %v8807_v45  ;;  %v6679_v18 = vmul.f32 -1.442695, %v13093_v10 }
 0x3ac   : > { %v8811_v32 = vpop.eup %8810  ;;  %8830 = vrcp.f32 %v4142_v61  ;;  %v4132_v3 = vadd.f32 1.0, %v8809_v46  ;;  %v6928_v46 = vmul.f32 -1.442695, %v11835_v6  ;;  %v6684_v6 = vmul.f32 -1.442695, %v11845_v52 }
 0x3ad   : > { %v8813_v1 = vpop.eup %8812  ;;  %8832 = vrcp.f32 %v4401_v39  ;;  %v4405_v36 = vadd.f32 1.0, %v8811_v32  ;;  %v6669_v32 = vmul.f32 -1.442695, %v11837_v57  ;;  %v6933_v57 = vmul.f32 -1.442695, %v11851_v60 }
 0x3ae   : > { %v8815_v9 = vpop.eup %8814  ;;  %8834 = vrcp.f32 %v4132_v3  ;;  %v4147_v23 = vadd.f32 1.0, %v8813_v1  ;;  %v12093_v3 = vpop.f32.mrb[209].mxu0  ;;  %v6937_v52 = vmul.f32 -1.442695, %v11865_v29  ;;  %v6689_v29 = vmul.f32 -1.442695, %v11871_v12 }
 0x3af   : > { %v8817_v21 = vpop.eup %8816  ;;  %8836 = vrcp.f32 %v4405_v36  ;;  %v4406_v16 = vadd.f32 1.0, %v8815_v9  ;;  %v12103_v36 = vpop.f32.mrb[210].mxu1 }
 0x3b0   : > { %v8819_v19 = vpop.eup %8818  ;;  %8838 = vrcp.f32 %v4147_v23  ;;  %v4137_v62 = vadd.f32 1.0, %v8817_v21  ;;  %v6932_v23 = vmul.f32 -1.442695, %v11843_v44  ;;  %v12105_v21 = vpop.f32.mrb[210].mxu0  ;;  %v6674_v44 = vmul.f32 -1.442695, %v11853_v24 }
 0x3b1   : > { %v8821_v45 = vpop.eup %8820  ;;  %8840 = vrcp.f32 %v4406_v16  ;;  %v4410_v61 = vadd.f32 1.0, %v8819_v19  ;;  %v12112_v10 = vpop.f32.mrb[211].mxu1  ;;  %v6938_v24 = vmul.f32 -1.442695, %v11869_v40 }
 0x3b2   : > { %v8823_v39 = vpop.eup %8822  ;;  %6061 = vst [vmem:[%s10149_s27 + $0x8f8] sm:$0xff] %v8821_v45  ;;  %8842 = vrcp.f32 %v4137_v62  ;;  %v12114_v60 = vpop.f32.mrb[211].mxu0  ;;  %v6699_v45 = vmul.f32 -1.442695, %v11867_v22 }
 0x3b3   : > { %v8825_v9 = vpop.eup %8824  ;;  %5793 = vst.msk [vmem:[%s10149_s27 + $0x98] sm:$0xff] %vm5777_vm3, %v8823_v39  ;;  %8844 = vrcp.f32 %v4410_v61  ;;  %v12130_v40 = vpop.f32.mrb[212].mxu1 }
 0x3b4   : > { %v8827_v1 = vpop.eup %8826  ;;  %6062 = vst [vmem:[%s10149_s27 + $0x900] sm:$0xff] %v8825_v9  ;;  %8846 = vpow2.f32 %v6679_v18  ;;  %v6704_v9 = vmul.f32 -1.442695, %v11875_v0 }
 0x3b5   : > { %v8829_v19 = vpop.eup %8828  ;;  %5783 = vst.msk [vmem:[%s10149_s27 + $0x48] sm:$0xff] %vm5777_vm3, %v8827_v1  ;;  %8848 = vpow2.f32 %v6928_v46  ;;  %v12132_v1 = vpop.f32.mrb[212].mxu0 }
 0x3b6   : > { %v8831_v16 = vpop.eup %8830  ;;  %6066 = vst [vmem:[%s10149_s27 + $0x920] sm:$0xff] %v8829_v19  ;;  %8850 = vpow2.f32 %v6669_v32  ;;  %v6942_v32 = vmul.f32 -1.442695, %v11873_v34  ;;  %v12137_v19 = vpop.f32.mrb[213].mxu0 }
 0x3b7   : > { %v8833_v62 = vpop.eup %8832  ;;  %5808 = vst.msk [vmem:[%s10149_s27 + $0x110] sm:$0xff] %vm5777_vm3, %v8831_v16  ;;  %8852 = vpow2.f32 %v6932_v23  ;;  %v12141_v0 = vpop.f32.mrb[214].mxu0 }
 0x3b8   : > { %v8835_v18 = vpop.eup %8834  ;;  %6067 = vst [vmem:[%s10149_s27 + $0x928] sm:$0xff] %v8833_v62  ;;  %8854 = vpow2.f32 %v6684_v6  ;;  %v12135_v6 = vpop.f32.mrb[213].mxu1 }
 0x3b9   : > { %v8837_v61 = vpop.eup %8836  ;;  %5798 = vst.msk [vmem:[%s10149_s27 + $0xc0] sm:$0xff] %vm5777_vm3, %v8835_v18  ;;  %8856 = vpow2.f32 %v6933_v57  ;;  %v12139_v16 = vpop.f32.mrb[214].mxu1 }
 0x3ba   : > { %v8839_v46 = vpop.eup %8838  ;;  %6071 = vst [vmem:[%s10149_s27 + $0x948] sm:$0xff] %v8837_v61  ;;  %8858 = vpow2.f32 %v6674_v44  ;;  %v12145_v61 = vpop.f32.mrb[215].mxu0 }
 0x3bb   : > { %v8841_v39 = vpop.eup %8840  ;;  %5813 = vst.msk [vmem:[%s10149_s27 + $0x138] sm:$0xff] %vm5777_vm3, %v8839_v46  ;;  %8860 = vpow2.f32 %v6937_v52  ;;  %v12143_v52 = vpop.f32.mrb[215].mxu1 }
 0x3bc   : > { %v8843_v22 = vpop.eup %8842  ;;  %6072 = vst [vmem:[%s10149_s27 + $0x950] sm:$0xff] %v8841_v39  ;;  %8862 = vpow2.f32 %v6699_v45  ;;  %13094 = vst [vmem:[#allocation32_spill] sm:$0xff] %v12143_v52 }
 0x3bd   : > { %v8845_v23 = vpop.eup %8844  ;;  %5803 = vst.msk [vmem:[%s10149_s27 + $0xe8] sm:$0xff] %vm5777_vm3, %v8843_v22  ;;  %8864 = vpow2.f32 %v6938_v24 }
 0x3be   : > { %v8847_v12 = vpop.eup %8846  ;;  %6076 = vst [vmem:[%s10149_s27 + $0x970] sm:$0xff] %v8845_v23  ;;  %8866 = vpow2.f32 %v6689_v29 }
 0x3bf   : > { %v8849_v34 = vpop.eup %8848  ;;  %v4162_v57 = vadd.f32 1.0, %v8847_v12  ;;  %8868 = vpow2.f32 %v6942_v32 }
 0x3c0   : > { %v8851_v44 = vpop.eup %8850  ;;  %v4411_v62 = vadd.f32 1.0, %v8849_v34  ;;  %8870 = vpow2.f32 %v6704_v9 }
 0x3c1   : > { %v8853_v18 = vpop.eup %8852  ;;  %8872 = vrcp.f32 %v4162_v57  ;;  %v4152_v45 = vadd.f32 1.0, %v8851_v44 }
 0x3c2   : > { %v8855_v24 = vpop.eup %8854  ;;  %8874 = vrcp.f32 %v4411_v62  ;;  %v4415_v46 = vadd.f32 1.0, %v8853_v18 }
 0x3c3   : > { %v8857_v29 = vpop.eup %8856  ;;  %8876 = vrcp.f32 %v4152_v45  ;;  %v4167_v39 = vadd.f32 1.0, %v8855_v24 }
 0x3c4   : > { %v8859_v32 = vpop.eup %8858  ;;  %8878 = vrcp.f32 %v4415_v46  ;;  %v4416_v22 = vadd.f32 1.0, %v8857_v29  ;;  %v6943_v29 = vmul.f32 -1.442695, %v11877_v2 }
 0x3c5   : > { %v8861_v23 = vpop.eup %8860  ;;  %8880 = vrcp.f32 %v4167_v39  ;;  %v4157_v12 = vadd.f32 1.0, %v8859_v32 }
 0x3c6   : > { %v8863_v9 = vpop.eup %8862  ;;  %8882 = vrcp.f32 %v4416_v22  ;;  %v4420_v34 = vadd.f32 1.0, %v8861_v23  ;;  %v6694_v22 = vmul.f32 -1.442695, %v11885_v5  ;;  %v6948_v5 = vmul.f32 -1.442695, %v11905_v47 }
 0x3c7   : > { %v8865_v52 = vpop.eup %8864  ;;  %8884 = vrcp.f32 %v4157_v12  ;;  %v4182_v57 = vadd.f32 1.0, %v8863_v9  ;;  %v6719_v9 = vmul.f32 -1.442695, %v11901_v59  ;;  %v6953_v47 = vmul.f32 -1.442695, %v11918_v53  ;;  %v13095_v53 = vld [vmem:[#allocation20_spill] sm:$0xff] }
 0x3c8   : > { %v8867_v44 = vpop.eup %8866  ;;  %8886 = vrcp.f32 %v4420_v34  ;;  %v4421_v62 = vadd.f32 1.0, %v8865_v52  ;;  %v6947_v52 = vmul.f32 -1.442695, %v11899_v25 }
 0x3c9   : > { %v8869_v18 = vpop.eup %8868  ;;  %8888 = vrcp.f32 %v4182_v57  ;;  %v4172_v45 = vadd.f32 1.0, %v8867_v44  ;;  %v6709_v57 = vmul.f32 -1.442695, %v11907_v42  ;;  %v6952_v44 = vmul.f32 -1.442695, %v11911_v11  ;;  %v12167_v42 = vpop.f32.mrb[216].mxu1 }
 0x3ca   : > { %v8871_v24 = vpop.eup %8870  ;;  %8890 = vrcp.f32 %v4421_v62  ;;  %v4425_v46 = vadd.f32 1.0, %v8869_v18  ;;  %v6724_v62 = vmul.f32 -1.442695, %v11913_v28  ;;  %v6714_v11 = vmul.f32 -1.442695, %v11920_v13  ;;  %v13096_v13 = vld [vmem:[#allocation21_spill] sm:$0xff] }
 0x3cb   : > { %v8873_v39 = vpop.eup %8872  ;;  %8892 = vrcp.f32 %v4172_v45  ;;  %v4187_v32 = vadd.f32 1.0, %v8871_v24  ;;  %v12169_v45 = vpop.f32.mrb[216].mxu0 }
 0x3cc   : > { %v8875_v23 = vpop.eup %8874  ;;  %5828 = vst.msk [vmem:[%s10149_s27 + $0x1b0] sm:$0xff] %vm5777_vm3, %v8873_v39  ;;  %8894 = vrcp.f32 %v4425_v46  ;;  %v12173_v46 = vpop.f32.mrb[217].mxu1  ;;  %v6957_v39 = vmul.f32 -1.442695, %v13095_v53 }
 0x3cd   : > { %v8877_v12 = vpop.eup %8876  ;;  %6077 = vst [vmem:[%s10149_s27 + $0x978] sm:$0xff] %v8875_v23  ;;  %8896 = vrcp.f32 %v4187_v32  ;;  %v12175_v28 = vpop.f32.mrb[217].mxu0 }
 0x3ce   : > { %v8879_v2 = vpop.eup %8878  ;;  %5818 = vst.msk [vmem:[%s10149_s27 + $0x160] sm:$0xff] %vm5777_vm3, %v8877_v12  ;;  %8898 = vpow2.f32 %v6943_v29  ;;  %v12180_v32 = vpop.f32.mrb[218].mxu1 }
 0x3cf   : > { %v8881_v34 = vpop.eup %8880  ;;  %6081 = vst [vmem:[%s10149_s27 + $0x998] sm:$0xff] %v8879_v2  ;;  %8900 = vpow2.f32 %v6694_v22  ;;  %v12182_v22 = vpop.f32.mrb[218].mxu0 }
 0x3d0   : > { %v8883_v25 = vpop.eup %8882  ;;  %5833 = vst.msk [vmem:[%s10149_s27 + $0x1d8] sm:$0xff] %vm5777_vm3, %v8881_v34  ;;  %8902 = vpow2.f32 %v6947_v52  ;;  %v6739_v52 = vmul.f32 -1.442695, %v13096_v13  ;;  %v12191_v34 = vpop.f32.mrb[219].mxu0 }
 0x3d1   : > { %v8885_v59 = vpop.eup %8884  ;;  %6082 = vst [vmem:[%s10149_s27 + $0x9a0] sm:$0xff] %v8883_v25  ;;  %8904 = vpow2.f32 %v6719_v9  ;;  %v13097_v9 = vld [vmem:[#allocation22_spill] sm:$0xff] }
 0x3d2   : > { %v8887_v18 = vpop.eup %8886  ;;  %5823 = vst.msk [vmem:[%s10149_s27 + $0x188] sm:$0xff] %vm5777_vm3, %v8885_v59  ;;  %8906 = vpow2.f32 %v6948_v5  ;;  %v6958_v2 = vmul.f32 -1.442695, %v13097_v9  ;;  %v12189_v5 = vpop.f32.mrb[219].mxu1 }
 0x3d3   : > { %v8889_v24 = vpop.eup %8888  ;;  %6086 = vst [vmem:[%s10149_s27 + $0x9c0] sm:$0xff] %v8887_v18  ;;  %8908 = vpow2.f32 %v6709_v57 }
 0x3d4   : > { %v8891_v29 = vpop.eup %8890  ;;  %5848 = vst.msk [vmem:[%s10149_s27 + $0x250] sm:$0xff] %vm5777_vm3, %v8889_v24  ;;  %8910 = vpow2.f32 %v6952_v44  ;;  %v12198_v24 = vpop.f32.mrb[220].mxu0 }
 0x3d5   : > { %v8893_v23 = vpop.eup %8892  ;;  %6087 = vst [vmem:[%s10149_s27 + $0x9c8] sm:$0xff] %v8891_v29  ;;  %8912 = vpow2.f32 %v6724_v62 }
 0x3d6   : > { %v8895_v12 = vpop.eup %8894  ;;  %5838 = vst.msk [vmem:[%s10149_s27 + $0x200] sm:$0xff] %vm5777_vm3, %v8893_v23  ;;  %8914 = vpow2.f32 %v6953_v47  ;;  %v12196_v47 = vpop.f32.mrb[220].mxu1 }
 0x3d7   : > { %v8897_v57 = vpop.eup %8896  ;;  %6091 = vst [vmem:[%s10149_s27 + $0x9e8] sm:$0xff] %v8895_v12  ;;  %8916 = vpow2.f32 %v6714_v11  ;;  %v12200_v23 = vpop.f32.mrb[221].mxu1 }
 0x3d8   : > { %v8899_v25 = vpop.eup %8898  ;;  %5853 = vst.msk [vmem:[%s10149_s27 + $0x278] sm:$0xff] %vm5777_vm3, %v8897_v57  ;;  %8918 = vpow2.f32 %v6957_v39  ;;  %13098 = vst [vmem:[#allocation33_spill] sm:$0xff] %v12200_v23  ;;  %v12202_v11 = vpop.f32.mrb[221].mxu0 }
 0x3d9   : > { %v8901_v44 = vpop.eup %8900  ;;  %v4426_v59 = vadd.f32 1.0, %v8899_v25  ;;  %8920 = vpow2.f32 %v6739_v52  ;;  %13099 = vst [vmem:[#allocation34_spill] sm:$0xff] %v12202_v11  ;;  %v12204_v12 = vpop.f32.mrb[222].mxu1 }
 0x3da   : > { %v8903_v62 = vpop.eup %8902  ;;  %v4177_v18 = vadd.f32 1.0, %v8901_v44  ;;  %8922 = vpow2.f32 %v6958_v2  ;;  %13100 = vst [vmem:[#allocation35_spill] sm:$0xff] %v12204_v12 }
 0x3db   : > { %v8905_v29 = vpop.eup %8904  ;;  %8924 = vrcp.f32 %v4426_v59  ;;  %v4430_v53 = vadd.f32 1.0, %v8903_v62 }
 0x3dc   : > { %v8907_v13 = vpop.eup %8906  ;;  %8926 = vrcp.f32 %v4177_v18  ;;  %v4202_v39 = vadd.f32 1.0, %v8905_v29 }
 0x3dd   : > { %v8909_v52 = vpop.eup %8908  ;;  %8928 = vrcp.f32 %v4430_v53  ;;  %v4431_v9 = vadd.f32 1.0, %v8907_v13 }
 0x3de   : > { %v8911_v2 = vpop.eup %8910  ;;  %8930 = vrcp.f32 %v4202_v39  ;;  %v4192_v57 = vadd.f32 1.0, %v8909_v52  ;;  %v13101_v52 = vld [vmem:[#allocation23_spill] sm:$0xff] }
 0x3df   : > { %v8913_v25 = vpop.eup %8912  ;;  %8932 = vrcp.f32 %v4431_v9  ;;  %v4435_v44 = vadd.f32 1.0, %v8911_v2  ;;  %v6729_v9 = vmul.f32 -1.442695, %v13101_v52 }
 0x3e0   : > { %v8915_v59 = vpop.eup %8914  ;;  %8934 = vrcp.f32 %v4192_v57  ;;  %v4207_v62 = vadd.f32 1.0, %v8913_v25  ;;  %v6962_v25 = vmul.f32 -1.442695, %v11939_v30  ;;  %v6734_v30 = vmul.f32 -1.442695, %v11949_v49  ;;  %v13103_v49 = vld [vmem:[#allocation25_spill] sm:$0xff] }
 0x3e1   : > { %v8917_v23 = vpop.eup %8916  ;;  %8936 = vrcp.f32 %v4435_v44  ;;  %v4436_v11 = vadd.f32 1.0, %v8915_v59 }
 0x3e2   : > { %v8919_v18 = vpop.eup %8918  ;;  %8938 = vrcp.f32 %v4207_v62  ;;  %v4197_v29 = vadd.f32 1.0, %v8917_v23  ;;  %v6744_v23 = vmul.f32 -1.442695, %v11941_v50  ;;  %v6967_v50 = vmul.f32 -1.442695, %v11963_v26  ;;  %v13104_v26 = vld [vmem:[#allocation26_spill] sm:$0xff] }
 0x3e3   : > { %v8921_v12 = vpop.eup %8920  ;;  %8940 = vrcp.f32 %v4436_v11  ;;  %v4440_v53 = vadd.f32 1.0, %v8919_v18  ;;  %v6963_v11 = vmul.f32 -1.442695, %v11947_v58 }
 0x3e4   : > { %v8923_v13 = vpop.eup %8922  ;;  %8942 = vrcp.f32 %v4197_v29  ;;  %v4222_v39 = vadd.f32 1.0, %v8921_v12  ;;  %v12213_v12 = vpop.f32.mrb[222].mxu0 }
 0x3e5   : > { %v8925_v2 = vpop.eup %8924  ;;  %8944 = vrcp.f32 %v4440_v53  ;;  %v4441_v57 = vadd.f32 1.0, %v8923_v13  ;;  %v12220_v29 = vpop.f32.mrb[223].mxu1  ;;  %v13102_v13 = vld [vmem:[#allocation24_spill] sm:$0xff] }
 0x3e6   : > { %v8927_v44 = vpop.eup %8926  ;;  %6092 = vst [vmem:[%s10149_s27 + $0x9f0] sm:$0xff] %v8925_v2  ;;  %8946 = vrcp.f32 %v4222_v39  ;;  %v12222_v53 = vpop.f32.mrb[223].mxu0  ;;  %v6759_v39 = vmul.f32 -1.442695, %v13102_v13 }
 0x3e7   : > { %v8929_v59 = vpop.eup %8928  ;;  %5843 = vst.msk [vmem:[%s10149_s27 + $0x228] sm:$0xff] %vm5777_vm3, %v8927_v44  ;;  %8948 = vrcp.f32 %v4441_v57  ;;  %v6749_v57 = vmul.f32 -1.442695, %v13104_v26  ;;  %v13105_v44 = vld [vmem:[#allocation27_spill] sm:$0xff]  ;;  %v12239_v13 = vpop.f32.mrb[224].mxu1 }
 0x3e8   : > { %v8931_v62 = vpop.eup %8930  ;;  %6096 = vst [vmem:[%s10149_s27 + $0xa10] sm:$0xff] %v8929_v59  ;;  %8950 = vpow2.f32 %v6729_v9  ;;  %v6968_v9 = vmul.f32 -1.442695, %v13103_v49  ;;  %v13108_v49 = vld [vmem:[#allocation2_spill] sm:$0xff]  ;;  %v12245_v26 = vpop.f32.mrb[225].mxu1 }
 0x3e9   : > { %v8933_v18 = vpop.eup %8932  ;;  %5868 = vst.msk [vmem:[%s10149_s27 + $0x2f0] sm:$0xff] %vm5777_vm3, %v8931_v62  ;;  %8952 = vpow2.f32 %v6962_v25  ;;  %v13106_v62 = vld [vmem:[#allocation28_spill] sm:$0xff]  ;;  %13109 = vst [vmem:[#allocation8_spill] sm:$0xff] %v12245_v26 }
 0x3ea   : > { %v8935_v58 = vpop.eup %8934  ;;  %6097 = vst [vmem:[%s10149_s27 + $0xa18] sm:$0xff] %v8933_v18  ;;  %8954 = vpow2.f32 %v6744_v23  ;;  %v6972_v23 = vmul.f32 -1.442695, %v13105_v44 }
 0x3eb   : > { %v8937_v52 = vpop.eup %8936  ;;  %5858 = vst.msk [vmem:[%s10149_s27 + $0x2a0] sm:$0xff] %vm5777_vm3, %v8935_v58  ;;  %8956 = vpow2.f32 %v6963_v11  ;;  %v6764_v11 = vmul.f32 -1.442695, %v13106_v62 }
 0x3ec   : > { %v8939_v2 = vpop.eup %8938  ;;  %6101 = vst [vmem:[%s10149_s27 + $0xa38] sm:$0xff] %v8937_v52  ;;  %8958 = vpow2.f32 %v6734_v30  ;;  %v13107_v30 = vld [vmem:[#allocation29_spill] sm:$0xff]  ;;  %v12241_v52 = vpop.f32.mrb[224].mxu0 }
 0x3ed   : > { %v8941_v25 = vpop.eup %8940  ;;  %5873 = vst.msk [vmem:[%s10149_s27 + $0x318] sm:$0xff] %vm5777_vm3, %v8939_v2  ;;  %8960 = vpow2.f32 %v6967_v50  ;;  %v6973_v58 = vmul.f32 -1.442695, %v13107_v30  ;;  %v6754_v2 = vmul.f32 -1.442695, %v13108_v49 }
 0x3ee   : > { %v8943_v59 = vpop.eup %8942  ;;  %6102 = vst [vmem:[%s10149_s27 + $0xa40] sm:$0xff] %v8941_v25  ;;  %8962 = vpow2.f32 %v6759_v39  ;;  %v12247_v39 = vpop.f32.mrb[225].mxu0 }
 0x3ef   : > { %v8945_v18 = vpop.eup %8944  ;;  %5863 = vst.msk [vmem:[%s10149_s27 + $0x2c8] sm:$0xff] %vm5777_vm3, %v8943_v59  ;;  %8964 = vpow2.f32 %v6968_v9  ;;  %13110 = vst [vmem:[#allocation7_spill] sm:$0xff] %v12247_v39  ;;  %v12251_v9 = vpop.f32.mrb[226].mxu1 }
 0x3f0   : > { %v8947_v50 = vpop.eup %8946  ;;  %6106 = vst [vmem:[%s10149_s27 + $0xa60] sm:$0xff] %v8945_v18  ;;  %8966 = vpow2.f32 %v6749_v57  ;;  %13111 = vst [vmem:[#allocation9_spill] sm:$0xff] %v12251_v9  ;;  %v12253_v44 = vpop.f32.mrb[226].mxu0 }
 0x3f1   : > { %v8949_v25 = vpop.eup %8948  ;;  %5888 = vst.msk [vmem:[%s10149_s27 + $0x390] sm:$0xff] %vm5777_vm3, %v8947_v50  ;;  %8968 = vpow2.f32 %v6972_v23  ;;  %13112 = vst [vmem:[#allocation10_spill] sm:$0xff] %v12253_v44  ;;  %v12256_v57 = vpop.f32.mrb[227].mxu1 }
 0x3f2   : > { %v8951_v59 = vpop.eup %8950  ;;  %6107 = vst [vmem:[%s10149_s27 + $0xa68] sm:$0xff] %v8949_v25  ;;  %8970 = vpow2.f32 %v6764_v11  ;;  %13113 = vst [vmem:[#allocation11_spill] sm:$0xff] %v12256_v57  ;;  %v12258_v30 = vpop.f32.mrb[227].mxu0 }
 0x3f3   : > { %v8953_v62 = vpop.eup %8952  ;;  %v4212_v18 = vadd.f32 1.0, %v8951_v59  ;;  %8972 = vpow2.f32 %v6973_v58  ;;  %13114 = vst [vmem:[#allocation12_spill] sm:$0xff] %v12258_v30  ;;  %v12260_v11 = vpop.f32.mrb[228].mxu1 }
 0x3f4   : > { %v8955_v49 = vpop.eup %8954  ;;  %v4445_v39 = vadd.f32 1.0, %v8953_v62  ;;  %8974 = vpow2.f32 %v6754_v2  ;;  %13115 = vst [vmem:[#allocation13_spill] sm:$0xff] %v12260_v11  ;;  %v12262_v59 = vpop.f32.mrb[228].mxu0 }
 0x3f5   : > { %v8957_v26 = vpop.eup %8956  ;;  %8976 = vrcp.f32 %v4212_v18  ;;  %v4227_v23 = vadd.f32 1.0, %v8955_v49  ;;  %13116 = vst [vmem:[#allocation14_spill] sm:$0xff] %v12262_v59 }
 0x3f6   : > { %v8959_v50 = vpop.eup %8958  ;;  %8978 = vrcp.f32 %v4445_v39  ;;  %v4446_v9 = vadd.f32 1.0, %v8957_v26 }
 0x3f7   : > { %v8961_v44 = vpop.eup %8960  ;;  %8980 = vrcp.f32 %v4227_v23  ;;  %v4217_v25 = vadd.f32 1.0, %v8959_v50 }
 0x3f8   : > { %v8963_v58 = vpop.eup %8962  ;;  %8982 = vrcp.f32 %v4446_v9  ;;  %v4450_v57 = vadd.f32 1.0, %v8961_v44  ;;  %v6977_v44 = vmul.f32 -1.442695, %v11981_v41  ;;  %v6982_v41 = vmul.f32 -1.442695, %v12003_v20 }
 0x3f9   : > { %v8965_v30 = vpop.eup %8964  ;;  %8984 = vrcp.f32 %v4217_v25  ;;  %v4242_v62 = vadd.f32 1.0, %v8963_v58 }
 0x3fa   : > { %v8967_v2 = vpop.eup %8966  ;;  %8986 = vrcp.f32 %v4450_v57  ;;  %v4451_v18 = vadd.f32 1.0, %v8965_v30  ;;  %v6779_v30 = vmul.f32 -1.442695, %v11985_v38  ;;  %v12274_v38 = vpop.f32.mrb[229].mxu1 }
 0x3fb   : > { %v8969_v49 = vpop.eup %8968  ;;  %8988 = vrcp.f32 %v4242_v62  ;;  %v4232_v39 = vadd.f32 1.0, %v8967_v2  ;;  %v6978_v62 = vmul.f32 -1.442695, %v11995_v7  ;;  %v6784_v7 = vmul.f32 -1.442695, %v12005_v8 }
 0x3fc   : > { %v8971_v26 = vpop.eup %8970  ;;  %8990 = vrcp.f32 %v4451_v18  ;;  %v4455_v23 = vadd.f32 1.0, %v8969_v49  ;;  %v6769_v18 = vmul.f32 -1.442695, %v11997_v31  ;;  %v6983_v31 = vmul.f32 -1.442695, %v12011_v48 }
 0x3fd   : > { %v8973_v50 = vpop.eup %8972  ;;  %8992 = vrcp.f32 %v4232_v39  ;;  %v4247_v59 = vadd.f32 1.0, %v8971_v26  ;;  %v12283_v26 = vpop.f32.mrb[230].mxu1  ;;  %v6987_v8 = vmul.f32 -1.442695, %v12023_v15  ;;  %v6789_v15 = vmul.f32 -1.442695, %v12029_v51 }
 0x3fe   : > { %v8975_v11 = vpop.eup %8974  ;;  %8994 = vrcp.f32 %v4455_v23  ;;  %v4456_v9 = vadd.f32 1.0, %v8973_v50  ;;  %v6774_v50 = vmul.f32 -1.442695, %v12013_v54  ;;  %v6988_v54 = vmul.f32 -1.442695, %v12027_v14 }
 0x3ff   : > { %v8977_v25 = vpop.eup %8976  ;;  %8996 = vrcp.f32 %v4247_v59  ;;  %v4237_v57 = vadd.f32 1.0, %v8975_v11  ;;  %v12276_v11 = vpop.f32.mrb[229].mxu0 }
 0x400   : > { %v8979_v58 = vpop.eup %8978  ;;  %5878 = vst.msk [vmem:[%s10149_s27 + $0x340] sm:$0xff] %vm5777_vm3, %v8977_v25  ;;  %8998 = vrcp.f32 %v4456_v9  ;;  %v12285_v20 = vpop.f32.mrb[230].mxu0 }
 0x401   : > { %v8981_v2 = vpop.eup %8980  ;;  %6111 = vst [vmem:[%s10149_s27 + $0xa88] sm:$0xff] %v8979_v58  ;;  %9000 = vrcp.f32 %v4237_v57  ;;  %v12294_v48 = vpop.f32.mrb[231].mxu0  ;;  %v6799_v57 = vmul.f32 -1.442695, %v12025_v55 }
 0x402   : > { %v8983_v49 = vpop.eup %8982  ;;  %5893 = vst.msk [vmem:[%s10149_s27 + $0x3b8] sm:$0xff] %vm5777_vm3, %v8981_v2  ;;  %9002 = vpow2.f32 %v6977_v44  ;;  %v12292_v44 = vpop.f32.mrb[231].mxu1  ;;  %v13117_v2 = vld [vmem:[#allocation3_spill] sm:$0xff] }
 0x403   : > { %v8985_v59 = vpop.eup %8984  ;;  %6112 = vst [vmem:[%s10149_s27 + $0xa90] sm:$0xff] %v8983_v49  ;;  %9004 = vpow2.f32 %v6779_v30  ;;  %v12311_v14 = vpop.f32.mrb[232].mxu0 }
 0x404   : > { %v8987_v39 = vpop.eup %8986  ;;  %5883 = vst.msk [vmem:[%s10149_s27 + $0x368] sm:$0xff] %vm5777_vm3, %v8985_v59  ;;  %9006 = vpow2.f32 %v6978_v62 }
 0x405   : > { %v8989_v23 = vpop.eup %8988  ;;  %6116 = vst [vmem:[%s10149_s27 + $0xab0] sm:$0xff] %v8987_v39  ;;  %9008 = vpow2.f32 %v6769_v18  ;;  %v6992_v18 = vmul.f32 -1.442695, %v13117_v2  ;;  %v12315_v39 = vpop.f32.mrb[233].mxu0 }
 0x406   : > { %v8991_v9 = vpop.eup %8990  ;;  %5908 = vst.msk [vmem:[%s10149_s27 + $0x430] sm:$0xff] %vm5777_vm3, %v8989_v23  ;;  %9010 = vpow2.f32 %v6982_v41  ;;  %v12309_v41 = vpop.f32.mrb[232].mxu1 }
 0x407   : > { %v8993_v25 = vpop.eup %8992  ;;  %6117 = vst [vmem:[%s10149_s27 + $0xab8] sm:$0xff] %v8991_v9  ;;  %9012 = vpow2.f32 %v6784_v7  ;;  %v12313_v51 = vpop.f32.mrb[233].mxu1 }
 0x408   : > { %v8995_v30 = vpop.eup %8994  ;;  %5898 = vst.msk [vmem:[%s10149_s27 + $0x3e0] sm:$0xff] %vm5777_vm3, %v8993_v25  ;;  %9014 = vpow2.f32 %v6983_v31  ;;  %v12319_v9 = vpop.f32.mrb[234].mxu0 }
 0x409   : > { %v8997_v58 = vpop.eup %8996  ;;  %6121 = vst [vmem:[%s10149_s27 + $0xad8] sm:$0xff] %v8995_v30  ;;  %9016 = vpow2.f32 %v6774_v50  ;;  %v12317_v50 = vpop.f32.mrb[234].mxu1  ;;  %13118 = vst [vmem:[#allocation15_spill] sm:$0xff] %v12319_v9 }
 0x40a   : > { %v8999_v62 = vpop.eup %8998  ;;  %5913 = vst.msk [vmem:[%s10149_s27 + $0x458] sm:$0xff] %vm5777_vm3, %v8997_v58  ;;  %9018 = vpow2.f32 %v6987_v8 }
 0x40b   : > { %v9001_v49 = vpop.eup %9000  ;;  %6122 = vst [vmem:[%s10149_s27 + $0xae0] sm:$0xff] %v8999_v62  ;;  %9020 = vpow2.f32 %v6799_v57  ;;  %v12321_v57 = vpop.f32.mrb[235].mxu1 }
 0x40c   : > { %v9003_v55 = vpop.eup %9002  ;;  %5903 = vst.msk [vmem:[%s10149_s27 + $0x408] sm:$0xff] %vm5777_vm3, %v9001_v49  ;;  %9022 = vpow2.f32 %v6988_v54 }
 0x40d   : > { %v9005_v59 = vpop.eup %9004  ;;  %v4460_v7 = vadd.f32 1.0, %v9003_v55  ;;  %9024 = vpow2.f32 %v6789_v15 }
 0x40e   : > { %v9007_v31 = vpop.eup %9006  ;;  %v4262_v23 = vadd.f32 1.0, %v9005_v59  ;;  %9026 = vpow2.f32 %v6992_v18 }
 0x40f   : > { %v9009_v8 = vpop.eup %9008  ;;  %9028 = vrcp.f32 %v4460_v7  ;;  %v4461_v25 = vadd.f32 1.0, %v9007_v31 }
 0x410   : > { %v9011_v30 = vpop.eup %9010  ;;  %9030 = vrcp.f32 %v4262_v23  ;;  %v4252_v54 = vadd.f32 1.0, %v9009_v8 }
 0x411   : > { %v9013_v58 = vpop.eup %9012  ;;  %9032 = vrcp.f32 %v4461_v25  ;;  %v4465_v15 = vadd.f32 1.0, %v9011_v30 }
 0x412   : > { %v9015_v62 = vpop.eup %9014  ;;  %9034 = vrcp.f32 %v4252_v54  ;;  %v4267_v2 = vadd.f32 1.0, %v9013_v58  ;;  %v13119_v58 = vld [vmem:[#allocation30_spill] sm:$0xff] }
 0x413   : > { %v9017_v49 = vpop.eup %9016  ;;  %9036 = vrcp.f32 %v4465_v15  ;;  %v4466_v18 = vadd.f32 1.0, %v9015_v62  ;;  %v6804_v15 = vmul.f32 -1.442695, %v13119_v58 }
 0x414   : > { %v9019_v55 = vpop.eup %9018  ;;  %9038 = vrcp.f32 %v4267_v2  ;;  %v4257_v59 = vadd.f32 1.0, %v9017_v49  ;;  %v6993_v49 = vmul.f32 -1.442695, %v12043_v63  ;;  %v6819_v63 = vmul.f32 -1.442695, %v12061_v4 }
 0x415   : > { %v9021_v9 = vpop.eup %9020  ;;  %9040 = vrcp.f32 %v4466_v18  ;;  %v4470_v7 = vadd.f32 1.0, %v9019_v55 }
 0x416   : > { %v9023_v31 = vpop.eup %9022  ;;  %9042 = vrcp.f32 %v4257_v59  ;;  %v4282_v23 = vadd.f32 1.0, %v9021_v9  ;;  %v6794_v9 = vmul.f32 -1.442695, %v12045_v33  ;;  %v6997_v59 = vmul.f32 -1.442695, %v12059_v17 }
 0x417   : > { %v9025_v8 = vpop.eup %9024  ;;  %9044 = vrcp.f32 %v4470_v7  ;;  %v4471_v25 = vadd.f32 1.0, %v9023_v31  ;;  %v12330_v7 = vpop.f32.mrb[235].mxu0  ;;  %v6998_v33 = vmul.f32 -1.442695, %v12065_v56  ;;  %v6809_v17 = vmul.f32 -1.442695, %v12067_v35 }
 0x418   : > { %v9027_v30 = vpop.eup %9026  ;;  %9046 = vrcp.f32 %v4282_v23  ;;  %v4272_v54 = vadd.f32 1.0, %v9025_v8  ;;  %v7003_v56 = vmul.f32 -1.442695, %v12079_v43  ;;  %v12347_v35 = vpop.f32.mrb[236].mxu1  ;;  %v13121_v43 = vld [vmem:[#allocation4_spill] sm:$0xff] }
 0x419   : > { %v9029_v62 = vpop.eup %9028  ;;  %9048 = vrcp.f32 %v4471_v25  ;;  %v4475_v2 = vadd.f32 1.0, %v9027_v30  ;;  %v7002_v30 = vmul.f32 -1.442695, %v12072_v37  ;;  %v13120_v37 = vld [vmem:[#allocation31_spill] sm:$0xff] }
 0x41a   : > { %v9031_v18 = vpop.eup %9030  ;;  %6126 = vst [vmem:[%s10149_s27 + $0xb00] sm:$0xff] %v9029_v62  ;;  %9050 = vrcp.f32 %v4272_v54  ;;  %v6824_v54 = vmul.f32 -1.442695, %v12074_v27 }
 0x41b   : > { %v9033_v55 = vpop.eup %9032  ;;  %5928 = vst.msk [vmem:[%s10149_s27 + $0x4d0] sm:$0xff] %vm5777_vm3, %v9031_v18  ;;  %9052 = vrcp.f32 %v4475_v2  ;;  %v6814_v2 = vmul.f32 -1.442695, %v13120_v37 }
 0x41c   : > { %v9035_v31 = vpop.eup %9034  ;;  %6127 = vst [vmem:[%s10149_s27 + $0xb08] sm:$0xff] %v9033_v55  ;;  %9054 = vpow2.f32 %v6804_v15  ;;  %v12349_v15 = vpop.f32.mrb[236].mxu0 }
 0x41d   : > { %v9037_v23 = vpop.eup %9036  ;;  %5918 = vst.msk [vmem:[%s10149_s27 + $0x480] sm:$0xff] %vm5777_vm3, %v9035_v31  ;;  %9056 = vpow2.f32 %v6993_v49  ;;  %v12353_v49 = vpop.f32.mrb[237].mxu1 }
 0x41e   : > { %v9039_v8 = vpop.eup %9038  ;;  %6131 = vst [vmem:[%s10149_s27 + $0xb28] sm:$0xff] %v9037_v23  ;;  %9058 = vpow2.f32 %v6794_v9  ;;  %v12355_v27 = vpop.f32.mrb[237].mxu0  ;;  %v7007_v9 = vmul.f32 -1.442695, %v13121_v43 }
 0x41f   : > { %v9041_v25 = vpop.eup %9040  ;;  %5933 = vst.msk [vmem:[%s10149_s27 + $0x4f8] sm:$0xff] %vm5777_vm3, %v9039_v8  ;;  %9060 = vpow2.f32 %v6997_v59  ;;  %v12360_v55 = vpop.f32.mrb[238].mxu1 }
 0x420   : > { %v9043_v4 = vpop.eup %9042  ;;  %6132 = vst [vmem:[%s10149_s27 + $0xb30] sm:$0xff] %v9041_v25  ;;  %9062 = vpow2.f32 %v6819_v63  ;;  %v12362_v59 = vpop.f32.mrb[238].mxu0  ;;  %v13122_v63 = vld [vmem:[#allocation5_spill] sm:$0xff] }
 0x421   : > { %v9045_v58 = vpop.eup %9044  ;;  %5923 = vst.msk [vmem:[%s10149_s27 + $0x4a8] sm:$0xff] %vm5777_vm3, %v9043_v4  ;;  %9064 = vpow2.f32 %v6998_v33  ;;  %v6839_v23 = vmul.f32 -1.442695, %v13122_v63  ;;  %v12368_v8 = vpop.f32.mrb[239].mxu1 }
 0x422   : > { %v9047_v62 = vpop.eup %9046  ;;  %6136 = vst [vmem:[%s10149_s27 + $0xb50] sm:$0xff] %v9045_v58  ;;  %9066 = vpow2.f32 %v6809_v17  ;;  %v12370_v17 = vpop.f32.mrb[239].mxu0 }
 0x423   : > { %v9049_v18 = vpop.eup %9048  ;;  %5948 = vst.msk [vmem:[%s10149_s27 + $0x570] sm:$0xff] %vm5777_vm3, %v9047_v62  ;;  %9068 = vpow2.f32 %v7002_v30  ;;  %v12375_v43 = vpop.f32.mrb[240].mxu0 }
 0x424   : > { %v9051_v31 = vpop.eup %9050  ;;  %6137 = vst [vmem:[%s10149_s27 + $0xb58] sm:$0xff] %v9049_v18  ;;  %9070 = vpow2.f32 %v6824_v54  ;;  %v12373_v18 = vpop.f32.mrb[240].mxu1  ;;  %13124 = vst [vmem:[#allocation17_spill] sm:$0xff] %v12375_v43 }
 0x425   : > { %v9053_v33 = vpop.eup %9052  ;;  %5938 = vst.msk [vmem:[%s10149_s27 + $0x520] sm:$0xff] %vm5777_vm3, %v9051_v31  ;;  %9072 = vpow2.f32 %v7003_v56  ;;  %13123 = vst [vmem:[#allocation16_spill] sm:$0xff] %v12373_v18  ;;  %v12377_v63 = vpop.f32.mrb[241].mxu1 }
 0x426   : > { %v9055_v25 = vpop.eup %9054  ;;  %6141 = vst [vmem:[%s10149_s27 + $0xb78] sm:$0xff] %v9053_v33  ;;  %9074 = vpow2.f32 %v6814_v2  ;;  %13125 = vst [vmem:[#allocation18_spill] sm:$0xff] %v12377_v63  ;;  %v12379_v33 = vpop.f32.mrb[241].mxu0 }
 0x427   : > { %v9057_v30 = vpop.eup %9056  ;;  %v4287_v4 = vadd.f32 1.0, %v9055_v25  ;;  %9076 = vpow2.f32 %v7007_v9  ;;  %13126 = vst [vmem:[#allocation19_spill] sm:$0xff] %v12379_v33 }
 0x428   : > { %v9059_v58 = vpop.eup %9058  ;;  %v4476_v62 = vadd.f32 1.0, %v9057_v30  ;;  %9078 = vpow2.f32 %v6839_v23 }
 0x429   : > { %v9061_v54 = vpop.eup %9060  ;;  %9080 = vrcp.f32 %v4287_v4  ;;  %v4277_v37 = vadd.f32 1.0, %v9059_v58 }
 0x42a   : > { %v9063_v56 = vpop.eup %9062  ;;  %9082 = vrcp.f32 %v4476_v62  ;;  %v4480_v31 = vadd.f32 1.0, %v9061_v54 }
 0x42b   : > { %v9065_v2 = vpop.eup %9064  ;;  %9084 = vrcp.f32 %v4277_v37  ;;  %v4302_v9 = vadd.f32 1.0, %v9063_v56 }
 0x42c   : > { %v9067_v25 = vpop.eup %9066  ;;  %9086 = vrcp.f32 %v4480_v31  ;;  %v4481_v23 = vadd.f32 1.0, %v9065_v2  ;;  %v13127_v2 = vld [vmem:[#allocation6_spill] sm:$0xff] }
 0x42d   : > { %v9069_v30 = vpop.eup %9068  ;;  %9088 = vrcp.f32 %v4302_v9  ;;  %v4292_v4 = vadd.f32 1.0, %v9067_v25  ;;  %v7008_v9 = vmul.f32 -1.442695, %v13127_v2  ;;  %v6859_v2 = vmul.f32 -1.442695, %v12132_v1 }
 0x42e   : > { %v9071_v58 = vpop.eup %9070  ;;  %9090 = vrcp.f32 %v4481_v23  ;;  %v4485_v18 = vadd.f32 1.0, %v9069_v30  ;;  %v6829_v30 = vmul.f32 -1.442695, %v12093_v3  ;;  %v7013_v3 = vmul.f32 -1.442695, %v12112_v10 }
 0x42f   : > { %v9073_v43 = vpop.eup %9072  ;;  %9092 = vrcp.f32 %v4292_v4  ;;  %v4307_v62 = vadd.f32 1.0, %v9071_v58  ;;  %v12391_v58 = vpop.f32.mrb[242].mxu1 }
 0x430   : > { %v9075_v54 = vpop.eup %9074  ;;  %9094 = vrcp.f32 %v4485_v18  ;;  %v4486_v63 = vadd.f32 1.0, %v9073_v43  ;;  %v7012_v18 = vmul.f32 -1.442695, %v12103_v36  ;;  %v6834_v36 = vmul.f32 -1.442695, %v12114_v60 }
 0x431   : > { %v9077_v33 = vpop.eup %9076  ;;  %9096 = vrcp.f32 %v4307_v62  ;;  %v4297_v37 = vadd.f32 1.0, %v9075_v54  ;;  %v12393_v62 = vpop.f32.mrb[242].mxu0  ;;  %v7018_v60 = vmul.f32 -1.442695, %v12135_v6  ;;  %v13128_v6 = vld [vmem:[#allocation32_spill] sm:$0xff] }
 0x432   : > { %v9079_v56 = vpop.eup %9078  ;;  %9098 = vrcp.f32 %v4486_v63  ;;  %v4490_v31 = vadd.f32 1.0, %v9077_v33  ;;  %v6844_v63 = vmul.f32 -1.442695, %v12105_v21  ;;  %v7017_v21 = vmul.f32 -1.442695, %v12130_v40  ;;  %v12402_v10 = vpop.f32.mrb[243].mxu0 }
 0x433   : > { %v9081_v25 = vpop.eup %9080  ;;  %9100 = vrcp.f32 %v4297_v37  ;;  %v4322_v23 = vadd.f32 1.0, %v9079_v56  ;;  %v12400_v56 = vpop.f32.mrb[243].mxu1  ;;  %v6849_v40 = vmul.f32 -1.442695, %v12137_v19 }
 0x434   : > { %v9083_v4 = vpop.eup %9082  ;;  %5953 = vst.msk [vmem:[%s10149_s27 + $0x598] sm:$0xff] %vm5777_vm3, %v9081_v25  ;;  %9102 = vrcp.f32 %v4490_v31  ;;  %v12419_v19 = vpop.f32.mrb[244].mxu1 }
 0x435   : > { %v9085_v43 = vpop.eup %9084  ;;  %6142 = vst [vmem:[%s10149_s27 + $0xb80] sm:$0xff] %v9083_v4  ;;  %9104 = vrcp.f32 %v4322_v23  ;;  %v6864_v4 = vmul.f32 -1.442695, %v12141_v0 }
 0x436   : > { %v9087_v33 = vpop.eup %9086  ;;  %5943 = vst.msk [vmem:[%s10149_s27 + $0x548] sm:$0xff] %vm5777_vm3, %v9085_v43  ;;  %9106 = vpow2.f32 %v7008_v9  ;;  %v7023_v43 = vmul.f32 -1.442695, %v13128_v6 }
 0x437   : > { %v9089_v54 = vpop.eup %9088  ;;  %6146 = vst [vmem:[%s10149_s27 + $0xba0] sm:$0xff] %v9087_v33  ;;  %9108 = vpow2.f32 %v6829_v30  ;;  %v7022_v30 = vmul.f32 -1.442695, %v12139_v16  ;;  %v12424_v16 = vpop.f32.mrb[245].mxu1 }
 0x438   : > { %v9091_v37 = vpop.eup %9090  ;;  %5968 = vst.msk [vmem:[%s10149_s27 + $0x610] sm:$0xff] %vm5777_vm3, %v9089_v54  ;;  %9110 = vpow2.f32 %v7012_v18  ;;  %v12430_v0 = vpop.f32.mrb[246].mxu1 }
 0x439   : > { %v9093_v31 = vpop.eup %9092  ;;  %6147 = vst [vmem:[%s10149_s27 + $0xba8] sm:$0xff] %v9091_v37  ;;  %9112 = vpow2.f32 %v6844_v63  ;;  %v12421_v63 = vpop.f32.mrb[244].mxu0 }
 0x43a   : > { %v9095_v9 = vpop.eup %9094  ;;  %5958 = vst.msk [vmem:[%s10149_s27 + $0x5c0] sm:$0xff] %vm5777_vm3, %v9093_v31  ;;  %9114 = vpow2.f32 %v7013_v3  ;;  %v12426_v3 = vpop.f32.mrb[245].mxu0 }
 0x43b   : > { %v9097_v25 = vpop.eup %9096  ;;  %6151 = vst [vmem:[%s10149_s27 + $0xbc8] sm:$0xff] %v9095_v9  ;;  %9116 = vpow2.f32 %v6834_v36  ;;  %v12432_v36 = vpop.f32.mrb[246].mxu0 }
 0x43c   : > { %v9099_v23 = vpop.eup %9098  ;;  %5973 = vst.msk [vmem:[%s10149_s27 + $0x638] sm:$0xff] %vm5777_vm3, %v9097_v25  ;;  %9118 = vpow2.f32 %v7017_v21  ;;  %v12434_v31 = vpop.f32.mrb[247].mxu1 }
 0x43d   : > { %v9101_v1 = vpop.eup %9100  ;;  %6152 = vst [vmem:[%s10149_s27 + $0xbd0] sm:$0xff] %v9099_v23  ;;  %9120 = vpow2.f32 %v6859_v2  ;;  %13129 = vst [vmem:[#allocation20_spill] sm:$0xff] %v12434_v31 }
 0x43e   : > { %v9103_v18 = vpop.eup %9102  ;;  %5963 = vst.msk [vmem:[%s10149_s27 + $0x5e8] sm:$0xff] %vm5777_vm3, %v9101_v1  ;;  %9122 = vpow2.f32 %v7018_v60  ;;  %v12436_v60 = vpop.f32.mrb[247].mxu0 }
 0x43f   : > { %v9105_v33 = vpop.eup %9104  ;;  %6156 = vst [vmem:[%s10149_s27 + $0xbf0] sm:$0xff] %v9103_v18  ;;  %9124 = vpow2.f32 %v6849_v40  ;;  %13130 = vst [vmem:[#allocation21_spill] sm:$0xff] %v12436_v60 }
 0x440   : > { %v9107_v54 = vpop.eup %9106  ;;  %5988 = vst.msk [vmem:[%s10149_s27 + $0x6b0] sm:$0xff] %vm5777_vm3, %v9105_v33  ;;  %9126 = vpow2.f32 %v7022_v30 }
 0x441   : > { %v9109_v37 = vpop.eup %9108  ;;  %v4491_v21 = vadd.f32 1.0, %v9107_v54  ;;  %9128 = vpow2.f32 %v6864_v4  ;;  %v12438_v4 = vpop.f32.mrb[248].mxu1 }
 0x442   : > { %v9111_v2 = vpop.eup %9110  ;;  %v4312_v9 = vadd.f32 1.0, %v9109_v37  ;;  %9130 = vpow2.f32 %v7023_v43 }
 0x443   : > { %v9113_v25 = vpop.eup %9112  ;;  %9132 = vrcp.f32 %v4491_v21  ;;  %v4495_v40 = vadd.f32 1.0, %v9111_v2 }
 0x444   : > { %v9115_v23 = vpop.eup %9114  ;;  %9134 = vrcp.f32 %v4312_v9  ;;  %v4327_v30 = vadd.f32 1.0, %v9113_v25 }
 0x445   : > { %v9117_v1 = vpop.eup %9116  ;;  %9136 = vrcp.f32 %v4495_v40  ;;  %v4496_v18 = vadd.f32 1.0, %v9115_v23 }
 0x446   : > { %v9119_v6 = vpop.eup %9118  ;;  %9138 = vrcp.f32 %v4327_v30  ;;  %v4317_v33 = vadd.f32 1.0, %v9117_v1  ;;  %v6854_v1 = vmul.f32 -1.442695, %v12145_v61  ;;  %v7028_v61 = vmul.f32 -1.442695, %v12173_v46 }
 0x447   : > { %v9121_v54 = vpop.eup %9120  ;;  %9140 = vrcp.f32 %v4496_v18  ;;  %v4500_v37 = vadd.f32 1.0, %v9119_v6  ;;  %v6884_v46 = vmul.f32 -1.442695, %v12182_v22  ;;  %v7037_v22 = vmul.f32 -1.442695, %v12196_v47  ;;  %v13132_v47 = vld [vmem:[#allocation34_spill] sm:$0xff] }
 0x448   : > { %v9123_v43 = vpop.eup %9122  ;;  %9142 = vrcp.f32 %v4317_v33  ;;  %v4342_v60 = vadd.f32 1.0, %v9121_v54  ;;  %v7027_v33 = vmul.f32 -1.442695, %v12167_v42  ;;  %v12442_v54 = vpop.f32.mrb[248].mxu0  ;;  %v6869_v42 = vmul.f32 -1.442695, %v12175_v28 }
 0x449   : > { %v9125_v31 = vpop.eup %9124  ;;  %9144 = vrcp.f32 %v4500_v37  ;;  %v4501_v21 = vadd.f32 1.0, %v9123_v43  ;;  %v7033_v28 = vmul.f32 -1.442695, %v12189_v5 }
 0x44a   : > { %v9127_v2 = vpop.eup %9126  ;;  %9146 = vrcp.f32 %v4342_v60  ;;  %v4332_v9 = vadd.f32 1.0, %v9125_v31  ;;  %v6879_v31 = vmul.f32 -1.442695, %v12169_v45  ;;  %v7032_v45 = vmul.f32 -1.442695, %v12180_v32 }
 0x44b   : > { %v9129_v25 = vpop.eup %9128  ;;  %9148 = vrcp.f32 %v4501_v21  ;;  %v4505_v40 = vadd.f32 1.0, %v9127_v2  ;;  %v12454_v2 = vpop.f32.mrb[249].mxu1 }
 0x44c   : > { %v9131_v23 = vpop.eup %9130  ;;  %9150 = vrcp.f32 %v4332_v9  ;;  %v4347_v30 = vadd.f32 1.0, %v9129_v25  ;;  %v12456_v9 = vpop.f32.mrb[249].mxu0 }
 0x44d   : > { %v9133_v18 = vpop.eup %9132  ;;  %9152 = vrcp.f32 %v4505_v40  ;;  %v4506_v6 = vadd.f32 1.0, %v9131_v23  ;;  %v12463_v23 = vpop.f32.mrb[250].mxu1 }
 0x44e   : > { %v9135_v60 = vpop.eup %9134  ;;  %6157 = vst [vmem:[%s10149_s27 + $0xbf8] sm:$0xff] %v9133_v18  ;;  %9154 = vrcp.f32 %v4347_v30  ;;  %v12465_v32 = vpop.f32.mrb[250].mxu0 }
 0x44f   : > { %v9137_v37 = vpop.eup %9136  ;;  %5978 = vst.msk [vmem:[%s10149_s27 + $0x660] sm:$0xff] %vm5777_vm3, %v9135_v60  ;;  %9156 = vrcp.f32 %v4506_v6  ;;  %v12472_v6 = vpop.f32.mrb[251].mxu1  ;;  %v6899_v60 = vmul.f32 -1.442695, %v12198_v24 }
 0x450   : > { %v9139_v43 = vpop.eup %9138  ;;  %6161 = vst [vmem:[%s10149_s27 + $0xc18] sm:$0xff] %v9137_v37  ;;  %9158 = vpow2.f32 %v6854_v1  ;;  %v6874_v1 = vmul.f32 -1.442695, %v12191_v34  ;;  %v12474_v5 = vpop.f32.mrb[251].mxu0  ;;  %v13131_v34 = vld [vmem:[#allocation33_spill] sm:$0xff] }
 0x451   : > { %v9141_v21 = vpop.eup %9140  ;;  %5993 = vst.msk [vmem:[%s10149_s27 + $0x6d8] sm:$0xff] %vm5777_vm3, %v9139_v43  ;;  %9160 = vpow2.f32 %v7027_v33  ;;  %v7038_v37 = vmul.f32 -1.442695, %v13131_v34  ;;  %v6889_v43 = vmul.f32 -1.442695, %v13132_v47 }
 0x452   : > { %v9143_v25 = vpop.eup %9142  ;;  %6162 = vst [vmem:[%s10149_s27 + $0xc20] sm:$0xff] %v9141_v21  ;;  %9162 = vpow2.f32 %v6879_v31 }
 0x453   : > { %v9145_v40 = vpop.eup %9144  ;;  %5983 = vst.msk [vmem:[%s10149_s27 + $0x688] sm:$0xff] %vm5777_vm3, %v9143_v25  ;;  %9164 = vpow2.f32 %v7028_v61  ;;  %v12486_v25 = vpop.f32.mrb[252].mxu1 }
 0x454   : > { %v9147_v30 = vpop.eup %9146  ;;  %6166 = vst [vmem:[%s10149_s27 + $0xc40] sm:$0xff] %v9145_v40  ;;  %9166 = vpow2.f32 %v6869_v42 }
 0x455   : > { %v9149_v18 = vpop.eup %9148  ;;  %6008 = vst.msk [vmem:[%s10149_s27 + $0x750] sm:$0xff] %vm5777_vm3, %v9147_v30  ;;  %9168 = vpow2.f32 %v7032_v45  ;;  %v12490_v30 = vpop.f32.mrb[253].mxu1 }
 0x456   : > { %v9151_v33 = vpop.eup %9150  ;;  %6167 = vst [vmem:[%s10149_s27 + $0xc48] sm:$0xff] %v9149_v18  ;;  %9170 = vpow2.f32 %v6884_v46  ;;  %v12488_v46 = vpop.f32.mrb[252].mxu0 }
 0x457   : > { %v9153_v31 = vpop.eup %9152  ;;  %5998 = vst.msk [vmem:[%s10149_s27 + $0x700] sm:$0xff] %vm5777_vm3, %v9151_v33  ;;  %9172 = vpow2.f32 %v7033_v28  ;;  %v12494_v33 = vpop.f32.mrb[254].mxu1 }
 0x458   : > { %v9155_v61 = vpop.eup %9154  ;;  %6171 = vst [vmem:[%s10149_s27 + $0xc68] sm:$0xff] %v9153_v31  ;;  %9174 = vpow2.f32 %v6874_v1  ;;  %v12492_v1 = vpop.f32.mrb[253].mxu0  ;;  %13133 = vst [vmem:[#allocation22_spill] sm:$0xff] %v12494_v33 }
 0x459   : > { %v9157_v42 = vpop.eup %9156  ;;  %6013 = vst.msk [vmem:[%s10149_s27 + $0x778] sm:$0xff] %vm5777_vm3, %v9155_v61  ;;  %9176 = vpow2.f32 %v7037_v22 }
 0x45a   : > { %v9159_v21 = vpop.eup %9158  ;;  %6172 = vst [vmem:[%s10149_s27 + $0xc70] sm:$0xff] %v9157_v42  ;;  %9178 = vpow2.f32 %v6899_v60  ;;  %v12496_v60 = vpop.f32.mrb[254].mxu0 }
 0x45b   : > { %v9161_v45 = vpop.eup %9160  ;;  %v4337_v24 = vadd.f32 1.0, %v9159_v21  ;;  %9180 = vpow2.f32 %v7038_v37  ;;  %13134 = vst [vmem:[#allocation23_spill] sm:$0xff] %v12496_v60 }
 0x45c   : > { %v9163_v40 = vpop.eup %9162  ;;  %v4510_v28 = vadd.f32 1.0, %v9161_v45  ;;  %9182 = vpow2.f32 %v6889_v43 }
 0x45d   : > { %v9165_v18 = vpop.eup %9164  ;;  %9184 = vrcp.f32 %v4337_v24  ;;  %v4362_v22 = vadd.f32 1.0, %v9163_v40 }
 0x45e   : > { %v9167_v31 = vpop.eup %9166  ;;  %9186 = vrcp.f32 %v4510_v28  ;;  %v4511_v34 = vadd.f32 1.0, %v9165_v18 }
 0x45f   : > { %v9169_v37 = vpop.eup %9168  ;;  %9188 = vrcp.f32 %v4362_v22  ;;  %v4352_v61 = vadd.f32 1.0, %v9167_v31 }
 0x460   : > { %v9171_v47 = vpop.eup %9170  ;;  %9190 = vrcp.f32 %v4511_v34  ;;  %v4515_v43 = vadd.f32 1.0, %v9169_v37  ;;  %v13135_v37 = vld [vmem:[#allocation35_spill] sm:$0xff] }
 0x461   : > { %v9173_v42 = vpop.eup %9172  ;;  %9192 = vrcp.f32 %v4352_v61  ;;  %v4367_v21 = vadd.f32 1.0, %v9171_v47  ;;  %v7042_v61 = vmul.f32 -1.442695, %v13135_v37 }
 0x462   : > { %v9175_v45 = vpop.eup %9174  ;;  %9194 = vrcp.f32 %v4515_v43  ;;  %v4516_v24 = vadd.f32 1.0, %v9173_v42  ;;  %v6904_v42 = vmul.f32 -1.442695, %v12213_v12  ;;  %v7047_v12 = vmul.f32 -1.442695, %v12239_v13  ;;  %v13137_v13 = vld [vmem:[#allocation7_spill] sm:$0xff] }
 0x463   : > { %v9177_v40 = vpop.eup %9176  ;;  %9196 = vrcp.f32 %v4367_v21  ;;  %v4357_v33 = vadd.f32 1.0, %v9175_v45  ;;  %v7043_v45 = vmul.f32 -1.442695, %v12220_v29  ;;  %v6919_v29 = vmul.f32 -1.442695, %v12241_v52 }
 0x464   : > { %v9179_v60 = vpop.eup %9178  ;;  %9198 = vrcp.f32 %v4516_v24  ;;  %v4520_v28 = vadd.f32 1.0, %v9177_v40  ;;  %v12508_v40 = vpop.f32.mrb[255].mxu1  ;;  %v6909_v37 = vmul.f32 -1.442695, %v13137_v13 }
 0x465   : > { %v9181_v18 = vpop.eup %9180  ;;  %9200 = vrcp.f32 %v4357_v33  ;;  %v4382_v22 = vadd.f32 1.0, %v9179_v60  ;;  %v6894_v60 = vmul.f32 -1.442695, %v12222_v53  ;;  %v13136_v53 = vld [vmem:[#allocation8_spill] sm:$0xff] }
 0x466   : > { %v9183_v31 = vpop.eup %9182  ;;  %9202 = vrcp.f32 %v4520_v28  ;;  %v4521_v34 = vadd.f32 1.0, %v9181_v18  ;;  %v12510_v28 = vpop.f32.mrb[255].mxu0 }
 0x467   : > { %v9185_v47 = vpop.eup %9184  ;;  %9204 = vrcp.f32 %v4382_v22  ;;  %v4372_v43 = vadd.f32 1.0, %v9183_v31  ;;  %v7048_v31 = vmul.f32 -1.442695, %v13136_v53 }
 0x468   : > { %v9187_v21 = vpop.eup %9186  ;;  %6003 = vst.msk [vmem:[%s10149_s27 + $0x728] sm:$0xff] %vm5777_vm3, %v9185_v47  ;;  %9206 = vrcp.f32 %v4521_v34  ;;  %v13138_v47 = vld [vmem:[#allocation9_spill] sm:$0xff] }
 0x469   : > { %v9189_v33 = vpop.eup %9188  ;;  %6176 = vst [vmem:[%s10149_s27 + $0xc90] sm:$0xff] %v9187_v21  ;;  %9208 = vrcp.f32 %v4372_v43  ;;  %v7052_v43 = vmul.f32 -1.442695, %v13138_v47 }
 0x46a   : > { %v9191_v24 = vpop.eup %9190  ;;  %6028 = vst.msk [vmem:[%s10149_s27 + $0x7f0] sm:$0xff] %vm5777_vm3, %v9189_v33  ;;  %9210 = vpow2.f32 %v7042_v61  ;;  %v13140_v33 = vld [vmem:[#allocation11_spill] sm:$0xff] }
 0x46b   : > { %v9193_v18 = vpop.eup %9192  ;;  %6177 = vst [vmem:[%s10149_s27 + $0xc98] sm:$0xff] %v9191_v24  ;;  %9212 = vpow2.f32 %v6904_v42  ;;  %v13139_v42 = vld [vmem:[#allocation10_spill] sm:$0xff]  ;;  %v12527_v24 = vpop.f32.mrb[0].mxu1 }
 0x46c   : > { %v9195_v22 = vpop.eup %9194  ;;  %6018 = vst.msk [vmem:[%s10149_s27 + $0x7a0] sm:$0xff] %vm5777_vm3, %v9193_v18  ;;  %9214 = vpow2.f32 %v7043_v45  ;;  %v6924_v21 = vmul.f32 -1.442695, %v13139_v42  ;;  %v12529_v18 = vpop.f32.mrb[0].mxu0 }
 0x46d   : > { %v9197_v34 = vpop.eup %9196  ;;  %6181 = vst [vmem:[%s10149_s27 + $0xcb8] sm:$0xff] %v9195_v22  ;;  %9216 = vpow2.f32 %v6894_v60  ;;  %v7053_v60 = vmul.f32 -1.442695, %v13140_v33  ;;  %v13141_v22 = vld [vmem:[#allocation12_spill] sm:$0xff] }
 0x46e   : > { %v9199_v61 = vpop.eup %9198  ;;  %6033 = vst.msk [vmem:[%s10149_s27 + $0x818] sm:$0xff] %vm5777_vm3, %v9197_v34  ;;  %9218 = vpow2.f32 %v7047_v12  ;;  %v6914_v53 = vmul.f32 -1.442695, %v13141_v22  ;;  %v12535_v34 = vpop.f32.mrb[1].mxu0 }
 0x46f   : > { %v9201_v52 = vpop.eup %9200  ;;  %6182 = vst [vmem:[%s10149_s27 + $0xcc0] sm:$0xff] %v9199_v61  ;;  %9220 = vpow2.f32 %v6919_v29  ;;  %v12533_v29 = vpop.f32.mrb[1].mxu1  ;;  %13142 = vst [vmem:[#allocation24_spill] sm:$0xff] %v12535_v34 }
 0x470   : > { %v9203_v45 = vpop.eup %9202  ;;  %6023 = vst.msk [vmem:[%s10149_s27 + $0x7c8] sm:$0xff] %vm5777_vm3, %v9201_v52  ;;  %9222 = vpow2.f32 %v7048_v31  ;;  %v13143_v31 = vld [vmem:[#allocation13_spill] sm:$0xff]  ;;  %v12540_v47 = vpop.f32.mrb[2].mxu1 }
 0x471   : > { %v9205_v12 = vpop.eup %9204  ;;  %6186 = vst [vmem:[%s10149_s27 + $0xce0] sm:$0xff] %v9203_v45  ;;  %9224 = vpow2.f32 %v6909_v37  ;;  %v7057_v61 = vmul.f32 -1.442695, %v13143_v31  ;;  %13144 = vst [vmem:[#allocation25_spill] sm:$0xff] %v12540_v47  ;;  %v12542_v52 = vpop.f32.mrb[2].mxu0 }
 0x472   : > { %v9207_v13 = vpop.eup %9206  ;;  %6048 = vst.msk [vmem:[%s10149_s27 + $0x890] sm:$0xff] %vm5777_vm3, %v9205_v12  ;;  %9226 = vpow2.f32 %v7052_v43  ;;  %13145 = vst [vmem:[#allocation26_spill] sm:$0xff] %v12542_v52  ;;  %v12547_v45 = vpop.f32.mrb[3].mxu1 }
 0x473   : > { %v9209_v42 = vpop.eup %9208  ;;  %6187 = vst [vmem:[%s10149_s27 + $0xce8] sm:$0xff] %v9207_v13  ;;  %9228 = vpow2.f32 %v6924_v21  ;;  %13146 = vst [vmem:[#allocation27_spill] sm:$0xff] %v12547_v45  ;;  %v12549_v33 = vpop.f32.mrb[3].mxu0 }
 0x474   : > { %v9211_v37 = vpop.eup %9210  ;;  %6038 = vst.msk [vmem:[%s10149_s27 + $0x840] sm:$0xff] %vm5777_vm3, %v9209_v42  ;;  %9230 = vpow2.f32 %v7053_v60  ;;  %13147 = vst [vmem:[#allocation28_spill] sm:$0xff] %v12549_v33  ;;  %v12551_v13 = vpop.f32.mrb[4].mxu1 }
 0x475   : > { %v9213_v22 = vpop.eup %9212  ;;  %v4525_v12 = vadd.f32 1.0, %v9211_v37  ;;  %9232 = vpow2.f32 %v6914_v53  ;;  %13148 = vst [vmem:[#allocation29_spill] sm:$0xff] %v12551_v13  ;;  %v12553_v42 = vpop.f32.mrb[4].mxu0 }
 0x476   : > { %v9215_v43 = vpop.eup %9214  ;;  %v4387_v31 = vadd.f32 1.0, %v9213_v22  ;;  %9234 = vpow2.f32 %v7057_v61  ;;  %13149 = vst [vmem:[#allocation2_spill] sm:$0xff] %v12553_v42  ;;  %v12555_v33 = vpop.f32.mrb[5].mxu1 }
 0x477   : > { %v9217_v47 = vpop.eup %9216  ;;  %9236 = vrcp.f32 %v4525_v12  ;;  %v4526_v52 = vadd.f32 1.0, %v9215_v43  ;;  %13150 = vst [vmem:[#allocation3_spill] sm:$0xff] %v12555_v33 }
 0x478   : > { %v9219_v34 = vpop.eup %9218  ;;  %9238 = vrcp.f32 %v4387_v31  ;;  %v4377_v21 = vadd.f32 1.0, %v9217_v47 }
 0x479   : > { %v9221_v60 = vpop.eup %9220  ;;  %9240 = vrcp.f32 %v4526_v52  ;;  %v4530_v45 = vadd.f32 1.0, %v9219_v34 }
 0x47a   : > { %v9223_v37 = vpop.eup %9222  ;;  %9242 = vrcp.f32 %v4377_v21  ;;  %v4402_v53 = vadd.f32 1.0, %v9221_v60  ;;  %v13151_v60 = vld [vmem:[#allocation14_spill] sm:$0xff] }
 0x47b   : > { %v9225_v22 = vpop.eup %9224  ;;  %9244 = vrcp.f32 %v4530_v45  ;;  %v4531_v61 = vadd.f32 1.0, %v9223_v37  ;;  %v6939_v45 = vmul.f32 -1.442695, %v13151_v60 }
 0x47c   : > { %v9227_v12 = vpop.eup %9226  ;;  %9246 = vrcp.f32 %v4402_v53  ;;  %v4392_v43 = vadd.f32 1.0, %v9225_v22  ;;  %v7058_v22 = vmul.f32 -1.442695, %v12274_v38  ;;  %v6944_v38 = vmul.f32 -1.442695, %v12285_v20 }
 0x47d   : > { %v9229_v31 = vpop.eup %9228  ;;  %9248 = vrcp.f32 %v4531_v61  ;;  %v4535_v47 = vadd.f32 1.0, %v9227_v12  ;;  %v6929_v12 = vmul.f32 -1.442695, %v12276_v11  ;;  %v7063_v11 = vmul.f32 -1.442695, %v12292_v44 }
 0x47e   : > { %v9231_v13 = vpop.eup %9230  ;;  %9250 = vrcp.f32 %v4392_v43  ;;  %v4407_v42 = vadd.f32 1.0, %v9229_v31  ;;  %v12561_v43 = vpop.f32.mrb[5].mxu0  ;;  %v7067_v20 = vmul.f32 -1.442695, %v12309_v41  ;;  %v6949_v41 = vmul.f32 -1.442695, %v12315_v39 }
 0x47f   : > { %v9233_v52 = vpop.eup %9232  ;;  %9252 = vrcp.f32 %v4535_v47  ;;  %v4536_v34 = vadd.f32 1.0, %v9231_v13  ;;  %v12571_v47 = vpop.f32.mrb[6].mxu1 }
 0x480   : > { %v9235_v33 = vpop.eup %9234  ;;  %9254 = vrcp.f32 %v4407_v42  ;;  %v4397_v21 = vadd.f32 1.0, %v9233_v52  ;;  %v7062_v42 = vmul.f32 -1.442695, %v12283_v26  ;;  %v12573_v52 = vpop.f32.mrb[6].mxu0  ;;  %v6934_v26 = vmul.f32 -1.442695, %v12294_v48 }
 0x481   : > { %v9237_v37 = vpop.eup %9236  ;;  %9256 = vrcp.f32 %v4536_v34  ;;  %v4540_v53 = vadd.f32 1.0, %v9235_v33  ;;  %v12580_v60 = vpop.f32.mrb[7].mxu1  ;;  %v7068_v48 = vmul.f32 -1.442695, %v12313_v51 }
 0x482   : > { %v9239_v61 = vpop.eup %9238  ;;  %6191 = vst [vmem:[%s10149_s27 + $0xd08] sm:$0xff] %v9237_v37  ;;  %9258 = vrcp.f32 %v4397_v21  ;;  %v12582_v44 = vpop.f32.mrb[7].mxu0  ;;  %v6959_v37 = vmul.f32 -1.442695, %v12311_v14 }
 0x483   : > { %v9241_v13 = vpop.eup %9240  ;;  %6053 = vst.msk [vmem:[%s10149_s27 + $0x8b8] sm:$0xff] %vm5777_vm3, %v9239_v61  ;;  %9260 = vrcp.f32 %v4540_v53  ;;  %v12598_v51 = vpop.f32.mrb[8].mxu1 }
 0x484   : > { %v9243_v31 = vpop.eup %9242  ;;  %6192 = vst [vmem:[%s10149_s27 + $0xd10] sm:$0xff] %v9241_v13  ;;  %9262 = vpow2.f32 %v6939_v45  ;;  %v13152_v13 = vld [vmem:[#allocation15_spill] sm:$0xff] }
 0x485   : > { %v9245_v33 = vpop.eup %9244  ;;  %6043 = vst.msk [vmem:[%s10149_s27 + $0x868] sm:$0xff] %vm5777_vm3, %v9243_v31  ;;  %9264 = vpow2.f32 %v7058_v22 }
 0x486   : > { %v9247_v34 = vpop.eup %9246  ;;  %6196 = vst [vmem:[%s10149_s27 + $0xd30] sm:$0xff] %v9245_v33  ;;  %9266 = vpow2.f32 %v6929_v12  ;;  %v7072_v12 = vmul.f32 -1.442695, %v12317_v50  ;;  %v12603_v33 = vpop.f32.mrb[9].mxu1 }
 0x487   : > { %v9249_v21 = vpop.eup %9248  ;;  %6068 = vst.msk [vmem:[%s10149_s27 + $0x930] sm:$0xff] %vm5777_vm3, %v9247_v34  ;;  %9268 = vpow2.f32 %v7062_v42  ;;  %v6964_v42 = vmul.f32 -1.442695, %v13152_v13 }
 0x488   : > { %v9251_v45 = vpop.eup %9250  ;;  %6197 = vst [vmem:[%s10149_s27 + $0xd38] sm:$0xff] %v9249_v21  ;;  %9270 = vpow2.f32 %v6944_v38  ;;  %v12600_v38 = vpop.f32.mrb[8].mxu0 }
 0x489   : > { %v9253_v53 = vpop.eup %9252  ;;  %6058 = vst.msk [vmem:[%s10149_s27 + $0x8e0] sm:$0xff] %vm5777_vm3, %v9251_v45  ;;  %9272 = vpow2.f32 %v7063_v11  ;;  %v12605_v11 = vpop.f32.mrb[9].mxu0 }
 0x48a   : > { %v9255_v22 = vpop.eup %9254  ;;  %6201 = vst [vmem:[%s10149_s27 + $0xd58] sm:$0xff] %v9253_v53  ;;  %9274 = vpow2.f32 %v6934_v26  ;;  %v12607_v26 = vpop.f32.mrb[10].mxu1 }
 0x48b   : > { %v9257_v61 = vpop.eup %9256  ;;  %6073 = vst.msk [vmem:[%s10149_s27 + $0x958] sm:$0xff] %vm5777_vm3, %v9255_v22  ;;  %9276 = vpow2.f32 %v7067_v20  ;;  %v12609_v21 = vpop.f32.mrb[10].mxu0 }
 0x48c   : > { %v9259_v14 = vpop.eup %9258  ;;  %6202 = vst [vmem:[%s10149_s27 + $0xd60] sm:$0xff] %v9257_v61  ;;  %9278 = vpow2.f32 %v6959_v37  ;;  %13153 = vst [vmem:[#allocation30_spill] sm:$0xff] %v12609_v21  ;;  %v12611_v37 = vpop.f32.mrb[11].mxu1 }
 0x48d   : > { %v9261_v31 = vpop.eup %9260  ;;  %6063 = vst.msk [vmem:[%s10149_s27 + $0x908] sm:$0xff] %vm5777_vm3, %v9259_v14  ;;  %9280 = vpow2.f32 %v7068_v48  ;;  %13154 = vst [vmem:[#allocation31_spill] sm:$0xff] %v12611_v37  ;;  %v12613_v22 = vpop.f32.mrb[11].mxu0 }
 0x48e   : > { %v9263_v39 = vpop.eup %9262  ;;  %6206 = vst [vmem:[%s10149_s27 + $0xd80] sm:$0xff] %v9261_v31  ;;  %9282 = vpow2.f32 %v6949_v41 }
 0x48f   : > { %v9265_v50 = vpop.eup %9264  ;;  %v4422_v34 = vadd.f32 1.0, %v9263_v39  ;;  %9284 = vpow2.f32 %v7072_v12 }
 0x490   : > { %v9267_v20 = vpop.eup %9266  ;;  %v4541_v45 = vadd.f32 1.0, %v9265_v50  ;;  %9286 = vpow2.f32 %v6964_v42 }
 0x491   : > { %v9269_v53 = vpop.eup %9268  ;;  %9288 = vrcp.f32 %v4422_v34  ;;  %v4412_v48 = vadd.f32 1.0, %v9267_v20 }
 0x492   : > { %v9271_v41 = vpop.eup %9270  ;;  %9290 = vrcp.f32 %v4541_v45  ;;  %v4545_v61 = vadd.f32 1.0, %v9269_v53 }
 0x493   : > { %v9273_v14 = vpop.eup %9272  ;;  %9292 = vrcp.f32 %v4412_v48  ;;  %v4427_v12 = vadd.f32 1.0, %v9271_v41 }
 0x494   : > { %v9275_v13 = vpop.eup %9274  ;;  %9294 = vrcp.f32 %v4545_v61  ;;  %v4546_v31 = vadd.f32 1.0, %v9273_v14  ;;  %v7073_v14 = vmul.f32 -1.442695, %v12321_v57 }
 0x495   : > { %v9277_v39 = vpop.eup %9276  ;;  %9296 = vrcp.f32 %v4427_v12  ;;  %v4417_v50 = vadd.f32 1.0, %v9275_v13 }
 0x496   : > { %v9279_v42 = vpop.eup %9278  ;;  %9298 = vrcp.f32 %v4546_v31  ;;  %v4550_v37 = vadd.f32 1.0, %v9277_v39  ;;  %v6954_v31 = vmul.f32 -1.442695, %v12330_v7  ;;  %v7078_v7 = vmul.f32 -1.442695, %v12353_v49 }
 0x497   : > { %v9281_v21 = vpop.eup %9280  ;;  %9300 = vrcp.f32 %v4417_v50  ;;  %v4442_v34 = vadd.f32 1.0, %v9279_v42  ;;  %v6979_v50 = vmul.f32 -1.442695, %v12349_v15  ;;  %v7083_v49 = vmul.f32 -1.442695, %v12368_v8  ;;  %v13155_v8 = vld [vmem:[#allocation16_spill] sm:$0xff] }
 0x498   : > { %v9283_v20 = vpop.eup %9282  ;;  %9302 = vrcp.f32 %v4550_v37  ;;  %v4551_v45 = vadd.f32 1.0, %v9281_v21  ;;  %v7077_v21 = vmul.f32 -1.442695, %v12347_v35 }
 0x499   : > { %v9285_v53 = vpop.eup %9284  ;;  %9304 = vrcp.f32 %v4442_v34  ;;  %v4432_v48 = vadd.f32 1.0, %v9283_v20  ;;  %v6969_v34 = vmul.f32 -1.442695, %v12355_v27  ;;  %v7082_v20 = vmul.f32 -1.442695, %v12360_v55  ;;  %v12635_v27 = vpop.f32.mrb[12].mxu1 }
 0x49a   : > { %v9287_v41 = vpop.eup %9286  ;;  %9306 = vrcp.f32 %v4551_v45  ;;  %v4555_v61 = vadd.f32 1.0, %v9285_v53  ;;  %v6984_v45 = vmul.f32 -1.442695, %v12362_v59  ;;  %v6974_v55 = vmul.f32 -1.442695, %v12370_v17  ;;  %v13156_v17 = vld [vmem:[#allocation17_spill] sm:$0xff] }
 0x49b   : > { %v9289_v12 = vpop.eup %9288  ;;  %9308 = vrcp.f32 %v4432_v48  ;;  %v4447_v13 = vadd.f32 1.0, %v9287_v41  ;;  %v12637_v48 = vpop.f32.mrb[12].mxu0 }
 0x49c   : > { %v9291_v39 = vpop.eup %9290  ;;  %6088 = vst.msk [vmem:[%s10149_s27 + $0x9d0] sm:$0xff] %vm5777_vm3, %v9289_v12  ;;  %9310 = vrcp.f32 %v4555_v61  ;;  %v12641_v61 = vpop.f32.mrb[13].mxu1  ;;  %v7087_v12 = vmul.f32 -1.442695, %v13155_v8 }
 0x49d   : > { %v9293_v37 = vpop.eup %9292  ;;  %6207 = vst [vmem:[%s10149_s27 + $0xd88] sm:$0xff] %v9291_v39  ;;  %9312 = vrcp.f32 %v4447_v13  ;;  %v12643_v59 = vpop.f32.mrb[13].mxu0 }
 0x49e   : > { %v9295_v57 = vpop.eup %9294  ;;  %6078 = vst.msk [vmem:[%s10149_s27 + $0x980] sm:$0xff] %vm5777_vm3, %v9293_v37  ;;  %9314 = vpow2.f32 %v7073_v14  ;;  %v12648_v13 = vpop.f32.mrb[14].mxu1 }
 0x49f   : > { %v9297_v42 = vpop.eup %9296  ;;  %6211 = vst [vmem:[%s10149_s27 + $0xda8] sm:$0xff] %v9295_v57  ;;  %9316 = vpow2.f32 %v6954_v31  ;;  %v12650_v31 = vpop.f32.mrb[14].mxu0 }
 0x4a0   : > { %v9299_v35 = vpop.eup %9298  ;;  %6093 = vst.msk [vmem:[%s10149_s27 + $0x9f8] sm:$0xff] %vm5777_vm3, %v9297_v42  ;;  %9318 = vpow2.f32 %v7077_v21  ;;  %v6999_v21 = vmul.f32 -1.442695, %v13156_v17  ;;  %v12659_v42 = vpop.f32.mrb[15].mxu0 }
 0x4a1   : > { %v9301_v15 = vpop.eup %9300  ;;  %6212 = vst [vmem:[%s10149_s27 + $0xdb0] sm:$0xff] %v9299_v35  ;;  %9320 = vpow2.f32 %v6979_v50  ;;  %v13157_v50 = vld [vmem:[#allocation18_spill] sm:$0xff] }
 0x4a2   : > { %v9303_v53 = vpop.eup %9302  ;;  %6083 = vst.msk [vmem:[%s10149_s27 + $0x9a8] sm:$0xff] %vm5777_vm3, %v9301_v15  ;;  %9322 = vpow2.f32 %v7078_v7  ;;  %v7088_v57 = vmul.f32 -1.442695, %v13157_v50  ;;  %v12657_v7 = vpop.f32.mrb[15].mxu1 }
 0x4a3   : > { %v9305_v41 = vpop.eup %9304  ;;  %6216 = vst [vmem:[%s10149_s27 + $0xdd0] sm:$0xff] %v9303_v53  ;;  %9324 = vpow2.f32 %v6969_v34 }
 0x4a4   : > { %v9307_v14 = vpop.eup %9306  ;;  %6108 = vst.msk [vmem:[%s10149_s27 + $0xa70] sm:$0xff] %vm5777_vm3, %v9305_v41  ;;  %9326 = vpow2.f32 %v7082_v20  ;;  %v12666_v41 = vpop.f32.mrb[16].mxu0 }
 0x4a5   : > { %v9309_v39 = vpop.eup %9308  ;;  %6217 = vst [vmem:[%s10149_s27 + $0xdd8] sm:$0xff] %v9307_v14  ;;  %9328 = vpow2.f32 %v6984_v45 }
 0x4a6   : > { %v9311_v37 = vpop.eup %9310  ;;  %6098 = vst.msk [vmem:[%s10149_s27 + $0xa20] sm:$0xff] %vm5777_vm3, %v9309_v39  ;;  %9330 = vpow2.f32 %v7083_v49  ;;  %v12664_v49 = vpop.f32.mrb[16].mxu1 }
 0x4a7   : > { %v9313_v34 = vpop.eup %9312  ;;  %6221 = vst [vmem:[%s10149_s27 + $0xdf8] sm:$0xff] %v9311_v37  ;;  %9332 = vpow2.f32 %v6974_v55  ;;  %v12668_v39 = vpop.f32.mrb[17].mxu1 }
 0x4a8   : > { %v9315_v35 = vpop.eup %9314  ;;  %6113 = vst.msk [vmem:[%s10149_s27 + $0xa98] sm:$0xff] %vm5777_vm3, %v9313_v34  ;;  %9334 = vpow2.f32 %v7087_v12  ;;  %13158 = vst [vmem:[#allocation4_spill] sm:$0xff] %v12668_v39  ;;  %v12670_v55 = vpop.f32.mrb[17].mxu0 }
 0x4a9   : > { %v9317_v20 = vpop.eup %9316  ;;  %v4556_v15 = vadd.f32 1.0, %v9315_v35  ;;  %9336 = vpow2.f32 %v6999_v21  ;;  %13159 = vst [vmem:[#allocation5_spill] sm:$0xff] %v12670_v55  ;;  %v12672_v37 = vpop.f32.mrb[18].mxu1 }
 0x4aa   : > { %v9319_v45 = vpop.eup %9318  ;;  %v4437_v53 = vadd.f32 1.0, %v9317_v20  ;;  %9338 = vpow2.f32 %v7088_v57  ;;  %13160 = vst [vmem:[#allocation6_spill] sm:$0xff] %v12672_v37 }
 0x4ab   : > { %v9321_v14 = vpop.eup %9320  ;;  %9340 = vrcp.f32 %v4556_v15  ;;  %v4560_v8 = vadd.f32 1.0, %v9319_v45 }
 0x4ac   : > { %v9323_v17 = vpop.eup %9322  ;;  %9342 = vrcp.f32 %v4437_v53  ;;  %v4462_v12 = vadd.f32 1.0, %v9321_v14 }
 0x4ad   : > { %v9325_v21 = vpop.eup %9324  ;;  %9344 = vrcp.f32 %v4560_v8  ;;  %v4561_v50 = vadd.f32 1.0, %v9323_v17 }
 0x4ae   : > { %v9327_v57 = vpop.eup %9326  ;;  %9346 = vrcp.f32 %v4462_v12  ;;  %v4452_v34 = vadd.f32 1.0, %v9325_v21  ;;  %v13161_v21 = vld [vmem:[#allocation19_spill] sm:$0xff] }
 0x4af   : > { %v9329_v35 = vpop.eup %9328  ;;  %9348 = vrcp.f32 %v4561_v50  ;;  %v4565_v20 = vadd.f32 1.0, %v9327_v57  ;;  %v6989_v50 = vmul.f32 -1.442695, %v13161_v21 }
 0x4b0   : > { %v9331_v15 = vpop.eup %9330  ;;  %9350 = vrcp.f32 %v4452_v34  ;;  %v4467_v45 = vadd.f32 1.0, %v9329_v35  ;;  %v7092_v35 = vmul.f32 -1.442695, %v12391_v58  ;;  %v6994_v58 = vmul.f32 -1.442695, %v12402_v10 }
 0x4b1   : > { %v9333_v39 = vpop.eup %9332  ;;  %9352 = vrcp.f32 %v4565_v20  ;;  %v4566_v55 = vadd.f32 1.0, %v9331_v15  ;;  %v7098_v10 = vmul.f32 -1.442695, %v12424_v16  ;;  %v13162_v16 = vld [vmem:[#allocation20_spill] sm:$0xff] }
 0x4b2   : > { %v9335_v53 = vpop.eup %9334  ;;  %9354 = vrcp.f32 %v4467_v45  ;;  %v4457_v14 = vadd.f32 1.0, %v9333_v39  ;;  %v7004_v39 = vmul.f32 -1.442695, %v12393_v62  ;;  %v7097_v62 = vmul.f32 -1.442695, %v12419_v19 }
 0x4b3   : > { %v9337_v37 = vpop.eup %9336  ;;  %9356 = vrcp.f32 %v4566_v55  ;;  %v4570_v8 = vadd.f32 1.0, %v9335_v53  ;;  %v7093_v55 = vmul.f32 -1.442695, %v12400_v56  ;;  %v7009_v19 = vmul.f32 -1.442695, %v12426_v3 }
 0x4b4   : > { %v9339_v17 = vpop.eup %9338  ;;  %9358 = vrcp.f32 %v4457_v14  ;;  %v4482_v12 = vadd.f32 1.0, %v9337_v37  ;;  %v12681_v37 = vpop.f32.mrb[18].mxu0  ;;  %v7103_v3 = vmul.f32 -1.442695, %v13162_v16 }
 0x4b5   : > { %v9341_v57 = vpop.eup %9340  ;;  %9360 = vrcp.f32 %v4570_v8  ;;  %v4571_v34 = vadd.f32 1.0, %v9339_v17  ;;  %v12688_v14 = vpop.f32.mrb[19].mxu1  ;;  %v7019_v17 = vmul.f32 -1.442695, %v12421_v63 }
 0x4b6   : > { %v9343_v20 = vpop.eup %9342  ;;  %6222 = vst [vmem:[%s10149_s27 + $0xe00] sm:$0xff] %v9341_v57  ;;  %9362 = vrcp.f32 %v4482_v12  ;;  %v12690_v8 = vpop.f32.mrb[19].mxu0  ;;  %v7102_v57 = vmul.f32 -1.442695, %v12430_v0  ;;  %v13163_v0 = vld [vmem:[#allocation21_spill] sm:$0xff] }
 0x4b7   : > { %v9345_v15 = vpop.eup %9344  ;;  %6103 = vst.msk [vmem:[%s10149_s27 + $0xa48] sm:$0xff] %vm5777_vm3, %v9343_v20  ;;  %9364 = vrcp.f32 %v4571_v34  ;;  %v7024_v34 = vmul.f32 -1.442695, %v12432_v36  ;;  %v12707_v20 = vpop.f32.mrb[20].mxu1 }
 0x4b8   : > { %v9347_v45 = vpop.eup %9346  ;;  %6226 = vst [vmem:[%s10149_s27 + $0xe20] sm:$0xff] %v9345_v15  ;;  %9366 = vpow2.f32 %v6989_v50 }
 0x4b9   : > { %v9349_v53 = vpop.eup %9348  ;;  %6128 = vst.msk [vmem:[%s10149_s27 + $0xb10] sm:$0xff] %vm5777_vm3, %v9347_v45  ;;  %9368 = vpow2.f32 %v7092_v35  ;;  %v12713_v45 = vpop.f32.mrb[21].mxu1 }
 0x4ba   : > { %v9351_v56 = vpop.eup %9350  ;;  %6227 = vst [vmem:[%s10149_s27 + $0xe28] sm:$0xff] %v9349_v53  ;;  %9370 = vpow2.f32 %v7004_v39  ;;  %v12709_v39 = vpop.f32.mrb[20].mxu0 }
 0x4bb   : > { %v9353_v12 = vpop.eup %9352  ;;  %6118 = vst.msk [vmem:[%s10149_s27 + $0xac0] sm:$0xff] %vm5777_vm3, %v9351_v56  ;;  %9372 = vpow2.f32 %v7093_v55  ;;  %v7014_v55 = vmul.f32 -1.442695, %v13163_v0  ;;  %v1960_v53 = vpop.f32.mrb[22].mxu1 }
 0x4bc   : > { %v9355_v21 = vpop.eup %9354  ;;  %6231 = vst [vmem:[%s10149_s27 + $0xe48] sm:$0xff] %v9353_v12  ;;  %9374 = vpow2.f32 %v6994_v58  ;;  %v12715_v58 = vpop.f32.mrb[21].mxu0 }
 0x4bd   : > { %v9357_v50 = vpop.eup %9356  ;;  %6133 = vst.msk [vmem:[%s10149_s27 + $0xb38] sm:$0xff] %vm5777_vm3, %v9355_v21  ;;  %9376 = vpow2.f32 %v7097_v62  ;;  %v7355_v62 = vpop.f32.mrb[22].mxu0 }
 0x4be   : > { %v9359_v63 = vpop.eup %9358  ;;  %6232 = vst [vmem:[%s10149_s27 + $0xe50] sm:$0xff] %v9357_v50  ;;  %9378 = vpow2.f32 %v7019_v17  ;;  %v1961_v17 = vpop.f32.mrb[23].mxu1 }
 0x4bf   : > { %v9361_v35 = vpop.eup %9360  ;;  %6123 = vst.msk [vmem:[%s10149_s27 + $0xae8] sm:$0xff] %vm5777_vm3, %v9359_v63  ;;  %9380 = vpow2.f32 %v7098_v10  ;;  %v12720_v12 = vpop.f32.mrb[23].mxu0 }
 0x4c0   : > { %v9363_v15 = vpop.eup %9362  ;;  %6236 = vst [vmem:[%s10149_s27 + $0xe70] sm:$0xff] %v9361_v35  ;;  %9382 = vpow2.f32 %v7009_v19 }
 0x4c1   : > { %v9365_v36 = vpop.eup %9364  ;;  %6148 = vst.msk [vmem:[%s10149_s27 + $0xbb0] sm:$0xff] %vm5777_vm3, %v9363_v15  ;;  %9384 = vpow2.f32 %v7102_v57 }
 0x4c2   : > { %v9367_v56 = vpop.eup %9366  ;;  %6237 = vst [vmem:[%s10149_s27 + $0xe78] sm:$0xff] %v9365_v36  ;;  %9386 = vpow2.f32 %v7024_v34 }
 0x4c3   : > { %v9369_v10 = vpop.eup %9368  ;;  %v4472_v21 = vadd.f32 1.0, %v9367_v56  ;;  %9388 = vpow2.f32 %v7103_v3 }
 0x4c4   : > { %v9371_v19 = vpop.eup %9370  ;;  %v4575_v50 = vadd.f32 1.0, %v9369_v10  ;;  %9390 = vpow2.f32 %v7014_v55 }
 0x4c5   : > { %v9373_v63 = vpop.eup %9372  ;;  %9392 = vrcp.f32 %v4472_v21  ;;  %v4487_v35 = vadd.f32 1.0, %v9371_v19 }
 0x4c6   : > { %v9375_v16 = vpop.eup %9374  ;;  %9394 = vrcp.f32 %v4575_v50  ;;  %v4576_v57 = vadd.f32 1.0, %v9373_v63 }
 0x4c7   : > { %v9377_v15 = vpop.eup %9376  ;;  %9396 = vrcp.f32 %v4487_v35  ;;  %v4477_v0 = vadd.f32 1.0, %v9375_v16  ;;  %v7107_v16 = vmul.f32 -1.442695, %v12438_v4 }
 0x4c8   : > { %v9379_v36 = vpop.eup %9378  ;;  %9398 = vrcp.f32 %v4576_v57  ;;  %v4580_v34 = vadd.f32 1.0, %v9377_v15 }
 0x4c9   : > { %v9381_v53 = vpop.eup %9380  ;;  %9400 = vrcp.f32 %v4477_v0  ;;  %v4502_v62 = vadd.f32 1.0, %v9379_v36  ;;  %v7039_v0 = vmul.f32 -1.442695, %v12442_v54  ;;  %v7112_v54 = vmul.f32 -1.442695, %v12463_v23 }
 0x4ca   : > { %v9383_v56 = vpop.eup %9382  ;;  %9402 = vrcp.f32 %v4580_v34  ;;  %v4581_v3 = vadd.f32 1.0, %v9381_v53  ;;  %v7108_v34 = vmul.f32 -1.442695, %v12454_v2 }
 0x4cb   : > { %v9385_v17 = vpop.eup %9384  ;;  %9404 = vrcp.f32 %v4502_v62  ;;  %v4492_v55 = vadd.f32 1.0, %v9383_v56  ;;  %v7029_v62 = vmul.f32 -1.442695, %v12456_v9  ;;  %v7113_v9 = vmul.f32 -1.442695, %v12472_v6 }
 0x4cc   : > { %v9387_v10 = vpop.eup %9386  ;;  %9406 = vrcp.f32 %v4581_v3  ;;  %v4585_v21 = vadd.f32 1.0, %v9385_v17  ;;  %v7044_v3 = vmul.f32 -1.442695, %v12465_v32  ;;  %v7117_v32 = vmul.f32 -1.442695, %v12486_v25  ;;  %v13164_v25 = vld [vmem:[#allocation22_spill] sm:$0xff] }
 0x4cd   : > { %v9389_v19 = vpop.eup %9388  ;;  %9408 = vrcp.f32 %v4492_v55  ;;  %v4507_v50 = vadd.f32 1.0, %v9387_v10  ;;  %v7034_v55 = vmul.f32 -1.442695, %v12474_v5  ;;  %v7118_v5 = vmul.f32 -1.442695, %v12490_v30 }
 0x4ce   : > { %v9391_v63 = vpop.eup %9390  ;;  %9410 = vrcp.f32 %v4585_v21  ;;  %v4586_v35 = vadd.f32 1.0, %v9389_v19  ;;  %v7059_v21 = vmul.f32 -1.442695, %v12488_v46 }
 0x4cf   : > { %v9393_v57 = vpop.eup %9392  ;;  %9412 = vrcp.f32 %v4507_v50  ;;  %v4497_v15 = vadd.f32 1.0, %v9391_v63  ;;  %v7049_v50 = vmul.f32 -1.442695, %v12492_v1 }
 0x4d0   : > { %v9395_v36 = vpop.eup %9394  ;;  %6138 = vst.msk [vmem:[%s10149_s27 + $0xb60] sm:$0xff] %vm5777_vm3, %v9393_v57  ;;  %9414 = vrcp.f32 %v4586_v35  ;;  %v7122_v35 = vmul.f32 -1.442695, %v13164_v25 }
 0x4d1   : > { %v9397_v53 = vpop.eup %9396  ;;  %6241 = vst [vmem:[%s10149_s27 + $0xe98] sm:$0xff] %v9395_v36  ;;  %9416 = vrcp.f32 %v4497_v15 }
 0x4d2   : > { %v9399_v4 = vpop.eup %9398  ;;  %6153 = vst.msk [vmem:[%s10149_s27 + $0xbd8] sm:$0xff] %vm5777_vm3, %v9397_v53  ;;  %9418 = vpow2.f32 %v7107_v16 }
 0x4d3   : > { %v9401_v56 = vpop.eup %9400  ;;  %6242 = vst [vmem:[%s10149_s27 + $0xea0] sm:$0xff] %v9399_v4  ;;  %9420 = vpow2.f32 %v7039_v0 }
 0x4d4   : > { %v9403_v2 = vpop.eup %9402  ;;  %6143 = vst.msk [vmem:[%s10149_s27 + $0xb88] sm:$0xff] %vm5777_vm3, %v9401_v56  ;;  %9422 = vpow2.f32 %v7108_v34 }
 0x4d5   : > { %v9405_v17 = vpop.eup %9404  ;;  %6246 = vst [vmem:[%s10149_s27 + $0xec0] sm:$0xff] %v9403_v2  ;;  %9424 = vpow2.f32 %v7029_v62 }
 0x4d6   : > { %v9407_v23 = vpop.eup %9406  ;;  %6168 = vst.msk [vmem:[%s10149_s27 + $0xc50] sm:$0xff] %vm5777_vm3, %v9405_v17  ;;  %9426 = vpow2.f32 %v7112_v54 }
 0x4d7   : > { %v9409_v10 = vpop.eup %9408  ;;  %6247 = vst [vmem:[%s10149_s27 + $0xec8] sm:$0xff] %v9407_v23  ;;  %9428 = vpow2.f32 %v7044_v3 }
 0x4d8   : > { %v9411_v6 = vpop.eup %9410  ;;  %6158 = vst.msk [vmem:[%s10149_s27 + $0xc00] sm:$0xff] %vm5777_vm3, %v9409_v10  ;;  %9430 = vpow2.f32 %v7113_v9 }
 0x4d9   : > { %v9413_v19 = vpop.eup %9412  ;;  %6251 = vst [vmem:[%s10149_s27 + $0xee8] sm:$0xff] %v9411_v6  ;;  %9432 = vpow2.f32 %v7034_v55 }
 0x4da   : > { %v9415_v63 = vpop.eup %9414  ;;  %6173 = vst.msk [vmem:[%s10149_s27 + $0xc78] sm:$0xff] %vm5777_vm3, %v9413_v19  ;;  %9434 = vpow2.f32 %v7117_v32 }
 0x4db   : > { %v9417_v16 = vpop.eup %9416  ;;  %6252 = vst [vmem:[%s10149_s27 + $0xef0] sm:$0xff] %v9415_v63  ;;  %9436 = vpow2.f32 %v7059_v21 }
 0x4dc   : > { %v9419_v46 = vpop.eup %9418  ;;  %6163 = vst.msk [vmem:[%s10149_s27 + $0xc28] sm:$0xff] %vm5777_vm3, %v9417_v16  ;;  %9438 = vpow2.f32 %v7118_v5  ;;  %v7123_v16 = vmul.f32 -1.442695, %v12508_v40 }
 0x4dd   : > { %v9421_v57 = vpop.eup %9420  ;;  %v4590_v30 = vadd.f32 1.0, %v9419_v46  ;;  %9440 = vpow2.f32 %v7049_v50  ;;  %v13165_v50 = vld [vmem:[#allocation23_spill] sm:$0xff] }
 0x4de   : > { %v9423_v15 = vpop.eup %9422  ;;  %v4522_v0 = vadd.f32 1.0, %v9421_v57  ;;  %9442 = vpow2.f32 %v7122_v35  ;;  %v7064_v63 = vmul.f32 -1.442695, %v13165_v50  ;;  %v7054_v57 = vmul.f32 -1.442695, %v12510_v28 }
 0x4df   : > { %v9425_v1 = vpop.eup %9424  ;;  %9444 = vrcp.f32 %v4590_v30  ;;  %v4591_v36 = vadd.f32 1.0, %v9423_v15  ;;  %v7127_v15 = vmul.f32 -1.442695, %v12527_v24  ;;  %v7128_v28 = vmul.f32 -1.442695, %v12533_v29 }
 0x4e0   : > { %v9427_v34 = vpop.eup %9426  ;;  %9446 = vrcp.f32 %v4522_v0  ;;  %v4512_v53 = vadd.f32 1.0, %v9425_v1  ;;  %v7079_v1 = vmul.f32 -1.442695, %v12529_v18 }
 0x4e1   : > { %v9429_v62 = vpop.eup %9428  ;;  %9448 = vrcp.f32 %v4591_v36  ;;  %v4595_v4 = vadd.f32 1.0, %v9427_v34  ;;  %v13166_v34 = vld [vmem:[#allocation24_spill] sm:$0xff] }
 0x4e2   : > { %v9431_v54 = vpop.eup %9430  ;;  %9450 = vrcp.f32 %v4512_v53  ;;  %v4527_v56 = vadd.f32 1.0, %v9429_v62  ;;  %v7069_v53 = vmul.f32 -1.442695, %v13166_v34  ;;  %v13167_v62 = vld [vmem:[#allocation25_spill] sm:$0xff] }
 0x4e3   : > { %v9433_v3 = vpop.eup %9432  ;;  %9452 = vrcp.f32 %v4595_v4  ;;  %v4596_v2 = vadd.f32 1.0, %v9431_v54  ;;  %v7132_v18 = vmul.f32 -1.442695, %v13167_v62  ;;  %v13168_v54 = vld [vmem:[#allocation26_spill] sm:$0xff] }
 0x4e4   : > { %v9435_v9 = vpop.eup %9434  ;;  %9454 = vrcp.f32 %v4527_v56  ;;  %v4517_v17 = vadd.f32 1.0, %v9433_v3  ;;  %v7084_v56 = vmul.f32 -1.442695, %v13168_v54  ;;  %v13169_v3 = vld [vmem:[#allocation27_spill] sm:$0xff] }
 0x4e5   : > { %v9437_v55 = vpop.eup %9436  ;;  %9456 = vrcp.f32 %v4596_v2  ;;  %v4600_v23 = vadd.f32 1.0, %v9435_v9  ;;  %v7133_v2 = vmul.f32 -1.442695, %v13169_v3 }
 0x4e6   : > { %v9439_v32 = vpop.eup %9438  ;;  %9458 = vrcp.f32 %v4517_v17  ;;  %v4542_v10 = vadd.f32 1.0, %v9437_v55  ;;  %v13170_v17 = vld [vmem:[#allocation28_spill] sm:$0xff] }
 0x4e7   : > { %v9441_v21 = vpop.eup %9440  ;;  %9460 = vrcp.f32 %v4600_v23  ;;  %v4601_v6 = vadd.f32 1.0, %v9439_v32  ;;  %v7074_v55 = vmul.f32 -1.442695, %v13170_v17  ;;  %v13171_v32 = vld [vmem:[#allocation29_spill] sm:$0xff] }
 0x4e8   : > { %v9443_v5 = vpop.eup %9442  ;;  %9462 = vrcp.f32 %v4542_v10  ;;  %v4532_v19 = vadd.f32 1.0, %v9441_v21  ;;  %v7137_v10 = vmul.f32 -1.442695, %v13171_v32  ;;  %v7089_v32 = vmul.f32 -1.442695, %v12561_v43 }
 0x4e9   : > { %v9445_v25 = vpop.eup %9444  ;;  %9464 = vrcp.f32 %v4601_v6  ;;  %v4605_v35 = vadd.f32 1.0, %v9443_v5  ;;  %v13172_v6 = vld [vmem:[#allocation2_spill] sm:$0xff]  ;;  %v7143_v43 = vmul.f32 -1.442695, %v12580_v60 }
 0x4ea   : > { %v9447_v46 = vpop.eup %9446  ;;  %6256 = vst [vmem:[%s10149_s27 + $0xf10] sm:$0xff] %v9445_v25  ;;  %9466 = vrcp.f32 %v4532_v19  ;;  %v7099_v5 = vmul.f32 -1.442695, %v13172_v6 }
 0x4eb   : > { %v9449_v30 = vpop.eup %9448  ;;  %6188 = vst.msk [vmem:[%s10149_s27 + $0xcf0] sm:$0xff] %vm5777_vm3, %v9447_v46  ;;  %9468 = vrcp.f32 %v4605_v35 }
 0x4ec   : > { %v9451_v0 = vpop.eup %9450  ;;  %6257 = vst [vmem:[%s10149_s27 + $0xf18] sm:$0xff] %v9449_v30  ;;  %9470 = vpow2.f32 %v7064_v63 }
 0x4ed   : > { %v9453_v40 = vpop.eup %9452  ;;  %6178 = vst.msk [vmem:[%s10149_s27 + $0xca0] sm:$0xff] %vm5777_vm3, %v9451_v0  ;;  %9472 = vpow2.f32 %v7123_v16 }
 0x4ee   : > { %v9455_v36 = vpop.eup %9454  ;;  %6261 = vst [vmem:[%s10149_s27 + $0xf38] sm:$0xff] %v9453_v40  ;;  %9474 = vpow2.f32 %v7054_v57 }
 0x4ef   : > { %v9457_v24 = vpop.eup %9456  ;;  %6193 = vst.msk [vmem:[%s10149_s27 + $0xd18] sm:$0xff] %vm5777_vm3, %v9455_v36  ;;  %9476 = vpow2.f32 %v7127_v15 }
 0x4f0   : > { %v9459_v4 = vpop.eup %9458  ;;  %6262 = vst [vmem:[%s10149_s27 + $0xf40] sm:$0xff] %v9457_v24  ;;  %9478 = vpow2.f32 %v7079_v1 }
 0x4f1   : > { %v9461_v29 = vpop.eup %9460  ;;  %6183 = vst.msk [vmem:[%s10149_s27 + $0xcc8] sm:$0xff] %vm5777_vm3, %v9459_v4  ;;  %9480 = vpow2.f32 %v7128_v28 }
 0x4f2   : > { %v9463_v9 = vpop.eup %9462  ;;  %6266 = vst [vmem:[%s10149_s27 + $0xf60] sm:$0xff] %v9461_v29  ;;  %9482 = vpow2.f32 %v7069_v53 }
 0x4f3   : > { %v9465_v23 = vpop.eup %9464  ;;  %6208 = vst.msk [vmem:[%s10149_s27 + $0xd90] sm:$0xff] %vm5777_vm3, %v9463_v9  ;;  %9484 = vpow2.f32 %v7132_v18  ;;  %v13173_v9 = vld [vmem:[#allocation3_spill] sm:$0xff] }
 0x4f4   : > { %v9467_v21 = vpop.eup %9466  ;;  %6267 = vst [vmem:[%s10149_s27 + $0xf68] sm:$0xff] %v9465_v23  ;;  %9486 = vpow2.f32 %v7084_v56  ;;  %v7138_v17 = vmul.f32 -1.442695, %v13173_v9 }
 0x4f5   : > { %v9469_v19 = vpop.eup %9468  ;;  %6198 = vst.msk [vmem:[%s10149_s27 + $0xd40] sm:$0xff] %vm5777_vm3, %v9467_v21  ;;  %9488 = vpow2.f32 %v7133_v2  ;;  %v7142_v21 = vmul.f32 -1.442695, %v12571_v47 }
 0x4f6   : > { %v9471_v50 = vpop.eup %9470  ;;  %6271 = vst [vmem:[%s10149_s27 + $0xf88] sm:$0xff] %v9469_v19  ;;  %9490 = vpow2.f32 %v7074_v55 }
 0x4f7   : > { %v9473_v63 = vpop.eup %9472  ;;  %v4547_v25 = vadd.f32 1.0, %v9471_v50  ;;  %9492 = vpow2.f32 %v7137_v10 }
 0x4f8   : > { %v9475_v35 = vpop.eup %9474  ;;  %v4606_v16 = vadd.f32 1.0, %v9473_v63  ;;  %9494 = vpow2.f32 %v7099_v5  ;;  %v7104_v5 = vmul.f32 -1.442695, %v12573_v52  ;;  %v7094_v63 = vmul.f32 -1.442695, %v12582_v44 }
 0x4f9   : > { %v9477_v46 = vpop.eup %9476  ;;  %9496 = vrcp.f32 %v4547_v25  ;;  %v4537_v57 = vadd.f32 1.0, %v9475_v35  ;;  %v7147_v52 = vmul.f32 -1.442695, %v12598_v51  ;;  %v7119_v35 = vmul.f32 -1.442695, %v12600_v38 }
 0x4fa   : > { %v9479_v30 = vpop.eup %9478  ;;  %9498 = vrcp.f32 %v4606_v16  ;;  %v4610_v15 = vadd.f32 1.0, %v9477_v46  ;;  %v7148_v44 = vmul.f32 -1.442695, %v12603_v33  ;;  %v7109_v46 = vmul.f32 -1.442695, %v12605_v11  ;;  %v13175_v33 = vld [vmem:[#allocation31_spill] sm:$0xff] }
 0x4fb   : > { %v9481_v0 = vpop.eup %9480  ;;  %9500 = vrcp.f32 %v4537_v57  ;;  %v4562_v1 = vadd.f32 1.0, %v9479_v30  ;;  %v7152_v38 = vmul.f32 -1.442695, %v12607_v26  ;;  %v13174_v30 = vld [vmem:[#allocation30_spill] sm:$0xff] }
 0x4fc   : > { %v9483_v40 = vpop.eup %9482  ;;  %9502 = vrcp.f32 %v4610_v15  ;;  %v4611_v28 = vadd.f32 1.0, %v9481_v0  ;;  %v7124_v15 = vmul.f32 -1.442695, %v13174_v30  ;;  %v7159_v30 = vmul.f32 -1.442695, %v12666_v41 }
 0x4fd   : > { %v9485_v36 = vpop.eup %9484  ;;  %9504 = vrcp.f32 %v4562_v1  ;;  %v4552_v34 = vadd.f32 1.0, %v9483_v40  ;;  %v7153_v1 = vmul.f32 -1.442695, %v13175_v33  ;;  %v13177_v33 = vld [vmem:[#allocation5_spill] sm:$0xff] }
 0x4fe   : > { %v9487_v53 = vpop.eup %9486  ;;  %9506 = vrcp.f32 %v4611_v28  ;;  %v4615_v24 = vadd.f32 1.0, %v9485_v36 }
 0x4ff   : > { %v9489_v62 = vpop.eup %9488  ;;  %9508 = vrcp.f32 %v4552_v34  ;;  %v4567_v18 = vadd.f32 1.0, %v9487_v53 }
 0x500   : > { %v9491_v4 = vpop.eup %9490  ;;  %9510 = vrcp.f32 %v4615_v24  ;;  %v4616_v54 = vadd.f32 1.0, %v9489_v62 }
 0x501   : > { %v9493_v56 = vpop.eup %9492  ;;  %9512 = vrcp.f32 %v4567_v18  ;;  %v4557_v29 = vadd.f32 1.0, %v9491_v4 }
 0x502   : > { %v9495_v3 = vpop.eup %9494  ;;  %9514 = vrcp.f32 %v4616_v54  ;;  %v4620_v2 = vadd.f32 1.0, %v9493_v56 }
 0x503   : > { %v9497_v55 = vpop.eup %9496  ;;  %9516 = vrcp.f32 %v4557_v29  ;;  %v4582_v23 = vadd.f32 1.0, %v9495_v3 }
 0x504   : > { %v9499_v10 = vpop.eup %9498  ;;  %6213 = vst.msk [vmem:[%s10149_s27 + $0xdb8] sm:$0xff] %vm5777_vm3, %v9497_v55  ;;  %9518 = vrcp.f32 %v4620_v2 }
 0x505   : > { %v9501_v6 = vpop.eup %9500  ;;  %6272 = vst [vmem:[%s10149_s27 + $0xf90] sm:$0xff] %v9499_v10  ;;  %9520 = vrcp.f32 %v4582_v23 }
 0x506   : > { %v9503_v19 = vpop.eup %9502  ;;  %6203 = vst.msk [vmem:[%s10149_s27 + $0xd68] sm:$0xff] %vm5777_vm3, %v9501_v6  ;;  %9522 = vpow2.f32 %v7138_v17 }
 0x507   : > { %v9505_v50 = vpop.eup %9504  ;;  %6276 = vst [vmem:[%s10149_s27 + $0xfb0] sm:$0xff] %v9503_v19  ;;  %9524 = vpow2.f32 %v7089_v32 }
 0x508   : > { %v9507_v47 = vpop.eup %9506  ;;  %6228 = vst.msk [vmem:[%s10149_s27 + $0xe30] sm:$0xff] %vm5777_vm3, %v9505_v50  ;;  %9526 = vpow2.f32 %v7142_v21 }
 0x509   : > { %v9509_v25 = vpop.eup %9508  ;;  %6277 = vst [vmem:[%s10149_s27 + $0xfb8] sm:$0xff] %v9507_v47  ;;  %9528 = vpow2.f32 %v7104_v5  ;;  %v7157_v47 = vmul.f32 -1.442695, %v12635_v27 }
 0x50a   : > { %v9511_v60 = vpop.eup %9510  ;;  %6218 = vst.msk [vmem:[%s10149_s27 + $0xde0] sm:$0xff] %vm5777_vm3, %v9509_v25  ;;  %9530 = vpow2.f32 %v7143_v43  ;;  %v7114_v43 = vmul.f32 -1.442695, %v12613_v22  ;;  %v7139_v25 = vmul.f32 -1.442695, %v12637_v48 }
 0x50b   : > { %v9513_v16 = vpop.eup %9512  ;;  %6281 = vst [vmem:[%s10149_s27 + $0xfd8] sm:$0xff] %v9511_v60  ;;  %9532 = vpow2.f32 %v7094_v63  ;;  %v7158_v60 = vmul.f32 -1.442695, %v12641_v61  ;;  %v7162_v48 = vmul.f32 -1.442695, %v12648_v13 }
 0x50c   : > { %v9515_v51 = vpop.eup %9514  ;;  %6233 = vst.msk [vmem:[%s10149_s27 + $0xe58] sm:$0xff] %vm5777_vm3, %v9513_v16  ;;  %9534 = vpow2.f32 %v7147_v52 }
 0x50d   : > { %v9517_v57 = vpop.eup %9516  ;;  %6282 = vst [vmem:[%s10149_s27 + $0xfe0] sm:$0xff] %v9515_v51  ;;  %9536 = vpow2.f32 %v7119_v35 }
 0x50e   : > { %v9519_v0 = vpop.eup %9518  ;;  %6223 = vst.msk [vmem:[%s10149_s27 + $0xe08] sm:$0xff] %vm5777_vm3, %v9517_v57  ;;  %9538 = vpow2.f32 %v7148_v44  ;;  %v7129_v44 = vmul.f32 -1.442695, %v12643_v59  ;;  %v7163_v59 = vmul.f32 -1.442695, %v12657_v7 }
 0x50f   : > { %v9521_v40 = vpop.eup %9520  ;;  %6286 = vst [vmem:[%s10149_s27 + $0x1000] sm:$0xff] %v9519_v0  ;;  %9540 = vpow2.f32 %v7109_v46  ;;  %v7144_v46 = vmul.f32 -1.442695, %v12650_v31  ;;  %v7167_v31 = vmul.f32 -1.442695, %v12664_v49 }
 0x510   : > { %v9523_v11 = vpop.eup %9522  ;;  %6248 = vst.msk [vmem:[%s10149_s27 + $0xed0] sm:$0xff] %vm5777_vm3, %v9521_v40  ;;  %9542 = vpow2.f32 %v7152_v38  ;;  %v7134_v38 = vmul.f32 -1.442695, %v12659_v42 }
 0x511   : > { %v9525_v28 = vpop.eup %9524  ;;  %v4621_v26 = vadd.f32 1.0, %v9523_v11  ;;  %9544 = vpow2.f32 %v7124_v15  ;;  %v13176_v15 = vld [vmem:[#allocation4_spill] sm:$0xff] }
 0x512   : > { %v9527_v36 = vpop.eup %9526  ;;  %v4572_v34 = vadd.f32 1.0, %v9525_v28  ;;  %9546 = vpow2.f32 %v7153_v1  ;;  %v7168_v0 = vmul.f32 -1.442695, %v13176_v15  ;;  %v7149_v1 = vmul.f32 -1.442695, %v13177_v33 }
 0x513   : > { %v9529_v53 = vpop.eup %9528  ;;  %9548 = vrcp.f32 %v4621_v26  ;;  %v4625_v24 = vadd.f32 1.0, %v9527_v36 }
 0x514   : > { %v9531_v62 = vpop.eup %9530  ;;  %9550 = vrcp.f32 %v4572_v34  ;;  %v4587_v18 = vadd.f32 1.0, %v9529_v53 }
 0x515   : > { %v9533_v4 = vpop.eup %9532  ;;  %9552 = vrcp.f32 %v4625_v24  ;;  %v4626_v54 = vadd.f32 1.0, %v9531_v62 }
 0x516   : > { %v9535_v56 = vpop.eup %9534  ;;  %9554 = vrcp.f32 %v4587_v18  ;;  %v4577_v29 = vadd.f32 1.0, %v9533_v4 }
 0x517   : > { %v9537_v3 = vpop.eup %9536  ;;  %9556 = vrcp.f32 %v4626_v54  ;;  %v4630_v2 = vadd.f32 1.0, %v9535_v56 }
 0x518   : > { %v9539_v9 = vpop.eup %9538  ;;  %9558 = vrcp.f32 %v4577_v29  ;;  %v4602_v17 = vadd.f32 1.0, %v9537_v3 }
 0x519   : > { %v9541_v55 = vpop.eup %9540  ;;  %9560 = vrcp.f32 %v4630_v2  ;;  %v4631_v23 = vadd.f32 1.0, %v9539_v9 }
 0x51a   : > { %v9543_v32 = vpop.eup %9542  ;;  %9562 = vrcp.f32 %v4602_v17  ;;  %v4592_v10 = vadd.f32 1.0, %v9541_v55 }
 0x51b   : > { %v9545_v21 = vpop.eup %9544  ;;  %9564 = vrcp.f32 %v4631_v23  ;;  %v4635_v6 = vadd.f32 1.0, %v9543_v32 }
 0x51c   : > { %v9547_v5 = vpop.eup %9546  ;;  %9566 = vrcp.f32 %v4592_v10  ;;  %v4607_v19 = vadd.f32 1.0, %v9545_v21 }
 0x51d   : > { %v9549_v50 = vpop.eup %9548  ;;  %9568 = vrcp.f32 %v4635_v6  ;;  %v4636_v63 = vadd.f32 1.0, %v9547_v5  ;;  %v13178_v5 = vld [vmem:[#allocation6_spill] sm:$0xff] }
 0x51e   : > { %v9551_v52 = vpop.eup %9550  ;;  %6287 = vst [vmem:[%s10149_s27 + $0x1008] sm:$0xff] %v9549_v50  ;;  %9570 = vrcp.f32 %v4607_v19  ;;  %v7172_v19 = vmul.f32 -1.442695, %v13178_v5 }
 0x51f   : > { %v9553_v35 = vpop.eup %9552  ;;  %6238 = vst.msk [vmem:[%s10149_s27 + $0xe80] sm:$0xff] %vm5777_vm3, %v9551_v52  ;;  %9572 = vrcp.f32 %v4636_v63  ;;  %v7164_v63 = vmul.f32 -1.442695, %v12681_v37  ;;  %v7173_v52 = vmul.f32 -1.442695, %v12688_v14 }
 0x520   : > { %v9555_v22 = vpop.eup %9554  ;;  %6291 = vst [vmem:[%s10149_s27 + $0x1028] sm:$0xff] %v9553_v35  ;;  %9574 = vpow2.f32 %v7114_v43  ;;  %v7154_v35 = vmul.f32 -1.442695, %v12690_v8  ;;  %v7177_v37 = vmul.f32 -1.442695, %v12707_v20 }
 0x521   : > { %v9557_v27 = vpop.eup %9556  ;;  %6253 = vst.msk [vmem:[%s10149_s27 + $0xef8] sm:$0xff] %vm5777_vm3, %v9555_v22  ;;  %9576 = vpow2.f32 %v7157_v47  ;;  %v7178_v8 = vmul.f32 -1.442695, %v12713_v45  ;;  %v7169_v20 = vmul.f32 -1.442695, %v12715_v58 }
 0x522   : > { %v9559_v16 = vpop.eup %9558  ;;  %6292 = vst [vmem:[%s10149_s27 + $0x1030] sm:$0xff] %v9557_v27  ;;  %9578 = vpow2.f32 %v7139_v25 }
 0x523   : > { %v9561_v61 = vpop.eup %9560  ;;  %6243 = vst.msk [vmem:[%s10149_s27 + $0xea8] sm:$0xff] %vm5777_vm3, %v9559_v16  ;;  %9580 = vpow2.f32 %v7158_v60 }
 0x524   : > { %v9563_v51 = vpop.eup %9562  ;;  %6296 = vst [vmem:[%s10149_s27 + $0x1050] sm:$0xff] %v9561_v61  ;;  %9582 = vpow2.f32 %v7129_v44  ;;  %v7179_v44 = vmul.f32 -1.442695, %v12709_v39  ;;  %v7174_v39 = vmul.f32 -1.442695, %v12720_v12 }
 0x525   : > { %v9565_v13 = vpop.eup %9564  ;;  %6268 = vst.msk [vmem:[%s10149_s27 + $0xf70] sm:$0xff] %vm5777_vm3, %v9563_v51  ;;  %9584 = vpow2.f32 %v7162_v48 }
 0x526   : > { %v9567_v57 = vpop.eup %9566  ;;  %6297 = vst [vmem:[%s10149_s27 + $0x1058] sm:$0xff] %v9565_v13  ;;  %9586 = vpow2.f32 %v7144_v46 }
 0x527   : > { %v9569_v7 = vpop.eup %9568  ;;  %6258 = vst.msk [vmem:[%s10149_s27 + $0xf20] sm:$0xff] %vm5777_vm3, %v9567_v57  ;;  %9588 = vpow2.f32 %v7163_v59 }
 0x528   : > { %v9571_v42 = vpop.eup %9570  ;;  %6301 = vst [vmem:[%s10149_s27 + $0x1078] sm:$0xff] %v9569_v7  ;;  %9590 = vpow2.f32 %v7134_v38 }
 0x529   : > { %v9573_v40 = vpop.eup %9572  ;;  %6273 = vst.msk [vmem:[%s10149_s27 + $0xf98] sm:$0xff] %vm5777_vm3, %v9571_v42  ;;  %9592 = vpow2.f32 %v7167_v31 }
 0x52a   : > { %v9575_v49 = vpop.eup %9574  ;;  %6302 = vst [vmem:[%s10149_s27 + $0x1080] sm:$0xff] %v9573_v40  ;;  %9594 = vpow2.f32 %v7159_v30 }
 0x52b   : > { %v9577_v11 = vpop.eup %9576  ;;  %v4597_v41 = vadd.f32 1.0, %v9575_v49  ;;  %9596 = vpow2.f32 %v7168_v0 }
 0x52c   : > { %v9579_v28 = vpop.eup %9578  ;;  %v4640_v26 = vadd.f32 1.0, %v9577_v11  ;;  %9598 = vpow2.f32 %v7149_v1 }
 0x52d   : > { %v9581_v36 = vpop.eup %9580  ;;  %9600 = vrcp.f32 %v4597_v41  ;;  %v4622_v34 = vadd.f32 1.0, %v9579_v28 }
 0x52e   : > { %v9583_v53 = vpop.eup %9582  ;;  %9602 = vrcp.f32 %v4640_v26  ;;  %v4641_v24 = vadd.f32 1.0, %v9581_v36 }
 0x52f   : > { %v9585_v62 = vpop.eup %9584  ;;  %9604 = vrcp.f32 %v4622_v34  ;;  %v4612_v18 = vadd.f32 1.0, %v9583_v53 }
 0x530   : > { %v9587_v4 = vpop.eup %9586  ;;  %9606 = vrcp.f32 %v4641_v24  ;;  %v4645_v54 = vadd.f32 1.0, %v9585_v62 }
 0x531   : > { %v9589_v56 = vpop.eup %9588  ;;  %9608 = vrcp.f32 %v4612_v18  ;;  %v4627_v29 = vadd.f32 1.0, %v9587_v4 }
 0x532   : > { %v9591_v3 = vpop.eup %9590  ;;  %9610 = vrcp.f32 %v4645_v54  ;;  %v4646_v2 = vadd.f32 1.0, %v9589_v56 }
 0x533   : > { %v9593_v9 = vpop.eup %9592  ;;  %9612 = vrcp.f32 %v4627_v29  ;;  %v4617_v17 = vadd.f32 1.0, %v9591_v3 }
 0x534   : > { %v9595_v55 = vpop.eup %9594  ;;  %9614 = vrcp.f32 %v4646_v2  ;;  %v4650_v23 = vadd.f32 1.0, %v9593_v9 }
 0x535   : > { %v9597_v32 = vpop.eup %9596  ;;  %9616 = vrcp.f32 %v4617_v17  ;;  %v4642_v10 = vadd.f32 1.0, %v9595_v55 }
 0x536   : > { %v9599_v21 = vpop.eup %9598  ;;  %9618 = vrcp.f32 %v4650_v23  ;;  %v4651_v6 = vadd.f32 1.0, %v9597_v32 }
 0x537   : > { %v9601_v43 = vpop.eup %9600  ;;  %9620 = vrcp.f32 %v4642_v10  ;;  %v4632_v50 = vadd.f32 1.0, %v9599_v21 }
 0x538   : > { %v9603_v47 = vpop.eup %9602  ;;  %6263 = vst.msk [vmem:[%s10149_s27 + $0xf48] sm:$0xff] %vm5777_vm3, %v9601_v43  ;;  %9622 = vrcp.f32 %v4651_v6 }
 0x539   : > { %v9605_v25 = vpop.eup %9604  ;;  %6306 = vst [vmem:[%s10149_s27 + $0x10a0] sm:$0xff] %v9603_v47  ;;  %9624 = vrcp.f32 %v4632_v50 }
 0x53a   : > { %v9607_v60 = vpop.eup %9606  ;;  %6288 = vst.msk [vmem:[%s10149_s27 + $0x1010] sm:$0xff] %vm5777_vm3, %v9605_v25  ;;  %9626 = vpow2.f32 %v7172_v19 }
 0x53b   : > { %v9609_v22 = vpop.eup %9608  ;;  %6307 = vst [vmem:[%s10149_s27 + $0x10a8] sm:$0xff] %v9607_v60  ;;  %9628 = vpow2.f32 %v7164_v63 }
 0x53c   : > { %v9611_v14 = vpop.eup %9610  ;;  %6278 = vst.msk [vmem:[%s10149_s27 + $0xfc0] sm:$0xff] %vm5777_vm3, %v9609_v22  ;;  %9630 = vpow2.f32 %v7173_v52 }
 0x53d   : > { %v9613_v27 = vpop.eup %9612  ;;  %6311 = vst [vmem:[%s10149_s27 + $0x10c8] sm:$0xff] %v9611_v14  ;;  %9632 = vpow2.f32 %v7154_v35 }
 0x53e   : > { %v9615_v48 = vpop.eup %9614  ;;  %6293 = vst.msk [vmem:[%s10149_s27 + $0x1038] sm:$0xff] %vm5777_vm3, %v9613_v27  ;;  %9634 = vpow2.f32 %v7177_v37 }
 0x53f   : > { %v9617_v16 = vpop.eup %9616  ;;  %6312 = vst [vmem:[%s10149_s27 + $0x10d0] sm:$0xff] %v9615_v48  ;;  %9636 = vpow2.f32 %v7179_v44 }
 0x540   : > { %v9619_v46 = vpop.eup %9618  ;;  %6283 = vst.msk [vmem:[%s10149_s27 + $0xfe8] sm:$0xff] %vm5777_vm3, %v9617_v16  ;;  %9638 = vpow2.f32 %v7178_v8 }
 0x541   : > { %v9621_v45 = vpop.eup %9620  ;;  %6316 = vst [vmem:[%s10149_s27 + $0x10f0] sm:$0xff] %v9619_v46  ;;  %9640 = vpow2.f32 %v7169_v20 }
 0x542   : > { %v9623_v61 = vpop.eup %9622  ;;  %6308 = vst.msk [vmem:[%s10149_s27 + $0x10b0] sm:$0xff] %vm5777_vm3, %v9621_v45  ;;  %9642 = vpow2.f32 %v7174_v39 }
 0x543   : > { %v9625_v58 = vpop.eup %9624  ;;  %6317 = vst [vmem:[%s10149_s27 + $0x10f8] sm:$0xff] %v9623_v61 }
 0x544   : > { %v9627_v59 = vpop.eup %9626  ;;  %6298 = vst.msk [vmem:[%s10149_s27 + $0x1060] sm:$0xff] %vm5777_vm3, %v9625_v58 }
 0x545   : > { %v9629_v12 = vpop.eup %9628  ;;  %v4655_v51 = vadd.f32 1.0, %v9627_v59 }
 0x546   : > { %v9631_v38 = vpop.eup %9630  ;;  %v4647_v13 = vadd.f32 1.0, %v9629_v12 }
 0x547   : > { %v9633_v31 = vpop.eup %9632  ;;  %9644 = vrcp.f32 %v4655_v51  ;;  %v4656_v57 = vadd.f32 1.0, %v9631_v38 }
 0x548   : > { %v9635_v30 = vpop.eup %9634  ;;  %9646 = vrcp.f32 %v4647_v13  ;;  %v4637_v7 = vadd.f32 1.0, %v9633_v31 }
 0x549   : > { %v9637_v15 = vpop.eup %9636  ;;  %9648 = vrcp.f32 %v4656_v57  ;;  %v4660_v0 = vadd.f32 1.0, %v9635_v30 }
 0x54a   : > { %v9639_v42 = vpop.eup %9638  ;;  %9650 = vrcp.f32 %v4637_v7  ;;  %v4662_v33 = vadd.f32 1.0, %v9637_v15 }
 0x54b   : > { %v9641_v1 = vpop.eup %9640  ;;  %9652 = vrcp.f32 %v4660_v0  ;;  %v4661_v40 = vadd.f32 1.0, %v9639_v42 }
 0x54c   : > { %v9643_v49 = vpop.eup %9642  ;;  %9654 = vrcp.f32 %v4662_v33  ;;  %v4652_v11 = vadd.f32 1.0, %v9641_v1 }
 0x54d   : > { %9656 = vrcp.f32 %v4661_v40  ;;  %v4657_v41 = vadd.f32 1.0, %v9643_v49 }
 0x54e   : > { %9658 = vrcp.f32 %v4652_v11 }
 0x54f   : > { %9660 = vrcp.f32 %v4657_v41 }
 0x551   : > { %v9645_v28 = vpop.eup %9644 }
 0x552   : > { %v9647_v26 = vpop.eup %9646  ;;  %6321 = vst [vmem:[%s10149_s27 + $0x1118] sm:$0xff] %v9645_v28 }
 0x553   : > { %v9649_v36 = vpop.eup %9648  ;;  %6313 = vst.msk [vmem:[%s10149_s27 + $0x10d8] sm:$0xff] %vm5777_vm3, %v9647_v26 }
 0x554   : > { %v9651_v34 = vpop.eup %9650  ;;  %6322 = vst [vmem:[%s10149_s27 + $0x1120] sm:$0xff] %v9649_v36 }
 0x555   : > { %v9653_v53 = vpop.eup %9652  ;;  %6303 = vst.msk [vmem:[%s10149_s27 + $0x1088] sm:$0xff] %vm5777_vm3, %v9651_v34 }
 0x556   : > { %v9655_v24 = vpop.eup %9654  ;;  %6326 = vst [vmem:[%s10149_s27 + $0x1140] sm:$0xff] %v9653_v53 }
 0x557   : > { %v9657_v62 = vpop.eup %9656  ;;  %6328 = vst.msk [vmem:[%s10149_s27 + $0x1150] sm:$0xff] %vm5777_vm3, %v9655_v24 }
 0x558   : > { %v9659_v18 = vpop.eup %9658  ;;  %6327 = vst [vmem:[%s10149_s27 + $0x1148] sm:$0xff] %v9657_v62 }
 0x559   : > { %v9661_v4 = vpop.eup %9660  ;;  %6318 = vst.msk [vmem:[%s10149_s27 + $0x1100] sm:$0xff] %vm5777_vm3, %v9659_v18 }
 0x55a   : > { %6323 = vst.msk [vmem:[%s10149_s27 + $0x1128] sm:$0xff] %vm5777_vm3, %v9661_v4 }
 0x55b PF: > { %s12_s9 = sadd.s32 1, %s9725_s9  }
 0x55c   : > { %p9_p4 = scmp.ge.s32.totalorder %s12_s9, 4  }
 0x55e   :  { %11 = sbr.rel (!%p9_p4) target bundleno = 1 (0x1), region = 58 }

</bundles_post_ra>
